<compile_context>
chip_gen: v7x
topology: tpu7x:2x2x1
jax: 0.10.0
libtpu: 0.0.40
codegen_flags: <defaults>
</compile_context>

<pallas_src>
import math
import numpy as np
import jax
import jax.numpy as jnp
from jax.experimental import pallas as pl
from jax.experimental.pallas import tpu as pltpu

# ----------------------------- hyper-parameters ------------------------------------
SRC_VOCAB = 64
TGT_VOCAB = 128                  # multiple of 128 -> lane-dense logits store
D_MODEL   = 128                  # lane-dense activations
N_HEADS   = 4
HEAD_DIM  = D_MODEL // N_HEADS   # 32
D_FF      = 256
N_LAYERS  = 2
BATCH     = 2
S_SRC     = 8
S_TGT     = 8
SRC_PAD   = 1
TGT_PAD   = 1
LN_EPS    = 1e-5
SQRT_D    = math.sqrt(D_MODEL)
INV_SQRT_HD = 1.0 / math.sqrt(HEAD_DIM)
NEG_INF   = -1e30
R_SRC     = BATCH * S_SRC        # rows with batch folded in
R_TGT     = BATCH * S_TGT


def make_positional_encoding(max_len, d_model):
    pos = np.arange(max_len, dtype=np.float32)[:, None]
    div = np.exp(-math.log(10000.0) * np.arange(0, d_model, 2, dtype=np.float32) / d_model)
    pe = np.zeros((max_len, d_model), dtype=np.float32)
    pe[:, 0::2] = np.sin(pos * div)
    pe[:, 1::2] = np.cos(pos * div)
    return jnp.asarray(pe)


PE_TABLE = make_positional_encoding(64, D_MODEL)


# ===================================================================================
# In-kernel building blocks (operate on values loaded from VMEM refs)
# ===================================================================================
def _layer_norm(x, g, b):
    mu = jnp.mean(x, axis=-1, keepdims=True)
    var = jnp.mean(jnp.square(x - mu), axis=-1, keepdims=True)
    return (x - mu) * jax.lax.rsqrt(var + LN_EPS) * g + b


def _split_heads(z):
    # (rows, D) -> (H, rows, HEAD_DIM): lane-aligned 32-wide static slices stacked on a
    # new leading batch axis (the one unavoidable head-major repack; done once per
    # Q/K/V instead of per-head matmul loops).
    return jnp.concatenate(
        [z[None, :, h * HEAD_DIM:(h + 1) * HEAD_DIM] for h in range(N_HEADS)], axis=0)


def _mha(xq, xkv, bias, wq, bq, wk, bk, wv, bv, wo, bo):
    """Multi-head attention over batch-folded rows.  bias: (rows_q, rows_k) additive."""
    q = jnp.dot(xq, wq, preferred_element_type=jnp.float32) + bq
    k = jnp.dot(xkv, wk, preferred_element_type=jnp.float32) + bk
    v = jnp.dot(xkv, wv, preferred_element_type=jnp.float32) + bv
    qh, kh, vh = _split_heads(q), _split_heads(k), _split_heads(v)

    # single head-batched contraction (contract HEAD_DIM, batch on H) -> (H, Rq, Rk)
    s = jnp.einsum('hqd,hkd->hqk', qh, kh, preferred_element_type=jnp.float32)
    s = s * INV_SQRT_HD + bias[None, :, :]
    s = s - jnp.max(s, axis=-1, keepdims=True)
    p = jnp.exp(s)
    p = p * pl.reciprocal(jnp.sum(p, axis=-1, keepdims=True), approx=True)  # EUP vrcp

    ctx = jnp.einsum('hqk,hkd->hqd', p, vh, preferred_element_type=jnp.float32)  # (H,Rq,hd)

    # output projection = sum over heads of ctx_h @ W_o[h-block]; avoids any
    # head->lane relayout (no transpose / no concatenate back to (Rq, D)).
    out = bo
    for h in range(N_HEADS):
        out = out + jnp.dot(ctx[h], wo[h * HEAD_DIM:(h + 1) * HEAD_DIM, :],
                            preferred_element_type=jnp.float32)
    return out, p


def _ffn(x, w1, b1, w2, b2):
    f = jnp.maximum(jnp.dot(x, w1, preferred_element_type=jnp.float32) + b1, 0.0)
    return jnp.dot(f, w2, preferred_element_type=jnp.float32) + b2


# ===================================================================================
# The single fused kernel: whole TransformerModel forward
# ===================================================================================
def transformer_kernel(*refs):
    (src_x_ref, tgt_x_ref, pe_src_ref, pe_tgt_ref,
     enc_bias_ref, dec_self_bias_ref, dec_cross_bias_ref) = refs[0:7]
    enc_w = refs[7:23]        # 16 stacked encoder arrays (leading dim = N_LAYERS)
    dec_w = refs[23:49]       # 26 stacked decoder arrays
    fc_w_ref, fc_b_ref = refs[49], refs[50]
    logits_ref, attn_ref = refs[51], refs[52]

    (e_wq, e_bq, e_wk, e_bk, e_wv, e_bv, e_wo, e_bo,
     e_g1, e_be1, e_w1, e_b1, e_w2, e_b2, e_g2, e_be2) = enc_w
    (d_swq, d_sbq, d_swk, d_sbk, d_swv, d_sbv, d_swo, d_sbo,
     d_cwq, d_cbq, d_cwk, d_cbk, d_cwv, d_cbv, d_cwo, d_cbo,
     d_g1, d_be1, d_g2, d_be2, d_g3, d_be3,
     d_w1, d_b1, d_w2, d_b2) = dec_w

    enc_bias = enc_bias_ref[...]            # (R_SRC, R_SRC)
    self_bias = dec_self_bias_ref[...]      # (R_TGT, R_TGT)  (pad + causal)
    cross_bias = dec_cross_bias_ref[...]    # (R_TGT, R_SRC)

    # ---------------- Encoder (embed already scaled; add PE here) ------------------
    x = src_x_ref[...] + pe_src_ref[...]                    # (R_SRC, D)
    for l in range(N_LAYERS):                               # static unroll, weights VMEM-resident
        a, _ = _mha(x, x, enc_bias,
                    e_wq[l], e_bq[l], e_wk[l], e_bk[l],
                    e_wv[l], e_bv[l], e_wo[l], e_bo[l])
        x = _layer_norm(x + a, e_g1[l], e_be1[l])
        x = _layer_norm(x + _ffn(x, e_w1[l], e_b1[l], e_w2[l], e_b2[l]),
                        e_g2[l], e_be2[l])
    enc_out = x

    # ---------------- Decoder -------------------------------------------------------
    y = tgt_x_ref[...] + pe_tgt_ref[...]                    # (R_TGT, D)
    p_cross = None
    for l in range(N_LAYERS):
        sa, _ = _mha(y, y, self_bias,
                     d_swq[l], d_sbq[l], d_swk[l], d_sbk[l],
                     d_swv[l], d_sbv[l], d_swo[l], d_sbo[l])
        y = _layer_norm(y + sa, d_g1[l], d_be1[l])
        ca, p_cross = _mha(y, enc_out, cross_bias,
                           d_cwq[l], d_cbq[l], d_cwk[l], d_cbk[l],
                           d_cwv[l], d_cbv[l], d_cwo[l], d_cbo[l])
        y = _layer_norm(y + ca, d_g2[l], d_be2[l])
        y = _layer_norm(y + _ffn(y, d_w1[l], d_b1[l], d_w2[l], d_b2[l]),
                        d_g3[l], d_be3[l])

    # ---------------- Final projection (lane-dense (R_TGT, 128) store) -------------
    logits_ref[...] = (jnp.dot(y, fc_w_ref[...], preferred_element_type=jnp.float32)
                       + fc_b_ref[...])

    # attention weights from the last decoder layer's cross-attention, per batch
    attn_ref[...] = jnp.concatenate(
        [p_cross[None, :, b * S_TGT:(b + 1) * S_TGT, b * S_SRC:(b + 1) * S_SRC]
         for b in range(BATCH)], axis=0)                    # (B, H, T, S_src)


# ===================================================================================
# JAX wrapper: glue (gather, masks, PE tiling) + the single pallas_call
# ===================================================================================
def _attn_bias(q_len, k_tokens, k_pad_idx, causal):
    """Additive bias (B*q_len, B*k_len): 0 where attention allowed, -1e30 otherwise.
    Encodes same-batch + key-not-pad (+ causal) masking for batch-folded rows."""
    B, k_len = k_tokens.shape
    qb = jnp.repeat(jnp.arange(B, dtype=jnp.int32), q_len)
    kb = jnp.repeat(jnp.arange(B, dtype=jnp.int32), k_len)
    allowed = (qb[:, None] == kb[None, :]) & (k_tokens.reshape(-1) != k_pad_idx)[None, :]
    if causal:
        qp = jnp.tile(jnp.arange(q_len, dtype=jnp.int32), B)
        kp = jnp.tile(jnp.arange(k_len, dtype=jnp.int32), B)
        allowed = allowed & (kp[None, :] <= qp[:, None])
    return jnp.where(allowed, 0.0, NEG_INF).astype(jnp.float32)


def transformer_forward(src, tgt, packed):
    # glue: embedding gather (tables already pre-scaled by sqrt(d_model)), PE tiling,
    # mask construction.  All hot-path math runs inside the single Pallas kernel.
    src_x = jnp.take(packed['enc_embed_scaled'], src, axis=0).reshape(R_SRC, D_MODEL)
    tgt_x = jnp.take(packed['dec_embed_scaled'], tgt, axis=0).reshape(R_TGT, D_MODEL)
    pe_src = jnp.tile(PE_TABLE[:S_SRC], (BATCH, 1))
    pe_tgt = jnp.tile(PE_TABLE[:S_TGT], (BATCH, 1))
    enc_bias = _attn_bias(S_SRC, src, SRC_PAD, causal=False)
    dec_self_bias = _attn_bias(S_TGT, tgt, TGT_PAD, causal=True)
    dec_cross_bias = _attn_bias(S_TGT, src, SRC_PAD, causal=False)

    inputs = (src_x, tgt_x, pe_src, pe_tgt, enc_bias, dec_self_bias, dec_cross_bias,
              *packed['enc_stacked'], *packed['dec_stacked'],
              packed['fc_w'], packed['fc_b'])

    logits_flat, attn = pl.pallas_call(
        transformer_kernel,
        out_shape=(jax.ShapeDtypeStruct((R_TGT, TGT_VOCAB), jnp.float32),
                   jax.ShapeDtypeStruct((BATCH, N_HEADS, S_TGT, S_SRC), jnp.float32)),
        # no grid: single invocation, everything (weights ~3 MB) resident in VMEM
        compiler_params=pltpu.CompilerParams(vmem_limit_bytes=32 * 1024 * 1024),
    )(*inputs)
    return logits_flat.reshape(BATCH, S_TGT, TGT_VOCAB), attn


# ===================================================================================
# Parameter init (torch-style layouts: W is [in, out], y = x @ W + b) and packing
# ===================================================================================
def init_params(key):
    def dense(k, fin, fout):
        kw, kb = jax.random.split(k)
        s = 1.0 / math.sqrt(fin)
        w = jax.random.uniform(kw, (fin, fout), jnp.float32, -s, s)
        b = jax.random.uniform(kb, (1, fout), jnp.float32, -s, s)
        return w, b

    def mha_p(k):
        ks = jax.random.split(k, 4)
        wq, bq = dense(ks[0], D_MODEL, D_MODEL)
        wk, bk = dense(ks[1], D_MODEL, D_MODEL)
        wv, bv = dense(ks[2], D_MODEL, D_MODEL)
        wo, bo = dense(ks[3], D_MODEL, D_MODEL)
        return dict(wq=wq, bq=bq, wk=wk, bk=bk, wv=wv, bv=bv, wo=wo, bo=bo)

    def ffn_p(k):
        k1, k2 = jax.random.split(k)
        w1, b1 = dense(k1, D_MODEL, D_FF)
        w2, b2 = dense(k2, D_FF, D_MODEL)
        return dict(w1=w1, b1=b1, w2=w2, b2=b2)

    def ln_p(k):
        kg, kb = jax.random.split(k)
        g = 1.0 + 0.1 * jax.random.normal(kg, (1, D_MODEL), jnp.float32)
        b = 0.1 * jax.random.normal(kb, (1, D_MODEL), jnp.float32)
        return g, b

    k_es, k_ds, k_fc, k_rest = jax.random.split(key, 4)
    enc_embed = 0.1 * jax.random.normal(k_es, (SRC_VOCAB, D_MODEL), jnp.float32)
    dec_embed = 0.1 * jax.random.normal(k_ds, (TGT_VOCAB, D_MODEL), jnp.float32)
    fc_w, fc_b = dense(k_fc, D_MODEL, TGT_VOCAB)

    enc_layers = []
    for i in range(N_LAYERS):
        k = jax.random.fold_in(jax.random.fold_in(k_rest, 0), i)
        ka, kf, k1, k2 = jax.random.split(k, 4)
        g1, be1 = ln_p(k1); g2, be2 = ln_p(k2)
        enc_layers.append(dict(self=mha_p(ka), ffn=ffn_p(kf),
                               g1=g1, be1=be1, g2=g2, be2=be2))
    dec_layers = []
    for i in range(N_LAYERS):
        k = jax.random.fold_in(jax.random.fold_in(k_rest, 1), i)
        ka, kc, kf, k1, k2, k3 = jax.random.split(k, 6)
        g1, be1 = ln_p(k1); g2, be2 = ln_p(k2); g3, be3 = ln_p(k3)
        dec_layers.append(dict(self=mha_p(ka), cross=mha_p(kc), ffn=ffn_p(kf),
                               g1=g1, be1=be1, g2=g2, be2=be2, g3=g3, be3=be3))
    return dict(enc_embed=enc_embed, dec_embed=dec_embed,
                enc_layers=enc_layers, dec_layers=dec_layers,
                fc_w=fc_w, fc_b=fc_b)


def pack_params(params):
    """Fold sqrt(d_model) into embedding tables and stack per-layer weights along a
    leading layer axis so the fused kernel can index them statically."""
    def stack(rows):
        return tuple(jnp.stack(list(cols), axis=0) for cols in zip(*rows))

    enc_rows = [(L['self']['wq'], L['self']['bq'], L['self']['wk'], L['self']['bk'],
                 L['self']['wv'], L['self']['bv'], L['self']['wo'], L['self']['bo'],
                 L['g1'], L['be1'],
                 L['ffn']['w1'], L['ffn']['b1'], L['ffn']['w2'], L['ffn']['b2'],
                 L['g2'], L['be2']) for L in params['enc_layers']]
    dec_rows = [(L['self']['wq'], L['self']['bq'], L['self']['wk'], L['self']['bk'],
                 L['self']['wv'], L['self']['bv'], L['self']['wo'], L['self']['bo'],
                 L['cross']['wq'], L['cross']['bq'], L['cross']['wk'], L['cross']['bk'],
                 L['cross']['wv'], L['cross']['bv'], L['cross']['wo'], L['cross']['bo'],
                 L['g1'], L['be1'], L['g2'], L['be2'], L['g3'], L['be3'],
                 L['ffn']['w1'], L['ffn']['b1'], L['ffn']['w2'], L['ffn']['b2'])
                for L in params['dec_layers']]
    return dict(enc_embed_scaled=params['enc_embed'] * SQRT_D,
                dec_embed_scaled=params['dec_embed'] * SQRT_D,
                enc_stacked=stack(enc_rows),
                dec_stacked=stack(dec_rows),
                fc_w=params['fc_w'], fc_b=params['fc_b'])


# ===================================================================================
# Pure-JAX reference (mirrors the PyTorch module; eval-mode dropout = identity)
# ===================================================================================
def reference_forward(src, tgt, params):
    def mha_ref(q_in, k_in, v_in, p, mask):
        B, Tq, _ = q_in.shape
        Tk = k_in.shape[1]
        Q = (q_in @ p['wq'] + p['bq']).reshape(B, Tq, N_HEADS, HEAD_DIM).transpose(0, 2, 1, 3)
        K = (k_in @ p['wk'] + p['bk']).reshape(B, Tk, N_HEADS, HEAD_DIM).transpose(0, 2, 1, 3)
        V = (v_in @ p['wv'] + p['bv']).reshape(B, Tk, N_HEADS, HEAD_DIM).transpose(0, 2, 1, 3)
        e = jnp.einsum('bhqd,bhkd->bhqk', Q, K) / math.sqrt(HEAD_DIM)
        e = jnp.where(mask, e, NEG_INF)
        a = jax.nn.softmax(e, axis=-1)
        x = jnp.einsum('bhqk,bhkd->bhqd', a, V).transpose(0, 2, 1, 3).reshape(B, Tq, D_MODEL)
        return x @ p['wo'] + p['bo'], a

    def ln(x, g, b):
        mu = x.mean(-1, keepdims=True)
        var = ((x - mu) ** 2).mean(-1, keepdims=True)
        return (x - mu) / jnp.sqrt(var + LN_EPS) * g + b

    def ffn(x, p):
        return jnp.maximum(x @ p['w1'] + p['b1'], 0.0) @ p['w2'] + p['b2']

    src_mask = (src != SRC_PAD)[:, None, None, :]                       # (B,1,1,S)
    causal = jnp.tril(jnp.ones((S_TGT, S_TGT), dtype=bool))[None, None]
    tgt_mask = (tgt != TGT_PAD)[:, None, None, :] & causal              # (B,1,T,T)

    x = jnp.take(params['enc_embed'], src, axis=0) * SQRT_D + PE_TABLE[:S_SRC][None]
    for p in params['enc_layers']:
        a, _ = mha_ref(x, x, x, p['self'], src_mask)
        x = ln(x + a, p['g1'], p['be1'])
        x = ln(x + ffn(x, p['ffn']), p['g2'], p['be2'])
    enc_out = x

    y = jnp.take(params['dec_embed'], tgt, axis=0) * SQRT_D + PE_TABLE[:S_TGT][None]
    attn = None
    for p in params['dec_layers']:
        a, _ = mha_ref(y, y, y, p['self'], tgt_mask)
        y = ln(y + a, p['g1'], p['be1'])
        c, attn = mha_ref(y, enc_out, enc_out, p['cross'], src_mask)
        y = ln(y + c, p['g2'], p['be2'])
        y = ln(y + ffn(y, p['ffn']), p['g3'], p['be3'])
    logits = y @ params['fc_w'] + params['fc_b']
    return logits, attn


# ===================================================================================
if __name__ == "__main__":
    key = jax.random.PRNGKey(0)
    k_src, k_tgt, k_par = jax.random.split(key, 3)

    # tokens in [2, vocab) so no accidental pads; pad the sequence tails explicitly
    src = jax.random.randint(k_src, (BATCH, S_SRC), 2, SRC_VOCAB, dtype=jnp.int32)
    tgt = jax.random.randint(k_tgt, (BATCH, S_TGT), 2, TGT_VOCAB, dtype=jnp.int32)
    src = src.at[:, -1].set(SRC_PAD)
    tgt = tgt.at[:, -2:].set(TGT_PAD)

    params = init_params(k_par)
    packed = pack_params(params)

    forward = jax.jit(transformer_forward)
    logits, attn = forward(src, tgt, packed)
    logits = jax.block_until_ready(logits)
    attn = jax.block_until_ready(attn)

    ref_logits, ref_attn = reference_forward(src, tgt, params)

    # Tolerance accommodates the approx (EUP) softmax reciprocal and MXU f32 rounding
    # differences vs the XLA reference; structural errors would be orders larger.
    np.testing.assert_allclose(np.asarray(logits), np.asarray(ref_logits),
                               rtol=1e-2, atol=1e-2)
    np.testing.assert_allclose(np.asarray(attn), np.asarray(ref_attn),
                               rtol=1e-2, atol=1e-2)

    assert logits.shape == (BATCH, S_TGT, TGT_VOCAB)
    assert attn.shape == (BATCH, N_HEADS, S_TGT, S_SRC)
    # TODO(synk): nn.Dropout layers are identity (eval mode); training-mode dropout not implemented.
    print("KERNEL_OK")
</pallas_src>

<mosaic_0001>
module attributes {stable_mosaic.version = 11 : i64} {
  func.func @transformer_kernel(%arg0: memref<16x128xf32, #tpu.memory_space<vmem>>, %arg1: memref<16x128xf32, #tpu.memory_space<vmem>>, %arg2: memref<16x128xf32, #tpu.memory_space<vmem>>, %arg3: memref<16x128xf32, #tpu.memory_space<vmem>>, %arg4: memref<16x16xf32, #tpu.memory_space<vmem>>, %arg5: memref<16x16xf32, #tpu.memory_space<vmem>>, %arg6: memref<16x16xf32, #tpu.memory_space<vmem>>, %arg7: memref<2x128x128xf32, #tpu.memory_space<vmem>>, %arg8: memref<2x1x128xf32, #tpu.memory_space<vmem>>, %arg9: memref<2x128x128xf32, #tpu.memory_space<vmem>>, %arg10: memref<2x1x128xf32, #tpu.memory_space<vmem>>, %arg11: memref<2x128x128xf32, #tpu.memory_space<vmem>>, %arg12: memref<2x1x128xf32, #tpu.memory_space<vmem>>, %arg13: memref<2x128x128xf32, #tpu.memory_space<vmem>>, %arg14: memref<2x1x128xf32, #tpu.memory_space<vmem>>, %arg15: memref<2x1x128xf32, #tpu.memory_space<vmem>>, %arg16: memref<2x1x128xf32, #tpu.memory_space<vmem>>, %arg17: memref<2x128x256xf32, #tpu.memory_space<vmem>>, %arg18: memref<2x1x256xf32, #tpu.memory_space<vmem>>, %arg19: memref<2x256x128xf32, #tpu.memory_space<vmem>>, %arg20: memref<2x1x128xf32, #tpu.memory_space<vmem>>, %arg21: memref<2x1x128xf32, #tpu.memory_space<vmem>>, %arg22: memref<2x1x128xf32, #tpu.memory_space<vmem>>, %arg23: memref<2x128x128xf32, #tpu.memory_space<vmem>>, %arg24: memref<2x1x128xf32, #tpu.memory_space<vmem>>, %arg25: memref<2x128x128xf32, #tpu.memory_space<vmem>>, %arg26: memref<2x1x128xf32, #tpu.memory_space<vmem>>, %arg27: memref<2x128x128xf32, #tpu.memory_space<vmem>>, %arg28: memref<2x1x128xf32, #tpu.memory_space<vmem>>, %arg29: memref<2x128x128xf32, #tpu.memory_space<vmem>>, %arg30: memref<2x1x128xf32, #tpu.memory_space<vmem>>, %arg31: memref<2x128x128xf32, #tpu.memory_space<vmem>>, %arg32: memref<2x1x128xf32, #tpu.memory_space<vmem>>, %arg33: memref<2x128x128xf32, #tpu.memory_space<vmem>>, %arg34: memref<2x1x128xf32, #tpu.memory_space<vmem>>, %arg35: memref<2x128x128xf32, #tpu.memory_space<vmem>>, %arg36: memref<2x1x128xf32, #tpu.memory_space<vmem>>, %arg37: memref<2x128x128xf32, #tpu.memory_space<vmem>>, %arg38: memref<2x1x128xf32, #tpu.memory_space<vmem>>, %arg39: memref<2x1x128xf32, #tpu.memory_space<vmem>>, %arg40: memref<2x1x128xf32, #tpu.memory_space<vmem>>, %arg41: memref<2x1x128xf32, #tpu.memory_space<vmem>>, %arg42: memref<2x1x128xf32, #tpu.memory_space<vmem>>, %arg43: memref<2x1x128xf32, #tpu.memory_space<vmem>>, %arg44: memref<2x1x128xf32, #tpu.memory_space<vmem>>, %arg45: memref<2x128x256xf32, #tpu.memory_space<vmem>>, %arg46: memref<2x1x256xf32, #tpu.memory_space<vmem>>, %arg47: memref<2x256x128xf32, #tpu.memory_space<vmem>>, %arg48: memref<2x1x128xf32, #tpu.memory_space<vmem>>, %arg49: memref<128x128xf32, #tpu.memory_space<vmem>>, %arg50: memref<1x128xf32, #tpu.memory_space<vmem>>, %arg51: memref<16x128xf32, #tpu.memory_space<vmem>>, %arg52: memref<2x4x8x8xf32, #tpu.memory_space<vmem>>) attributes {dimension_semantics = [], scalar_prefetch = 0 : i64, scratch_operands = 0 : i64, tpu.core_type = #tpu.core_type<tc>} {
    %c0 = arith.constant 0 : index
    %c0_0 = arith.constant 0 : index
    %0 = vector.load %arg4[%c0, %c0_0] : memref<16x16xf32, #tpu.memory_space<vmem>>, vector<16x16xf32>
    %c0_1 = arith.constant 0 : index
    %c0_2 = arith.constant 0 : index
    %1 = vector.load %arg5[%c0_1, %c0_2] : memref<16x16xf32, #tpu.memory_space<vmem>>, vector<16x16xf32>
    %c0_3 = arith.constant 0 : index
    %c0_4 = arith.constant 0 : index
    %2 = vector.load %arg6[%c0_3, %c0_4] : memref<16x16xf32, #tpu.memory_space<vmem>>, vector<16x16xf32>
    %c0_5 = arith.constant 0 : index
    %c0_6 = arith.constant 0 : index
    %3 = vector.load %arg0[%c0_5, %c0_6] : memref<16x128xf32, #tpu.memory_space<vmem>>, vector<16x128xf32>
    %c0_7 = arith.constant 0 : index
    %c0_8 = arith.constant 0 : index
    %4 = vector.load %arg2[%c0_7, %c0_8] : memref<16x128xf32, #tpu.memory_space<vmem>>, vector<16x128xf32>
    %5 = arith.addf %3, %4 : vector<16x128xf32>
    %c0_9 = arith.constant 0 : index
    %c0_10 = arith.constant 0 : index
    %c0_11 = arith.constant 0 : index
    %6 = vector.load %arg7[%c0_9, %c0_10, %c0_11] : memref<2x128x128xf32, #tpu.memory_space<vmem>>, vector<1x128x128xf32>
    %7 = vector.shape_cast %6 : vector<1x128x128xf32> to vector<128x128xf32>
    %c0_12 = arith.constant 0 : index
    %c0_13 = arith.constant 0 : index
    %c0_14 = arith.constant 0 : index
    %8 = vector.load %arg8[%c0_12, %c0_13, %c0_14] : memref<2x1x128xf32, #tpu.memory_space<vmem>>, vector<1x1x128xf32>
    %9 = vector.shape_cast %8 : vector<1x1x128xf32> to vector<1x128xf32>
    %c0_15 = arith.constant 0 : index
    %c0_16 = arith.constant 0 : index
    %c0_17 = arith.constant 0 : index
    %10 = vector.load %arg9[%c0_15, %c0_16, %c0_17] : memref<2x128x128xf32, #tpu.memory_space<vmem>>, vector<1x128x128xf32>
    %11 = vector.shape_cast %10 : vector<1x128x128xf32> to vector<128x128xf32>
    %c0_18 = arith.constant 0 : index
    %c0_19 = arith.constant 0 : index
    %c0_20 = arith.constant 0 : index
    %12 = vector.load %arg10[%c0_18, %c0_19, %c0_20] : memref<2x1x128xf32, #tpu.memory_space<vmem>>, vector<1x1x128xf32>
    %13 = vector.shape_cast %12 : vector<1x1x128xf32> to vector<1x128xf32>
    %c0_21 = arith.constant 0 : index
    %c0_22 = arith.constant 0 : index
    %c0_23 = arith.constant 0 : index
    %14 = vector.load %arg11[%c0_21, %c0_22, %c0_23] : memref<2x128x128xf32, #tpu.memory_space<vmem>>, vector<1x128x128xf32>
    %15 = vector.shape_cast %14 : vector<1x128x128xf32> to vector<128x128xf32>
    %c0_24 = arith.constant 0 : index
    %c0_25 = arith.constant 0 : index
    %c0_26 = arith.constant 0 : index
    %16 = vector.load %arg12[%c0_24, %c0_25, %c0_26] : memref<2x1x128xf32, #tpu.memory_space<vmem>>, vector<1x1x128xf32>
    %17 = vector.shape_cast %16 : vector<1x1x128xf32> to vector<1x128xf32>
    %c0_27 = arith.constant 0 : index
    %c0_28 = arith.constant 0 : index
    %c0_29 = arith.constant 0 : index
    %18 = vector.load %arg13[%c0_27, %c0_28, %c0_29] : memref<2x128x128xf32, #tpu.memory_space<vmem>>, vector<1x128x128xf32>
    %19 = vector.shape_cast %18 : vector<1x128x128xf32> to vector<128x128xf32>
    %c0_30 = arith.constant 0 : index
    %c0_31 = arith.constant 0 : index
    %c0_32 = arith.constant 0 : index
    %20 = vector.load %arg14[%c0_30, %c0_31, %c0_32] : memref<2x1x128xf32, #tpu.memory_space<vmem>>, vector<1x1x128xf32>
    %21 = vector.shape_cast %20 : vector<1x1x128xf32> to vector<1x128xf32>
    %cst = arith.constant dense<0.000000e+00> : vector<16x128xf32>
    %22 = tpu.matmul %5, %7, %cst {dimension_numbers = #tpu.dot_dimension_numbers<[1], [0], [0], [1], [0, 0, 1, 1], [], []>} : vector<16x128xf32>, vector<128x128xf32>, vector<16x128xf32> -> vector<16x128xf32>
    %23 = vector.broadcast %9 : vector<1x128xf32> to vector<16x128xf32>
    %24 = arith.addf %22, %23 : vector<16x128xf32>
    %cst_33 = arith.constant dense<0.000000e+00> : vector<16x128xf32>
    %25 = tpu.matmul %5, %11, %cst_33 {dimension_numbers = #tpu.dot_dimension_numbers<[1], [0], [0], [1], [0, 0, 1, 1], [], []>} : vector<16x128xf32>, vector<128x128xf32>, vector<16x128xf32> -> vector<16x128xf32>
    %26 = vector.broadcast %13 : vector<1x128xf32> to vector<16x128xf32>
    %27 = arith.addf %25, %26 : vector<16x128xf32>
    %cst_34 = arith.constant dense<0.000000e+00> : vector<16x128xf32>
    %28 = tpu.matmul %5, %15, %cst_34 {dimension_numbers = #tpu.dot_dimension_numbers<[1], [0], [0], [1], [0, 0, 1, 1], [], []>} : vector<16x128xf32>, vector<128x128xf32>, vector<16x128xf32> -> vector<16x128xf32>
    %29 = vector.broadcast %17 : vector<1x128xf32> to vector<16x128xf32>
    %30 = arith.addf %28, %29 : vector<16x128xf32>
    %31 = vector.extract_strided_slice %24 {offsets = [0, 0], sizes = [16, 32], strides = [1, 1]} : vector<16x128xf32> to vector<16x32xf32>
    %32 = vector.shape_cast %31 : vector<16x32xf32> to vector<1x16x32xf32>
    %33 = vector.extract_strided_slice %24 {offsets = [0, 32], sizes = [16, 32], strides = [1, 1]} : vector<16x128xf32> to vector<16x32xf32>
    %34 = vector.shape_cast %33 : vector<16x32xf32> to vector<1x16x32xf32>
    %35 = vector.extract_strided_slice %24 {offsets = [0, 64], sizes = [16, 32], strides = [1, 1]} : vector<16x128xf32> to vector<16x32xf32>
    %36 = vector.shape_cast %35 : vector<16x32xf32> to vector<1x16x32xf32>
    %37 = vector.extract_strided_slice %24 {offsets = [0, 96], sizes = [16, 32], strides = [1, 1]} : vector<16x128xf32> to vector<16x32xf32>
    %38 = vector.shape_cast %37 : vector<16x32xf32> to vector<1x16x32xf32>
    %39 = tpu.concatenate %32, %34, %36, %38 in 0 : vector<1x16x32xf32>, vector<1x16x32xf32>, vector<1x16x32xf32>, vector<1x16x32xf32> -> vector<4x16x32xf32>
    %40 = vector.extract_strided_slice %27 {offsets = [0, 0], sizes = [16, 32], strides = [1, 1]} : vector<16x128xf32> to vector<16x32xf32>
    %41 = vector.shape_cast %40 : vector<16x32xf32> to vector<1x16x32xf32>
    %42 = vector.extract_strided_slice %27 {offsets = [0, 32], sizes = [16, 32], strides = [1, 1]} : vector<16x128xf32> to vector<16x32xf32>
    %43 = vector.shape_cast %42 : vector<16x32xf32> to vector<1x16x32xf32>
    %44 = vector.extract_strided_slice %27 {offsets = [0, 64], sizes = [16, 32], strides = [1, 1]} : vector<16x128xf32> to vector<16x32xf32>
    %45 = vector.shape_cast %44 : vector<16x32xf32> to vector<1x16x32xf32>
    %46 = vector.extract_strided_slice %27 {offsets = [0, 96], sizes = [16, 32], strides = [1, 1]} : vector<16x128xf32> to vector<16x32xf32>
    %47 = vector.shape_cast %46 : vector<16x32xf32> to vector<1x16x32xf32>
    %48 = tpu.concatenate %41, %43, %45, %47 in 0 : vector<1x16x32xf32>, vector<1x16x32xf32>, vector<1x16x32xf32>, vector<1x16x32xf32> -> vector<4x16x32xf32>
    %49 = vector.extract_strided_slice %30 {offsets = [0, 0], sizes = [16, 32], strides = [1, 1]} : vector<16x128xf32> to vector<16x32xf32>
    %50 = vector.shape_cast %49 : vector<16x32xf32> to vector<1x16x32xf32>
    %51 = vector.extract_strided_slice %30 {offsets = [0, 32], sizes = [16, 32], strides = [1, 1]} : vector<16x128xf32> to vector<16x32xf32>
    %52 = vector.shape_cast %51 : vector<16x32xf32> to vector<1x16x32xf32>
    %53 = vector.extract_strided_slice %30 {offsets = [0, 64], sizes = [16, 32], strides = [1, 1]} : vector<16x128xf32> to vector<16x32xf32>
    %54 = vector.shape_cast %53 : vector<16x32xf32> to vector<1x16x32xf32>
    %55 = vector.extract_strided_slice %30 {offsets = [0, 96], sizes = [16, 32], strides = [1, 1]} : vector<16x128xf32> to vector<16x32xf32>
    %56 = vector.shape_cast %55 : vector<16x32xf32> to vector<1x16x32xf32>
    %57 = tpu.concatenate %50, %52, %54, %56 in 0 : vector<1x16x32xf32>, vector<1x16x32xf32>, vector<1x16x32xf32>, vector<1x16x32xf32> -> vector<4x16x32xf32>
    "tpu.trace_start"() <{level = 10 : i32, message = "hqd,hkd->hqk"}> : () -> ()
    %cst_35 = arith.constant dense<0.000000e+00> : vector<4x16x16xf32>
    %58 = tpu.matmul %39, %48, %cst_35 {dimension_numbers = #tpu.dot_dimension_numbers<[2], [2], [1], [1], [0, 0, 0, 1, 1, 1], [0], [0]>} : vector<4x16x32xf32>, vector<4x16x32xf32>, vector<4x16x16xf32> -> vector<4x16x16xf32>
    "tpu.trace_stop"() : () -> ()
    %cst_36 = arith.constant 0.176776692 : f32
    %59 = vector.broadcast %cst_36 : f32 to vector<4x16x16xf32>
    %60 = arith.mulf %58, %59 : vector<4x16x16xf32>
    %61 = vector.shape_cast %0 : vector<16x16xf32> to vector<1x16x16xf32>
    %62 = vector.broadcast %61 : vector<1x16x16xf32> to vector<4x16x16xf32>
    %63 = arith.addf %60, %62 : vector<4x16x16xf32>
    %cst_37 = arith.constant dense<0xFF800000> : vector<4x16xf32>
    %64 = vector.multi_reduction <maximumf>, %63, %cst_37 [2] : vector<4x16x16xf32> to vector<4x16xf32>
    %65 = vector.shape_cast %64 : vector<4x16xf32> to vector<4x16x1xf32>
    %66 = vector.broadcast %65 : vector<4x16x1xf32> to vector<4x16x16xf32>
    %67 = arith.subf %63, %66 : vector<4x16x16xf32>
    %68 = math.exp %67 : vector<4x16x16xf32>
    %cst_38 = arith.constant dense<0.000000e+00> : vector<4x16xf32>
    %69 = vector.multi_reduction <add>, %68, %cst_38 [2] : vector<4x16x16xf32> to vector<4x16xf32>
    %70 = vector.shape_cast %69 : vector<4x16xf32> to vector<4x16x1xf32>
    %71 = tpu.reciprocal %70 {approx = true} : vector<4x16x1xf32> -> vector<4x16x1xf32>
    %72 = vector.broadcast %71 : vector<4x16x1xf32> to vector<4x16x16xf32>
    %73 = arith.mulf %68, %72 : vector<4x16x16xf32>
    "tpu.trace_start"() <{level = 10 : i32, message = "hqk,hkd->hqd"}> : () -> ()
    %cst_39 = arith.constant dense<0.000000e+00> : vector<4x16x32xf32>
    %74 = tpu.matmul %73, %57, %cst_39 {dimension_numbers = #tpu.dot_dimension_numbers<[2], [1], [1], [2], [0, 0, 0, 1, 1, 2], [0], [0]>} : vector<4x16x16xf32>, vector<4x16x32xf32>, vector<4x16x32xf32> -> vector<4x16x32xf32>
    "tpu.trace_stop"() : () -> ()
    %75 = vector.extract_strided_slice %74 {offsets = [0, 0, 0], sizes = [1, 16, 32], strides = [1, 1, 1]} : vector<4x16x32xf32> to vector<1x16x32xf32>
    %76 = vector.shape_cast %75 : vector<1x16x32xf32> to vector<16x32xf32>
    %77 = vector.extract_strided_slice %19 {offsets = [0, 0], sizes = [32, 128], strides = [1, 1]} : vector<128x128xf32> to vector<32x128xf32>
    %cst_40 = arith.constant dense<0.000000e+00> : vector<16x128xf32>
    %78 = tpu.matmul %76, %77, %cst_40 {dimension_numbers = #tpu.dot_dimension_numbers<[1], [0], [0], [1], [0, 0, 1, 1], [], []>} : vector<16x32xf32>, vector<32x128xf32>, vector<16x128xf32> -> vector<16x128xf32>
    %79 = vector.broadcast %21 : vector<1x128xf32> to vector<16x128xf32>
    %80 = arith.addf %79, %78 : vector<16x128xf32>
    %81 = vector.extract_strided_slice %74 {offsets = [1, 0, 0], sizes = [1, 16, 32], strides = [1, 1, 1]} : vector<4x16x32xf32> to vector<1x16x32xf32>
    %82 = vector.shape_cast %81 : vector<1x16x32xf32> to vector<16x32xf32>
    %83 = vector.extract_strided_slice %19 {offsets = [32, 0], sizes = [32, 128], strides = [1, 1]} : vector<128x128xf32> to vector<32x128xf32>
    %cst_41 = arith.constant dense<0.000000e+00> : vector<16x128xf32>
    %84 = tpu.matmul %82, %83, %cst_41 {dimension_numbers = #tpu.dot_dimension_numbers<[1], [0], [0], [1], [0, 0, 1, 1], [], []>} : vector<16x32xf32>, vector<32x128xf32>, vector<16x128xf32> -> vector<16x128xf32>
    %85 = arith.addf %80, %84 : vector<16x128xf32>
    %86 = vector.extract_strided_slice %74 {offsets = [2, 0, 0], sizes = [1, 16, 32], strides = [1, 1, 1]} : vector<4x16x32xf32> to vector<1x16x32xf32>
    %87 = vector.shape_cast %86 : vector<1x16x32xf32> to vector<16x32xf32>
    %88 = vector.extract_strided_slice %19 {offsets = [64, 0], sizes = [32, 128], strides = [1, 1]} : vector<128x128xf32> to vector<32x128xf32>
    %cst_42 = arith.constant dense<0.000000e+00> : vector<16x128xf32>
    %89 = tpu.matmul %87, %88, %cst_42 {dimension_numbers = #tpu.dot_dimension_numbers<[1], [0], [0], [1], [0, 0, 1, 1], [], []>} : vector<16x32xf32>, vector<32x128xf32>, vector<16x128xf32> -> vector<16x128xf32>
    %90 = arith.addf %85, %89 : vector<16x128xf32>
    %91 = vector.extract_strided_slice %74 {offsets = [3, 0, 0], sizes = [1, 16, 32], strides = [1, 1, 1]} : vector<4x16x32xf32> to vector<1x16x32xf32>
    %92 = vector.shape_cast %91 : vector<1x16x32xf32> to vector<16x32xf32>
    %93 = vector.extract_strided_slice %19 {offsets = [96, 0], sizes = [32, 128], strides = [1, 1]} : vector<128x128xf32> to vector<32x128xf32>
    %cst_43 = arith.constant dense<0.000000e+00> : vector<16x128xf32>
    %94 = tpu.matmul %92, %93, %cst_43 {dimension_numbers = #tpu.dot_dimension_numbers<[1], [0], [0], [1], [0, 0, 1, 1], [], []>} : vector<16x32xf32>, vector<32x128xf32>, vector<16x128xf32> -> vector<16x128xf32>
    %95 = arith.addf %90, %94 : vector<16x128xf32>
    %96 = arith.addf %5, %95 : vector<16x128xf32>
    %c0_44 = arith.constant 0 : index
    %c0_45 = arith.constant 0 : index
    %c0_46 = arith.constant 0 : index
    %97 = vector.load %arg15[%c0_44, %c0_45, %c0_46] : memref<2x1x128xf32, #tpu.memory_space<vmem>>, vector<1x1x128xf32>
    %98 = vector.shape_cast %97 : vector<1x1x128xf32> to vector<1x128xf32>
    %c0_47 = arith.constant 0 : index
    %c0_48 = arith.constant 0 : index
    %c0_49 = arith.constant 0 : index
    %99 = vector.load %arg16[%c0_47, %c0_48, %c0_49] : memref<2x1x128xf32, #tpu.memory_space<vmem>>, vector<1x1x128xf32>
    %100 = vector.shape_cast %99 : vector<1x1x128xf32> to vector<1x128xf32>
    %cst_50 = arith.constant dense<0.000000e+00> : vector<16xf32>
    %101 = vector.multi_reduction <add>, %96, %cst_50 [1] : vector<16x128xf32> to vector<16xf32>
    %102 = vector.shape_cast %101 : vector<16xf32> to vector<16x1xf32>
    %cst_51 = arith.constant 1.280000e+02 : f32
    %103 = vector.broadcast %cst_51 : f32 to vector<16x1xf32>
    %104 = arith.divf %102, %103 : vector<16x1xf32>
    %105 = vector.broadcast %104 : vector<16x1xf32> to vector<16x128xf32>
    %106 = arith.subf %96, %105 : vector<16x128xf32>
    %107 = arith.mulf %106, %106 : vector<16x128xf32>
    %cst_52 = arith.constant dense<0.000000e+00> : vector<16xf32>
    %108 = vector.multi_reduction <add>, %107, %cst_52 [1] : vector<16x128xf32> to vector<16xf32>
    %109 = vector.shape_cast %108 : vector<16xf32> to vector<16x1xf32>
    %cst_53 = arith.constant 1.280000e+02 : f32
    %110 = vector.broadcast %cst_53 : f32 to vector<16x1xf32>
    %111 = arith.divf %109, %110 : vector<16x1xf32>
    %112 = vector.broadcast %104 : vector<16x1xf32> to vector<16x128xf32>
    %113 = arith.subf %96, %112 : vector<16x128xf32>
    %cst_54 = arith.constant 9.99999974E-6 : f32
    %114 = vector.broadcast %cst_54 : f32 to vector<16x1xf32>
    %115 = arith.addf %111, %114 : vector<16x1xf32>
    %116 = math.rsqrt %115 : vector<16x1xf32>
    %117 = vector.broadcast %116 : vector<16x1xf32> to vector<16x128xf32>
    %118 = arith.mulf %113, %117 : vector<16x128xf32>
    %119 = vector.broadcast %98 : vector<1x128xf32> to vector<16x128xf32>
    %120 = arith.mulf %118, %119 : vector<16x128xf32>
    %121 = vector.broadcast %100 : vector<1x128xf32> to vector<16x128xf32>
    %122 = arith.addf %120, %121 : vector<16x128xf32>
    %c0_55 = arith.constant 0 : index
    %c0_56 = arith.constant 0 : index
    %c0_57 = arith.constant 0 : index
    %123 = vector.load %arg17[%c0_55, %c0_56, %c0_57] : memref<2x128x256xf32, #tpu.memory_space<vmem>>, vector<1x128x256xf32>
    %124 = vector.shape_cast %123 : vector<1x128x256xf32> to vector<128x256xf32>
    %c0_58 = arith.constant 0 : index
    %c0_59 = arith.constant 0 : index
    %c0_60 = arith.constant 0 : index
    %125 = vector.load %arg18[%c0_58, %c0_59, %c0_60] : memref<2x1x256xf32, #tpu.memory_space<vmem>>, vector<1x1x256xf32>
    %126 = vector.shape_cast %125 : vector<1x1x256xf32> to vector<1x256xf32>
    %c0_61 = arith.constant 0 : index
    %c0_62 = arith.constant 0 : index
    %c0_63 = arith.constant 0 : index
    %127 = vector.load %arg19[%c0_61, %c0_62, %c0_63] : memref<2x256x128xf32, #tpu.memory_space<vmem>>, vector<1x256x128xf32>
    %128 = vector.shape_cast %127 : vector<1x256x128xf32> to vector<256x128xf32>
    %c0_64 = arith.constant 0 : index
    %c0_65 = arith.constant 0 : index
    %c0_66 = arith.constant 0 : index
    %129 = vector.load %arg20[%c0_64, %c0_65, %c0_66] : memref<2x1x128xf32, #tpu.memory_space<vmem>>, vector<1x1x128xf32>
    %130 = vector.shape_cast %129 : vector<1x1x128xf32> to vector<1x128xf32>
    %cst_67 = arith.constant dense<0.000000e+00> : vector<16x256xf32>
    %131 = tpu.matmul %122, %124, %cst_67 {dimension_numbers = #tpu.dot_dimension_numbers<[1], [0], [0], [1], [0, 0, 1, 1], [], []>} : vector<16x128xf32>, vector<128x256xf32>, vector<16x256xf32> -> vector<16x256xf32>
    %132 = vector.broadcast %126 : vector<1x256xf32> to vector<16x256xf32>
    %133 = arith.addf %131, %132 : vector<16x256xf32>
    %cst_68 = arith.constant 0.000000e+00 : f32
    %134 = vector.broadcast %cst_68 : f32 to vector<16x256xf32>
    %135 = arith.maximumf %133, %134 : vector<16x256xf32>
    %cst_69 = arith.constant dense<0.000000e+00> : vector<16x128xf32>
    %136 = tpu.matmul %135, %128, %cst_69 {dimension_numbers = #tpu.dot_dimension_numbers<[1], [0], [0], [1], [0, 0, 1, 1], [], []>} : vector<16x256xf32>, vector<256x128xf32>, vector<16x128xf32> -> vector<16x128xf32>
    %137 = vector.broadcast %130 : vector<1x128xf32> to vector<16x128xf32>
    %138 = arith.addf %136, %137 : vector<16x128xf32>
    %139 = arith.addf %122, %138 : vector<16x128xf32>
    %c0_70 = arith.constant 0 : index
    %c0_71 = arith.constant 0 : index
    %c0_72 = arith.constant 0 : index
    %140 = vector.load %arg21[%c0_70, %c0_71, %c0_72] : memref<2x1x128xf32, #tpu.memory_space<vmem>>, vector<1x1x128xf32>
    %141 = vector.shape_cast %140 : vector<1x1x128xf32> to vector<1x128xf32>
    %c0_73 = arith.constant 0 : index
    %c0_74 = arith.constant 0 : index
    %c0_75 = arith.constant 0 : index
    %142 = vector.load %arg22[%c0_73, %c0_74, %c0_75] : memref<2x1x128xf32, #tpu.memory_space<vmem>>, vector<1x1x128xf32>
    %143 = vector.shape_cast %142 : vector<1x1x128xf32> to vector<1x128xf32>
    %cst_76 = arith.constant dense<0.000000e+00> : vector<16xf32>
    %144 = vector.multi_reduction <add>, %139, %cst_76 [1] : vector<16x128xf32> to vector<16xf32>
    %145 = vector.shape_cast %144 : vector<16xf32> to vector<16x1xf32>
    %cst_77 = arith.constant 1.280000e+02 : f32
    %146 = vector.broadcast %cst_77 : f32 to vector<16x1xf32>
    %147 = arith.divf %145, %146 : vector<16x1xf32>
    %148 = vector.broadcast %147 : vector<16x1xf32> to vector<16x128xf32>
    %149 = arith.subf %139, %148 : vector<16x128xf32>
    %150 = arith.mulf %149, %149 : vector<16x128xf32>
    %cst_78 = arith.constant dense<0.000000e+00> : vector<16xf32>
    %151 = vector.multi_reduction <add>, %150, %cst_78 [1] : vector<16x128xf32> to vector<16xf32>
    %152 = vector.shape_cast %151 : vector<16xf32> to vector<16x1xf32>
    %cst_79 = arith.constant 1.280000e+02 : f32
    %153 = vector.broadcast %cst_79 : f32 to vector<16x1xf32>
    %154 = arith.divf %152, %153 : vector<16x1xf32>
    %155 = vector.broadcast %147 : vector<16x1xf32> to vector<16x128xf32>
    %156 = arith.subf %139, %155 : vector<16x128xf32>
    %cst_80 = arith.constant 9.99999974E-6 : f32
    %157 = vector.broadcast %cst_80 : f32 to vector<16x1xf32>
    %158 = arith.addf %154, %157 : vector<16x1xf32>
    %159 = math.rsqrt %158 : vector<16x1xf32>
    %160 = vector.broadcast %159 : vector<16x1xf32> to vector<16x128xf32>
    %161 = arith.mulf %156, %160 : vector<16x128xf32>
    %162 = vector.broadcast %141 : vector<1x128xf32> to vector<16x128xf32>
    %163 = arith.mulf %161, %162 : vector<16x128xf32>
    %164 = vector.broadcast %143 : vector<1x128xf32> to vector<16x128xf32>
    %165 = arith.addf %163, %164 : vector<16x128xf32>
    %c1 = arith.constant 1 : index
    %c0_81 = arith.constant 0 : index
    %c0_82 = arith.constant 0 : index
    %166 = vector.load %arg7[%c1, %c0_81, %c0_82] : memref<2x128x128xf32, #tpu.memory_space<vmem>>, vector<1x128x128xf32>
    %167 = vector.shape_cast %166 : vector<1x128x128xf32> to vector<128x128xf32>
    %c1_83 = arith.constant 1 : index
    %c0_84 = arith.constant 0 : index
    %c0_85 = arith.constant 0 : index
    %168 = vector.load %arg8[%c1_83, %c0_84, %c0_85] : memref<2x1x128xf32, #tpu.memory_space<vmem>>, vector<1x1x128xf32>
    %169 = vector.shape_cast %168 : vector<1x1x128xf32> to vector<1x128xf32>
    %c1_86 = arith.constant 1 : index
    %c0_87 = arith.constant 0 : index
    %c0_88 = arith.constant 0 : index
    %170 = vector.load %arg9[%c1_86, %c0_87, %c0_88] : memref<2x128x128xf32, #tpu.memory_space<vmem>>, vector<1x128x128xf32>
    %171 = vector.shape_cast %170 : vector<1x128x128xf32> to vector<128x128xf32>
    %c1_89 = arith.constant 1 : index
    %c0_90 = arith.constant 0 : index
    %c0_91 = arith.constant 0 : index
    %172 = vector.load %arg10[%c1_89, %c0_90, %c0_91] : memref<2x1x128xf32, #tpu.memory_space<vmem>>, vector<1x1x128xf32>
    %173 = vector.shape_cast %172 : vector<1x1x128xf32> to vector<1x128xf32>
    %c1_92 = arith.constant 1 : index
    %c0_93 = arith.constant 0 : index
    %c0_94 = arith.constant 0 : index
    %174 = vector.load %arg11[%c1_92, %c0_93, %c0_94] : memref<2x128x128xf32, #tpu.memory_space<vmem>>, vector<1x128x128xf32>
    %175 = vector.shape_cast %174 : vector<1x128x128xf32> to vector<128x128xf32>
    %c1_95 = arith.constant 1 : index
    %c0_96 = arith.constant 0 : index
    %c0_97 = arith.constant 0 : index
    %176 = vector.load %arg12[%c1_95, %c0_96, %c0_97] : memref<2x1x128xf32, #tpu.memory_space<vmem>>, vector<1x1x128xf32>
    %177 = vector.shape_cast %176 : vector<1x1x128xf32> to vector<1x128xf32>
    %c1_98 = arith.constant 1 : index
    %c0_99 = arith.constant 0 : index
    %c0_100 = arith.constant 0 : index
    %178 = vector.load %arg13[%c1_98, %c0_99, %c0_100] : memref<2x128x128xf32, #tpu.memory_space<vmem>>, vector<1x128x128xf32>
    %179 = vector.shape_cast %178 : vector<1x128x128xf32> to vector<128x128xf32>
    %c1_101 = arith.constant 1 : index
    %c0_102 = arith.constant 0 : index
    %c0_103 = arith.constant 0 : index
    %180 = vector.load %arg14[%c1_101, %c0_102, %c0_103] : memref<2x1x128xf32, #tpu.memory_space<vmem>>, vector<1x1x128xf32>
    %181 = vector.shape_cast %180 : vector<1x1x128xf32> to vector<1x128xf32>
    %cst_104 = arith.constant dense<0.000000e+00> : vector<16x128xf32>
    %182 = tpu.matmul %165, %167, %cst_104 {dimension_numbers = #tpu.dot_dimension_numbers<[1], [0], [0], [1], [0, 0, 1, 1], [], []>} : vector<16x128xf32>, vector<128x128xf32>, vector<16x128xf32> -> vector<16x128xf32>
    %183 = vector.broadcast %169 : vector<1x128xf32> to vector<16x128xf32>
    %184 = arith.addf %182, %183 : vector<16x128xf32>
    %cst_105 = arith.constant dense<0.000000e+00> : vector<16x128xf32>
    %185 = tpu.matmul %165, %171, %cst_105 {dimension_numbers = #tpu.dot_dimension_numbers<[1], [0], [0], [1], [0, 0, 1, 1], [], []>} : vector<16x128xf32>, vector<128x128xf32>, vector<16x128xf32> -> vector<16x128xf32>
    %186 = vector.broadcast %173 : vector<1x128xf32> to vector<16x128xf32>
    %187 = arith.addf %185, %186 : vector<16x128xf32>
    %cst_106 = arith.constant dense<0.000000e+00> : vector<16x128xf32>
    %188 = tpu.matmul %165, %175, %cst_106 {dimension_numbers = #tpu.dot_dimension_numbers<[1], [0], [0], [1], [0, 0, 1, 1], [], []>} : vector<16x128xf32>, vector<128x128xf32>, vector<16x128xf32> -> vector<16x128xf32>
    %189 = vector.broadcast %177 : vector<1x128xf32> to vector<16x128xf32>
    %190 = arith.addf %188, %189 : vector<16x128xf32>
    %191 = vector.extract_strided_slice %184 {offsets = [0, 0], sizes = [16, 32], strides = [1, 1]} : vector<16x128xf32> to vector<16x32xf32>
    %192 = vector.shape_cast %191 : vector<16x32xf32> to vector<1x16x32xf32>
    %193 = vector.extract_strided_slice %184 {offsets = [0, 32], sizes = [16, 32], strides = [1, 1]} : vector<16x128xf32> to vector<16x32xf32>
    %194 = vector.shape_cast %193 : vector<16x32xf32> to vector<1x16x32xf32>
    %195 = vector.extract_strided_slice %184 {offsets = [0, 64], sizes = [16, 32], strides = [1, 1]} : vector<16x128xf32> to vector<16x32xf32>
    %196 = vector.shape_cast %195 : vector<16x32xf32> to vector<1x16x32xf32>
    %197 = vector.extract_strided_slice %184 {offsets = [0, 96], sizes = [16, 32], strides = [1, 1]} : vector<16x128xf32> to vector<16x32xf32>
    %198 = vector.shape_cast %197 : vector<16x32xf32> to vector<1x16x32xf32>
    %199 = tpu.concatenate %192, %194, %196, %198 in 0 : vector<1x16x32xf32>, vector<1x16x32xf32>, vector<1x16x32xf32>, vector<1x16x32xf32> -> vector<4x16x32xf32>
    %200 = vector.extract_strided_slice %187 {offsets = [0, 0], sizes = [16, 32], strides = [1, 1]} : vector<16x128xf32> to vector<16x32xf32>
    %201 = vector.shape_cast %200 : vector<16x32xf32> to vector<1x16x32xf32>
    %202 = vector.extract_strided_slice %187 {offsets = [0, 32], sizes = [16, 32], strides = [1, 1]} : vector<16x128xf32> to vector<16x32xf32>
    %203 = vector.shape_cast %202 : vector<16x32xf32> to vector<1x16x32xf32>
    %204 = vector.extract_strided_slice %187 {offsets = [0, 64], sizes = [16, 32], strides = [1, 1]} : vector<16x128xf32> to vector<16x32xf32>
    %205 = vector.shape_cast %204 : vector<16x32xf32> to vector<1x16x32xf32>
    %206 = vector.extract_strided_slice %187 {offsets = [0, 96], sizes = [16, 32], strides = [1, 1]} : vector<16x128xf32> to vector<16x32xf32>
    %207 = vector.shape_cast %206 : vector<16x32xf32> to vector<1x16x32xf32>
    %208 = tpu.concatenate %201, %203, %205, %207 in 0 : vector<1x16x32xf32>, vector<1x16x32xf32>, vector<1x16x32xf32>, vector<1x16x32xf32> -> vector<4x16x32xf32>
    %209 = vector.extract_strided_slice %190 {offsets = [0, 0], sizes = [16, 32], strides = [1, 1]} : vector<16x128xf32> to vector<16x32xf32>
    %210 = vector.shape_cast %209 : vector<16x32xf32> to vector<1x16x32xf32>
    %211 = vector.extract_strided_slice %190 {offsets = [0, 32], sizes = [16, 32], strides = [1, 1]} : vector<16x128xf32> to vector<16x32xf32>
    %212 = vector.shape_cast %211 : vector<16x32xf32> to vector<1x16x32xf32>
    %213 = vector.extract_strided_slice %190 {offsets = [0, 64], sizes = [16, 32], strides = [1, 1]} : vector<16x128xf32> to vector<16x32xf32>
    %214 = vector.shape_cast %213 : vector<16x32xf32> to vector<1x16x32xf32>
    %215 = vector.extract_strided_slice %190 {offsets = [0, 96], sizes = [16, 32], strides = [1, 1]} : vector<16x128xf32> to vector<16x32xf32>
    %216 = vector.shape_cast %215 : vector<16x32xf32> to vector<1x16x32xf32>
    %217 = tpu.concatenate %210, %212, %214, %216 in 0 : vector<1x16x32xf32>, vector<1x16x32xf32>, vector<1x16x32xf32>, vector<1x16x32xf32> -> vector<4x16x32xf32>
    "tpu.trace_start"() <{level = 10 : i32, message = "hqd,hkd->hqk"}> : () -> ()
    %cst_107 = arith.constant dense<0.000000e+00> : vector<4x16x16xf32>
    %218 = tpu.matmul %199, %208, %cst_107 {dimension_numbers = #tpu.dot_dimension_numbers<[2], [2], [1], [1], [0, 0, 0, 1, 1, 1], [0], [0]>} : vector<4x16x32xf32>, vector<4x16x32xf32>, vector<4x16x16xf32> -> vector<4x16x16xf32>
    "tpu.trace_stop"() : () -> ()
    %cst_108 = arith.constant 0.176776692 : f32
    %219 = vector.broadcast %cst_108 : f32 to vector<4x16x16xf32>
    %220 = arith.mulf %218, %219 : vector<4x16x16xf32>
    %221 = vector.shape_cast %0 : vector<16x16xf32> to vector<1x16x16xf32>
    %222 = vector.broadcast %221 : vector<1x16x16xf32> to vector<4x16x16xf32>
    %223 = arith.addf %220, %222 : vector<4x16x16xf32>
    %cst_109 = arith.constant dense<0xFF800000> : vector<4x16xf32>
    %224 = vector.multi_reduction <maximumf>, %223, %cst_109 [2] : vector<4x16x16xf32> to vector<4x16xf32>
    %225 = vector.shape_cast %224 : vector<4x16xf32> to vector<4x16x1xf32>
    %226 = vector.broadcast %225 : vector<4x16x1xf32> to vector<4x16x16xf32>
    %227 = arith.subf %223, %226 : vector<4x16x16xf32>
    %228 = math.exp %227 : vector<4x16x16xf32>
    %cst_110 = arith.constant dense<0.000000e+00> : vector<4x16xf32>
    %229 = vector.multi_reduction <add>, %228, %cst_110 [2] : vector<4x16x16xf32> to vector<4x16xf32>
    %230 = vector.shape_cast %229 : vector<4x16xf32> to vector<4x16x1xf32>
    %231 = tpu.reciprocal %230 {approx = true} : vector<4x16x1xf32> -> vector<4x16x1xf32>
    %232 = vector.broadcast %231 : vector<4x16x1xf32> to vector<4x16x16xf32>
    %233 = arith.mulf %228, %232 : vector<4x16x16xf32>
    "tpu.trace_start"() <{level = 10 : i32, message = "hqk,hkd->hqd"}> : () -> ()
    %cst_111 = arith.constant dense<0.000000e+00> : vector<4x16x32xf32>
    %234 = tpu.matmul %233, %217, %cst_111 {dimension_numbers = #tpu.dot_dimension_numbers<[2], [1], [1], [2], [0, 0, 0, 1, 1, 2], [0], [0]>} : vector<4x16x16xf32>, vector<4x16x32xf32>, vector<4x16x32xf32> -> vector<4x16x32xf32>
    "tpu.trace_stop"() : () -> ()
    %235 = vector.extract_strided_slice %234 {offsets = [0, 0, 0], sizes = [1, 16, 32], strides = [1, 1, 1]} : vector<4x16x32xf32> to vector<1x16x32xf32>
    %236 = vector.shape_cast %235 : vector<1x16x32xf32> to vector<16x32xf32>
    %237 = vector.extract_strided_slice %179 {offsets = [0, 0], sizes = [32, 128], strides = [1, 1]} : vector<128x128xf32> to vector<32x128xf32>
    %cst_112 = arith.constant dense<0.000000e+00> : vector<16x128xf32>
    %238 = tpu.matmul %236, %237, %cst_112 {dimension_numbers = #tpu.dot_dimension_numbers<[1], [0], [0], [1], [0, 0, 1, 1], [], []>} : vector<16x32xf32>, vector<32x128xf32>, vector<16x128xf32> -> vector<16x128xf32>
    %239 = vector.broadcast %181 : vector<1x128xf32> to vector<16x128xf32>
    %240 = arith.addf %239, %238 : vector<16x128xf32>
    %241 = vector.extract_strided_slice %234 {offsets = [1, 0, 0], sizes = [1, 16, 32], strides = [1, 1, 1]} : vector<4x16x32xf32> to vector<1x16x32xf32>
    %242 = vector.shape_cast %241 : vector<1x16x32xf32> to vector<16x32xf32>
    %243 = vector.extract_strided_slice %179 {offsets = [32, 0], sizes = [32, 128], strides = [1, 1]} : vector<128x128xf32> to vector<32x128xf32>
    %cst_113 = arith.constant dense<0.000000e+00> : vector<16x128xf32>
    %244 = tpu.matmul %242, %243, %cst_113 {dimension_numbers = #tpu.dot_dimension_numbers<[1], [0], [0], [1], [0, 0, 1, 1], [], []>} : vector<16x32xf32>, vector<32x128xf32>, vector<16x128xf32> -> vector<16x128xf32>
    %245 = arith.addf %240, %244 : vector<16x128xf32>
    %246 = vector.extract_strided_slice %234 {offsets = [2, 0, 0], sizes = [1, 16, 32], strides = [1, 1, 1]} : vector<4x16x32xf32> to vector<1x16x32xf32>
    %247 = vector.shape_cast %246 : vector<1x16x32xf32> to vector<16x32xf32>
    %248 = vector.extract_strided_slice %179 {offsets = [64, 0], sizes = [32, 128], strides = [1, 1]} : vector<128x128xf32> to vector<32x128xf32>
    %cst_114 = arith.constant dense<0.000000e+00> : vector<16x128xf32>
    %249 = tpu.matmul %247, %248, %cst_114 {dimension_numbers = #tpu.dot_dimension_numbers<[1], [0], [0], [1], [0, 0, 1, 1], [], []>} : vector<16x32xf32>, vector<32x128xf32>, vector<16x128xf32> -> vector<16x128xf32>
    %250 = arith.addf %245, %249 : vector<16x128xf32>
    %251 = vector.extract_strided_slice %234 {offsets = [3, 0, 0], sizes = [1, 16, 32], strides = [1, 1, 1]} : vector<4x16x32xf32> to vector<1x16x32xf32>
    %252 = vector.shape_cast %251 : vector<1x16x32xf32> to vector<16x32xf32>
    %253 = vector.extract_strided_slice %179 {offsets = [96, 0], sizes = [32, 128], strides = [1, 1]} : vector<128x128xf32> to vector<32x128xf32>
    %cst_115 = arith.constant dense<0.000000e+00> : vector<16x128xf32>
    %254 = tpu.matmul %252, %253, %cst_115 {dimension_numbers = #tpu.dot_dimension_numbers<[1], [0], [0], [1], [0, 0, 1, 1], [], []>} : vector<16x32xf32>, vector<32x128xf32>, vector<16x128xf32> -> vector<16x128xf32>
    %255 = arith.addf %250, %254 : vector<16x128xf32>
    %256 = arith.addf %165, %255 : vector<16x128xf32>
    %c1_116 = arith.constant 1 : index
    %c0_117 = arith.constant 0 : index
    %c0_118 = arith.constant 0 : index
    %257 = vector.load %arg15[%c1_116, %c0_117, %c0_118] : memref<2x1x128xf32, #tpu.memory_space<vmem>>, vector<1x1x128xf32>
    %258 = vector.shape_cast %257 : vector<1x1x128xf32> to vector<1x128xf32>
    %c1_119 = arith.constant 1 : index
    %c0_120 = arith.constant 0 : index
    %c0_121 = arith.constant 0 : index
    %259 = vector.load %arg16[%c1_119, %c0_120, %c0_121] : memref<2x1x128xf32, #tpu.memory_space<vmem>>, vector<1x1x128xf32>
    %260 = vector.shape_cast %259 : vector<1x1x128xf32> to vector<1x128xf32>
    %cst_122 = arith.constant dense<0.000000e+00> : vector<16xf32>
    %261 = vector.multi_reduction <add>, %256, %cst_122 [1] : vector<16x128xf32> to vector<16xf32>
    %262 = vector.shape_cast %261 : vector<16xf32> to vector<16x1xf32>
    %cst_123 = arith.constant 1.280000e+02 : f32
    %263 = vector.broadcast %cst_123 : f32 to vector<16x1xf32>
    %264 = arith.divf %262, %263 : vector<16x1xf32>
    %265 = vector.broadcast %264 : vector<16x1xf32> to vector<16x128xf32>
    %266 = arith.subf %256, %265 : vector<16x128xf32>
    %267 = arith.mulf %266, %266 : vector<16x128xf32>
    %cst_124 = arith.constant dense<0.000000e+00> : vector<16xf32>
    %268 = vector.multi_reduction <add>, %267, %cst_124 [1] : vector<16x128xf32> to vector<16xf32>
    %269 = vector.shape_cast %268 : vector<16xf32> to vector<16x1xf32>
    %cst_125 = arith.constant 1.280000e+02 : f32
    %270 = vector.broadcast %cst_125 : f32 to vector<16x1xf32>
    %271 = arith.divf %269, %270 : vector<16x1xf32>
    %272 = vector.broadcast %264 : vector<16x1xf32> to vector<16x128xf32>
    %273 = arith.subf %256, %272 : vector<16x128xf32>
    %cst_126 = arith.constant 9.99999974E-6 : f32
    %274 = vector.broadcast %cst_126 : f32 to vector<16x1xf32>
    %275 = arith.addf %271, %274 : vector<16x1xf32>
    %276 = math.rsqrt %275 : vector<16x1xf32>
    %277 = vector.broadcast %276 : vector<16x1xf32> to vector<16x128xf32>
    %278 = arith.mulf %273, %277 : vector<16x128xf32>
    %279 = vector.broadcast %258 : vector<1x128xf32> to vector<16x128xf32>
    %280 = arith.mulf %278, %279 : vector<16x128xf32>
    %281 = vector.broadcast %260 : vector<1x128xf32> to vector<16x128xf32>
    %282 = arith.addf %280, %281 : vector<16x128xf32>
    %c1_127 = arith.constant 1 : index
    %c0_128 = arith.constant 0 : index
    %c0_129 = arith.constant 0 : index
    %283 = vector.load %arg17[%c1_127, %c0_128, %c0_129] : memref<2x128x256xf32, #tpu.memory_space<vmem>>, vector<1x128x256xf32>
    %284 = vector.shape_cast %283 : vector<1x128x256xf32> to vector<128x256xf32>
    %c1_130 = arith.constant 1 : index
    %c0_131 = arith.constant 0 : index
    %c0_132 = arith.constant 0 : index
    %285 = vector.load %arg18[%c1_130, %c0_131, %c0_132] : memref<2x1x256xf32, #tpu.memory_space<vmem>>, vector<1x1x256xf32>
    %286 = vector.shape_cast %285 : vector<1x1x256xf32> to vector<1x256xf32>
    %c1_133 = arith.constant 1 : index
    %c0_134 = arith.constant 0 : index
    %c0_135 = arith.constant 0 : index
    %287 = vector.load %arg19[%c1_133, %c0_134, %c0_135] : memref<2x256x128xf32, #tpu.memory_space<vmem>>, vector<1x256x128xf32>
    %288 = vector.shape_cast %287 : vector<1x256x128xf32> to vector<256x128xf32>
    %c1_136 = arith.constant 1 : index
    %c0_137 = arith.constant 0 : index
    %c0_138 = arith.constant 0 : index
    %289 = vector.load %arg20[%c1_136, %c0_137, %c0_138] : memref<2x1x128xf32, #tpu.memory_space<vmem>>, vector<1x1x128xf32>
    %290 = vector.shape_cast %289 : vector<1x1x128xf32> to vector<1x128xf32>
    %cst_139 = arith.constant dense<0.000000e+00> : vector<16x256xf32>
    %291 = tpu.matmul %282, %284, %cst_139 {dimension_numbers = #tpu.dot_dimension_numbers<[1], [0], [0], [1], [0, 0, 1, 1], [], []>} : vector<16x128xf32>, vector<128x256xf32>, vector<16x256xf32> -> vector<16x256xf32>
    %292 = vector.broadcast %286 : vector<1x256xf32> to vector<16x256xf32>
    %293 = arith.addf %291, %292 : vector<16x256xf32>
    %cst_140 = arith.constant 0.000000e+00 : f32
    %294 = vector.broadcast %cst_140 : f32 to vector<16x256xf32>
    %295 = arith.maximumf %293, %294 : vector<16x256xf32>
    %cst_141 = arith.constant dense<0.000000e+00> : vector<16x128xf32>
    %296 = tpu.matmul %295, %288, %cst_141 {dimension_numbers = #tpu.dot_dimension_numbers<[1], [0], [0], [1], [0, 0, 1, 1], [], []>} : vector<16x256xf32>, vector<256x128xf32>, vector<16x128xf32> -> vector<16x128xf32>
    %297 = vector.broadcast %290 : vector<1x128xf32> to vector<16x128xf32>
    %298 = arith.addf %296, %297 : vector<16x128xf32>
    %299 = arith.addf %282, %298 : vector<16x128xf32>
    %c1_142 = arith.constant 1 : index
    %c0_143 = arith.constant 0 : index
    %c0_144 = arith.constant 0 : index
    %300 = vector.load %arg21[%c1_142, %c0_143, %c0_144] : memref<2x1x128xf32, #tpu.memory_space<vmem>>, vector<1x1x128xf32>
    %301 = vector.shape_cast %300 : vector<1x1x128xf32> to vector<1x128xf32>
    %c1_145 = arith.constant 1 : index
    %c0_146 = arith.constant 0 : index
    %c0_147 = arith.constant 0 : index
    %302 = vector.load %arg22[%c1_145, %c0_146, %c0_147] : memref<2x1x128xf32, #tpu.memory_space<vmem>>, vector<1x1x128xf32>
    %303 = vector.shape_cast %302 : vector<1x1x128xf32> to vector<1x128xf32>
    %cst_148 = arith.constant dense<0.000000e+00> : vector<16xf32>
    %304 = vector.multi_reduction <add>, %299, %cst_148 [1] : vector<16x128xf32> to vector<16xf32>
    %305 = vector.shape_cast %304 : vector<16xf32> to vector<16x1xf32>
    %cst_149 = arith.constant 1.280000e+02 : f32
    %306 = vector.broadcast %cst_149 : f32 to vector<16x1xf32>
    %307 = arith.divf %305, %306 : vector<16x1xf32>
    %308 = vector.broadcast %307 : vector<16x1xf32> to vector<16x128xf32>
    %309 = arith.subf %299, %308 : vector<16x128xf32>
    %310 = arith.mulf %309, %309 : vector<16x128xf32>
    %cst_150 = arith.constant dense<0.000000e+00> : vector<16xf32>
    %311 = vector.multi_reduction <add>, %310, %cst_150 [1] : vector<16x128xf32> to vector<16xf32>
    %312 = vector.shape_cast %311 : vector<16xf32> to vector<16x1xf32>
    %cst_151 = arith.constant 1.280000e+02 : f32
    %313 = vector.broadcast %cst_151 : f32 to vector<16x1xf32>
    %314 = arith.divf %312, %313 : vector<16x1xf32>
    %315 = vector.broadcast %307 : vector<16x1xf32> to vector<16x128xf32>
    %316 = arith.subf %299, %315 : vector<16x128xf32>
    %cst_152 = arith.constant 9.99999974E-6 : f32
    %317 = vector.broadcast %cst_152 : f32 to vector<16x1xf32>
    %318 = arith.addf %314, %317 : vector<16x1xf32>
    %319 = math.rsqrt %318 : vector<16x1xf32>
    %320 = vector.broadcast %319 : vector<16x1xf32> to vector<16x128xf32>
    %321 = arith.mulf %316, %320 : vector<16x128xf32>
    %322 = vector.broadcast %301 : vector<1x128xf32> to vector<16x128xf32>
    %323 = arith.mulf %321, %322 : vector<16x128xf32>
    %324 = vector.broadcast %303 : vector<1x128xf32> to vector<16x128xf32>
    %325 = arith.addf %323, %324 : vector<16x128xf32>
    %c0_153 = arith.constant 0 : index
    %c0_154 = arith.constant 0 : index
    %326 = vector.load %arg1[%c0_153, %c0_154] : memref<16x128xf32, #tpu.memory_space<vmem>>, vector<16x128xf32>
    %c0_155 = arith.constant 0 : index
    %c0_156 = arith.constant 0 : index
    %327 = vector.load %arg3[%c0_155, %c0_156] : memref<16x128xf32, #tpu.memory_space<vmem>>, vector<16x128xf32>
    %328 = arith.addf %326, %327 : vector<16x128xf32>
    %c0_157 = arith.constant 0 : index
    %c0_158 = arith.constant 0 : index
    %c0_159 = arith.constant 0 : index
    %329 = vector.load %arg23[%c0_157, %c0_158, %c0_159] : memref<2x128x128xf32, #tpu.memory_space<vmem>>, vector<1x128x128xf32>
    %330 = vector.shape_cast %329 : vector<1x128x128xf32> to vector<128x128xf32>
    %c0_160 = arith.constant 0 : index
    %c0_161 = arith.constant 0 : index
    %c0_162 = arith.constant 0 : index
    %331 = vector.load %arg24[%c0_160, %c0_161, %c0_162] : memref<2x1x128xf32, #tpu.memory_space<vmem>>, vector<1x1x128xf32>
    %332 = vector.shape_cast %331 : vector<1x1x128xf32> to vector<1x128xf32>
    %c0_163 = arith.constant 0 : index
    %c0_164 = arith.constant 0 : index
    %c0_165 = arith.constant 0 : index
    %333 = vector.load %arg25[%c0_163, %c0_164, %c0_165] : memref<2x128x128xf32, #tpu.memory_space<vmem>>, vector<1x128x128xf32>
    %334 = vector.shape_cast %333 : vector<1x128x128xf32> to vector<128x128xf32>
    %c0_166 = arith.constant 0 : index
    %c0_167 = arith.constant 0 : index
    %c0_168 = arith.constant 0 : index
    %335 = vector.load %arg26[%c0_166, %c0_167, %c0_168] : memref<2x1x128xf32, #tpu.memory_space<vmem>>, vector<1x1x128xf32>
    %336 = vector.shape_cast %335 : vector<1x1x128xf32> to vector<1x128xf32>
    %c0_169 = arith.constant 0 : index
    %c0_170 = arith.constant 0 : index
    %c0_171 = arith.constant 0 : index
    %337 = vector.load %arg27[%c0_169, %c0_170, %c0_171] : memref<2x128x128xf32, #tpu.memory_space<vmem>>, vector<1x128x128xf32>
    %338 = vector.shape_cast %337 : vector<1x128x128xf32> to vector<128x128xf32>
    %c0_172 = arith.constant 0 : index
    %c0_173 = arith.constant 0 : index
    %c0_174 = arith.constant 0 : index
    %339 = vector.load %arg28[%c0_172, %c0_173, %c0_174] : memref<2x1x128xf32, #tpu.memory_space<vmem>>, vector<1x1x128xf32>
    %340 = vector.shape_cast %339 : vector<1x1x128xf32> to vector<1x128xf32>
    %c0_175 = arith.constant 0 : index
    %c0_176 = arith.constant 0 : index
    %c0_177 = arith.constant 0 : index
    %341 = vector.load %arg29[%c0_175, %c0_176, %c0_177] : memref<2x128x128xf32, #tpu.memory_space<vmem>>, vector<1x128x128xf32>
    %342 = vector.shape_cast %341 : vector<1x128x128xf32> to vector<128x128xf32>
    %c0_178 = arith.constant 0 : index
    %c0_179 = arith.constant 0 : index
    %c0_180 = arith.constant 0 : index
    %343 = vector.load %arg30[%c0_178, %c0_179, %c0_180] : memref<2x1x128xf32, #tpu.memory_space<vmem>>, vector<1x1x128xf32>
    %344 = vector.shape_cast %343 : vector<1x1x128xf32> to vector<1x128xf32>
    %cst_181 = arith.constant dense<0.000000e+00> : vector<16x128xf32>
    %345 = tpu.matmul %328, %330, %cst_181 {dimension_numbers = #tpu.dot_dimension_numbers<[1], [0], [0], [1], [0, 0, 1, 1], [], []>} : vector<16x128xf32>, vector<128x128xf32>, vector<16x128xf32> -> vector<16x128xf32>
    %346 = vector.broadcast %332 : vector<1x128xf32> to vector<16x128xf32>
    %347 = arith.addf %345, %346 : vector<16x128xf32>
    %cst_182 = arith.constant dense<0.000000e+00> : vector<16x128xf32>
    %348 = tpu.matmul %328, %334, %cst_182 {dimension_numbers = #tpu.dot_dimension_numbers<[1], [0], [0], [1], [0, 0, 1, 1], [], []>} : vector<16x128xf32>, vector<128x128xf32>, vector<16x128xf32> -> vector<16x128xf32>
    %349 = vector.broadcast %336 : vector<1x128xf32> to vector<16x128xf32>
    %350 = arith.addf %348, %349 : vector<16x128xf32>
    %cst_183 = arith.constant dense<0.000000e+00> : vector<16x128xf32>
    %351 = tpu.matmul %328, %338, %cst_183 {dimension_numbers = #tpu.dot_dimension_numbers<[1], [0], [0], [1], [0, 0, 1, 1], [], []>} : vector<16x128xf32>, vector<128x128xf32>, vector<16x128xf32> -> vector<16x128xf32>
    %352 = vector.broadcast %340 : vector<1x128xf32> to vector<16x128xf32>
    %353 = arith.addf %351, %352 : vector<16x128xf32>
    %354 = vector.extract_strided_slice %347 {offsets = [0, 0], sizes = [16, 32], strides = [1, 1]} : vector<16x128xf32> to vector<16x32xf32>
    %355 = vector.shape_cast %354 : vector<16x32xf32> to vector<1x16x32xf32>
    %356 = vector.extract_strided_slice %347 {offsets = [0, 32], sizes = [16, 32], strides = [1, 1]} : vector<16x128xf32> to vector<16x32xf32>
    %357 = vector.shape_cast %356 : vector<16x32xf32> to vector<1x16x32xf32>
    %358 = vector.extract_strided_slice %347 {offsets = [0, 64], sizes = [16, 32], strides = [1, 1]} : vector<16x128xf32> to vector<16x32xf32>
    %359 = vector.shape_cast %358 : vector<16x32xf32> to vector<1x16x32xf32>
    %360 = vector.extract_strided_slice %347 {offsets = [0, 96], sizes = [16, 32], strides = [1, 1]} : vector<16x128xf32> to vector<16x32xf32>
    %361 = vector.shape_cast %360 : vector<16x32xf32> to vector<1x16x32xf32>
    %362 = tpu.concatenate %355, %357, %359, %361 in 0 : vector<1x16x32xf32>, vector<1x16x32xf32>, vector<1x16x32xf32>, vector<1x16x32xf32> -> vector<4x16x32xf32>
    %363 = vector.extract_strided_slice %350 {offsets = [0, 0], sizes = [16, 32], strides = [1, 1]} : vector<16x128xf32> to vector<16x32xf32>
    %364 = vector.shape_cast %363 : vector<16x32xf32> to vector<1x16x32xf32>
    %365 = vector.extract_strided_slice %350 {offsets = [0, 32], sizes = [16, 32], strides = [1, 1]} : vector<16x128xf32> to vector<16x32xf32>
    %366 = vector.shape_cast %365 : vector<16x32xf32> to vector<1x16x32xf32>
    %367 = vector.extract_strided_slice %350 {offsets = [0, 64], sizes = [16, 32], strides = [1, 1]} : vector<16x128xf32> to vector<16x32xf32>
    %368 = vector.shape_cast %367 : vector<16x32xf32> to vector<1x16x32xf32>
    %369 = vector.extract_strided_slice %350 {offsets = [0, 96], sizes = [16, 32], strides = [1, 1]} : vector<16x128xf32> to vector<16x32xf32>
    %370 = vector.shape_cast %369 : vector<16x32xf32> to vector<1x16x32xf32>
    %371 = tpu.concatenate %364, %366, %368, %370 in 0 : vector<1x16x32xf32>, vector<1x16x32xf32>, vector<1x16x32xf32>, vector<1x16x32xf32> -> vector<4x16x32xf32>
    %372 = vector.extract_strided_slice %353 {offsets = [0, 0], sizes = [16, 32], strides = [1, 1]} : vector<16x128xf32> to vector<16x32xf32>
    %373 = vector.shape_cast %372 : vector<16x32xf32> to vector<1x16x32xf32>
    %374 = vector.extract_strided_slice %353 {offsets = [0, 32], sizes = [16, 32], strides = [1, 1]} : vector<16x128xf32> to vector<16x32xf32>
    %375 = vector.shape_cast %374 : vector<16x32xf32> to vector<1x16x32xf32>
    %376 = vector.extract_strided_slice %353 {offsets = [0, 64], sizes = [16, 32], strides = [1, 1]} : vector<16x128xf32> to vector<16x32xf32>
    %377 = vector.shape_cast %376 : vector<16x32xf32> to vector<1x16x32xf32>
    %378 = vector.extract_strided_slice %353 {offsets = [0, 96], sizes = [16, 32], strides = [1, 1]} : vector<16x128xf32> to vector<16x32xf32>
    %379 = vector.shape_cast %378 : vector<16x32xf32> to vector<1x16x32xf32>
    %380 = tpu.concatenate %373, %375, %377, %379 in 0 : vector<1x16x32xf32>, vector<1x16x32xf32>, vector<1x16x32xf32>, vector<1x16x32xf32> -> vector<4x16x32xf32>
    "tpu.trace_start"() <{level = 10 : i32, message = "hqd,hkd->hqk"}> : () -> ()
    %cst_184 = arith.constant dense<0.000000e+00> : vector<4x16x16xf32>
    %381 = tpu.matmul %362, %371, %cst_184 {dimension_numbers = #tpu.dot_dimension_numbers<[2], [2], [1], [1], [0, 0, 0, 1, 1, 1], [0], [0]>} : vector<4x16x32xf32>, vector<4x16x32xf32>, vector<4x16x16xf32> -> vector<4x16x16xf32>
    "tpu.trace_stop"() : () -> ()
    %cst_185 = arith.constant 0.176776692 : f32
    %382 = vector.broadcast %cst_185 : f32 to vector<4x16x16xf32>
    %383 = arith.mulf %381, %382 : vector<4x16x16xf32>
    %384 = vector.shape_cast %1 : vector<16x16xf32> to vector<1x16x16xf32>
    %385 = vector.broadcast %384 : vector<1x16x16xf32> to vector<4x16x16xf32>
    %386 = arith.addf %383, %385 : vector<4x16x16xf32>
    %cst_186 = arith.constant dense<0xFF800000> : vector<4x16xf32>
    %387 = vector.multi_reduction <maximumf>, %386, %cst_186 [2] : vector<4x16x16xf32> to vector<4x16xf32>
    %388 = vector.shape_cast %387 : vector<4x16xf32> to vector<4x16x1xf32>
    %389 = vector.broadcast %388 : vector<4x16x1xf32> to vector<4x16x16xf32>
    %390 = arith.subf %386, %389 : vector<4x16x16xf32>
    %391 = math.exp %390 : vector<4x16x16xf32>
    %cst_187 = arith.constant dense<0.000000e+00> : vector<4x16xf32>
    %392 = vector.multi_reduction <add>, %391, %cst_187 [2] : vector<4x16x16xf32> to vector<4x16xf32>
    %393 = vector.shape_cast %392 : vector<4x16xf32> to vector<4x16x1xf32>
    %394 = tpu.reciprocal %393 {approx = true} : vector<4x16x1xf32> -> vector<4x16x1xf32>
    %395 = vector.broadcast %394 : vector<4x16x1xf32> to vector<4x16x16xf32>
    %396 = arith.mulf %391, %395 : vector<4x16x16xf32>
    "tpu.trace_start"() <{level = 10 : i32, message = "hqk,hkd->hqd"}> : () -> ()
    %cst_188 = arith.constant dense<0.000000e+00> : vector<4x16x32xf32>
    %397 = tpu.matmul %396, %380, %cst_188 {dimension_numbers = #tpu.dot_dimension_numbers<[2], [1], [1], [2], [0, 0, 0, 1, 1, 2], [0], [0]>} : vector<4x16x16xf32>, vector<4x16x32xf32>, vector<4x16x32xf32> -> vector<4x16x32xf32>
    "tpu.trace_stop"() : () -> ()
    %398 = vector.extract_strided_slice %397 {offsets = [0, 0, 0], sizes = [1, 16, 32], strides = [1, 1, 1]} : vector<4x16x32xf32> to vector<1x16x32xf32>
    %399 = vector.shape_cast %398 : vector<1x16x32xf32> to vector<16x32xf32>
    %400 = vector.extract_strided_slice %342 {offsets = [0, 0], sizes = [32, 128], strides = [1, 1]} : vector<128x128xf32> to vector<32x128xf32>
    %cst_189 = arith.constant dense<0.000000e+00> : vector<16x128xf32>
    %401 = tpu.matmul %399, %400, %cst_189 {dimension_numbers = #tpu.dot_dimension_numbers<[1], [0], [0], [1], [0, 0, 1, 1], [], []>} : vector<16x32xf32>, vector<32x128xf32>, vector<16x128xf32> -> vector<16x128xf32>
    %402 = vector.broadcast %344 : vector<1x128xf32> to vector<16x128xf32>
    %403 = arith.addf %402, %401 : vector<16x128xf32>
    %404 = vector.extract_strided_slice %397 {offsets = [1, 0, 0], sizes = [1, 16, 32], strides = [1, 1, 1]} : vector<4x16x32xf32> to vector<1x16x32xf32>
    %405 = vector.shape_cast %404 : vector<1x16x32xf32> to vector<16x32xf32>
    %406 = vector.extract_strided_slice %342 {offsets = [32, 0], sizes = [32, 128], strides = [1, 1]} : vector<128x128xf32> to vector<32x128xf32>
    %cst_190 = arith.constant dense<0.000000e+00> : vector<16x128xf32>
    %407 = tpu.matmul %405, %406, %cst_190 {dimension_numbers = #tpu.dot_dimension_numbers<[1], [0], [0], [1], [0, 0, 1, 1], [], []>} : vector<16x32xf32>, vector<32x128xf32>, vector<16x128xf32> -> vector<16x128xf32>
    %408 = arith.addf %403, %407 : vector<16x128xf32>
    %409 = vector.extract_strided_slice %397 {offsets = [2, 0, 0], sizes = [1, 16, 32], strides = [1, 1, 1]} : vector<4x16x32xf32> to vector<1x16x32xf32>
    %410 = vector.shape_cast %409 : vector<1x16x32xf32> to vector<16x32xf32>
    %411 = vector.extract_strided_slice %342 {offsets = [64, 0], sizes = [32, 128], strides = [1, 1]} : vector<128x128xf32> to vector<32x128xf32>
    %cst_191 = arith.constant dense<0.000000e+00> : vector<16x128xf32>
    %412 = tpu.matmul %410, %411, %cst_191 {dimension_numbers = #tpu.dot_dimension_numbers<[1], [0], [0], [1], [0, 0, 1, 1], [], []>} : vector<16x32xf32>, vector<32x128xf32>, vector<16x128xf32> -> vector<16x128xf32>
    %413 = arith.addf %408, %412 : vector<16x128xf32>
    %414 = vector.extract_strided_slice %397 {offsets = [3, 0, 0], sizes = [1, 16, 32], strides = [1, 1, 1]} : vector<4x16x32xf32> to vector<1x16x32xf32>
    %415 = vector.shape_cast %414 : vector<1x16x32xf32> to vector<16x32xf32>
    %416 = vector.extract_strided_slice %342 {offsets = [96, 0], sizes = [32, 128], strides = [1, 1]} : vector<128x128xf32> to vector<32x128xf32>
    %cst_192 = arith.constant dense<0.000000e+00> : vector<16x128xf32>
    %417 = tpu.matmul %415, %416, %cst_192 {dimension_numbers = #tpu.dot_dimension_numbers<[1], [0], [0], [1], [0, 0, 1, 1], [], []>} : vector<16x32xf32>, vector<32x128xf32>, vector<16x128xf32> -> vector<16x128xf32>
    %418 = arith.addf %413, %417 : vector<16x128xf32>
    %419 = arith.addf %328, %418 : vector<16x128xf32>
    %c0_193 = arith.constant 0 : index
    %c0_194 = arith.constant 0 : index
    %c0_195 = arith.constant 0 : index
    %420 = vector.load %arg39[%c0_193, %c0_194, %c0_195] : memref<2x1x128xf32, #tpu.memory_space<vmem>>, vector<1x1x128xf32>
    %421 = vector.shape_cast %420 : vector<1x1x128xf32> to vector<1x128xf32>
    %c0_196 = arith.constant 0 : index
    %c0_197 = arith.constant 0 : index
    %c0_198 = arith.constant 0 : index
    %422 = vector.load %arg40[%c0_196, %c0_197, %c0_198] : memref<2x1x128xf32, #tpu.memory_space<vmem>>, vector<1x1x128xf32>
    %423 = vector.shape_cast %422 : vector<1x1x128xf32> to vector<1x128xf32>
    %cst_199 = arith.constant dense<0.000000e+00> : vector<16xf32>
    %424 = vector.multi_reduction <add>, %419, %cst_199 [1] : vector<16x128xf32> to vector<16xf32>
    %425 = vector.shape_cast %424 : vector<16xf32> to vector<16x1xf32>
    %cst_200 = arith.constant 1.280000e+02 : f32
    %426 = vector.broadcast %cst_200 : f32 to vector<16x1xf32>
    %427 = arith.divf %425, %426 : vector<16x1xf32>
    %428 = vector.broadcast %427 : vector<16x1xf32> to vector<16x128xf32>
    %429 = arith.subf %419, %428 : vector<16x128xf32>
    %430 = arith.mulf %429, %429 : vector<16x128xf32>
    %cst_201 = arith.constant dense<0.000000e+00> : vector<16xf32>
    %431 = vector.multi_reduction <add>, %430, %cst_201 [1] : vector<16x128xf32> to vector<16xf32>
    %432 = vector.shape_cast %431 : vector<16xf32> to vector<16x1xf32>
    %cst_202 = arith.constant 1.280000e+02 : f32
    %433 = vector.broadcast %cst_202 : f32 to vector<16x1xf32>
    %434 = arith.divf %432, %433 : vector<16x1xf32>
    %435 = vector.broadcast %427 : vector<16x1xf32> to vector<16x128xf32>
    %436 = arith.subf %419, %435 : vector<16x128xf32>
    %cst_203 = arith.constant 9.99999974E-6 : f32
    %437 = vector.broadcast %cst_203 : f32 to vector<16x1xf32>
    %438 = arith.addf %434, %437 : vector<16x1xf32>
    %439 = math.rsqrt %438 : vector<16x1xf32>
    %440 = vector.broadcast %439 : vector<16x1xf32> to vector<16x128xf32>
    %441 = arith.mulf %436, %440 : vector<16x128xf32>
    %442 = vector.broadcast %421 : vector<1x128xf32> to vector<16x128xf32>
    %443 = arith.mulf %441, %442 : vector<16x128xf32>
    %444 = vector.broadcast %423 : vector<1x128xf32> to vector<16x128xf32>
    %445 = arith.addf %443, %444 : vector<16x128xf32>
    %c0_204 = arith.constant 0 : index
    %c0_205 = arith.constant 0 : index
    %c0_206 = arith.constant 0 : index
    %446 = vector.load %arg31[%c0_204, %c0_205, %c0_206] : memref<2x128x128xf32, #tpu.memory_space<vmem>>, vector<1x128x128xf32>
    %447 = vector.shape_cast %446 : vector<1x128x128xf32> to vector<128x128xf32>
    %c0_207 = arith.constant 0 : index
    %c0_208 = arith.constant 0 : index
    %c0_209 = arith.constant 0 : index
    %448 = vector.load %arg32[%c0_207, %c0_208, %c0_209] : memref<2x1x128xf32, #tpu.memory_space<vmem>>, vector<1x1x128xf32>
    %449 = vector.shape_cast %448 : vector<1x1x128xf32> to vector<1x128xf32>
    %c0_210 = arith.constant 0 : index
    %c0_211 = arith.constant 0 : index
    %c0_212 = arith.constant 0 : index
    %450 = vector.load %arg33[%c0_210, %c0_211, %c0_212] : memref<2x128x128xf32, #tpu.memory_space<vmem>>, vector<1x128x128xf32>
    %451 = vector.shape_cast %450 : vector<1x128x128xf32> to vector<128x128xf32>
    %c0_213 = arith.constant 0 : index
    %c0_214 = arith.constant 0 : index
    %c0_215 = arith.constant 0 : index
    %452 = vector.load %arg34[%c0_213, %c0_214, %c0_215] : memref<2x1x128xf32, #tpu.memory_space<vmem>>, vector<1x1x128xf32>
    %453 = vector.shape_cast %452 : vector<1x1x128xf32> to vector<1x128xf32>
    %c0_216 = arith.constant 0 : index
    %c0_217 = arith.constant 0 : index
    %c0_218 = arith.constant 0 : index
    %454 = vector.load %arg35[%c0_216, %c0_217, %c0_218] : memref<2x128x128xf32, #tpu.memory_space<vmem>>, vector<1x128x128xf32>
    %455 = vector.shape_cast %454 : vector<1x128x128xf32> to vector<128x128xf32>
    %c0_219 = arith.constant 0 : index
    %c0_220 = arith.constant 0 : index
    %c0_221 = arith.constant 0 : index
    %456 = vector.load %arg36[%c0_219, %c0_220, %c0_221] : memref<2x1x128xf32, #tpu.memory_space<vmem>>, vector<1x1x128xf32>
    %457 = vector.shape_cast %456 : vector<1x1x128xf32> to vector<1x128xf32>
    %c0_222 = arith.constant 0 : index
    %c0_223 = arith.constant 0 : index
    %c0_224 = arith.constant 0 : index
    %458 = vector.load %arg37[%c0_222, %c0_223, %c0_224] : memref<2x128x128xf32, #tpu.memory_space<vmem>>, vector<1x128x128xf32>
    %459 = vector.shape_cast %458 : vector<1x128x128xf32> to vector<128x128xf32>
    %c0_225 = arith.constant 0 : index
    %c0_226 = arith.constant 0 : index
    %c0_227 = arith.constant 0 : index
    %460 = vector.load %arg38[%c0_225, %c0_226, %c0_227] : memref<2x1x128xf32, #tpu.memory_space<vmem>>, vector<1x1x128xf32>
    %461 = vector.shape_cast %460 : vector<1x1x128xf32> to vector<1x128xf32>
    %cst_228 = arith.constant dense<0.000000e+00> : vector<16x128xf32>
    %462 = tpu.matmul %445, %447, %cst_228 {dimension_numbers = #tpu.dot_dimension_numbers<[1], [0], [0], [1], [0, 0, 1, 1], [], []>} : vector<16x128xf32>, vector<128x128xf32>, vector<16x128xf32> -> vector<16x128xf32>
    %463 = vector.broadcast %449 : vector<1x128xf32> to vector<16x128xf32>
    %464 = arith.addf %462, %463 : vector<16x128xf32>
    %cst_229 = arith.constant dense<0.000000e+00> : vector<16x128xf32>
    %465 = tpu.matmul %325, %451, %cst_229 {dimension_numbers = #tpu.dot_dimension_numbers<[1], [0], [0], [1], [0, 0, 1, 1], [], []>} : vector<16x128xf32>, vector<128x128xf32>, vector<16x128xf32> -> vector<16x128xf32>
    %466 = vector.broadcast %453 : vector<1x128xf32> to vector<16x128xf32>
    %467 = arith.addf %465, %466 : vector<16x128xf32>
    %cst_230 = arith.constant dense<0.000000e+00> : vector<16x128xf32>
    %468 = tpu.matmul %325, %455, %cst_230 {dimension_numbers = #tpu.dot_dimension_numbers<[1], [0], [0], [1], [0, 0, 1, 1], [], []>} : vector<16x128xf32>, vector<128x128xf32>, vector<16x128xf32> -> vector<16x128xf32>
    %469 = vector.broadcast %457 : vector<1x128xf32> to vector<16x128xf32>
    %470 = arith.addf %468, %469 : vector<16x128xf32>
    %471 = vector.extract_strided_slice %464 {offsets = [0, 0], sizes = [16, 32], strides = [1, 1]} : vector<16x128xf32> to vector<16x32xf32>
    %472 = vector.shape_cast %471 : vector<16x32xf32> to vector<1x16x32xf32>
    %473 = vector.extract_strided_slice %464 {offsets = [0, 32], sizes = [16, 32], strides = [1, 1]} : vector<16x128xf32> to vector<16x32xf32>
    %474 = vector.shape_cast %473 : vector<16x32xf32> to vector<1x16x32xf32>
    %475 = vector.extract_strided_slice %464 {offsets = [0, 64], sizes = [16, 32], strides = [1, 1]} : vector<16x128xf32> to vector<16x32xf32>
    %476 = vector.shape_cast %475 : vector<16x32xf32> to vector<1x16x32xf32>
    %477 = vector.extract_strided_slice %464 {offsets = [0, 96], sizes = [16, 32], strides = [1, 1]} : vector<16x128xf32> to vector<16x32xf32>
    %478 = vector.shape_cast %477 : vector<16x32xf32> to vector<1x16x32xf32>
    %479 = tpu.concatenate %472, %474, %476, %478 in 0 : vector<1x16x32xf32>, vector<1x16x32xf32>, vector<1x16x32xf32>, vector<1x16x32xf32> -> vector<4x16x32xf32>
    %480 = vector.extract_strided_slice %467 {offsets = [0, 0], sizes = [16, 32], strides = [1, 1]} : vector<16x128xf32> to vector<16x32xf32>
    %481 = vector.shape_cast %480 : vector<16x32xf32> to vector<1x16x32xf32>
    %482 = vector.extract_strided_slice %467 {offsets = [0, 32], sizes = [16, 32], strides = [1, 1]} : vector<16x128xf32> to vector<16x32xf32>
    %483 = vector.shape_cast %482 : vector<16x32xf32> to vector<1x16x32xf32>
    %484 = vector.extract_strided_slice %467 {offsets = [0, 64], sizes = [16, 32], strides = [1, 1]} : vector<16x128xf32> to vector<16x32xf32>
    %485 = vector.shape_cast %484 : vector<16x32xf32> to vector<1x16x32xf32>
    %486 = vector.extract_strided_slice %467 {offsets = [0, 96], sizes = [16, 32], strides = [1, 1]} : vector<16x128xf32> to vector<16x32xf32>
    %487 = vector.shape_cast %486 : vector<16x32xf32> to vector<1x16x32xf32>
    %488 = tpu.concatenate %481, %483, %485, %487 in 0 : vector<1x16x32xf32>, vector<1x16x32xf32>, vector<1x16x32xf32>, vector<1x16x32xf32> -> vector<4x16x32xf32>
    %489 = vector.extract_strided_slice %470 {offsets = [0, 0], sizes = [16, 32], strides = [1, 1]} : vector<16x128xf32> to vector<16x32xf32>
    %490 = vector.shape_cast %489 : vector<16x32xf32> to vector<1x16x32xf32>
    %491 = vector.extract_strided_slice %470 {offsets = [0, 32], sizes = [16, 32], strides = [1, 1]} : vector<16x128xf32> to vector<16x32xf32>
    %492 = vector.shape_cast %491 : vector<16x32xf32> to vector<1x16x32xf32>
    %493 = vector.extract_strided_slice %470 {offsets = [0, 64], sizes = [16, 32], strides = [1, 1]} : vector<16x128xf32> to vector<16x32xf32>
    %494 = vector.shape_cast %493 : vector<16x32xf32> to vector<1x16x32xf32>
    %495 = vector.extract_strided_slice %470 {offsets = [0, 96], sizes = [16, 32], strides = [1, 1]} : vector<16x128xf32> to vector<16x32xf32>
    %496 = vector.shape_cast %495 : vector<16x32xf32> to vector<1x16x32xf32>
    %497 = tpu.concatenate %490, %492, %494, %496 in 0 : vector<1x16x32xf32>, vector<1x16x32xf32>, vector<1x16x32xf32>, vector<1x16x32xf32> -> vector<4x16x32xf32>
    "tpu.trace_start"() <{level = 10 : i32, message = "hqd,hkd->hqk"}> : () -> ()
    %cst_231 = arith.constant dense<0.000000e+00> : vector<4x16x16xf32>
    %498 = tpu.matmul %479, %488, %cst_231 {dimension_numbers = #tpu.dot_dimension_numbers<[2], [2], [1], [1], [0, 0, 0, 1, 1, 1], [0], [0]>} : vector<4x16x32xf32>, vector<4x16x32xf32>, vector<4x16x16xf32> -> vector<4x16x16xf32>
    "tpu.trace_stop"() : () -> ()
    %cst_232 = arith.constant 0.176776692 : f32
    %499 = vector.broadcast %cst_232 : f32 to vector<4x16x16xf32>
    %500 = arith.mulf %498, %499 : vector<4x16x16xf32>
    %501 = vector.shape_cast %2 : vector<16x16xf32> to vector<1x16x16xf32>
    %502 = vector.broadcast %501 : vector<1x16x16xf32> to vector<4x16x16xf32>
    %503 = arith.addf %500, %502 : vector<4x16x16xf32>
    %cst_233 = arith.constant dense<0xFF800000> : vector<4x16xf32>
    %504 = vector.multi_reduction <maximumf>, %503, %cst_233 [2] : vector<4x16x16xf32> to vector<4x16xf32>
    %505 = vector.shape_cast %504 : vector<4x16xf32> to vector<4x16x1xf32>
    %506 = vector.broadcast %505 : vector<4x16x1xf32> to vector<4x16x16xf32>
    %507 = arith.subf %503, %506 : vector<4x16x16xf32>
    %508 = math.exp %507 : vector<4x16x16xf32>
    %cst_234 = arith.constant dense<0.000000e+00> : vector<4x16xf32>
    %509 = vector.multi_reduction <add>, %508, %cst_234 [2] : vector<4x16x16xf32> to vector<4x16xf32>
    %510 = vector.shape_cast %509 : vector<4x16xf32> to vector<4x16x1xf32>
    %511 = tpu.reciprocal %510 {approx = true} : vector<4x16x1xf32> -> vector<4x16x1xf32>
    %512 = vector.broadcast %511 : vector<4x16x1xf32> to vector<4x16x16xf32>
    %513 = arith.mulf %508, %512 : vector<4x16x16xf32>
    "tpu.trace_start"() <{level = 10 : i32, message = "hqk,hkd->hqd"}> : () -> ()
    %cst_235 = arith.constant dense<0.000000e+00> : vector<4x16x32xf32>
    %514 = tpu.matmul %513, %497, %cst_235 {dimension_numbers = #tpu.dot_dimension_numbers<[2], [1], [1], [2], [0, 0, 0, 1, 1, 2], [0], [0]>} : vector<4x16x16xf32>, vector<4x16x32xf32>, vector<4x16x32xf32> -> vector<4x16x32xf32>
    "tpu.trace_stop"() : () -> ()
    %515 = vector.extract_strided_slice %514 {offsets = [0, 0, 0], sizes = [1, 16, 32], strides = [1, 1, 1]} : vector<4x16x32xf32> to vector<1x16x32xf32>
    %516 = vector.shape_cast %515 : vector<1x16x32xf32> to vector<16x32xf32>
    %517 = vector.extract_strided_slice %459 {offsets = [0, 0], sizes = [32, 128], strides = [1, 1]} : vector<128x128xf32> to vector<32x128xf32>
    %cst_236 = arith.constant dense<0.000000e+00> : vector<16x128xf32>
    %518 = tpu.matmul %516, %517, %cst_236 {dimension_numbers = #tpu.dot_dimension_numbers<[1], [0], [0], [1], [0, 0, 1, 1], [], []>} : vector<16x32xf32>, vector<32x128xf32>, vector<16x128xf32> -> vector<16x128xf32>
    %519 = vector.broadcast %461 : vector<1x128xf32> to vector<16x128xf32>
    %520 = arith.addf %519, %518 : vector<16x128xf32>
    %521 = vector.extract_strided_slice %514 {offsets = [1, 0, 0], sizes = [1, 16, 32], strides = [1, 1, 1]} : vector<4x16x32xf32> to vector<1x16x32xf32>
    %522 = vector.shape_cast %521 : vector<1x16x32xf32> to vector<16x32xf32>
    %523 = vector.extract_strided_slice %459 {offsets = [32, 0], sizes = [32, 128], strides = [1, 1]} : vector<128x128xf32> to vector<32x128xf32>
    %cst_237 = arith.constant dense<0.000000e+00> : vector<16x128xf32>
    %524 = tpu.matmul %522, %523, %cst_237 {dimension_numbers = #tpu.dot_dimension_numbers<[1], [0], [0], [1], [0, 0, 1, 1], [], []>} : vector<16x32xf32>, vector<32x128xf32>, vector<16x128xf32> -> vector<16x128xf32>
    %525 = arith.addf %520, %524 : vector<16x128xf32>
    %526 = vector.extract_strided_slice %514 {offsets = [2, 0, 0], sizes = [1, 16, 32], strides = [1, 1, 1]} : vector<4x16x32xf32> to vector<1x16x32xf32>
    %527 = vector.shape_cast %526 : vector<1x16x32xf32> to vector<16x32xf32>
    %528 = vector.extract_strided_slice %459 {offsets = [64, 0], sizes = [32, 128], strides = [1, 1]} : vector<128x128xf32> to vector<32x128xf32>
    %cst_238 = arith.constant dense<0.000000e+00> : vector<16x128xf32>
    %529 = tpu.matmul %527, %528, %cst_238 {dimension_numbers = #tpu.dot_dimension_numbers<[1], [0], [0], [1], [0, 0, 1, 1], [], []>} : vector<16x32xf32>, vector<32x128xf32>, vector<16x128xf32> -> vector<16x128xf32>
    %530 = arith.addf %525, %529 : vector<16x128xf32>
    %531 = vector.extract_strided_slice %514 {offsets = [3, 0, 0], sizes = [1, 16, 32], strides = [1, 1, 1]} : vector<4x16x32xf32> to vector<1x16x32xf32>
    %532 = vector.shape_cast %531 : vector<1x16x32xf32> to vector<16x32xf32>
    %533 = vector.extract_strided_slice %459 {offsets = [96, 0], sizes = [32, 128], strides = [1, 1]} : vector<128x128xf32> to vector<32x128xf32>
    %cst_239 = arith.constant dense<0.000000e+00> : vector<16x128xf32>
    %534 = tpu.matmul %532, %533, %cst_239 {dimension_numbers = #tpu.dot_dimension_numbers<[1], [0], [0], [1], [0, 0, 1, 1], [], []>} : vector<16x32xf32>, vector<32x128xf32>, vector<16x128xf32> -> vector<16x128xf32>
    %535 = arith.addf %530, %534 : vector<16x128xf32>
    %536 = arith.addf %445, %535 : vector<16x128xf32>
    %c0_240 = arith.constant 0 : index
    %c0_241 = arith.constant 0 : index
    %c0_242 = arith.constant 0 : index
    %537 = vector.load %arg41[%c0_240, %c0_241, %c0_242] : memref<2x1x128xf32, #tpu.memory_space<vmem>>, vector<1x1x128xf32>
    %538 = vector.shape_cast %537 : vector<1x1x128xf32> to vector<1x128xf32>
    %c0_243 = arith.constant 0 : index
    %c0_244 = arith.constant 0 : index
    %c0_245 = arith.constant 0 : index
    %539 = vector.load %arg42[%c0_243, %c0_244, %c0_245] : memref<2x1x128xf32, #tpu.memory_space<vmem>>, vector<1x1x128xf32>
    %540 = vector.shape_cast %539 : vector<1x1x128xf32> to vector<1x128xf32>
    %cst_246 = arith.constant dense<0.000000e+00> : vector<16xf32>
    %541 = vector.multi_reduction <add>, %536, %cst_246 [1] : vector<16x128xf32> to vector<16xf32>
    %542 = vector.shape_cast %541 : vector<16xf32> to vector<16x1xf32>
    %cst_247 = arith.constant 1.280000e+02 : f32
    %543 = vector.broadcast %cst_247 : f32 to vector<16x1xf32>
    %544 = arith.divf %542, %543 : vector<16x1xf32>
    %545 = vector.broadcast %544 : vector<16x1xf32> to vector<16x128xf32>
    %546 = arith.subf %536, %545 : vector<16x128xf32>
    %547 = arith.mulf %546, %546 : vector<16x128xf32>
    %cst_248 = arith.constant dense<0.000000e+00> : vector<16xf32>
    %548 = vector.multi_reduction <add>, %547, %cst_248 [1] : vector<16x128xf32> to vector<16xf32>
    %549 = vector.shape_cast %548 : vector<16xf32> to vector<16x1xf32>
    %cst_249 = arith.constant 1.280000e+02 : f32
    %550 = vector.broadcast %cst_249 : f32 to vector<16x1xf32>
    %551 = arith.divf %549, %550 : vector<16x1xf32>
    %552 = vector.broadcast %544 : vector<16x1xf32> to vector<16x128xf32>
    %553 = arith.subf %536, %552 : vector<16x128xf32>
    %cst_250 = arith.constant 9.99999974E-6 : f32
    %554 = vector.broadcast %cst_250 : f32 to vector<16x1xf32>
    %555 = arith.addf %551, %554 : vector<16x1xf32>
    %556 = math.rsqrt %555 : vector<16x1xf32>
    %557 = vector.broadcast %556 : vector<16x1xf32> to vector<16x128xf32>
    %558 = arith.mulf %553, %557 : vector<16x128xf32>
    %559 = vector.broadcast %538 : vector<1x128xf32> to vector<16x128xf32>
    %560 = arith.mulf %558, %559 : vector<16x128xf32>
    %561 = vector.broadcast %540 : vector<1x128xf32> to vector<16x128xf32>
    %562 = arith.addf %560, %561 : vector<16x128xf32>
    %c0_251 = arith.constant 0 : index
    %c0_252 = arith.constant 0 : index
    %c0_253 = arith.constant 0 : index
    %563 = vector.load %arg45[%c0_251, %c0_252, %c0_253] : memref<2x128x256xf32, #tpu.memory_space<vmem>>, vector<1x128x256xf32>
    %564 = vector.shape_cast %563 : vector<1x128x256xf32> to vector<128x256xf32>
    %c0_254 = arith.constant 0 : index
    %c0_255 = arith.constant 0 : index
    %c0_256 = arith.constant 0 : index
    %565 = vector.load %arg46[%c0_254, %c0_255, %c0_256] : memref<2x1x256xf32, #tpu.memory_space<vmem>>, vector<1x1x256xf32>
    %566 = vector.shape_cast %565 : vector<1x1x256xf32> to vector<1x256xf32>
    %c0_257 = arith.constant 0 : index
    %c0_258 = arith.constant 0 : index
    %c0_259 = arith.constant 0 : index
    %567 = vector.load %arg47[%c0_257, %c0_258, %c0_259] : memref<2x256x128xf32, #tpu.memory_space<vmem>>, vector<1x256x128xf32>
    %568 = vector.shape_cast %567 : vector<1x256x128xf32> to vector<256x128xf32>
    %c0_260 = arith.constant 0 : index
    %c0_261 = arith.constant 0 : index
    %c0_262 = arith.constant 0 : index
    %569 = vector.load %arg48[%c0_260, %c0_261, %c0_262] : memref<2x1x128xf32, #tpu.memory_space<vmem>>, vector<1x1x128xf32>
    %570 = vector.shape_cast %569 : vector<1x1x128xf32> to vector<1x128xf32>
    %cst_263 = arith.constant dense<0.000000e+00> : vector<16x256xf32>
    %571 = tpu.matmul %562, %564, %cst_263 {dimension_numbers = #tpu.dot_dimension_numbers<[1], [0], [0], [1], [0, 0, 1, 1], [], []>} : vector<16x128xf32>, vector<128x256xf32>, vector<16x256xf32> -> vector<16x256xf32>
    %572 = vector.broadcast %566 : vector<1x256xf32> to vector<16x256xf32>
    %573 = arith.addf %571, %572 : vector<16x256xf32>
    %cst_264 = arith.constant 0.000000e+00 : f32
    %574 = vector.broadcast %cst_264 : f32 to vector<16x256xf32>
    %575 = arith.maximumf %573, %574 : vector<16x256xf32>
    %cst_265 = arith.constant dense<0.000000e+00> : vector<16x128xf32>
    %576 = tpu.matmul %575, %568, %cst_265 {dimension_numbers = #tpu.dot_dimension_numbers<[1], [0], [0], [1], [0, 0, 1, 1], [], []>} : vector<16x256xf32>, vector<256x128xf32>, vector<16x128xf32> -> vector<16x128xf32>
    %577 = vector.broadcast %570 : vector<1x128xf32> to vector<16x128xf32>
    %578 = arith.addf %576, %577 : vector<16x128xf32>
    %579 = arith.addf %562, %578 : vector<16x128xf32>
    %c0_266 = arith.constant 0 : index
    %c0_267 = arith.constant 0 : index
    %c0_268 = arith.constant 0 : index
    %580 = vector.load %arg43[%c0_266, %c0_267, %c0_268] : memref<2x1x128xf32, #tpu.memory_space<vmem>>, vector<1x1x128xf32>
    %581 = vector.shape_cast %580 : vector<1x1x128xf32> to vector<1x128xf32>
    %c0_269 = arith.constant 0 : index
    %c0_270 = arith.constant 0 : index
    %c0_271 = arith.constant 0 : index
    %582 = vector.load %arg44[%c0_269, %c0_270, %c0_271] : memref<2x1x128xf32, #tpu.memory_space<vmem>>, vector<1x1x128xf32>
    %583 = vector.shape_cast %582 : vector<1x1x128xf32> to vector<1x128xf32>
    %cst_272 = arith.constant dense<0.000000e+00> : vector<16xf32>
    %584 = vector.multi_reduction <add>, %579, %cst_272 [1] : vector<16x128xf32> to vector<16xf32>
    %585 = vector.shape_cast %584 : vector<16xf32> to vector<16x1xf32>
    %cst_273 = arith.constant 1.280000e+02 : f32
    %586 = vector.broadcast %cst_273 : f32 to vector<16x1xf32>
    %587 = arith.divf %585, %586 : vector<16x1xf32>
    %588 = vector.broadcast %587 : vector<16x1xf32> to vector<16x128xf32>
    %589 = arith.subf %579, %588 : vector<16x128xf32>
    %590 = arith.mulf %589, %589 : vector<16x128xf32>
    %cst_274 = arith.constant dense<0.000000e+00> : vector<16xf32>
    %591 = vector.multi_reduction <add>, %590, %cst_274 [1] : vector<16x128xf32> to vector<16xf32>
    %592 = vector.shape_cast %591 : vector<16xf32> to vector<16x1xf32>
    %cst_275 = arith.constant 1.280000e+02 : f32
    %593 = vector.broadcast %cst_275 : f32 to vector<16x1xf32>
    %594 = arith.divf %592, %593 : vector<16x1xf32>
    %595 = vector.broadcast %587 : vector<16x1xf32> to vector<16x128xf32>
    %596 = arith.subf %579, %595 : vector<16x128xf32>
    %cst_276 = arith.constant 9.99999974E-6 : f32
    %597 = vector.broadcast %cst_276 : f32 to vector<16x1xf32>
    %598 = arith.addf %594, %597 : vector<16x1xf32>
    %599 = math.rsqrt %598 : vector<16x1xf32>
    %600 = vector.broadcast %599 : vector<16x1xf32> to vector<16x128xf32>
    %601 = arith.mulf %596, %600 : vector<16x128xf32>
    %602 = vector.broadcast %581 : vector<1x128xf32> to vector<16x128xf32>
    %603 = arith.mulf %601, %602 : vector<16x128xf32>
    %604 = vector.broadcast %583 : vector<1x128xf32> to vector<16x128xf32>
    %605 = arith.addf %603, %604 : vector<16x128xf32>
    %c1_277 = arith.constant 1 : index
    %c0_278 = arith.constant 0 : index
    %c0_279 = arith.constant 0 : index
    %606 = vector.load %arg23[%c1_277, %c0_278, %c0_279] : memref<2x128x128xf32, #tpu.memory_space<vmem>>, vector<1x128x128xf32>
    %607 = vector.shape_cast %606 : vector<1x128x128xf32> to vector<128x128xf32>
    %c1_280 = arith.constant 1 : index
    %c0_281 = arith.constant 0 : index
    %c0_282 = arith.constant 0 : index
    %608 = vector.load %arg24[%c1_280, %c0_281, %c0_282] : memref<2x1x128xf32, #tpu.memory_space<vmem>>, vector<1x1x128xf32>
    %609 = vector.shape_cast %608 : vector<1x1x128xf32> to vector<1x128xf32>
    %c1_283 = arith.constant 1 : index
    %c0_284 = arith.constant 0 : index
    %c0_285 = arith.constant 0 : index
    %610 = vector.load %arg25[%c1_283, %c0_284, %c0_285] : memref<2x128x128xf32, #tpu.memory_space<vmem>>, vector<1x128x128xf32>
    %611 = vector.shape_cast %610 : vector<1x128x128xf32> to vector<128x128xf32>
    %c1_286 = arith.constant 1 : index
    %c0_287 = arith.constant 0 : index
    %c0_288 = arith.constant 0 : index
    %612 = vector.load %arg26[%c1_286, %c0_287, %c0_288] : memref<2x1x128xf32, #tpu.memory_space<vmem>>, vector<1x1x128xf32>
    %613 = vector.shape_cast %612 : vector<1x1x128xf32> to vector<1x128xf32>
    %c1_289 = arith.constant 1 : index
    %c0_290 = arith.constant 0 : index
    %c0_291 = arith.constant 0 : index
    %614 = vector.load %arg27[%c1_289, %c0_290, %c0_291] : memref<2x128x128xf32, #tpu.memory_space<vmem>>, vector<1x128x128xf32>
    %615 = vector.shape_cast %614 : vector<1x128x128xf32> to vector<128x128xf32>
    %c1_292 = arith.constant 1 : index
    %c0_293 = arith.constant 0 : index
    %c0_294 = arith.constant 0 : index
    %616 = vector.load %arg28[%c1_292, %c0_293, %c0_294] : memref<2x1x128xf32, #tpu.memory_space<vmem>>, vector<1x1x128xf32>
    %617 = vector.shape_cast %616 : vector<1x1x128xf32> to vector<1x128xf32>
    %c1_295 = arith.constant 1 : index
    %c0_296 = arith.constant 0 : index
    %c0_297 = arith.constant 0 : index
    %618 = vector.load %arg29[%c1_295, %c0_296, %c0_297] : memref<2x128x128xf32, #tpu.memory_space<vmem>>, vector<1x128x128xf32>
    %619 = vector.shape_cast %618 : vector<1x128x128xf32> to vector<128x128xf32>
    %c1_298 = arith.constant 1 : index
    %c0_299 = arith.constant 0 : index
    %c0_300 = arith.constant 0 : index
    %620 = vector.load %arg30[%c1_298, %c0_299, %c0_300] : memref<2x1x128xf32, #tpu.memory_space<vmem>>, vector<1x1x128xf32>
    %621 = vector.shape_cast %620 : vector<1x1x128xf32> to vector<1x128xf32>
    %cst_301 = arith.constant dense<0.000000e+00> : vector<16x128xf32>
    %622 = tpu.matmul %605, %607, %cst_301 {dimension_numbers = #tpu.dot_dimension_numbers<[1], [0], [0], [1], [0, 0, 1, 1], [], []>} : vector<16x128xf32>, vector<128x128xf32>, vector<16x128xf32> -> vector<16x128xf32>
    %623 = vector.broadcast %609 : vector<1x128xf32> to vector<16x128xf32>
    %624 = arith.addf %622, %623 : vector<16x128xf32>
    %cst_302 = arith.constant dense<0.000000e+00> : vector<16x128xf32>
    %625 = tpu.matmul %605, %611, %cst_302 {dimension_numbers = #tpu.dot_dimension_numbers<[1], [0], [0], [1], [0, 0, 1, 1], [], []>} : vector<16x128xf32>, vector<128x128xf32>, vector<16x128xf32> -> vector<16x128xf32>
    %626 = vector.broadcast %613 : vector<1x128xf32> to vector<16x128xf32>
    %627 = arith.addf %625, %626 : vector<16x128xf32>
    %cst_303 = arith.constant dense<0.000000e+00> : vector<16x128xf32>
    %628 = tpu.matmul %605, %615, %cst_303 {dimension_numbers = #tpu.dot_dimension_numbers<[1], [0], [0], [1], [0, 0, 1, 1], [], []>} : vector<16x128xf32>, vector<128x128xf32>, vector<16x128xf32> -> vector<16x128xf32>
    %629 = vector.broadcast %617 : vector<1x128xf32> to vector<16x128xf32>
    %630 = arith.addf %628, %629 : vector<16x128xf32>
    %631 = vector.extract_strided_slice %624 {offsets = [0, 0], sizes = [16, 32], strides = [1, 1]} : vector<16x128xf32> to vector<16x32xf32>
    %632 = vector.shape_cast %631 : vector<16x32xf32> to vector<1x16x32xf32>
    %633 = vector.extract_strided_slice %624 {offsets = [0, 32], sizes = [16, 32], strides = [1, 1]} : vector<16x128xf32> to vector<16x32xf32>
    %634 = vector.shape_cast %633 : vector<16x32xf32> to vector<1x16x32xf32>
    %635 = vector.extract_strided_slice %624 {offsets = [0, 64], sizes = [16, 32], strides = [1, 1]} : vector<16x128xf32> to vector<16x32xf32>
    %636 = vector.shape_cast %635 : vector<16x32xf32> to vector<1x16x32xf32>
    %637 = vector.extract_strided_slice %624 {offsets = [0, 96], sizes = [16, 32], strides = [1, 1]} : vector<16x128xf32> to vector<16x32xf32>
    %638 = vector.shape_cast %637 : vector<16x32xf32> to vector<1x16x32xf32>
    %639 = tpu.concatenate %632, %634, %636, %638 in 0 : vector<1x16x32xf32>, vector<1x16x32xf32>, vector<1x16x32xf32>, vector<1x16x32xf32> -> vector<4x16x32xf32>
    %640 = vector.extract_strided_slice %627 {offsets = [0, 0], sizes = [16, 32], strides = [1, 1]} : vector<16x128xf32> to vector<16x32xf32>
    %641 = vector.shape_cast %640 : vector<16x32xf32> to vector<1x16x32xf32>
    %642 = vector.extract_strided_slice %627 {offsets = [0, 32], sizes = [16, 32], strides = [1, 1]} : vector<16x128xf32> to vector<16x32xf32>
    %643 = vector.shape_cast %642 : vector<16x32xf32> to vector<1x16x32xf32>
    %644 = vector.extract_strided_slice %627 {offsets = [0, 64], sizes = [16, 32], strides = [1, 1]} : vector<16x128xf32> to vector<16x32xf32>
    %645 = vector.shape_cast %644 : vector<16x32xf32> to vector<1x16x32xf32>
    %646 = vector.extract_strided_slice %627 {offsets = [0, 96], sizes = [16, 32], strides = [1, 1]} : vector<16x128xf32> to vector<16x32xf32>
    %647 = vector.shape_cast %646 : vector<16x32xf32> to vector<1x16x32xf32>
    %648 = tpu.concatenate %641, %643, %645, %647 in 0 : vector<1x16x32xf32>, vector<1x16x32xf32>, vector<1x16x32xf32>, vector<1x16x32xf32> -> vector<4x16x32xf32>
    %649 = vector.extract_strided_slice %630 {offsets = [0, 0], sizes = [16, 32], strides = [1, 1]} : vector<16x128xf32> to vector<16x32xf32>
    %650 = vector.shape_cast %649 : vector<16x32xf32> to vector<1x16x32xf32>
    %651 = vector.extract_strided_slice %630 {offsets = [0, 32], sizes = [16, 32], strides = [1, 1]} : vector<16x128xf32> to vector<16x32xf32>
    %652 = vector.shape_cast %651 : vector<16x32xf32> to vector<1x16x32xf32>
    %653 = vector.extract_strided_slice %630 {offsets = [0, 64], sizes = [16, 32], strides = [1, 1]} : vector<16x128xf32> to vector<16x32xf32>
    %654 = vector.shape_cast %653 : vector<16x32xf32> to vector<1x16x32xf32>
    %655 = vector.extract_strided_slice %630 {offsets = [0, 96], sizes = [16, 32], strides = [1, 1]} : vector<16x128xf32> to vector<16x32xf32>
    %656 = vector.shape_cast %655 : vector<16x32xf32> to vector<1x16x32xf32>
    %657 = tpu.concatenate %650, %652, %654, %656 in 0 : vector<1x16x32xf32>, vector<1x16x32xf32>, vector<1x16x32xf32>, vector<1x16x32xf32> -> vector<4x16x32xf32>
    "tpu.trace_start"() <{level = 10 : i32, message = "hqd,hkd->hqk"}> : () -> ()
    %cst_304 = arith.constant dense<0.000000e+00> : vector<4x16x16xf32>
    %658 = tpu.matmul %639, %648, %cst_304 {dimension_numbers = #tpu.dot_dimension_numbers<[2], [2], [1], [1], [0, 0, 0, 1, 1, 1], [0], [0]>} : vector<4x16x32xf32>, vector<4x16x32xf32>, vector<4x16x16xf32> -> vector<4x16x16xf32>
    "tpu.trace_stop"() : () -> ()
    %cst_305 = arith.constant 0.176776692 : f32
    %659 = vector.broadcast %cst_305 : f32 to vector<4x16x16xf32>
    %660 = arith.mulf %658, %659 : vector<4x16x16xf32>
    %661 = vector.shape_cast %1 : vector<16x16xf32> to vector<1x16x16xf32>
    %662 = vector.broadcast %661 : vector<1x16x16xf32> to vector<4x16x16xf32>
    %663 = arith.addf %660, %662 : vector<4x16x16xf32>
    %cst_306 = arith.constant dense<0xFF800000> : vector<4x16xf32>
    %664 = vector.multi_reduction <maximumf>, %663, %cst_306 [2] : vector<4x16x16xf32> to vector<4x16xf32>
    %665 = vector.shape_cast %664 : vector<4x16xf32> to vector<4x16x1xf32>
    %666 = vector.broadcast %665 : vector<4x16x1xf32> to vector<4x16x16xf32>
    %667 = arith.subf %663, %666 : vector<4x16x16xf32>
    %668 = math.exp %667 : vector<4x16x16xf32>
    %cst_307 = arith.constant dense<0.000000e+00> : vector<4x16xf32>
    %669 = vector.multi_reduction <add>, %668, %cst_307 [2] : vector<4x16x16xf32> to vector<4x16xf32>
    %670 = vector.shape_cast %669 : vector<4x16xf32> to vector<4x16x1xf32>
    %671 = tpu.reciprocal %670 {approx = true} : vector<4x16x1xf32> -> vector<4x16x1xf32>
    %672 = vector.broadcast %671 : vector<4x16x1xf32> to vector<4x16x16xf32>
    %673 = arith.mulf %668, %672 : vector<4x16x16xf32>
    "tpu.trace_start"() <{level = 10 : i32, message = "hqk,hkd->hqd"}> : () -> ()
    %cst_308 = arith.constant dense<0.000000e+00> : vector<4x16x32xf32>
    %674 = tpu.matmul %673, %657, %cst_308 {dimension_numbers = #tpu.dot_dimension_numbers<[2], [1], [1], [2], [0, 0, 0, 1, 1, 2], [0], [0]>} : vector<4x16x16xf32>, vector<4x16x32xf32>, vector<4x16x32xf32> -> vector<4x16x32xf32>
    "tpu.trace_stop"() : () -> ()
    %675 = vector.extract_strided_slice %674 {offsets = [0, 0, 0], sizes = [1, 16, 32], strides = [1, 1, 1]} : vector<4x16x32xf32> to vector<1x16x32xf32>
    %676 = vector.shape_cast %675 : vector<1x16x32xf32> to vector<16x32xf32>
    %677 = vector.extract_strided_slice %619 {offsets = [0, 0], sizes = [32, 128], strides = [1, 1]} : vector<128x128xf32> to vector<32x128xf32>
    %cst_309 = arith.constant dense<0.000000e+00> : vector<16x128xf32>
    %678 = tpu.matmul %676, %677, %cst_309 {dimension_numbers = #tpu.dot_dimension_numbers<[1], [0], [0], [1], [0, 0, 1, 1], [], []>} : vector<16x32xf32>, vector<32x128xf32>, vector<16x128xf32> -> vector<16x128xf32>
    %679 = vector.broadcast %621 : vector<1x128xf32> to vector<16x128xf32>
    %680 = arith.addf %679, %678 : vector<16x128xf32>
    %681 = vector.extract_strided_slice %674 {offsets = [1, 0, 0], sizes = [1, 16, 32], strides = [1, 1, 1]} : vector<4x16x32xf32> to vector<1x16x32xf32>
    %682 = vector.shape_cast %681 : vector<1x16x32xf32> to vector<16x32xf32>
    %683 = vector.extract_strided_slice %619 {offsets = [32, 0], sizes = [32, 128], strides = [1, 1]} : vector<128x128xf32> to vector<32x128xf32>
    %cst_310 = arith.constant dense<0.000000e+00> : vector<16x128xf32>
    %684 = tpu.matmul %682, %683, %cst_310 {dimension_numbers = #tpu.dot_dimension_numbers<[1], [0], [0], [1], [0, 0, 1, 1], [], []>} : vector<16x32xf32>, vector<32x128xf32>, vector<16x128xf32> -> vector<16x128xf32>
    %685 = arith.addf %680, %684 : vector<16x128xf32>
    %686 = vector.extract_strided_slice %674 {offsets = [2, 0, 0], sizes = [1, 16, 32], strides = [1, 1, 1]} : vector<4x16x32xf32> to vector<1x16x32xf32>
    %687 = vector.shape_cast %686 : vector<1x16x32xf32> to vector<16x32xf32>
    %688 = vector.extract_strided_slice %619 {offsets = [64, 0], sizes = [32, 128], strides = [1, 1]} : vector<128x128xf32> to vector<32x128xf32>
    %cst_311 = arith.constant dense<0.000000e+00> : vector<16x128xf32>
    %689 = tpu.matmul %687, %688, %cst_311 {dimension_numbers = #tpu.dot_dimension_numbers<[1], [0], [0], [1], [0, 0, 1, 1], [], []>} : vector<16x32xf32>, vector<32x128xf32>, vector<16x128xf32> -> vector<16x128xf32>
    %690 = arith.addf %685, %689 : vector<16x128xf32>
    %691 = vector.extract_strided_slice %674 {offsets = [3, 0, 0], sizes = [1, 16, 32], strides = [1, 1, 1]} : vector<4x16x32xf32> to vector<1x16x32xf32>
    %692 = vector.shape_cast %691 : vector<1x16x32xf32> to vector<16x32xf32>
    %693 = vector.extract_strided_slice %619 {offsets = [96, 0], sizes = [32, 128], strides = [1, 1]} : vector<128x128xf32> to vector<32x128xf32>
    %cst_312 = arith.constant dense<0.000000e+00> : vector<16x128xf32>
    %694 = tpu.matmul %692, %693, %cst_312 {dimension_numbers = #tpu.dot_dimension_numbers<[1], [0], [0], [1], [0, 0, 1, 1], [], []>} : vector<16x32xf32>, vector<32x128xf32>, vector<16x128xf32> -> vector<16x128xf32>
    %695 = arith.addf %690, %694 : vector<16x128xf32>
    %696 = arith.addf %605, %695 : vector<16x128xf32>
    %c1_313 = arith.constant 1 : index
    %c0_314 = arith.constant 0 : index
    %c0_315 = arith.constant 0 : index
    %697 = vector.load %arg39[%c1_313, %c0_314, %c0_315] : memref<2x1x128xf32, #tpu.memory_space<vmem>>, vector<1x1x128xf32>
    %698 = vector.shape_cast %697 : vector<1x1x128xf32> to vector<1x128xf32>
    %c1_316 = arith.constant 1 : index
    %c0_317 = arith.constant 0 : index
    %c0_318 = arith.constant 0 : index
    %699 = vector.load %arg40[%c1_316, %c0_317, %c0_318] : memref<2x1x128xf32, #tpu.memory_space<vmem>>, vector<1x1x128xf32>
    %700 = vector.shape_cast %699 : vector<1x1x128xf32> to vector<1x128xf32>
    %cst_319 = arith.constant dense<0.000000e+00> : vector<16xf32>
    %701 = vector.multi_reduction <add>, %696, %cst_319 [1] : vector<16x128xf32> to vector<16xf32>
    %702 = vector.shape_cast %701 : vector<16xf32> to vector<16x1xf32>
    %cst_320 = arith.constant 1.280000e+02 : f32
    %703 = vector.broadcast %cst_320 : f32 to vector<16x1xf32>
    %704 = arith.divf %702, %703 : vector<16x1xf32>
    %705 = vector.broadcast %704 : vector<16x1xf32> to vector<16x128xf32>
    %706 = arith.subf %696, %705 : vector<16x128xf32>
    %707 = arith.mulf %706, %706 : vector<16x128xf32>
    %cst_321 = arith.constant dense<0.000000e+00> : vector<16xf32>
    %708 = vector.multi_reduction <add>, %707, %cst_321 [1] : vector<16x128xf32> to vector<16xf32>
    %709 = vector.shape_cast %708 : vector<16xf32> to vector<16x1xf32>
    %cst_322 = arith.constant 1.280000e+02 : f32
    %710 = vector.broadcast %cst_322 : f32 to vector<16x1xf32>
    %711 = arith.divf %709, %710 : vector<16x1xf32>
    %712 = vector.broadcast %704 : vector<16x1xf32> to vector<16x128xf32>
    %713 = arith.subf %696, %712 : vector<16x128xf32>
    %cst_323 = arith.constant 9.99999974E-6 : f32
    %714 = vector.broadcast %cst_323 : f32 to vector<16x1xf32>
    %715 = arith.addf %711, %714 : vector<16x1xf32>
    %716 = math.rsqrt %715 : vector<16x1xf32>
    %717 = vector.broadcast %716 : vector<16x1xf32> to vector<16x128xf32>
    %718 = arith.mulf %713, %717 : vector<16x128xf32>
    %719 = vector.broadcast %698 : vector<1x128xf32> to vector<16x128xf32>
    %720 = arith.mulf %718, %719 : vector<16x128xf32>
    %721 = vector.broadcast %700 : vector<1x128xf32> to vector<16x128xf32>
    %722 = arith.addf %720, %721 : vector<16x128xf32>
    %c1_324 = arith.constant 1 : index
    %c0_325 = arith.constant 0 : index
    %c0_326 = arith.constant 0 : index
    %723 = vector.load %arg31[%c1_324, %c0_325, %c0_326] : memref<2x128x128xf32, #tpu.memory_space<vmem>>, vector<1x128x128xf32>
    %724 = vector.shape_cast %723 : vector<1x128x128xf32> to vector<128x128xf32>
    %c1_327 = arith.constant 1 : index
    %c0_328 = arith.constant 0 : index
    %c0_329 = arith.constant 0 : index
    %725 = vector.load %arg32[%c1_327, %c0_328, %c0_329] : memref<2x1x128xf32, #tpu.memory_space<vmem>>, vector<1x1x128xf32>
    %726 = vector.shape_cast %725 : vector<1x1x128xf32> to vector<1x128xf32>
    %c1_330 = arith.constant 1 : index
    %c0_331 = arith.constant 0 : index
    %c0_332 = arith.constant 0 : index
    %727 = vector.load %arg33[%c1_330, %c0_331, %c0_332] : memref<2x128x128xf32, #tpu.memory_space<vmem>>, vector<1x128x128xf32>
    %728 = vector.shape_cast %727 : vector<1x128x128xf32> to vector<128x128xf32>
    %c1_333 = arith.constant 1 : index
    %c0_334 = arith.constant 0 : index
    %c0_335 = arith.constant 0 : index
    %729 = vector.load %arg34[%c1_333, %c0_334, %c0_335] : memref<2x1x128xf32, #tpu.memory_space<vmem>>, vector<1x1x128xf32>
    %730 = vector.shape_cast %729 : vector<1x1x128xf32> to vector<1x128xf32>
    %c1_336 = arith.constant 1 : index
    %c0_337 = arith.constant 0 : index
    %c0_338 = arith.constant 0 : index
    %731 = vector.load %arg35[%c1_336, %c0_337, %c0_338] : memref<2x128x128xf32, #tpu.memory_space<vmem>>, vector<1x128x128xf32>
    %732 = vector.shape_cast %731 : vector<1x128x128xf32> to vector<128x128xf32>
    %c1_339 = arith.constant 1 : index
    %c0_340 = arith.constant 0 : index
    %c0_341 = arith.constant 0 : index
    %733 = vector.load %arg36[%c1_339, %c0_340, %c0_341] : memref<2x1x128xf32, #tpu.memory_space<vmem>>, vector<1x1x128xf32>
    %734 = vector.shape_cast %733 : vector<1x1x128xf32> to vector<1x128xf32>
    %c1_342 = arith.constant 1 : index
    %c0_343 = arith.constant 0 : index
    %c0_344 = arith.constant 0 : index
    %735 = vector.load %arg37[%c1_342, %c0_343, %c0_344] : memref<2x128x128xf32, #tpu.memory_space<vmem>>, vector<1x128x128xf32>
    %736 = vector.shape_cast %735 : vector<1x128x128xf32> to vector<128x128xf32>
    %c1_345 = arith.constant 1 : index
    %c0_346 = arith.constant 0 : index
    %c0_347 = arith.constant 0 : index
    %737 = vector.load %arg38[%c1_345, %c0_346, %c0_347] : memref<2x1x128xf32, #tpu.memory_space<vmem>>, vector<1x1x128xf32>
    %738 = vector.shape_cast %737 : vector<1x1x128xf32> to vector<1x128xf32>
    %cst_348 = arith.constant dense<0.000000e+00> : vector<16x128xf32>
    %739 = tpu.matmul %722, %724, %cst_348 {dimension_numbers = #tpu.dot_dimension_numbers<[1], [0], [0], [1], [0, 0, 1, 1], [], []>} : vector<16x128xf32>, vector<128x128xf32>, vector<16x128xf32> -> vector<16x128xf32>
    %740 = vector.broadcast %726 : vector<1x128xf32> to vector<16x128xf32>
    %741 = arith.addf %739, %740 : vector<16x128xf32>
    %cst_349 = arith.constant dense<0.000000e+00> : vector<16x128xf32>
    %742 = tpu.matmul %325, %728, %cst_349 {dimension_numbers = #tpu.dot_dimension_numbers<[1], [0], [0], [1], [0, 0, 1, 1], [], []>} : vector<16x128xf32>, vector<128x128xf32>, vector<16x128xf32> -> vector<16x128xf32>
    %743 = vector.broadcast %730 : vector<1x128xf32> to vector<16x128xf32>
    %744 = arith.addf %742, %743 : vector<16x128xf32>
    %cst_350 = arith.constant dense<0.000000e+00> : vector<16x128xf32>
    %745 = tpu.matmul %325, %732, %cst_350 {dimension_numbers = #tpu.dot_dimension_numbers<[1], [0], [0], [1], [0, 0, 1, 1], [], []>} : vector<16x128xf32>, vector<128x128xf32>, vector<16x128xf32> -> vector<16x128xf32>
    %746 = vector.broadcast %734 : vector<1x128xf32> to vector<16x128xf32>
    %747 = arith.addf %745, %746 : vector<16x128xf32>
    %748 = vector.extract_strided_slice %741 {offsets = [0, 0], sizes = [16, 32], strides = [1, 1]} : vector<16x128xf32> to vector<16x32xf32>
    %749 = vector.shape_cast %748 : vector<16x32xf32> to vector<1x16x32xf32>
    %750 = vector.extract_strided_slice %741 {offsets = [0, 32], sizes = [16, 32], strides = [1, 1]} : vector<16x128xf32> to vector<16x32xf32>
    %751 = vector.shape_cast %750 : vector<16x32xf32> to vector<1x16x32xf32>
    %752 = vector.extract_strided_slice %741 {offsets = [0, 64], sizes = [16, 32], strides = [1, 1]} : vector<16x128xf32> to vector<16x32xf32>
    %753 = vector.shape_cast %752 : vector<16x32xf32> to vector<1x16x32xf32>
    %754 = vector.extract_strided_slice %741 {offsets = [0, 96], sizes = [16, 32], strides = [1, 1]} : vector<16x128xf32> to vector<16x32xf32>
    %755 = vector.shape_cast %754 : vector<16x32xf32> to vector<1x16x32xf32>
    %756 = tpu.concatenate %749, %751, %753, %755 in 0 : vector<1x16x32xf32>, vector<1x16x32xf32>, vector<1x16x32xf32>, vector<1x16x32xf32> -> vector<4x16x32xf32>
    %757 = vector.extract_strided_slice %744 {offsets = [0, 0], sizes = [16, 32], strides = [1, 1]} : vector<16x128xf32> to vector<16x32xf32>
    %758 = vector.shape_cast %757 : vector<16x32xf32> to vector<1x16x32xf32>
    %759 = vector.extract_strided_slice %744 {offsets = [0, 32], sizes = [16, 32], strides = [1, 1]} : vector<16x128xf32> to vector<16x32xf32>
    %760 = vector.shape_cast %759 : vector<16x32xf32> to vector<1x16x32xf32>
    %761 = vector.extract_strided_slice %744 {offsets = [0, 64], sizes = [16, 32], strides = [1, 1]} : vector<16x128xf32> to vector<16x32xf32>
    %762 = vector.shape_cast %761 : vector<16x32xf32> to vector<1x16x32xf32>
    %763 = vector.extract_strided_slice %744 {offsets = [0, 96], sizes = [16, 32], strides = [1, 1]} : vector<16x128xf32> to vector<16x32xf32>
    %764 = vector.shape_cast %763 : vector<16x32xf32> to vector<1x16x32xf32>
    %765 = tpu.concatenate %758, %760, %762, %764 in 0 : vector<1x16x32xf32>, vector<1x16x32xf32>, vector<1x16x32xf32>, vector<1x16x32xf32> -> vector<4x16x32xf32>
    %766 = vector.extract_strided_slice %747 {offsets = [0, 0], sizes = [16, 32], strides = [1, 1]} : vector<16x128xf32> to vector<16x32xf32>
    %767 = vector.shape_cast %766 : vector<16x32xf32> to vector<1x16x32xf32>
    %768 = vector.extract_strided_slice %747 {offsets = [0, 32], sizes = [16, 32], strides = [1, 1]} : vector<16x128xf32> to vector<16x32xf32>
    %769 = vector.shape_cast %768 : vector<16x32xf32> to vector<1x16x32xf32>
    %770 = vector.extract_strided_slice %747 {offsets = [0, 64], sizes = [16, 32], strides = [1, 1]} : vector<16x128xf32> to vector<16x32xf32>
    %771 = vector.shape_cast %770 : vector<16x32xf32> to vector<1x16x32xf32>
    %772 = vector.extract_strided_slice %747 {offsets = [0, 96], sizes = [16, 32], strides = [1, 1]} : vector<16x128xf32> to vector<16x32xf32>
    %773 = vector.shape_cast %772 : vector<16x32xf32> to vector<1x16x32xf32>
    %774 = tpu.concatenate %767, %769, %771, %773 in 0 : vector<1x16x32xf32>, vector<1x16x32xf32>, vector<1x16x32xf32>, vector<1x16x32xf32> -> vector<4x16x32xf32>
    "tpu.trace_start"() <{level = 10 : i32, message = "hqd,hkd->hqk"}> : () -> ()
    %cst_351 = arith.constant dense<0.000000e+00> : vector<4x16x16xf32>
    %775 = tpu.matmul %756, %765, %cst_351 {dimension_numbers = #tpu.dot_dimension_numbers<[2], [2], [1], [1], [0, 0, 0, 1, 1, 1], [0], [0]>} : vector<4x16x32xf32>, vector<4x16x32xf32>, vector<4x16x16xf32> -> vector<4x16x16xf32>
    "tpu.trace_stop"() : () -> ()
    %cst_352 = arith.constant 0.176776692 : f32
    %776 = vector.broadcast %cst_352 : f32 to vector<4x16x16xf32>
    %777 = arith.mulf %775, %776 : vector<4x16x16xf32>
    %778 = vector.shape_cast %2 : vector<16x16xf32> to vector<1x16x16xf32>
    %779 = vector.broadcast %778 : vector<1x16x16xf32> to vector<4x16x16xf32>
    %780 = arith.addf %777, %779 : vector<4x16x16xf32>
    %cst_353 = arith.constant dense<0xFF800000> : vector<4x16xf32>
    %781 = vector.multi_reduction <maximumf>, %780, %cst_353 [2] : vector<4x16x16xf32> to vector<4x16xf32>
    %782 = vector.shape_cast %781 : vector<4x16xf32> to vector<4x16x1xf32>
    %783 = vector.broadcast %782 : vector<4x16x1xf32> to vector<4x16x16xf32>
    %784 = arith.subf %780, %783 : vector<4x16x16xf32>
    %785 = math.exp %784 : vector<4x16x16xf32>
    %cst_354 = arith.constant dense<0.000000e+00> : vector<4x16xf32>
    %786 = vector.multi_reduction <add>, %785, %cst_354 [2] : vector<4x16x16xf32> to vector<4x16xf32>
    %787 = vector.shape_cast %786 : vector<4x16xf32> to vector<4x16x1xf32>
    %788 = tpu.reciprocal %787 {approx = true} : vector<4x16x1xf32> -> vector<4x16x1xf32>
    %789 = vector.broadcast %788 : vector<4x16x1xf32> to vector<4x16x16xf32>
    %790 = arith.mulf %785, %789 : vector<4x16x16xf32>
    "tpu.trace_start"() <{level = 10 : i32, message = "hqk,hkd->hqd"}> : () -> ()
    %cst_355 = arith.constant dense<0.000000e+00> : vector<4x16x32xf32>
    %791 = tpu.matmul %790, %774, %cst_355 {dimension_numbers = #tpu.dot_dimension_numbers<[2], [1], [1], [2], [0, 0, 0, 1, 1, 2], [0], [0]>} : vector<4x16x16xf32>, vector<4x16x32xf32>, vector<4x16x32xf32> -> vector<4x16x32xf32>
    "tpu.trace_stop"() : () -> ()
    %792 = vector.extract_strided_slice %791 {offsets = [0, 0, 0], sizes = [1, 16, 32], strides = [1, 1, 1]} : vector<4x16x32xf32> to vector<1x16x32xf32>
    %793 = vector.shape_cast %792 : vector<1x16x32xf32> to vector<16x32xf32>
    %794 = vector.extract_strided_slice %736 {offsets = [0, 0], sizes = [32, 128], strides = [1, 1]} : vector<128x128xf32> to vector<32x128xf32>
    %cst_356 = arith.constant dense<0.000000e+00> : vector<16x128xf32>
    %795 = tpu.matmul %793, %794, %cst_356 {dimension_numbers = #tpu.dot_dimension_numbers<[1], [0], [0], [1], [0, 0, 1, 1], [], []>} : vector<16x32xf32>, vector<32x128xf32>, vector<16x128xf32> -> vector<16x128xf32>
    %796 = vector.broadcast %738 : vector<1x128xf32> to vector<16x128xf32>
    %797 = arith.addf %796, %795 : vector<16x128xf32>
    %798 = vector.extract_strided_slice %791 {offsets = [1, 0, 0], sizes = [1, 16, 32], strides = [1, 1, 1]} : vector<4x16x32xf32> to vector<1x16x32xf32>
    %799 = vector.shape_cast %798 : vector<1x16x32xf32> to vector<16x32xf32>
    %800 = vector.extract_strided_slice %736 {offsets = [32, 0], sizes = [32, 128], strides = [1, 1]} : vector<128x128xf32> to vector<32x128xf32>
    %cst_357 = arith.constant dense<0.000000e+00> : vector<16x128xf32>
    %801 = tpu.matmul %799, %800, %cst_357 {dimension_numbers = #tpu.dot_dimension_numbers<[1], [0], [0], [1], [0, 0, 1, 1], [], []>} : vector<16x32xf32>, vector<32x128xf32>, vector<16x128xf32> -> vector<16x128xf32>
    %802 = arith.addf %797, %801 : vector<16x128xf32>
    %803 = vector.extract_strided_slice %791 {offsets = [2, 0, 0], sizes = [1, 16, 32], strides = [1, 1, 1]} : vector<4x16x32xf32> to vector<1x16x32xf32>
    %804 = vector.shape_cast %803 : vector<1x16x32xf32> to vector<16x32xf32>
    %805 = vector.extract_strided_slice %736 {offsets = [64, 0], sizes = [32, 128], strides = [1, 1]} : vector<128x128xf32> to vector<32x128xf32>
    %cst_358 = arith.constant dense<0.000000e+00> : vector<16x128xf32>
    %806 = tpu.matmul %804, %805, %cst_358 {dimension_numbers = #tpu.dot_dimension_numbers<[1], [0], [0], [1], [0, 0, 1, 1], [], []>} : vector<16x32xf32>, vector<32x128xf32>, vector<16x128xf32> -> vector<16x128xf32>
    %807 = arith.addf %802, %806 : vector<16x128xf32>
    %808 = vector.extract_strided_slice %791 {offsets = [3, 0, 0], sizes = [1, 16, 32], strides = [1, 1, 1]} : vector<4x16x32xf32> to vector<1x16x32xf32>
    %809 = vector.shape_cast %808 : vector<1x16x32xf32> to vector<16x32xf32>
    %810 = vector.extract_strided_slice %736 {offsets = [96, 0], sizes = [32, 128], strides = [1, 1]} : vector<128x128xf32> to vector<32x128xf32>
    %cst_359 = arith.constant dense<0.000000e+00> : vector<16x128xf32>
    %811 = tpu.matmul %809, %810, %cst_359 {dimension_numbers = #tpu.dot_dimension_numbers<[1], [0], [0], [1], [0, 0, 1, 1], [], []>} : vector<16x32xf32>, vector<32x128xf32>, vector<16x128xf32> -> vector<16x128xf32>
    %812 = arith.addf %807, %811 : vector<16x128xf32>
    %813 = arith.addf %722, %812 : vector<16x128xf32>
    %c1_360 = arith.constant 1 : index
    %c0_361 = arith.constant 0 : index
    %c0_362 = arith.constant 0 : index
    %814 = vector.load %arg41[%c1_360, %c0_361, %c0_362] : memref<2x1x128xf32, #tpu.memory_space<vmem>>, vector<1x1x128xf32>
    %815 = vector.shape_cast %814 : vector<1x1x128xf32> to vector<1x128xf32>
    %c1_363 = arith.constant 1 : index
    %c0_364 = arith.constant 0 : index
    %c0_365 = arith.constant 0 : index
    %816 = vector.load %arg42[%c1_363, %c0_364, %c0_365] : memref<2x1x128xf32, #tpu.memory_space<vmem>>, vector<1x1x128xf32>
    %817 = vector.shape_cast %816 : vector<1x1x128xf32> to vector<1x128xf32>
    %cst_366 = arith.constant dense<0.000000e+00> : vector<16xf32>
    %818 = vector.multi_reduction <add>, %813, %cst_366 [1] : vector<16x128xf32> to vector<16xf32>
    %819 = vector.shape_cast %818 : vector<16xf32> to vector<16x1xf32>
    %cst_367 = arith.constant 1.280000e+02 : f32
    %820 = vector.broadcast %cst_367 : f32 to vector<16x1xf32>
    %821 = arith.divf %819, %820 : vector<16x1xf32>
    %822 = vector.broadcast %821 : vector<16x1xf32> to vector<16x128xf32>
    %823 = arith.subf %813, %822 : vector<16x128xf32>
    %824 = arith.mulf %823, %823 : vector<16x128xf32>
    %cst_368 = arith.constant dense<0.000000e+00> : vector<16xf32>
    %825 = vector.multi_reduction <add>, %824, %cst_368 [1] : vector<16x128xf32> to vector<16xf32>
    %826 = vector.shape_cast %825 : vector<16xf32> to vector<16x1xf32>
    %cst_369 = arith.constant 1.280000e+02 : f32
    %827 = vector.broadcast %cst_369 : f32 to vector<16x1xf32>
    %828 = arith.divf %826, %827 : vector<16x1xf32>
    %829 = vector.broadcast %821 : vector<16x1xf32> to vector<16x128xf32>
    %830 = arith.subf %813, %829 : vector<16x128xf32>
    %cst_370 = arith.constant 9.99999974E-6 : f32
    %831 = vector.broadcast %cst_370 : f32 to vector<16x1xf32>
    %832 = arith.addf %828, %831 : vector<16x1xf32>
    %833 = math.rsqrt %832 : vector<16x1xf32>
    %834 = vector.broadcast %833 : vector<16x1xf32> to vector<16x128xf32>
    %835 = arith.mulf %830, %834 : vector<16x128xf32>
    %836 = vector.broadcast %815 : vector<1x128xf32> to vector<16x128xf32>
    %837 = arith.mulf %835, %836 : vector<16x128xf32>
    %838 = vector.broadcast %817 : vector<1x128xf32> to vector<16x128xf32>
    %839 = arith.addf %837, %838 : vector<16x128xf32>
    %c1_371 = arith.constant 1 : index
    %c0_372 = arith.constant 0 : index
    %c0_373 = arith.constant 0 : index
    %840 = vector.load %arg45[%c1_371, %c0_372, %c0_373] : memref<2x128x256xf32, #tpu.memory_space<vmem>>, vector<1x128x256xf32>
    %841 = vector.shape_cast %840 : vector<1x128x256xf32> to vector<128x256xf32>
    %c1_374 = arith.constant 1 : index
    %c0_375 = arith.constant 0 : index
    %c0_376 = arith.constant 0 : index
    %842 = vector.load %arg46[%c1_374, %c0_375, %c0_376] : memref<2x1x256xf32, #tpu.memory_space<vmem>>, vector<1x1x256xf32>
    %843 = vector.shape_cast %842 : vector<1x1x256xf32> to vector<1x256xf32>
    %c1_377 = arith.constant 1 : index
    %c0_378 = arith.constant 0 : index
    %c0_379 = arith.constant 0 : index
    %844 = vector.load %arg47[%c1_377, %c0_378, %c0_379] : memref<2x256x128xf32, #tpu.memory_space<vmem>>, vector<1x256x128xf32>
    %845 = vector.shape_cast %844 : vector<1x256x128xf32> to vector<256x128xf32>
    %c1_380 = arith.constant 1 : index
    %c0_381 = arith.constant 0 : index
    %c0_382 = arith.constant 0 : index
    %846 = vector.load %arg48[%c1_380, %c0_381, %c0_382] : memref<2x1x128xf32, #tpu.memory_space<vmem>>, vector<1x1x128xf32>
    %847 = vector.shape_cast %846 : vector<1x1x128xf32> to vector<1x128xf32>
    %cst_383 = arith.constant dense<0.000000e+00> : vector<16x256xf32>
    %848 = tpu.matmul %839, %841, %cst_383 {dimension_numbers = #tpu.dot_dimension_numbers<[1], [0], [0], [1], [0, 0, 1, 1], [], []>} : vector<16x128xf32>, vector<128x256xf32>, vector<16x256xf32> -> vector<16x256xf32>
    %849 = vector.broadcast %843 : vector<1x256xf32> to vector<16x256xf32>
    %850 = arith.addf %848, %849 : vector<16x256xf32>
    %cst_384 = arith.constant 0.000000e+00 : f32
    %851 = vector.broadcast %cst_384 : f32 to vector<16x256xf32>
    %852 = arith.maximumf %850, %851 : vector<16x256xf32>
    %cst_385 = arith.constant dense<0.000000e+00> : vector<16x128xf32>
    %853 = tpu.matmul %852, %845, %cst_385 {dimension_numbers = #tpu.dot_dimension_numbers<[1], [0], [0], [1], [0, 0, 1, 1], [], []>} : vector<16x256xf32>, vector<256x128xf32>, vector<16x128xf32> -> vector<16x128xf32>
    %854 = vector.broadcast %847 : vector<1x128xf32> to vector<16x128xf32>
    %855 = arith.addf %853, %854 : vector<16x128xf32>
    %856 = arith.addf %839, %855 : vector<16x128xf32>
    %c1_386 = arith.constant 1 : index
    %c0_387 = arith.constant 0 : index
    %c0_388 = arith.constant 0 : index
    %857 = vector.load %arg43[%c1_386, %c0_387, %c0_388] : memref<2x1x128xf32, #tpu.memory_space<vmem>>, vector<1x1x128xf32>
    %858 = vector.shape_cast %857 : vector<1x1x128xf32> to vector<1x128xf32>
    %c1_389 = arith.constant 1 : index
    %c0_390 = arith.constant 0 : index
    %c0_391 = arith.constant 0 : index
    %859 = vector.load %arg44[%c1_389, %c0_390, %c0_391] : memref<2x1x128xf32, #tpu.memory_space<vmem>>, vector<1x1x128xf32>
    %860 = vector.shape_cast %859 : vector<1x1x128xf32> to vector<1x128xf32>
    %cst_392 = arith.constant dense<0.000000e+00> : vector<16xf32>
    %861 = vector.multi_reduction <add>, %856, %cst_392 [1] : vector<16x128xf32> to vector<16xf32>
    %862 = vector.shape_cast %861 : vector<16xf32> to vector<16x1xf32>
    %cst_393 = arith.constant 1.280000e+02 : f32
    %863 = vector.broadcast %cst_393 : f32 to vector<16x1xf32>
    %864 = arith.divf %862, %863 : vector<16x1xf32>
    %865 = vector.broadcast %864 : vector<16x1xf32> to vector<16x128xf32>
    %866 = arith.subf %856, %865 : vector<16x128xf32>
    %867 = arith.mulf %866, %866 : vector<16x128xf32>
    %cst_394 = arith.constant dense<0.000000e+00> : vector<16xf32>
    %868 = vector.multi_reduction <add>, %867, %cst_394 [1] : vector<16x128xf32> to vector<16xf32>
    %869 = vector.shape_cast %868 : vector<16xf32> to vector<16x1xf32>
    %cst_395 = arith.constant 1.280000e+02 : f32
    %870 = vector.broadcast %cst_395 : f32 to vector<16x1xf32>
    %871 = arith.divf %869, %870 : vector<16x1xf32>
    %872 = vector.broadcast %864 : vector<16x1xf32> to vector<16x128xf32>
    %873 = arith.subf %856, %872 : vector<16x128xf32>
    %cst_396 = arith.constant 9.99999974E-6 : f32
    %874 = vector.broadcast %cst_396 : f32 to vector<16x1xf32>
    %875 = arith.addf %871, %874 : vector<16x1xf32>
    %876 = math.rsqrt %875 : vector<16x1xf32>
    %877 = vector.broadcast %876 : vector<16x1xf32> to vector<16x128xf32>
    %878 = arith.mulf %873, %877 : vector<16x128xf32>
    %879 = vector.broadcast %858 : vector<1x128xf32> to vector<16x128xf32>
    %880 = arith.mulf %878, %879 : vector<16x128xf32>
    %881 = vector.broadcast %860 : vector<1x128xf32> to vector<16x128xf32>
    %882 = arith.addf %880, %881 : vector<16x128xf32>
    %c0_397 = arith.constant 0 : index
    %c0_398 = arith.constant 0 : index
    %883 = vector.load %arg49[%c0_397, %c0_398] : memref<128x128xf32, #tpu.memory_space<vmem>>, vector<128x128xf32>
    %cst_399 = arith.constant dense<0.000000e+00> : vector<16x128xf32>
    %884 = tpu.matmul %882, %883, %cst_399 {dimension_numbers = #tpu.dot_dimension_numbers<[1], [0], [0], [1], [0, 0, 1, 1], [], []>} : vector<16x128xf32>, vector<128x128xf32>, vector<16x128xf32> -> vector<16x128xf32>
    %c0_400 = arith.constant 0 : index
    %c0_401 = arith.constant 0 : index
    %885 = vector.load %arg50[%c0_400, %c0_401] : memref<1x128xf32, #tpu.memory_space<vmem>>, vector<1x128xf32>
    %886 = vector.broadcast %885 : vector<1x128xf32> to vector<16x128xf32>
    %887 = arith.addf %884, %886 : vector<16x128xf32>
    %c0_402 = arith.constant 0 : index
    %c0_403 = arith.constant 0 : index
    %888 = vector.load %arg51[%c0_402, %c0_403] : memref<16x128xf32, #tpu.memory_space<vmem>>, vector<16x128xf32>
    tpu.vector_store %arg51[%c0_402, %c0_403], %887 {strides = array<i32>} : memref<16x128xf32, #tpu.memory_space<vmem>>, vector<16x128xf32>,
    %889 = vector.extract_strided_slice %790 {offsets = [0, 0, 0], sizes = [4, 8, 8], strides = [1, 1, 1]} : vector<4x16x16xf32> to vector<4x8x8xf32>
    %890 = vector.shape_cast %889 : vector<4x8x8xf32> to vector<1x4x8x8xf32>
    %891 = vector.extract_strided_slice %790 {offsets = [0, 8, 8], sizes = [4, 8, 8], strides = [1, 1, 1]} : vector<4x16x16xf32> to vector<4x8x8xf32>
    %892 = vector.shape_cast %891 : vector<4x8x8xf32> to vector<1x4x8x8xf32>
    %893 = tpu.concatenate %890, %892 in 0 : vector<1x4x8x8xf32>, vector<1x4x8x8xf32> -> vector<2x4x8x8xf32>
    %c0_404 = arith.constant 0 : index
    %c0_405 = arith.constant 0 : index
    %c0_406 = arith.constant 0 : index
    %c0_407 = arith.constant 0 : index
    %894 = vector.load %arg52[%c0_404, %c0_405, %c0_406, %c0_407] : memref<2x4x8x8xf32, #tpu.memory_space<vmem>>, vector<2x4x8x8xf32>
    tpu.vector_store %arg52[%c0_404, %c0_405, %c0_406, %c0_407], %893 {strides = array<i32>} : memref<2x4x8x8xf32, #tpu.memory_space<vmem>>, vector<2x4x8x8xf32>,
    return
  }
}

</mosaic_0001>

<bundles_post_ra>
// kernel: transformer_forward.1
= control target key start
LH: loop header
LB: loop body
LE: loop exit
PB: predicated region body
PF: predicated region fallthrough
CT: control target
= control target key end

     0   :  { %s16072_s6 = smov 1   ;;  %s16073_s10 = smov 2   ;;  %s17627_s0 = inlined_call_operand.smem [shape: u32[53], index: -1, kind: input, shape index: {}] }
   0x1   :  { %s16176_s5 = sld [smem:[%s17627_s0]]   ;;  %s16074_s14 = smov 3  }
   0x2   :  { %s16181_s9 = sld [smem:[%s17627_s0 + %s16072_s6]]   ;;  %s16075_s18 = smov 4  }
   0x3   :  { %s16186_s13 = sld [smem:[%s17627_s0 + %s16073_s10]]   ;;  %s16076_s22 = smov 5  }
   0x4   :  { %s16191_s17 = sld [smem:[%s17627_s0 + %s16074_s14]]   ;;  %s16077_s26 = smov 6  }
   0x5   :  { %s16196_s21 = sld [smem:[%s17627_s0 + %s16075_s18]]   ;;  %s16078_s30 = smov 7  }
   0x6   :  { %s16201_s25 = sld [smem:[%s17627_s0 + %s16076_s22]]   ;;  %s16079_s4 = smov 8  }
   0x7   :  { %17663 = sst [smem:[#allocation74_spill]] %s16176_s5  ;;  %s16080_s10 = smov 9  }
   0x8   :  { %17664 = sst [smem:[#allocation75_spill]] %s16181_s9  ;;  %s16081_s15 = smov 10  }
   0x9   :  { %17665 = sst [smem:[#allocation76_spill]] %s16186_s13  ;;  %s16082_s20 = smov 11  }
   0xa   :  { %17666 = sst [smem:[#allocation77_spill]] %s16191_s17  ;;  %s16084_s1 = smov 13  }
   0xb   :  { %17667 = sst [smem:[#allocation78_spill]] %s16196_s21  ;;  %s16085_s7 = smov 14  }
   0xc   :  { %17668 = sst [smem:[#allocation79_spill]] %s16201_s25  ;;  %s16087_s22 = smov 16  }
   0xd   :  { %s16206_s29 = sld [smem:[%s17627_s0 + %s16077_s26]]   ;;  %s16083_s26 = smov 12  }
   0xe   :  { %s16211_s3 = sld [smem:[%s17627_s0 + %s16078_s30]]   ;;  %s16088_s28 = smov 17  }
   0xf   :  { %s16216_s8 = sld [smem:[%s17627_s0 + %s16079_s4]]  }
  0x10   :  { %s16221_s14 = sld [smem:[%s17627_s0 + %s16080_s10]]  }
  0x11   :  { %s16226_s19 = sld [smem:[%s17627_s0 + %s16081_s15]]   ;;  %s16086_s15 = smov 15  }
  0x12   :  { %s16231_s24 = sld [smem:[%s17627_s0 + %s16082_s20]]  }
  0x13   :  { %17669 = sst [smem:[#allocation80_spill]] %s16206_s29 }
  0x14   :  { %17670 = sst [smem:[#allocation81_spill]] %s16211_s3 }
  0x15   :  { %17671 = sst [smem:[#allocation82_spill]] %s16216_s8 }
  0x16   :  { %s16236_s30 = sld [smem:[%s17627_s0 + %s16083_s26]]  }
  0x17   :  { %17672 = sst [smem:[#allocation83_spill]] %s16226_s19 }
  0x18   :  { %17673 = sst [smem:[#allocation84_spill]] %s16231_s24 }
  0x19   :  { %s16241_s6 = sld [smem:[%s17627_s0 + %s16084_s1]]  }
  0x1a   :  { %s16246_s12 = sld [smem:[%s17627_s0 + %s16085_s7]]   ;;  %s16089_s7 = smov 18  }
  0x1b   :  { %s16251_s20 = sld [smem:[%s17627_s0 + %s16086_s15]]   ;;  %s16090_s15 = smov 19  }
  0x1c   :  { %17674 = sst [smem:[#allocation85_spill]] %s16236_s30 }
  0x1d   :  { %s16256_s27 = sld [smem:[%s17627_s0 + %s16087_s22]]   ;;  %s16091_s22 = smov 20  }
  0x1e   :  { %s16261_s4 = sld [smem:[%s17627_s0 + %s16088_s28]]   ;;  %s16092_s28 = smov 21  }
  0x1f   :  { %s16266_s29 = sld [smem:[%s17627_s0 + %s16089_s7]]   ;;  %s16093_s7 = smov 22  }
  0x20   :  { %17675 = sst [smem:[#allocation86_spill]] %s16246_s12 }
  0x21   :  { %17676 = sst [smem:[#allocation87_spill]] %s16251_s20 }
  0x22   :  { %s16271_s25 = sld [smem:[%s17627_s0 + %s16090_s15]]   ;;  %s16094_s15 = smov 23  }
  0x23   :  { %s16276_s17 = sld [smem:[%s17627_s0 + %s16091_s22]]   ;;  %s16095_s22 = smov 24  }
  0x24   :  { %17677 = sst [smem:[#allocation88_spill]] %s16261_s4 }
  0x25   :  { %17678 = sst [smem:[#allocation89_spill]] %s16266_s29 }
  0x26   :  { %s16281_s9 = sld [smem:[%s17627_s0 + %s16092_s28]]   ;;  %s16096_s28 = smov 25  }
  0x27   :  { %s16286_s29 = sld [smem:[%s17627_s0 + %s16093_s7]]   ;;  %s16097_s7 = smov 26  }
  0x28   :  { %17679 = sst [smem:[#allocation90_spill]] %s16271_s25 }
  0x29   :  { %17680 = sst [smem:[#allocation91_spill]] %s16276_s17 }
  0x2a   :  { %s16291_s4 = sld [smem:[%s17627_s0 + %s16094_s15]]   ;;  %s16098_s15 = smov 27  }
  0x2b   :  { %s16296_s17 = sld [smem:[%s17627_s0 + %s16095_s22]]   ;;  %s16099_s22 = smov 28  }
  0x2c   :  { %17681 = sst [smem:[#allocation92_spill]] %s16281_s9 }
  0x2d   :  { %17682 = sst [smem:[#allocation93_spill]] %s16286_s29 }
  0x2e   :  { %s16301_s9 = sld [smem:[%s17627_s0 + %s16096_s28]]   ;;  %s16100_s28 = smov 29  }
  0x2f   :  { %s16306_s29 = sld [smem:[%s17627_s0 + %s16097_s7]]   ;;  %s16101_s7 = smov 30  }
  0x30   :  { %s16311_s12 = sld [smem:[%s17627_s0 + %s16098_s15]]   ;;  %s16102_s15 = smov 31  }
  0x31   :  { %17683 = sst [smem:[#allocation94_spill]] %s16296_s17 }
  0x32   :  { %s16316_s30 = sld [smem:[%s17627_s0 + %s16099_s22]]   ;;  %s16103_s22 = smov 32  }
  0x33   :  { %s16321_s21 = sld [smem:[%s17627_s0 + %s16100_s28]]   ;;  %s16104_s28 = smov 33  }
  0x34   :  { %s16326_s19 = sld [smem:[%s17627_s0 + %s16101_s7]]   ;;  %s16105_s7 = smov 34  }
  0x35   :  { %17684 = sst [smem:[#allocation95_spill]] %s16306_s29 }
  0x36   :  { %s16331_s8 = sld [smem:[%s17627_s0 + %s16102_s15]]   ;;  %s16106_s15 = smov 35  }
  0x37   :  { %s16336_s13 = sld [smem:[%s17627_s0 + %s16103_s22]]   ;;  %s16107_s22 = smov 36  }
  0x38   :  { %17685 = sst [smem:[#allocation96_spill]] %s16316_s30 }
  0x39   :  { %s16341_s5 = sld [smem:[%s17627_s0 + %s16104_s28]]   ;;  %s16108_s28 = smov 37  }
  0x3a   :  { %17686 = sst [smem:[#allocation97_spill]] %s16326_s19 }
  0x3b   :  { %s16346_s19 = sld [smem:[%s17627_s0 + %s16105_s7]]   ;;  %s16109_s7 = smov 38  }
  0x3c   :  { %s16351_s30 = sld [smem:[%s17627_s0 + %s16106_s15]]   ;;  %s16110_s15 = smov 39  }
  0x3d   :  { %17687 = sst [smem:[#allocation98_spill]] %s16336_s13 }
  0x3e   :  { %s16356_s13 = sld [smem:[%s17627_s0 + %s16107_s22]]   ;;  %s16111_s22 = smov 40  }
  0x3f   :  { %s16361_s29 = sld [smem:[%s17627_s0 + %s16108_s28]]   ;;  %s16112_s28 = smov 41  }
  0x40   :  { %s16371_s17 = sld [smem:[%s17627_s0 + %s16110_s15]]   ;;  %s16114_s15 = smov 43  }
  0x41   :  { %17688 = sst [smem:[#allocation99_spill]] %s16346_s19 }
  0x42   :  { %s16366_s19 = sld [smem:[%s17627_s0 + %s16109_s7]]   ;;  %s16113_s7 = smov 42  }
  0x43   :  { %s16381_s25 = sld [smem:[%s17627_s0 + %s16112_s28]]   ;;  %s16116_s28 = smov 45  }
  0x44   :  { %17689 = sst [smem:[#allocation100_spill]] %s16356_s13 }
  0x45   :  { %s16376_s13 = sld [smem:[%s17627_s0 + %s16111_s22]]   ;;  %s16115_s22 = smov 44  }
  0x46   :  { %s16391_s20 = sld [smem:[%s17627_s0 + %s16114_s15]]   ;;  %s16118_s15 = smov 47  }
  0x47   :  { %s16401_s24 = sld [smem:[%s17627_s0 + %s16116_s28]]   ;;  %s16120_s28 = smov 49  }
  0x48   :  { %17690 = sst [smem:[#allocation101_spill]] %s16366_s19 }
  0x49   :  { %s16386_s19 = sld [smem:[%s17627_s0 + %s16113_s7]]   ;;  %s16117_s7 = smov 46  }
  0x4a   :  { %s16411_s3 = sld [smem:[%s17627_s0 + %s16118_s15]]   ;;  %s16122_s15 = smov 51  }
  0x4b   :  { %17691 = sst [smem:[#allocation102_spill]] %s16376_s13 }
  0x4c   :  { %s16396_s13 = sld [smem:[%s17627_s0 + %s16115_s22]]   ;;  %s16119_s22 = smov 48  }
  0x4d   :  { %17694 = sst [smem:[#allocation105_spill]] %s16401_s24 }
  0x4e   :  { %s16421_s24 = sld [smem:[%s17627_s0 + %s16120_s28]]  }
  0x4f   :  { %17692 = sst [smem:[#allocation103_spill]] %s16386_s19 }
  0x50   :  { %s16406_s19 = sld [smem:[%s17627_s0 + %s16117_s7]]   ;;  %s16121_s7 = smov 50  }
  0x51   :  { %17696 = sst [smem:[#allocation107_spill]] %s16411_s3 }
  0x52   :  { %17693 = sst [smem:[#allocation104_spill]] %s16396_s13 }
  0x53   :  { %s16416_s13 = sld [smem:[%s17627_s0 + %s16119_s22]]   ;;  %s16123_s22 = smov 52  }
  0x54   :  { %s16431_s3 = sld [smem:[%s17627_s0 + %s16122_s15]]  }
  0x56   :  { %17695 = sst [smem:[#allocation106_spill]] %s16406_s19 }
  0x57   :  { %s16426_s19 = sld [smem:[%s17627_s0 + %s16121_s7]]  }
  0x59   :  { %17697 = sst [smem:[#allocation108_spill]] %s16416_s13 }
  0x5a   :  { %s16436_s13 = sld [smem:[%s17627_s0 + %s16123_s22]]  }
  0x5b   :  { %111 = vsyncpa [#allocation3], 0 }
  0x5c   :  { %112 = vsyncpa [#allocation6], 0 }
  0x5d   :  { %113 = vsyncpa [#allocation9], 0 }
  0x5e   :  { %114 = vsyncpa [#allocation12], 0 }
  0x5f   :  { %115 = vsyncpa [#allocation15], 0 }
  0x60   :  { %116 = vsyncpa [#allocation18], 0 }
  0x61   :  { %117 = vsyncpa [#allocation21], 0 }
  0x62   :  { %118 = vsyncpa [#allocation24], 0 }
  0x63   :  { %119 = vsyncpa [#allocation27], 0 }
  0x64   :  { %120 = vsyncpa [#allocation30], 0 }
  0x65   :  { %121 = vsyncpa [#allocation33], 0 }
  0x66   :  { %122 = vsyncpa [#allocation36], 0 }
  0x67   :  { %123 = vsyncpa [#allocation39], 0 }
  0x68   :  { %124 = vsyncpa [#allocation42], 0 }
  0x69   :  { %125 = vsyncpa [#allocation45], 0 }
  0x6a   :  { %126 = vsyncpa [#allocation48], 0 }
  0x6b   :  { %127 = vsyncpa [#allocation51], 0 }
  0x6c   :  { %128 = vsyncpa [#allocation4], 0 }
  0x6d   :  { %129 = vsyncpa [#allocation54], 0  ;;  %s16124_s0 = smov [#allocation5]   ;;  %s16125_s1 = smov [#allocation8]  }
  0x6e   :  { %s163_s28 = sshll.u32 %s16124_s0, 4  ;;  %s191_s2 = sshll.u32 %s16125_s1, 4  ;;  %s164_s28 = int_to_ptr.vmem [resolvable:$true] %s163_s28  ;;  %s16438_s2 = int_to_ptr.vmem [resolvable:$true] %s191_s2 }
  0x6f   :  { %s15286_s7 = scalar_lea.hbm %s16221_s14, 4096 }
  0x70   :  { %p15287_p0 = scmp.ne.s32.totalorder %s16221_s14, %s15286_s7  ;;  %p15290_p1 = scmp.lt.u32.totalorder %s15286_s7, %s16221_s14 }
  0x72   :  { %p15292_p2 = pnand %p15290_p1, %p15287_p0 }
  0x74   :  { %15295 = shalt.err (!%p15292_p2)
}
  0x75   :  { %s15296_s10 = scalar_lea.vmem %s164_s28, 4096  ;;  %p15301_p4 = scmp.lt.s32.totalorder %s164_s28, %s164_s28 }
  0x76   :  { %p15297_p3 = scmp.ne.s32.totalorder %s164_s28, %s15296_s10  ;;  %p15302_p5 = scmp.lt.s32.totalorder %s15296_s10, %s15296_s10 }
  0x78   :  { %p15303_p6 = por %p15302_p5, %p15301_p4 }
  0x7a   :  { %p15304_p7 = pnand %p15303_p6, %p15297_p3 }
  0x7c   :  { %15307 = shalt.err (!%p15304_p7)
}
  0x7d   :  { %s16126_s11 = smov 128   ;;  %s16127_s15 = smov 8  }
  0x7e   :  { %169 = dma.hbm_to_vmem [thread:$0]  %s16221_s14, 4096, %s164_s28, [#allocation6], %s16126_s11, %s16126_s11, %s16127_s15  }
  0x7f   :  { %s15308_s16 = scalar_lea.hbm %s16241_s6, 4096 }
  0x80   :  { %p15309_p8 = scmp.ne.s32.totalorder %s16241_s6, %s15308_s16  ;;  %p15312_p9 = scmp.lt.u32.totalorder %s15308_s16, %s16241_s6 }
  0x82   :  { %p15314_p10 = pnand %p15312_p9, %p15309_p8 }
  0x84   :  { %15317 = shalt.err (!%p15314_p10)
}
  0x85   :  { %s15318_s18 = scalar_lea.vmem %s16438_s2, 4096  ;;  %p15323_p12 = scmp.lt.s32.totalorder %s16438_s2, %s16438_s2 }
  0x86   :  { %p15319_p11 = scmp.ne.s32.totalorder %s16438_s2, %s15318_s18  ;;  %p15324_p13 = scmp.lt.s32.totalorder %s15318_s18, %s15318_s18 }
  0x88   :  { %p15325_p0 = por %p15324_p13, %p15323_p12 }
  0x8a   :  { %p15326_p1 = pnand %p15325_p0, %p15319_p11 }
  0x8c   :  { %15329 = shalt.err (!%p15326_p1)
}
  0x8d   :  { %197 = dma.hbm_to_vmem [thread:$0]  %s16241_s6, 4096, %s16438_s2, [#allocation9], %s16126_s11, %s16126_s11, %s16127_s15  }
  0x8e   :  { %s16128_s14 = smov [#allocation11]   ;;  %s16129_s23 = smov [#allocation14]  }
  0x8f   :  { %s217_s22 = sshll.u32 %s16128_s14, 4  ;;  %s251_s26 = sshll.u32 %s16129_s23, 4  ;;  %s218_s22 = int_to_ptr.vmem [resolvable:$true] %s217_s22  ;;  %s16459_s26 = int_to_ptr.vmem [resolvable:$true] %s251_s26 }
  0x90   :  { %s15330_s0 = scalar_lea.hbm %s16256_s27, 32 }
  0x91   :  { %p15331_p2 = scmp.ne.s32.totalorder %s16256_s27, %s15330_s0  ;;  %p15334_p3 = scmp.lt.u32.totalorder %s15330_s0, %s16256_s27 }
  0x93   :  { %p15336_p4 = pnand %p15334_p3, %p15331_p2 }
  0x95   :  { %15339 = shalt.err (!%p15336_p4)
}
  0x96   :  { %s15340_s28 = scalar_lea.vmem %s218_s22, 32  ;;  %p15345_p6 = scmp.lt.s32.totalorder %s218_s22, %s218_s22 }
  0x97   :  { %p15341_p5 = scmp.ne.s32.totalorder %s218_s22, %s15340_s28  ;;  %p15346_p7 = scmp.lt.s32.totalorder %s15340_s28, %s15340_s28 }
  0x99   :  { %p15347_p8 = por %p15346_p7, %p15345_p6 }
  0x9b   :  { %p15348_p9 = pnand %p15347_p8, %p15341_p5 }
  0x9d   :  { %15351 = shalt.err (!%p15348_p9)
}
  0x9e   :  { %s16130_s6 = smov 16   ;;  %s16131_s1 = smov 1  }
  0x9f   :  { %223 = dma.hbm_to_vmem [thread:$0]  %s16256_s27, 32, %s218_s22, [#allocation12], %s16130_s6, %s16130_s6, %s16131_s1  }
  0xa0   :  { %s15352_s2 = scalar_lea.hbm %s16291_s4, 4096 }
  0xa1   :  { %p15353_p10 = scmp.ne.s32.totalorder %s16291_s4, %s15352_s2  ;;  %p15356_p11 = scmp.lt.u32.totalorder %s15352_s2, %s16291_s4 }
  0xa3   :  { %p15358_p12 = pnand %p15356_p11, %p15353_p10 }
  0xa5   :  { %15361 = shalt.err (!%p15358_p12)
}
  0xa6   :  { %s15362_s7 = scalar_lea.vmem %s16459_s26, 4096  ;;  %p15367_p0 = scmp.lt.s32.totalorder %s16459_s26, %s16459_s26 }
  0xa7   :  { %p15363_p13 = scmp.ne.s32.totalorder %s16459_s26, %s15362_s7  ;;  %p15368_p1 = scmp.lt.s32.totalorder %s15362_s7, %s15362_s7 }
  0xa9   :  { %p15369_p2 = por %p15368_p1, %p15367_p0 }
  0xab   :  { %p15370_p3 = pnand %p15369_p2, %p15363_p13 }
  0xad   :  { %15373 = shalt.err (!%p15370_p3)
}
  0xae   :  { %257 = dma.hbm_to_vmem [thread:$0]  %s16291_s4, 4096, %s16459_s26, [#allocation15], %s16126_s11, %s16126_s11, %s16127_s15  }
  0xaf   :  { %s16132_s27 = smov [#allocation17]   ;;  %s16133_s16 = smov [#allocation20]  }
  0xb0   :  { %s275_s10 = sshll.u32 %s16132_s27, 4  ;;  %s299_s18 = sshll.u32 %s16133_s16, 4  ;;  %s276_s10 = int_to_ptr.vmem [resolvable:$true] %s275_s10  ;;  %s16480_s18 = int_to_ptr.vmem [resolvable:$true] %s299_s18 }
  0xb1   :  { %s15374_s14 = scalar_lea.hbm %s16301_s9, 4096 }
  0xb2   :  { %p15375_p4 = scmp.ne.s32.totalorder %s16301_s9, %s15374_s14  ;;  %p15378_p5 = scmp.lt.u32.totalorder %s15374_s14, %s16301_s9 }
  0xb4   :  { %p15380_p6 = pnand %p15378_p5, %p15375_p4 }
  0xb6   :  { %15383 = shalt.err (!%p15380_p6)
}
  0xb7   :  { %s15384_s22 = scalar_lea.vmem %s276_s10, 4096  ;;  %p15389_p8 = scmp.lt.s32.totalorder %s276_s10, %s276_s10 }
  0xb8   :  { %p15385_p7 = scmp.ne.s32.totalorder %s276_s10, %s15384_s22  ;;  %p15390_p9 = scmp.lt.s32.totalorder %s15384_s22, %s15384_s22 }
  0xba   :  { %p15391_p10 = por %p15390_p9, %p15389_p8 }
  0xbc   :  { %p15392_p11 = pnand %p15391_p10, %p15385_p7 }
  0xbe   :  { %15395 = shalt.err (!%p15392_p11)
}
  0xbf   :  { %281 = dma.hbm_to_vmem [thread:$0]  %s16301_s9, 4096, %s276_s10, [#allocation18], %s16126_s11, %s16126_s11, %s16127_s15  }
  0xc0   :  { %s15396_s4 = scalar_lea.hbm %s16311_s12, 4096 }
  0xc1   :  { %p15397_p12 = scmp.ne.s32.totalorder %s16311_s12, %s15396_s4  ;;  %p15400_p13 = scmp.lt.u32.totalorder %s15396_s4, %s16311_s12 }
  0xc3   :  { %p15402_p0 = pnand %p15400_p13, %p15397_p12 }
  0xc5   :  { %15405 = shalt.err (!%p15402_p0)
}
  0xc6   :  { %s15406_s23 = scalar_lea.vmem %s16480_s18, 4096  ;;  %p15411_p2 = scmp.lt.s32.totalorder %s16480_s18, %s16480_s18 }
  0xc7   :  { %p15407_p1 = scmp.ne.s32.totalorder %s16480_s18, %s15406_s23  ;;  %p15412_p3 = scmp.lt.s32.totalorder %s15406_s23, %s15406_s23 }
  0xc9   :  { %p15413_p4 = por %p15412_p3, %p15411_p2 }
  0xcb   :  { %p15414_p5 = pnand %p15413_p4, %p15407_p1 }
  0xcd   :  { %15417 = shalt.err (!%p15414_p5)
}
  0xce   :  { %305 = dma.hbm_to_vmem [thread:$0]  %s16311_s12, 4096, %s16480_s18, [#allocation21], %s16126_s11, %s16126_s11, %s16127_s15  }
  0xcf   :  { %s16134_s9 = smov [#allocation23]   ;;  %s16135_s0 = smov [#allocation26]  }
  0xd0   :  { %s323_s26 = sshll.u32 %s16134_s9, 4  ;;  %s347_s28 = sshll.u32 %s16135_s0, 4  ;;  %s324_s26 = int_to_ptr.vmem [resolvable:$true] %s323_s26  ;;  %s16501_s28 = int_to_ptr.vmem [resolvable:$true] %s347_s28 }
  0xd1   :  { %s15418_s2 = scalar_lea.hbm %s16321_s21, 4096 }
  0xd2   :  { %p15419_p6 = scmp.ne.s32.totalorder %s16321_s21, %s15418_s2  ;;  %p15422_p7 = scmp.lt.u32.totalorder %s15418_s2, %s16321_s21 }
  0xd4   :  { %p15424_p8 = pnand %p15422_p7, %p15419_p6 }
  0xd6   :  { %15427 = shalt.err (!%p15424_p8)
}
  0xd7   :  { %s15428_s7 = scalar_lea.vmem %s324_s26, 4096  ;;  %p15433_p10 = scmp.lt.s32.totalorder %s324_s26, %s324_s26 }
  0xd8   :  { %p15429_p9 = scmp.ne.s32.totalorder %s324_s26, %s15428_s7  ;;  %p15434_p11 = scmp.lt.s32.totalorder %s15428_s7, %s15428_s7 }
  0xda   :  { %p15435_p12 = por %p15434_p11, %p15433_p10 }
  0xdc   :  { %p15436_p13 = pnand %p15435_p12, %p15429_p9 }
  0xde   :  { %15439 = shalt.err (!%p15436_p13)
}
  0xdf   :  { %329 = dma.hbm_to_vmem [thread:$0]  %s16321_s21, 4096, %s324_s26, [#allocation24], %s16126_s11, %s16126_s11, %s16127_s15  }
  0xe0   :  { %s15440_s12 = scalar_lea.hbm %s16331_s8, 4096 }
  0xe1   :  { %p15441_p0 = scmp.ne.s32.totalorder %s16331_s8, %s15440_s12  ;;  %p15444_p1 = scmp.lt.u32.totalorder %s15440_s12, %s16331_s8 }
  0xe3   :  { %p15446_p2 = pnand %p15444_p1, %p15441_p0 }
  0xe5   :  { %15449 = shalt.err (!%p15446_p2)
}
  0xe6   :  { %s15450_s27 = scalar_lea.vmem %s16501_s28, 4096  ;;  %p15455_p4 = scmp.lt.s32.totalorder %s16501_s28, %s16501_s28 }
  0xe7   :  { %p15451_p3 = scmp.ne.s32.totalorder %s16501_s28, %s15450_s27  ;;  %p15456_p5 = scmp.lt.s32.totalorder %s15450_s27, %s15450_s27 }
  0xe9   :  { %p15457_p6 = por %p15456_p5, %p15455_p4 }
  0xeb   :  { %p15458_p7 = pnand %p15457_p6, %p15451_p3 }
  0xed   :  { %15461 = shalt.err (!%p15458_p7)
}
  0xee   :  { %353 = dma.hbm_to_vmem [thread:$0]  %s16331_s8, 4096, %s16501_s28, [#allocation27], %s16126_s11, %s16126_s11, %s16127_s15  }
  0xef   :  { %s16136_s21 = smov [#allocation29]   ;;  %s16137_s16 = smov [#allocation32]  }
  0xf0   :  { %s371_s10 = sshll.u32 %s16136_s21, 4  ;;  %s395_s18 = sshll.u32 %s16137_s16, 4  ;;  %s372_s10 = int_to_ptr.vmem [resolvable:$true] %s371_s10  ;;  %s16522_s18 = int_to_ptr.vmem [resolvable:$true] %s395_s18 }
  0xf1   :  { %s15462_s14 = scalar_lea.hbm %s16341_s5, 4096 }
  0xf2   :  { %p15463_p8 = scmp.ne.s32.totalorder %s16341_s5, %s15462_s14  ;;  %p15466_p9 = scmp.lt.u32.totalorder %s15462_s14, %s16341_s5 }
  0xf4   :  { %p15468_p10 = pnand %p15466_p9, %p15463_p8 }
  0xf6   :  { %15471 = shalt.err (!%p15468_p10)
}
  0xf7   :  { %s15472_s22 = scalar_lea.vmem %s372_s10, 4096  ;;  %p15477_p12 = scmp.lt.s32.totalorder %s372_s10, %s372_s10 }
  0xf8   :  { %p15473_p11 = scmp.ne.s32.totalorder %s372_s10, %s15472_s22  ;;  %p15478_p13 = scmp.lt.s32.totalorder %s15472_s22, %s15472_s22 }
  0xfa   :  { %p15479_p0 = por %p15478_p13, %p15477_p12 }
  0xfc   :  { %p15480_p1 = pnand %p15479_p0, %p15473_p11 }
  0xfe   :  { %15483 = shalt.err (!%p15480_p1)
}
  0xff   :  { %377 = dma.hbm_to_vmem [thread:$0]  %s16341_s5, 4096, %s372_s10, [#allocation30], %s16126_s11, %s16126_s11, %s16127_s15  }
 0x100   :  { %s15484_s8 = scalar_lea.hbm %s16351_s30, 4096 }
 0x101   :  { %p15485_p2 = scmp.ne.s32.totalorder %s16351_s30, %s15484_s8  ;;  %p15488_p3 = scmp.lt.u32.totalorder %s15484_s8, %s16351_s30 }
 0x103   :  { %p15490_p4 = pnand %p15488_p3, %p15485_p2 }
 0x105   :  { %15493 = shalt.err (!%p15490_p4)
}
 0x106   :  { %s15494_s4 = scalar_lea.vmem %s16522_s18, 4096  ;;  %p15499_p6 = scmp.lt.s32.totalorder %s16522_s18, %s16522_s18 }
 0x107   :  { %p15495_p5 = scmp.ne.s32.totalorder %s16522_s18, %s15494_s4  ;;  %p15500_p7 = scmp.lt.s32.totalorder %s15494_s4, %s15494_s4 }
 0x109   :  { %p15501_p8 = por %p15500_p7, %p15499_p6 }
 0x10b   :  { %p15502_p9 = pnand %p15501_p8, %p15495_p5 }
 0x10d   :  { %15505 = shalt.err (!%p15502_p9)
}
 0x10e   :  { %401 = dma.hbm_to_vmem [thread:$0]  %s16351_s30, 4096, %s16522_s18, [#allocation33], %s16126_s11, %s16126_s11, %s16127_s15  }
 0x10f   :  { %s16138_s5 = smov [#allocation35]   ;;  %s16139_s9 = smov [#allocation38]  }
 0x110   :  { %s419_s23 = sshll.u32 %s16138_s5, 4  ;;  %s443_s26 = sshll.u32 %s16139_s9, 4  ;;  %s420_s23 = int_to_ptr.vmem [resolvable:$true] %s419_s23  ;;  %s16543_s26 = int_to_ptr.vmem [resolvable:$true] %s443_s26 }
 0x111   :  { %s15506_s0 = scalar_lea.hbm %s16361_s29, 4096 }
 0x112   :  { %p15507_p10 = scmp.ne.s32.totalorder %s16361_s29, %s15506_s0  ;;  %p15510_p11 = scmp.lt.u32.totalorder %s15506_s0, %s16361_s29 }
 0x114   :  { %p15512_p12 = pnand %p15510_p11, %p15507_p10 }
 0x116   :  { %15515 = shalt.err (!%p15512_p12)
}
 0x117   :  { %s15516_s28 = scalar_lea.vmem %s420_s23, 4096  ;;  %p15521_p0 = scmp.lt.s32.totalorder %s420_s23, %s420_s23 }
 0x118   :  { %p15517_p13 = scmp.ne.s32.totalorder %s420_s23, %s15516_s28  ;;  %p15522_p1 = scmp.lt.s32.totalorder %s15516_s28, %s15516_s28 }
 0x11a   :  { %p15523_p2 = por %p15522_p1, %p15521_p0 }
 0x11c   :  { %p15524_p3 = pnand %p15523_p2, %p15517_p13 }
 0x11e   :  { %15527 = shalt.err (!%p15524_p3)
}
 0x11f   :  { %425 = dma.hbm_to_vmem [thread:$0]  %s16361_s29, 4096, %s420_s23, [#allocation36], %s16126_s11, %s16126_s11, %s16127_s15  }
 0x120   :  { %s15528_s30 = scalar_lea.hbm %s16371_s17, 32 }
 0x121   :  { %p15529_p4 = scmp.ne.s32.totalorder %s16371_s17, %s15528_s30  ;;  %p15532_p5 = scmp.lt.u32.totalorder %s15528_s30, %s16371_s17 }
 0x123   :  { %p15534_p6 = pnand %p15532_p5, %p15529_p4 }
 0x125   :  { %15537 = shalt.err (!%p15534_p6)
}
 0x126   :  { %s15538_s2 = scalar_lea.vmem %s16543_s26, 32  ;;  %p15543_p8 = scmp.lt.s32.totalorder %s16543_s26, %s16543_s26 }
 0x127   :  { %p15539_p7 = scmp.ne.s32.totalorder %s16543_s26, %s15538_s2  ;;  %p15544_p9 = scmp.lt.s32.totalorder %s15538_s2, %s15538_s2 }
 0x129   :  { %p15545_p10 = por %p15544_p9, %p15543_p8 }
 0x12b   :  { %p15546_p11 = pnand %p15545_p10, %p15539_p7 }
 0x12d   :  { %15549 = shalt.err (!%p15546_p11)
}
 0x12e   :  { %449 = dma.hbm_to_vmem [thread:$0]  %s16371_s17, 32, %s16543_s26, [#allocation39], %s16130_s6, %s16130_s6, %s16131_s1  }
 0x12f   :  { %s16140_s29 = smov [#allocation41]   ;;  %s16141_s12 = smov [#allocation44]  }
 0x130   :  { %s467_s7 = sshll.u32 %s16140_s29, 4  ;;  %s491_s27 = sshll.u32 %s16141_s12, 4  ;;  %s468_s7 = int_to_ptr.vmem [resolvable:$true] %s467_s7  ;;  %s16564_s27 = int_to_ptr.vmem [resolvable:$true] %s491_s27 }
 0x131   :  { %s15550_s21 = scalar_lea.hbm %s16381_s25, 32 }
 0x132   :  { %p15551_p12 = scmp.ne.s32.totalorder %s16381_s25, %s15550_s21  ;;  %p15554_p13 = scmp.lt.u32.totalorder %s15550_s21, %s16381_s25 }
 0x134   :  { %p15556_p0 = pnand %p15554_p13, %p15551_p12 }
 0x136   :  { %15559 = shalt.err (!%p15556_p0)
}
 0x137   :  { %s15560_s10 = scalar_lea.vmem %s468_s7, 32  ;;  %p15565_p2 = scmp.lt.s32.totalorder %s468_s7, %s468_s7 }
 0x138   :  { %p15561_p1 = scmp.ne.s32.totalorder %s468_s7, %s15560_s10  ;;  %p15566_p3 = scmp.lt.s32.totalorder %s15560_s10, %s15560_s10 }
 0x13a   :  { %p15567_p4 = por %p15566_p3, %p15565_p2 }
 0x13c   :  { %p15568_p5 = pnand %p15567_p4, %p15561_p1 }
 0x13e   :  { %15571 = shalt.err (!%p15568_p5)
}
 0x13f   :  { %473 = dma.hbm_to_vmem [thread:$0]  %s16381_s25, 32, %s468_s7, [#allocation42], %s16130_s6, %s16130_s6, %s16131_s1  }
 0x140   :  { %s15572_s17 = scalar_lea.hbm %s16391_s20, 32 }
 0x141   :  { %p15573_p6 = scmp.ne.s32.totalorder %s16391_s20, %s15572_s17  ;;  %p15576_p7 = scmp.lt.u32.totalorder %s15572_s17, %s16391_s20 }
 0x143   :  { %p15578_p8 = pnand %p15576_p7, %p15573_p6 }
 0x145   :  { %15581 = shalt.err (!%p15578_p8)
}
 0x146   :  { %s15582_s16 = scalar_lea.vmem %s16564_s27, 32  ;;  %p15587_p10 = scmp.lt.s32.totalorder %s16564_s27, %s16564_s27 }
 0x147   :  { %p15583_p9 = scmp.ne.s32.totalorder %s16564_s27, %s15582_s16  ;;  %p15588_p11 = scmp.lt.s32.totalorder %s15582_s16, %s15582_s16 }
 0x149   :  { %p15589_p12 = por %p15588_p11, %p15587_p10 }
 0x14b   :  { %p15590_p13 = pnand %p15589_p12, %p15583_p9 }
 0x14d   :  { %15593 = shalt.err (!%p15590_p13)
}
 0x14e   :  { %s17698_s25 = sld [smem:[#allocation105_spill]]  ;;  %s16142_s18 = smov [#allocation47]  }
 0x14f   :  { %497 = dma.hbm_to_vmem [thread:$0]  %s16391_s20, 32, %s16564_s27, [#allocation45], %s16130_s6, %s16130_s6, %s16131_s1  }
 0x150   :  { %s515_s14 = sshll.u32 %s16142_s18, 4  ;;  %s16143_s22 = smov [#allocation2]   ;;  %s516_s14 = int_to_ptr.vmem [resolvable:$true] %s515_s14 }
 0x151   :  { %s149_s8 = sshll.u32 %s16143_s22, 4  ;;  %s150_s8 = int_to_ptr.vmem [resolvable:$true] %s149_s8 }
 0x154   :  { %s15594_s4 = scalar_lea.hbm %s17698_s25, 8192 }
 0x155   :  { %p15595_p0 = scmp.ne.s32.totalorder %s17698_s25, %s15594_s4  ;;  %p15598_p1 = scmp.lt.u32.totalorder %s15594_s4, %s17698_s25 }
 0x157   :  { %p15600_p2 = pnand %p15598_p1, %p15595_p0 }
 0x159   :  { %15603 = shalt.err (!%p15600_p2)
}
 0x15a   :  { %s15604_s5 = scalar_lea.vmem %s516_s14, 8192  ;;  %p15609_p4 = scmp.lt.s32.totalorder %s516_s14, %s516_s14 }
 0x15b   :  { %p15605_p3 = scmp.ne.s32.totalorder %s516_s14, %s15604_s5  ;;  %p15610_p5 = scmp.lt.s32.totalorder %s15604_s5, %s15604_s5 }
 0x15d   :  { %p15611_p6 = por %p15610_p5, %p15609_p4 }
 0x15f   :  { %p15612_p7 = pnand %p15611_p6, %p15605_p3 }
 0x161   :  { %15615 = shalt.err (!%p15612_p7)
}
 0x162   :  { %s16144_s23 = smov 256   ;;  %s17699_s20 = sld [smem:[#allocation81_spill]] }
 0x163   :  { %521 = dma.hbm_to_vmem [thread:$0]  %s17698_s25, 8192, %s516_s14, [#allocation48], %s16144_s23, %s16144_s23, %s16130_s6  }
 0x168   :  { %s15616_s9 = scalar_lea.hbm %s17699_s20, 4096 }
 0x169   :  { %p15617_p8 = scmp.ne.s32.totalorder %s17699_s20, %s15616_s9  ;;  %p15620_p9 = scmp.lt.u32.totalorder %s15616_s9, %s17699_s20 }
 0x16b   :  { %p15622_p10 = pnand %p15620_p9, %p15617_p8 }
 0x16d   :  { %15625 = shalt.err (!%p15622_p10)
}
 0x16e   :  { %s15626_s26 = scalar_lea.vmem %s150_s8, 4096  ;;  %p15631_p12 = scmp.lt.s32.totalorder %s150_s8, %s150_s8 }
 0x16f   :  { %p15627_p11 = scmp.ne.s32.totalorder %s150_s8, %s15626_s26  ;;  %p15632_p13 = scmp.lt.s32.totalorder %s15626_s26, %s15626_s26 }
 0x171   :  { %p15633_p0 = por %p15632_p13, %p15631_p12 }
 0x173   :  { %p15634_p1 = pnand %p15633_p0, %p15627_p11 }
 0x175   :  { %15637 = shalt.err (!%p15634_p1)
}
 0x176   :  { %s17700_s0 = sld [smem:[#allocation84_spill]]  ;;  %s16145_s28 = smov [#allocation7]  }
 0x177   :  { %155 = dma.hbm_to_vmem [thread:$0]  %s17699_s20, 4096, %s150_s8, [#allocation3], %s16126_s11, %s16126_s11, %s16127_s15  }
 0x178   :  { %s177_s30 = sshll.u32 %s16145_s28, 4  ;;  %s16146_s2 = smov [#allocation10]   ;;  %s178_s30 = int_to_ptr.vmem [resolvable:$true] %s177_s30 }
 0x179   :  { %s205_s29 = sshll.u32 %s16146_s2, 4  ;;  %s206_s29 = int_to_ptr.vmem [resolvable:$true] %s205_s29 }
 0x17c   :  { %s15638_s7 = scalar_lea.hbm %s17700_s0, 4096 }
 0x17d   :  { %p15639_p2 = scmp.ne.s32.totalorder %s17700_s0, %s15638_s7  ;;  %p15642_p3 = scmp.lt.u32.totalorder %s15638_s7, %s17700_s0 }
 0x17f   :  { %p15644_p4 = pnand %p15642_p3, %p15639_p2 }
 0x181   :  { %15647 = shalt.err (!%p15644_p4)
}
 0x182   :  { %s15648_s12 = scalar_lea.vmem %s178_s30, 4096  ;;  %p15653_p6 = scmp.lt.s32.totalorder %s178_s30, %s178_s30 }
 0x183   :  { %p15649_p5 = scmp.ne.s32.totalorder %s178_s30, %s15648_s12  ;;  %p15654_p7 = scmp.lt.s32.totalorder %s15648_s12, %s15648_s12 }
 0x185   :  { %p15655_p8 = por %p15654_p7, %p15653_p6 }
 0x187   :  { %p15656_p9 = pnand %p15655_p8, %p15649_p5 }
 0x189   :  { %15659 = shalt.err (!%p15656_p9)
}
 0x18a   :  { %s17701_s27 = sld [smem:[#allocation87_spill]] }
 0x18b   :  { %183 = dma.hbm_to_vmem [thread:$0]  %s17700_s0, 4096, %s178_s30, [#allocation6], %s16126_s11, %s16126_s11, %s16127_s15  }
 0x190   :  { %s15660_s21 = scalar_lea.hbm %s17701_s27, 32 }
 0x191   :  { %p15661_p10 = scmp.ne.s32.totalorder %s17701_s27, %s15660_s21  ;;  %p15664_p11 = scmp.lt.u32.totalorder %s15660_s21, %s17701_s27 }
 0x193   :  { %p15666_p12 = pnand %p15664_p11, %p15661_p10 }
 0x195   :  { %15669 = shalt.err (!%p15666_p12)
}
 0x196   :  { %s15670_s10 = scalar_lea.vmem %s206_s29, 32  ;;  %p15675_p0 = scmp.lt.s32.totalorder %s206_s29, %s206_s29 }
 0x197   :  { %p15671_p13 = scmp.ne.s32.totalorder %s206_s29, %s15670_s10  ;;  %p15676_p1 = scmp.lt.s32.totalorder %s15670_s10, %s15670_s10 }
 0x199   :  { %p15677_p2 = por %p15676_p1, %p15675_p0 }
 0x19b   :  { %p15678_p3 = pnand %p15677_p2, %p15671_p13 }
 0x19d   :  { %15681 = shalt.err (!%p15678_p3)
}
 0x19e   :  { %s17702_s17 = sld [smem:[#allocation90_spill]]  ;;  %s16147_s16 = smov [#allocation13]  }
 0x19f   :  { %211 = dma.hbm_to_vmem [thread:$0]  %s17701_s27, 32, %s206_s29, [#allocation9], %s16130_s6, %s16130_s6, %s16131_s1  }
 0x1a0   :  { %s233_s25 = sshll.u32 %s16147_s16, 4  ;;  %s16148_s18 = smov [#allocation16]   ;;  %s234_s25 = int_to_ptr.vmem [resolvable:$true] %s233_s25 }
 0x1a1   :  { %s263_s14 = sshll.u32 %s16148_s18, 4  ;;  %s264_s14 = int_to_ptr.vmem [resolvable:$true] %s263_s14 }
 0x1a4   :  { %s15682_s22 = scalar_lea.hbm %s17702_s17, 8192 }
 0x1a5   :  { %p15683_p4 = scmp.ne.s32.totalorder %s17702_s17, %s15682_s22  ;;  %p15686_p5 = scmp.lt.u32.totalorder %s15682_s22, %s17702_s17 }
 0x1a7   :  { %p15688_p6 = pnand %p15686_p5, %p15683_p4 }
 0x1a9   :  { %15691 = shalt.err (!%p15688_p6)
}
 0x1aa   :  { %s15692_s8 = scalar_lea.vmem %s234_s25, 8192  ;;  %p15697_p8 = scmp.lt.s32.totalorder %s234_s25, %s234_s25 }
 0x1ab   :  { %p15693_p7 = scmp.ne.s32.totalorder %s234_s25, %s15692_s8  ;;  %p15698_p9 = scmp.lt.s32.totalorder %s15692_s8, %s15692_s8 }
 0x1ad   :  { %p15699_p10 = por %p15698_p9, %p15697_p8 }
 0x1af   :  { %p15700_p11 = pnand %p15699_p10, %p15693_p7 }
 0x1b1   :  { %15703 = shalt.err (!%p15700_p11)
}
 0x1b2   :  { %s17703_s4 = sld [smem:[#allocation94_spill]] }
 0x1b3   :  { %239 = dma.hbm_to_vmem [thread:$0]  %s17702_s17, 8192, %s234_s25, [#allocation12], %s16126_s11, %s16126_s11, %s16127_s15  }
 0x1b8   :  { %s15704_s5 = scalar_lea.hbm %s17703_s4, 32 }
 0x1b9   :  { %p15705_p12 = scmp.ne.s32.totalorder %s17703_s4, %s15704_s5  ;;  %p15708_p13 = scmp.lt.u32.totalorder %s15704_s5, %s17703_s4 }
 0x1bb   :  { %p15710_p0 = pnand %p15708_p13, %p15705_p12 }
 0x1bd   :  { %15713 = shalt.err (!%p15710_p0)
}
 0x1be   :  { %s15714_s23 = scalar_lea.vmem %s264_s14, 32  ;;  %p15719_p2 = scmp.lt.s32.totalorder %s264_s14, %s264_s14 }
 0x1bf   :  { %p15715_p1 = scmp.ne.s32.totalorder %s264_s14, %s15714_s23  ;;  %p15720_p3 = scmp.lt.s32.totalorder %s15714_s23, %s15714_s23 }
 0x1c1   :  { %p15721_p4 = por %p15720_p3, %p15719_p2 }
 0x1c3   :  { %p15722_p5 = pnand %p15721_p4, %p15715_p1 }
 0x1c5   :  { %15725 = shalt.err (!%p15722_p5)
}
 0x1c6   :  { %s17704_s20 = sld [smem:[#allocation95_spill]]  ;;  %s16149_s9 = smov [#allocation19]  }
 0x1c7   :  { %269 = dma.hbm_to_vmem [thread:$0]  %s17703_s4, 32, %s264_s14, [#allocation15], %s16130_s6, %s16130_s6, %s16131_s1  }
 0x1c8   :  { %s287_s26 = sshll.u32 %s16149_s9, 4  ;;  %s16150_s0 = smov [#allocation22]   ;;  %s288_s26 = int_to_ptr.vmem [resolvable:$true] %s287_s26 }
 0x1c9   :  { %s311_s28 = sshll.u32 %s16150_s0, 4  ;;  %s312_s28 = int_to_ptr.vmem [resolvable:$true] %s311_s28 }
 0x1cc   :  { %s15726_s30 = scalar_lea.hbm %s17704_s20, 32 }
 0x1cd   :  { %p15727_p6 = scmp.ne.s32.totalorder %s17704_s20, %s15726_s30  ;;  %p15730_p7 = scmp.lt.u32.totalorder %s15726_s30, %s17704_s20 }
 0x1cf   :  { %p15732_p8 = pnand %p15730_p7, %p15727_p6 }
 0x1d1   :  { %15735 = shalt.err (!%p15732_p8)
}
 0x1d2   :  { %s15736_s2 = scalar_lea.vmem %s288_s26, 32  ;;  %p15741_p10 = scmp.lt.s32.totalorder %s288_s26, %s288_s26 }
 0x1d3   :  { %p15737_p9 = scmp.ne.s32.totalorder %s288_s26, %s15736_s2  ;;  %p15742_p11 = scmp.lt.s32.totalorder %s15736_s2, %s15736_s2 }
 0x1d5   :  { %p15743_p12 = por %p15742_p11, %p15741_p10 }
 0x1d7   :  { %p15744_p13 = pnand %p15743_p12, %p15737_p9 }
 0x1d9   :  { %15747 = shalt.err (!%p15744_p13)
}
 0x1da   :  { %s17705_s29 = sld [smem:[#allocation96_spill]] }
 0x1db   :  { %293 = dma.hbm_to_vmem [thread:$0]  %s17704_s20, 32, %s288_s26, [#allocation18], %s16130_s6, %s16130_s6, %s16131_s1  }
 0x1e0   :  { %s15748_s7 = scalar_lea.hbm %s17705_s29, 32 }
 0x1e1   :  { %p15749_p0 = scmp.ne.s32.totalorder %s17705_s29, %s15748_s7  ;;  %p15752_p1 = scmp.lt.u32.totalorder %s15748_s7, %s17705_s29 }
 0x1e3   :  { %p15754_p2 = pnand %p15752_p1, %p15749_p0 }
 0x1e5   :  { %15757 = shalt.err (!%p15754_p2)
}
 0x1e6   :  { %s15758_s12 = scalar_lea.vmem %s312_s28, 32  ;;  %p15763_p4 = scmp.lt.s32.totalorder %s312_s28, %s312_s28 }
 0x1e7   :  { %p15759_p3 = scmp.ne.s32.totalorder %s312_s28, %s15758_s12  ;;  %p15764_p5 = scmp.lt.s32.totalorder %s15758_s12, %s15758_s12 }
 0x1e9   :  { %p15765_p6 = por %p15764_p5, %p15763_p4 }
 0x1eb   :  { %p15766_p7 = pnand %p15765_p6, %p15759_p3 }
 0x1ed   :  { %15769 = shalt.err (!%p15766_p7)
}
 0x1ee   :  { %s17706_s27 = sld [smem:[#allocation97_spill]]  ;;  %s16151_s21 = smov [#allocation25]  }
 0x1ef   :  { %317 = dma.hbm_to_vmem [thread:$0]  %s17705_s29, 32, %s312_s28, [#allocation21], %s16130_s6, %s16130_s6, %s16131_s1  }
 0x1f0   :  { %s335_s10 = sshll.u32 %s16151_s21, 4  ;;  %s16152_s17 = smov [#allocation28]   ;;  %s336_s10 = int_to_ptr.vmem [resolvable:$true] %s335_s10 }
 0x1f1   :  { %s359_s16 = sshll.u32 %s16152_s17, 4  ;;  %s360_s16 = int_to_ptr.vmem [resolvable:$true] %s359_s16 }
 0x1f4   :  { %s15770_s25 = scalar_lea.hbm %s17706_s27, 32 }
 0x1f5   :  { %p15771_p8 = scmp.ne.s32.totalorder %s17706_s27, %s15770_s25  ;;  %p15774_p9 = scmp.lt.u32.totalorder %s15770_s25, %s17706_s27 }
 0x1f7   :  { %p15776_p10 = pnand %p15774_p9, %p15771_p8 }
 0x1f9   :  { %15779 = shalt.err (!%p15776_p10)
}
 0x1fa   :  { %s15780_s18 = scalar_lea.vmem %s336_s10, 32  ;;  %p15785_p12 = scmp.lt.s32.totalorder %s336_s10, %s336_s10 }
 0x1fb   :  { %p15781_p11 = scmp.ne.s32.totalorder %s336_s10, %s15780_s18  ;;  %p15786_p13 = scmp.lt.s32.totalorder %s15780_s18, %s15780_s18 }
 0x1fd   :  { %p15787_p0 = por %p15786_p13, %p15785_p12 }
 0x1ff   :  { %p15788_p1 = pnand %p15787_p0, %p15781_p11 }
 0x201   :  { %15791 = shalt.err (!%p15788_p1)
}
 0x202   :  { %s17707_s14 = sld [smem:[#allocation98_spill]] }
 0x203   :  { %341 = dma.hbm_to_vmem [thread:$0]  %s17706_s27, 32, %s336_s10, [#allocation24], %s16130_s6, %s16130_s6, %s16131_s1  }
 0x208   :  { %s15792_s22 = scalar_lea.hbm %s17707_s14, 32 }
 0x209   :  { %p15793_p2 = scmp.ne.s32.totalorder %s17707_s14, %s15792_s22  ;;  %p15796_p3 = scmp.lt.u32.totalorder %s15792_s22, %s17707_s14 }
 0x20b   :  { %p15798_p4 = pnand %p15796_p3, %p15793_p2 }
 0x20d   :  { %15801 = shalt.err (!%p15798_p4)
}
 0x20e   :  { %s15802_s8 = scalar_lea.vmem %s360_s16, 32  ;;  %p15807_p6 = scmp.lt.s32.totalorder %s360_s16, %s360_s16 }
 0x20f   :  { %p15803_p5 = scmp.ne.s32.totalorder %s360_s16, %s15802_s8  ;;  %p15808_p7 = scmp.lt.s32.totalorder %s15802_s8, %s15802_s8 }
 0x211   :  { %p15809_p8 = por %p15808_p7, %p15807_p6 }
 0x213   :  { %p15810_p9 = pnand %p15809_p8, %p15803_p5 }
 0x215   :  { %15813 = shalt.err (!%p15810_p9)
}
 0x216   :  { %s17708_s4 = sld [smem:[#allocation99_spill]]  ;;  %s16153_s5 = smov [#allocation31]  }
 0x217   :  { %365 = dma.hbm_to_vmem [thread:$0]  %s17707_s14, 32, %s360_s16, [#allocation27], %s16130_s6, %s16130_s6, %s16131_s1  }
 0x218   :  { %s383_s23 = sshll.u32 %s16153_s5, 4  ;;  %s16154_s20 = smov [#allocation34]   ;;  %s384_s23 = int_to_ptr.vmem [resolvable:$true] %s383_s23 }
 0x219   :  { %s407_s9 = sshll.u32 %s16154_s20, 4  ;;  %s408_s9 = int_to_ptr.vmem [resolvable:$true] %s407_s9 }
 0x21c   :  { %s15814_s26 = scalar_lea.hbm %s17708_s4, 32 }
 0x21d   :  { %p15815_p10 = scmp.ne.s32.totalorder %s17708_s4, %s15814_s26  ;;  %p15818_p11 = scmp.lt.u32.totalorder %s15814_s26, %s17708_s4 }
 0x21f   :  { %p15820_p12 = pnand %p15818_p11, %p15815_p10 }
 0x221   :  { %15823 = shalt.err (!%p15820_p12)
}
 0x222   :  { %s15824_s0 = scalar_lea.vmem %s384_s23, 32  ;;  %p15829_p0 = scmp.lt.s32.totalorder %s384_s23, %s384_s23 }
 0x223   :  { %p15825_p13 = scmp.ne.s32.totalorder %s384_s23, %s15824_s0  ;;  %p15830_p1 = scmp.lt.s32.totalorder %s15824_s0, %s15824_s0 }
 0x225   :  { %p15831_p2 = por %p15830_p1, %p15829_p0 }
 0x227   :  { %p15832_p3 = pnand %p15831_p2, %p15825_p13 }
 0x229   :  { %15835 = shalt.err (!%p15832_p3)
}
 0x22a   :  { %s17709_s28 = sld [smem:[#allocation100_spill]] }
 0x22b   :  { %389 = dma.hbm_to_vmem [thread:$0]  %s17708_s4, 32, %s384_s23, [#allocation30], %s16130_s6, %s16130_s6, %s16131_s1  }
 0x230   :  { %s15836_s30 = scalar_lea.hbm %s17709_s28, 32 }
 0x231   :  { %p15837_p4 = scmp.ne.s32.totalorder %s17709_s28, %s15836_s30  ;;  %p15840_p5 = scmp.lt.u32.totalorder %s15836_s30, %s17709_s28 }
 0x233   :  { %p15842_p6 = pnand %p15840_p5, %p15837_p4 }
 0x235   :  { %15845 = shalt.err (!%p15842_p6)
}
 0x236   :  { %s15846_s2 = scalar_lea.vmem %s408_s9, 32  ;;  %p15851_p8 = scmp.lt.s32.totalorder %s408_s9, %s408_s9 }
 0x237   :  { %p15847_p7 = scmp.ne.s32.totalorder %s408_s9, %s15846_s2  ;;  %p15852_p9 = scmp.lt.s32.totalorder %s15846_s2, %s15846_s2 }
 0x239   :  { %p15853_p10 = por %p15852_p9, %p15851_p8 }
 0x23b   :  { %p15854_p11 = pnand %p15853_p10, %p15847_p7 }
 0x23d   :  { %15857 = shalt.err (!%p15854_p11)
}
 0x23e   :  { %s17710_s29 = sld [smem:[#allocation101_spill]]  ;;  %s16155_s7 = smov [#allocation37]  }
 0x23f   :  { %413 = dma.hbm_to_vmem [thread:$0]  %s17709_s28, 32, %s408_s9, [#allocation33], %s16130_s6, %s16130_s6, %s16131_s1  }
 0x240   :  { %s431_s12 = sshll.u32 %s16155_s7, 4  ;;  %s16156_s27 = smov [#allocation40]   ;;  %s432_s12 = int_to_ptr.vmem [resolvable:$true] %s431_s12 }
 0x241   :  { %s455_s21 = sshll.u32 %s16156_s27, 4  ;;  %s456_s21 = int_to_ptr.vmem [resolvable:$true] %s455_s21 }
 0x244   :  { %s15858_s10 = scalar_lea.hbm %s17710_s29, 32 }
 0x245   :  { %p15859_p12 = scmp.ne.s32.totalorder %s17710_s29, %s15858_s10  ;;  %p15862_p13 = scmp.lt.u32.totalorder %s15858_s10, %s17710_s29 }
 0x247   :  { %p15864_p0 = pnand %p15862_p13, %p15859_p12 }
 0x249   :  { %15867 = shalt.err (!%p15864_p0)
}
 0x24a   :  { %s15868_s17 = scalar_lea.vmem %s432_s12, 32  ;;  %p15873_p2 = scmp.lt.s32.totalorder %s432_s12, %s432_s12 }
 0x24b   :  { %p15869_p1 = scmp.ne.s32.totalorder %s432_s12, %s15868_s17  ;;  %p15874_p3 = scmp.lt.s32.totalorder %s15868_s17, %s15868_s17 }
 0x24d   :  { %p15875_p4 = por %p15874_p3, %p15873_p2 }
 0x24f   :  { %p15876_p5 = pnand %p15875_p4, %p15869_p1 }
 0x251   :  { %15879 = shalt.err (!%p15876_p5)
}
 0x252   :  { %s17711_s16 = sld [smem:[#allocation102_spill]] }
 0x253   :  { %437 = dma.hbm_to_vmem [thread:$0]  %s17710_s29, 32, %s432_s12, [#allocation36], %s16130_s6, %s16130_s6, %s16131_s1  }
 0x258   :  { %s15880_s25 = scalar_lea.hbm %s17711_s16, 32 }
 0x259   :  { %p15881_p6 = scmp.ne.s32.totalorder %s17711_s16, %s15880_s25  ;;  %p15884_p7 = scmp.lt.u32.totalorder %s15880_s25, %s17711_s16 }
 0x25b   :  { %p15886_p8 = pnand %p15884_p7, %p15881_p6 }
 0x25d   :  { %15889 = shalt.err (!%p15886_p8)
}
 0x25e   :  { %s15890_s18 = scalar_lea.vmem %s456_s21, 32  ;;  %p15895_p10 = scmp.lt.s32.totalorder %s456_s21, %s456_s21 }
 0x25f   :  { %p15891_p9 = scmp.ne.s32.totalorder %s456_s21, %s15890_s18  ;;  %p15896_p11 = scmp.lt.s32.totalorder %s15890_s18, %s15890_s18 }
 0x261   :  { %p15897_p12 = por %p15896_p11, %p15895_p10 }
 0x263   :  { %p15898_p13 = pnand %p15897_p12, %p15891_p9 }
 0x265   :  { %15901 = shalt.err (!%p15898_p13)
}
 0x266   :  { %s17712_s14 = sld [smem:[#allocation103_spill]]  ;;  %s16157_s22 = smov [#allocation43]  }
 0x267   :  { %461 = dma.hbm_to_vmem [thread:$0]  %s17711_s16, 32, %s456_s21, [#allocation39], %s16130_s6, %s16130_s6, %s16131_s1  }
 0x268   :  { %s479_s8 = sshll.u32 %s16157_s22, 4  ;;  %s16158_s4 = smov [#allocation46]   ;;  %s480_s8 = int_to_ptr.vmem [resolvable:$true] %s479_s8 }
 0x269   :  { %s503_s5 = sshll.u32 %s16158_s4, 4  ;;  %s504_s5 = int_to_ptr.vmem [resolvable:$true] %s503_s5 }
 0x26c   :  { %s15902_s23 = scalar_lea.hbm %s17712_s14, 32 }
 0x26d   :  { %p15903_p0 = scmp.ne.s32.totalorder %s17712_s14, %s15902_s23  ;;  %p15906_p1 = scmp.lt.u32.totalorder %s15902_s23, %s17712_s14 }
 0x26f   :  { %p15908_p2 = pnand %p15906_p1, %p15903_p0 }
 0x271   :  { %15911 = shalt.err (!%p15908_p2)
}
 0x272   :  { %s15912_s20 = scalar_lea.vmem %s480_s8, 32  ;;  %p15917_p4 = scmp.lt.s32.totalorder %s480_s8, %s480_s8 }
 0x273   :  { %p15913_p3 = scmp.ne.s32.totalorder %s480_s8, %s15912_s20  ;;  %p15918_p5 = scmp.lt.s32.totalorder %s15912_s20, %s15912_s20 }
 0x275   :  { %p15919_p6 = por %p15918_p5, %p15917_p4 }
 0x277   :  { %p15920_p7 = pnand %p15919_p6, %p15913_p3 }
 0x279   :  { %15923 = shalt.err (!%p15920_p7)
}
 0x27a   :  { %s17713_s9 = sld [smem:[#allocation104_spill]] }
 0x27b   :  { %485 = dma.hbm_to_vmem [thread:$0]  %s17712_s14, 32, %s480_s8, [#allocation42], %s16130_s6, %s16130_s6, %s16131_s1  }
 0x280   :  { %s15924_s26 = scalar_lea.hbm %s17713_s9, 32 }
 0x281   :  { %p15925_p8 = scmp.ne.s32.totalorder %s17713_s9, %s15924_s26  ;;  %p15928_p9 = scmp.lt.u32.totalorder %s15924_s26, %s17713_s9 }
 0x283   :  { %p15930_p10 = pnand %p15928_p9, %p15925_p8 }
 0x285   :  { %15933 = shalt.err (!%p15930_p10)
}
 0x286   :  { %s15934_s0 = scalar_lea.vmem %s504_s5, 32  ;;  %p15939_p12 = scmp.lt.s32.totalorder %s504_s5, %s504_s5 }
 0x287   :  { %p15935_p11 = scmp.ne.s32.totalorder %s504_s5, %s15934_s0  ;;  %p15940_p13 = scmp.lt.s32.totalorder %s15934_s0, %s15934_s0 }
 0x289   :  { %p15941_p0 = por %p15940_p13, %p15939_p12 }
 0x28b   :  { %p15942_p1 = pnand %p15941_p0, %p15935_p11 }
 0x28d   :  { %15945 = shalt.err (!%p15942_p1)
}
 0x28e   :  { %s17714_s28 = sld [smem:[#allocation107_spill]]  ;;  %s16159_s30 = smov [#allocation49]  }
 0x28f   :  { %509 = dma.hbm_to_vmem [thread:$0]  %s17713_s9, 32, %s504_s5, [#allocation45], %s16130_s6, %s16130_s6, %s16131_s1  }
 0x290   :  { %s529_s2 = sshll.u32 %s16159_s30, 4  ;;  %s16160_s29 = smov [#allocation50]   ;;  %s530_s2 = int_to_ptr.vmem [resolvable:$true] %s529_s2 }
 0x291   :  { %s541_s7 = sshll.u32 %s16160_s29, 4  ;;  %s542_s7 = int_to_ptr.vmem [resolvable:$true] %s541_s7 }
 0x294   :  { %s15946_s12 = scalar_lea.hbm %s17714_s28, 8192 }
 0x295   :  { %p15947_p2 = scmp.ne.s32.totalorder %s17714_s28, %s15946_s12  ;;  %p15950_p3 = scmp.lt.u32.totalorder %s15946_s12, %s17714_s28 }
 0x297   :  { %p15952_p4 = pnand %p15950_p3, %p15947_p2 }
 0x299   :  { %15955 = shalt.err (!%p15952_p4)
}
 0x29a   :  { %s15956_s27 = scalar_lea.vmem %s530_s2, 8192  ;;  %p15961_p6 = scmp.lt.s32.totalorder %s530_s2, %s530_s2 }
 0x29b   :  { %p15957_p5 = scmp.ne.s32.totalorder %s530_s2, %s15956_s27  ;;  %p15962_p7 = scmp.lt.s32.totalorder %s15956_s27, %s15956_s27 }
 0x29d   :  { %p15963_p8 = por %p15962_p7, %p15961_p6 }
 0x29f   :  { %p15964_p9 = pnand %p15963_p8, %p15957_p5 }
 0x2a1   :  { %15967 = shalt.err (!%p15964_p9)
}
 0x2a2   :  { %s17715_s21 = sld [smem:[#allocation108_spill]] }
 0x2a3   :  { %535 = dma.hbm_to_vmem [thread:$0]  %s17714_s28, 8192, %s530_s2, [#allocation48], %s16126_s11, %s16126_s11, %s16127_s15  }
 0x2a8   :  { %s15968_s10 = scalar_lea.hbm %s17715_s21, 32 }
 0x2a9   :  { %p15969_p10 = scmp.ne.s32.totalorder %s17715_s21, %s15968_s10  ;;  %p15972_p11 = scmp.lt.u32.totalorder %s15968_s10, %s17715_s21 }
 0x2ab   :  { %p15974_p12 = pnand %p15972_p11, %p15969_p10 }
 0x2ad   :  { %15977 = shalt.err (!%p15974_p12)
}
 0x2ae   :  { %s15978_s17 = scalar_lea.vmem %s542_s7, 32  ;;  %p15983_p0 = scmp.lt.s32.totalorder %s542_s7, %s542_s7 }
 0x2af   :  { %p15979_p13 = scmp.ne.s32.totalorder %s542_s7, %s15978_s17  ;;  %p15984_p1 = scmp.lt.s32.totalorder %s15978_s17, %s15978_s17 }
 0x2b1   :  { %p15985_p2 = por %p15984_p1, %p15983_p0 }
 0x2b3   :  { %p15986_p3 = pnand %p15985_p2, %p15979_p13 }
 0x2b5   :  { %15989 = shalt.err (!%p15986_p3)
}
 0x2b6   :  { %547 = dma.hbm_to_vmem [thread:$0]  %s17715_s21, 32, %s542_s7, [#allocation51], %s16130_s6, %s16130_s6, %s16131_s1  }
 0x2b7   :  { %16034 = dma.done.wait [#allocation3], 4096  }
 0x2b8   :  { %16035 = vsyncadd [#allocation3], 4294963200 }
 0x2b9   :  { %16036 = dma.done.wait [#allocation6], 8192  }
 0x2ba   :  { %16037 = vsyncadd [#allocation6], 4294959104 }
 0x2bb   :  { %16038 = dma.done.wait [#allocation9], 4128  }
 0x2bc   :  { %16039 = vsyncadd [#allocation9], 4294963168 }
 0x2bd   :  { %16040 = dma.done.wait [#allocation12], 8224  }
 0x2be   :  { %16041 = vsyncadd [#allocation12], 4294959072 }
 0x2bf   :  { %16042 = dma.done.wait [#allocation15], 4128  }
 0x2c0   :  { %16043 = vsyncadd [#allocation15], 4294963168 }
 0x2c1   :  { %16044 = dma.done.wait [#allocation18], 4128  }
 0x2c2   :  { %16045 = vsyncadd [#allocation18], 4294963168 }
 0x2c3   :  { %16046 = dma.done.wait [#allocation21], 4128  }
 0x2c4   :  { %16047 = vsyncadd [#allocation21], 4294963168 }
 0x2c5   :  { %16048 = dma.done.wait [#allocation24], 4128  }
 0x2c6   :  { %16049 = vsyncadd [#allocation24], 4294963168 }
 0x2c7   :  { %16050 = dma.done.wait [#allocation27], 4128  }
 0x2c8   :  { %16051 = vsyncadd [#allocation27], 4294963168 }
 0x2c9   :  { %16052 = dma.done.wait [#allocation30], 4128  }
 0x2ca   :  { %16053 = vsyncadd [#allocation30], 4294963168 }
 0x2cb   :  { %16054 = dma.done.wait [#allocation33], 4128  }
 0x2cc   :  { %16055 = vsyncadd [#allocation33], 4294963168 }
 0x2cd   :  { %16056 = dma.done.wait [#allocation36], 4128  }
 0x2ce   :  { %16057 = vsyncadd [#allocation36], 4294963168 }
 0x2cf   :  { %16058 = dma.done.wait [#allocation39], 64  }
 0x2d0   :  { %16059 = vsyncadd [#allocation39], 4294967232 }
 0x2d1   :  { %16060 = dma.done.wait [#allocation42], 64  }
 0x2d2   :  { %16061 = vsyncadd [#allocation42], 4294967232 }
 0x2d3   :  { %16062 = dma.done.wait [#allocation45], 64  }
 0x2d4   :  { %16063 = vsyncadd [#allocation45], 4294967232 }
 0x2d5   :  { %16064 = dma.done.wait [#allocation48], 16384  }
 0x2d6   :  { %16065 = vsyncadd [#allocation48], 4294950912 }
 0x2d7   :  { %16066 = dma.done.wait [#allocation51], 32  }
 0x2d8   :  { %16067 = vsyncadd [#allocation51], 4294967264  ;;  %v660_v0 = vld [vmem:[#allocation2] sm:$0xff]  ;;  %v661_v1 = vld [vmem:[#allocation2 + $0x8] sm:$0xff]  ;;  %s17716_s6 = sld [smem:[#allocation74_spill]]  ;;  %s17717_s1 = sld [smem:[#allocation76_spill]] }
 0x2d9   :  { %v677_v2 = vld [vmem:[#allocation5] sm:$0xff]  ;;  %v13428_v3 = vpack.c.bf16 %v661_v1, %v660_v0  ;;  %v678_v4 = vld [vmem:[#allocation5 + $0x8] sm:$0xff]  ;;  %v662_v5 = vld [vmem:[#allocation2 + $0x10] sm:$0xff]  ;;  %s17718_s16 = sld [smem:[#allocation82_spill]]  ;;  %s17719_s25 = sld [smem:[#allocation83_spill]]  ;;  %vm1019_vm0 = vcmask 261120  }
 0x2da   :  { %v663_v6 = vld [vmem:[#allocation2 + $0x18] sm:$0xff]  ;;  %v13460_v7 = vpack.c.bf16 %v678_v4, %v677_v2  ;;  %v679_v9 = vld [vmem:[#allocation5 + $0x10] sm:$0xff]  ;;  %v664_v11 = vld [vmem:[#allocation2 + $0x20] sm:$0xff]  ;;  %s16161_s18 = smov 96   ;;  %s16162_s14 = smov 64   ;;  %vm1368_vm2 = vcmask 130048  }
 0x2db   :  { %v13432_v8 = vpack.c.bf16 %v663_v6, %v662_v5  ;;  %v680_v10 = vld [vmem:[#allocation5 + $0x18] sm:$0xff]  ;;  %13429 = vmatprep.subr.bf16.mxu0 %v13428_v3  ;;  %v665_v13 = vld [vmem:[#allocation2 + $0x28] sm:$0xff]  ;;  %v681_v14 = vld [vmem:[#allocation5 + $0x20] sm:$0xff]  ;;  %s16163_s22 = smov 32   ;;  %s17722_s8 = sld [smem:[#allocation78_spill]]  ;;  %vm10941_vm3 = vcmask 64512  }
 0x2dc   :  { %v13464_v12 = vpack.c.bf16 %v680_v10, %v679_v9  ;;  %v682_v15 = vld [vmem:[#allocation5 + $0x28] sm:$0xff]  ;;  %13461 = vmatprep.subr.bf16.mxu1 %v13460_v7  ;;  %13431 = vmatpush3.bf16.msra.mxu0 %v13428_v3  ;;  %v13436_v16 = vpack.c.bf16 %v665_v13, %v664_v11  ;;  %v666_v18 = vld [vmem:[#allocation2 + $0x30] sm:$0xff]  ;;  %v667_v19 = vld [vmem:[#allocation2 + $0x38] sm:$0xff]  ;;  %s17723_s4 = sld [smem:[#allocation85_spill]]  ;;  %s17724_s5 = sld [smem:[#allocation86_spill]] }
 0x2dd   :  { %13463 = vmatpush3.bf16.msra.mxu1 %v13460_v7  ;;  %13433 = vmatprep.subr.bf16.mxu0 %v13432_v8  ;;  %v13468_v17 = vpack.c.bf16 %v682_v15, %v681_v14  ;;  %v683_v20 = vld [vmem:[#allocation5 + $0x30] sm:$0xff]  ;;  %v684_v21 = vld [vmem:[#allocation5 + $0x38] sm:$0xff]  ;;  %v13440_v22 = vpack.c.bf16 %v667_v19, %v666_v18  ;;  %v668_v24 = vld [vmem:[#allocation2 + $0x40] sm:$0xff]  ;;  %s17725_s23 = sld [smem:[#allocation88_spill]]  ;;  %s17726_s20 = sld [smem:[#allocation89_spill]] }
 0x2de   :  { %13465 = vmatprep.subr.bf16.mxu1 %v13464_v12  ;;  %v13472_v23 = vpack.c.bf16 %v684_v21, %v683_v20  ;;  %v669_v25 = vld [vmem:[#allocation2 + $0x48] sm:$0xff]  ;;  %v654_v26 = vld [vmem:[%s17716_s6] sm:$0xff]  ;;  %v670_v33 = vld [vmem:[#allocation2 + $0x50] sm:$0xff]  ;;  %s17727_s9 = sld [smem:[#allocation91_spill]]  ;;  %s17728_s26 = sld [smem:[#allocation92_spill]] }
 0x2df   :  { %v685_v27 = vld [vmem:[#allocation5 + $0x40] sm:$0xff]  ;;  %v686_v28 = vld [vmem:[#allocation5 + $0x48] sm:$0xff]  ;;  %v13444_v31 = vpack.c.bf16 %v669_v25, %v668_v24  ;;  %v671_v34 = vld [vmem:[#allocation2 + $0x58] sm:$0xff]  ;;  %s17729_s0 = sld [smem:[#allocation93_spill]]  ;;  %s17730_s28 = sld [smem:[#allocation75_spill]] }
 0x2e0   :  { %13435 = vmatpush3.bf16.msra.mxu0 %v13432_v8  ;;  %v656_v29 = vld [vmem:[%s17717_s1] sm:$0xff]  ;;  %v13476_v32 = vpack.c.bf16 %v686_v28, %v685_v27  ;;  %v687_v35 = vld [vmem:[#allocation5 + $0x50] sm:$0xff]  ;;  %v688_v36 = vld [vmem:[#allocation5 + $0x58] sm:$0xff]  ;;  %v13448_v37 = vpack.c.bf16 %v671_v34, %v670_v33  ;;  %s17731_s30 = sld [smem:[#allocation77_spill]]  ;;  %s17732_s2 = sld [smem:[#allocation79_spill]] }
 0x2e1   :  { %13467 = vmatpush3.bf16.msra.mxu1 %v13464_v12  ;;  %13437 = vmatprep.subr.bf16.mxu0 %v13436_v16  ;;  %v16711_v30 = vadd.f32 %v656_v29, %v654_v26  ;;  %v13480_v38 = vpack.c.bf16 %v688_v36, %v687_v35  ;;  %v672_v39 = vld [vmem:[#allocation2 + $0x60] sm:$0xff]  ;;  %v673_v40 = vld [vmem:[#allocation2 + $0x68] sm:$0xff]  ;;  %v674_v45 = vld [vmem:[#allocation2 + $0x70] sm:$0xff]  ;;  %s17733_s29 = sld [smem:[#allocation80_spill]]  ;;  %s17734_s7 = sld [smem:[#allocation106_spill]] }
 0x2e2   :  { %13469 = vmatprep.subr.bf16.mxu1 %v13468_v17  ;;  %v689_v41 = vld [vmem:[#allocation5 + $0x60] sm:$0xff]  ;;  %v690_v42 = vld [vmem:[#allocation5 + $0x68] sm:$0xff]  ;;  %v13452_v43 = vpack.c.bf16 %v673_v40, %v672_v39  ;;  %v675_v46 = vld [vmem:[#allocation2 + $0x78] sm:$0xff]  ;;  %s16165_s12 = smov 120  }
 0x2e3   :  { %12195 = vmatprep.mubr.f32.mxu0 %v16711_v30  ;;  %12230 = vmatprep.mubr.f32.mxu1 %v16711_v30  ;;  %v13484_v44 = vpack.c.bf16 %v690_v42, %v689_v41  ;;  %v691_v47 = vld [vmem:[#allocation5 + $0x70] sm:$0xff]  ;;  %v692_v48 = vld [vmem:[#allocation5 + $0x78] sm:$0xff]  ;;  %v13456_v49 = vpack.c.bf16 %v675_v46, %v674_v45  ;;  %v655_v51 = vld [vmem:[%s17716_s6 + $0x8] sm:$0xff] }
 0x2e4   :  { %13439 = vmatpush3.bf16.msra.mxu0 %v13436_v16  ;;  %v13488_v50 = vpack.c.bf16 %v692_v48, %v691_v47  ;;  %v657_v52 = vld [vmem:[%s17717_s1 + $0x8] sm:$0xff]  ;;  %v11051_v54 = vld [vmem:[%s17718_s16] ss:$0 sm:$0xff]  ;;  %vm16727_vm1 = vmpackc.low %vm1019_vm0, %vm1019_vm0 }
 0x2e5   :  { %13471 = vmatpush3.bf16.msra.mxu1 %v13468_v17  ;;  %13441 = vmatprep.subr.bf16.mxu0 %v13440_v22  ;;  %v16717_v53 = vadd.f32 %v657_v52, %v655_v51  ;;  %v11052_v55 = vld [vmem:[%s17719_s25] ss:$0 sm:$0xff]  ;;  %v695_v4 = vld [vmem:[#allocation7 + $0x8] sm:$0xff]  ;;  %v696_v5 = vld [vmem:[#allocation7 + $0x10] sm:$0xff] }
 0x2e6   :  { %13473 = vmatprep.subr.bf16.mxu1 %v13472_v23  ;;  %v694_v3 = vld [vmem:[#allocation7] sm:$0xff]  ;;  %v697_v7 = vld [vmem:[#allocation7 + $0x18] sm:$0xff]  ;;  %v699_v10 = vld [vmem:[#allocation7 + $0x28] sm:$0xff] }
 0x2e7   :  { %v13492_v6 = vpack.c.bf16 %v695_v4, %v694_v3  ;;  %v13496_v8 = vpack.c.bf16 %v697_v7, %v696_v5  ;;  %v698_v9 = vld [vmem:[#allocation7 + $0x20] sm:$0xff]  ;;  %v700_v12 = vld [vmem:[#allocation7 + $0x30] sm:$0xff]  ;;  %v701_v13 = vld [vmem:[#allocation7 + $0x38] sm:$0xff] }
 0x2e8   :  { %13443 = vmatpush3.bf16.msra.mxu0 %v13440_v22  ;;  %v13500_v11 = vpack.c.bf16 %v699_v10, %v698_v9  ;;  %v13504_v14 = vpack.c.bf16 %v701_v13, %v700_v12  ;;  %v702_v15 = vld [vmem:[#allocation7 + $0x40] sm:$0xff]  ;;  %v703_v16 = vld [vmem:[#allocation7 + $0x48] sm:$0xff]  ;;  %v704_v19 = vld [vmem:[#allocation7 + $0x50] sm:$0xff] }
 0x2e9   :  { %13475 = vmatpush3.bf16.msra.mxu1 %v13472_v23  ;;  %13445 = vmatprep.subr.bf16.mxu0 %v13444_v31  ;;  %v13508_v18 = vpack.c.bf16 %v703_v16, %v702_v15  ;;  %v705_v20 = vld [vmem:[#allocation7 + $0x58] sm:$0xff]  ;;  %v706_v25 = vld [vmem:[#allocation7 + $0x60] sm:$0xff]  ;;  %v707_v26 = vld [vmem:[#allocation7 + $0x68] sm:$0xff] }
 0x2ea   :  { %13477 = vmatprep.subr.bf16.mxu1 %v13476_v32  ;;  %v13512_v24 = vpack.c.bf16 %v705_v20, %v704_v19  ;;  %v708_v33 = vld [vmem:[#allocation7 + $0x70] sm:$0xff]  ;;  %v709_v34 = vld [vmem:[#allocation7 + $0x78] sm:$0xff]  ;;  %v649_v47 = vld [vmem:[%s17722_s8 + $0x8] sm:$0xff] }
 0x2eb   :  { %v13520_v40 = vpack.c.bf16 %v709_v34, %v708_v33  ;;  %v15284_v0 = vld [vmem:[%s17733_s29 + $0x8] sm:$0xff] }
 0x2ec   :  { %13447 = vmatpush3.bf16.msra.mxu0 %v13444_v31 }
 0x2ed   :  { %13479 = vmatpush3.bf16.msra.mxu1 %v13476_v32  ;;  %13449 = vmatprep.subr.bf16.mxu0 %v13448_v37  ;;  %v13516_v32 = vpack.c.bf16 %v707_v26, %v706_v25 }
 0x2ee   :  { %13481 = vmatprep.subr.bf16.mxu1 %v13480_v38 }
 0x2f0   :  { %13451 = vmatpush3.bf16.msra.mxu0 %v13448_v37 }
 0x2f1   :  { %13483 = vmatpush3.bf16.msra.mxu1 %v13480_v38  ;;  %13453 = vmatprep.subr.bf16.mxu0 %v13452_v43 }
 0x2f2   :  { %13485 = vmatprep.subr.bf16.mxu1 %v13484_v44 }
 0x2f4   :  { %13455 = vmatpush3.bf16.msra.mxu0 %v13452_v43 }
 0x2f5   :  { %13487 = vmatpush3.bf16.msra.mxu1 %v13484_v44  ;;  %13457 = vmatprep.subr.bf16.mxu0 %v13456_v49 }
 0x2f6   :  { %13489 = vmatprep.subr.bf16.mxu1 %v13488_v50 }
 0x2f8   :  { %13459 = vmatpush3.bf16.msra.mxu0 %v13456_v49 }
 0x2f9   :  { %13491 = vmatpush3.bf16.msra.mxu1 %v13488_v50  ;;  %13493 = vmatprep.subr.bf16.mxu0 %v13492_v6  ;;  %v648_v50 = vld [vmem:[%s17722_s8] sm:$0xff] }
 0x2fb   :  { %12196 = vmatmul.mubr.f32.vlgmr.msra.gmra.mrb[0].mxu0 %v16717_v53 }
 0x2fc   :  { %12231 = vmatmul.mubr.f32.vlgmr.msra.gmra.mrb[0].mxu1 %v16717_v53  ;;  %12265 = vmatprep.mubr.f32.mxu0 %v16711_v30 }
 0x2fd   :  { %13495 = vmatpush3.bf16.msra.mxu0 %v13492_v6 }
 0x2fe   :  { %13497 = vmatprep.subr.bf16.mxu0 %v13496_v8 }
 0x301   :  { %13499 = vmatpush3.bf16.msra.mxu0 %v13496_v8 }
 0x302   :  { %13501 = vmatprep.subr.bf16.mxu0 %v13500_v11 }
 0x305   :  { %13503 = vmatpush3.bf16.msra.mxu0 %v13500_v11 }
 0x306   :  { %13505 = vmatprep.subr.bf16.mxu0 %v13504_v14 }
 0x309   :  { %13507 = vmatpush3.bf16.msra.mxu0 %v13504_v14 }
 0x30a   :  { %13509 = vmatprep.subr.bf16.mxu0 %v13508_v18 }
 0x30d   :  { %13511 = vmatpush3.bf16.msra.mxu0 %v13508_v18 }
 0x30e   :  { %13513 = vmatprep.subr.bf16.mxu0 %v13512_v24 }
 0x311   :  { %13515 = vmatpush3.bf16.msra.mxu0 %v13512_v24 }
 0x312   :  { %13517 = vmatprep.subr.bf16.mxu0 %v13516_v32 }
 0x315   :  { %13519 = vmatpush3.bf16.msra.mxu0 %v13516_v32 }
 0x316   :  { %13521 = vmatprep.subr.bf16.mxu0 %v13520_v40 }
 0x319   :  { %13523 = vmatpush3.bf16.msra.mxu0 %v13520_v40 }
 0x31c   :  { %12266 = vmatmul.mubr.f32.vlgmr.msra.gmra.mrb[2].mxu0 %v16717_v53 }
 0x3ce   :  { %v12197_v56 = vpop.f32.mrb[0].mxu0 }
 0x3cf   :  { %v12232_v57 = vpop.f32.mrb[0].mxu1  ;;  %v800_v58 = vpop.f32.mrb[1].mxu0  ;;  %v806_v63 = vadd.f32 %v12197_v56, %v11051_v54 }
 0x3d0   :  { %v887_v59 = vadd.f32 %v12232_v57, %v11052_v55  ;;  %v801_v60 = vadd.f32 %v11051_v54, %v800_v58  ;;  %v881_v61 = vpop.f32.mrb[1].mxu1 }
 0x3d1   :  { %v882_v62 = vadd.f32 %v11052_v55, %v881_v61 }
 0x3d2   :  { %973 = vrot.lane.b32.xlu1 %v801_v60, %s16161_s18  ;;  %12272 = vmatprep.mubr.msk.f32.mxu1 %vm1019_vm0, %v801_v60 }
 0x3d3   :  { %v14868_v1 = vpack.i.bf16 %v887_v59, %v882_v62  ;;  %v13524_v2 = vpack.c.bf16 %v887_v59, %v882_v62 }
 0x3d5   :  { %14869 = vrot.lane.b32.xlu0 %v14868_v1, %s16161_s18  ;;  %13526 = vmatprep.subr.msk.bf16.mxu1 %vm16727_vm1, %v13524_v2 }
 0x3d6   :  { %13529 = vmatpush3.bf16.xpose.msk.msra.mxu1 %vm16727_vm1, %v13524_v2  ;;  %975 = vrot.lane.b32.xlu1 %v806_v63, %s16161_s18 }
 0x3d9   :  { %14874 = vrot.lane.b32.xlu0 %v14868_v1, %s16162_s14 }
 0x3da   :  { %977 = vrot.lane.b32.xlu1 %v801_v60, %s16162_s14 }
 0x3dd   :  { %14879 = vrot.lane.b32.xlu0 %v14868_v1, %s16163_s22  ;;  %12273 = vmatmul.mubr.msk.f32.vlgmr.msra.gmra.mrb[2].mxu1 %vm1019_vm0, %v806_v63 }
 0x3de   :  { %981 = vrot.lane.b32.xlu1 %v801_v60, %s16163_s22 }
 0x3e1   :  { %979 = vrot.lane.b32.xlu0 %v806_v63, %s16162_s14 }
 0x3e5   :  { %983 = vrot.lane.b32.xlu0 %v806_v63, %s16163_s22 }
 0x444   :  { %v974_v17 = vpop.permute.xlu1 %973 }
 0x445   :  { %12279 = vmatprep.mubr.msk.f32.mxu1 %vm1019_vm0, %v974_v17 }
 0x447   :  { %v14870_v21 = vpop.permute.xlu0 %14869 }
 0x448   :  { %v14872_v22 = vunpack.i.h.bf16 %v14870_v21  ;;  %v14871_v23 = vunpack.i.l.bf16 %v14870_v21  ;;  %v976_v35 = vpop.permute.xlu1 %975 }
 0x44a   :  { %v13530_v27 = vpack.c.bf16 %v14872_v22, %v14871_v23 }
 0x44b   :  { %v14875_v28 = vpop.permute.xlu0 %14874 }
 0x44c   :  { %v14877_v29 = vunpack.i.h.bf16 %v14875_v28  ;;  %v14876_v31 = vunpack.i.l.bf16 %v14875_v28  ;;  %13532 = vmatprep.subr.msk.bf16.mxu1 %vm16727_vm1, %v13530_v27  ;;  %v978_v41 = vpop.permute.xlu1 %977  ;;  %v12267_v28 = vpop.f32.mrb[2].mxu0 }
 0x44d   :  { %13535 = vmatpush3.bf16.xpose.msk.msra.mxu1 %vm16727_vm1, %v13530_v27  ;;  %v962_v32 = vpop.f32.mrb[3].mxu0 }
 0x44e   :  { %v13536_v36 = vpack.c.bf16 %v14877_v29, %v14876_v31  ;;  %v11053_v29 = vld [vmem:[%s17723_s4] ss:$0 sm:$0xff] }
 0x44f   :  { %v14880_v37 = vpop.permute.xlu0 %14879  ;;  %v968_v31 = vadd.f32 %v12267_v28, %v11053_v29  ;;  %v963_v33 = vadd.f32 %v11053_v29, %v962_v32 }
 0x450   :  { %v14882_v38 = vunpack.i.h.bf16 %v14880_v37  ;;  %v14881_v39 = vunpack.i.l.bf16 %v14880_v37  ;;  %13538 = vmatprep.subr.msk.bf16.mxu1 %vm16727_vm1, %v13536_v36  ;;  %v982_v44 = vpop.permute.xlu1 %981 }
 0x451   :  { %v13548_v34 = vpack.c.bf16 %v968_v31, %v963_v33 }
 0x452   :  { %v13542_v42 = vpack.c.bf16 %v14882_v38, %v14881_v39 }
 0x453   :  { %v980_v43 = vpop.permute.xlu0 %979  ;;  %13549 = vmatprep.subr.bf16.mxu0 %v13548_v34 }
 0x454   :  { %12280 = vmatmul.mubr.msk.f32.vlgmr.msra.gmra.mrb[4].mxu1 %vm1019_vm0, %v976_v35  ;;  %13551 = vmatpush3.bf16.msra.mxu0 %v13548_v34  ;;  %v14888_v35 = vpack.i.bf16 %v968_v31, %v963_v33 }
 0x455   :  { %13541 = vmatpush3.bf16.xpose.msk.msra.mxu1 %vm16727_vm1, %v13536_v36  ;;  %12286 = vmatprep.mubr.msk.f32.mxu1 %vm1019_vm0, %v978_v41 }
 0x456   :  { %13544 = vmatprep.subr.msk.bf16.mxu1 %vm16727_vm1, %v13542_v42 }
 0x457   :  { %v984_v45 = vpop.permute.xlu0 %983 }
 0x45c   :  { %12287 = vmatmul.mubr.msk.f32.vlgmr.msra.gmra.mrb[6].mxu1 %vm1019_vm0, %v980_v43 }
 0x45d   :  { %13547 = vmatpush3.bf16.xpose.msk.msra.mxu1 %vm16727_vm1, %v13542_v42  ;;  %12293 = vmatprep.mubr.msk.f32.mxu1 %vm1019_vm0, %v982_v44 }
 0x464   :  { %12294 = vmatmul.mubr.msk.f32.vlgmr.msra.gmra.mrb[8].mxu1 %vm1019_vm0, %v984_v45 }
 0x4b0   :  { %v12274_v46 = vpop.f32.mrb[2].mxu1 }
 0x4b1   :  { %v1353_v48 = vmul.f32 0.17677669, %v12274_v46  ;;  %v1094_v49 = vpop.f32.mrb[3].mxu1 }
 0x4b2   :  { %v1352_v51 = vmul.f32 0.17677669, %v1094_v49 }
 0x4b3   :  { %v1361_v52 = vadd.f32 %v1353_v48, %v649_v47 }
 0x4b4   :  { %v1360_v54 = vadd.f32 %v1352_v51, %v648_v50 }
 0x4b5   :  { %v1372_v55 = vsel %vm1368_vm2, %v1361_v52, -inf }
 0x4b6   :  { %1373 = vmax.xlane.f32.xlu0 %v1372_v55  ;;  %v1369_v56 = vsel %vm1368_vm2, %v1360_v54, -inf }
 0x4b7   :  { %1370 = vmax.xlane.f32.xlu1 %v1369_v56 }
 0x527   :  { %v12281_v57 = vpop.f32.mrb[4].mxu1 }
 0x528   :  { %v1355_v58 = vmul.f32 0.17677669, %v12281_v57  ;;  %v1177_v59 = vpop.f32.mrb[5].mxu1 }
 0x529   :  { %v1354_v60 = vmul.f32 0.17677669, %v1177_v59 }
 0x52a   :  { %v1363_v61 = vadd.f32 %v1355_v58, %v649_v47 }
 0x52b   :  { %v1362_v62 = vadd.f32 %v1354_v60, %v648_v50 }
 0x52c   :  { %v1378_v63 = vsel %vm1368_vm2, %v1363_v61, -inf }
 0x52d   :  { %1379 = vmax.xlane.f32.xlu1 %v1378_v63  ;;  %v1375_v1 = vsel %vm1368_vm2, %v1362_v62, -inf }
 0x52e   :  { %1376 = vmax.xlane.f32.xlu0 %v1375_v1 }
 0x52f   :  { %v12288_v2 = vpop.f32.mrb[6].mxu1 }
 0x530   :  { %v1357_v3 = vmul.f32 0.17677669, %v12288_v2  ;;  %v1260_v4 = vpop.f32.mrb[7].mxu1 }
 0x531   :  { %v1356_v5 = vmul.f32 0.17677669, %v1260_v4 }
 0x532   :  { %v1365_v6 = vadd.f32 %v1357_v3, %v649_v47 }
 0x533   :  { %v1364_v7 = vadd.f32 %v1356_v5, %v648_v50 }
 0x534   :  { %v1384_v8 = vsel %vm1368_vm2, %v1365_v6, -inf }
 0x535   :  { %1385 = vmax.xlane.f32.xlu1 %v1384_v8  ;;  %v1381_v9 = vsel %vm1368_vm2, %v1364_v7, -inf }
 0x536   :  { %1382 = vmax.xlane.f32.xlu0 %v1381_v9 }
 0x537   :  { %v12295_v10 = vpop.f32.mrb[8].mxu1 }
 0x538   :  { %v1359_v11 = vmul.f32 0.17677669, %v12295_v10  ;;  %v1343_v12 = vpop.f32.mrb[9].mxu1 }
 0x539   :  { %v1358_v13 = vmul.f32 0.17677669, %v1343_v12 }
 0x53a   :  { %v1367_v14 = vadd.f32 %v1359_v11, %v649_v47 }
 0x53b   :  { %v1366_v15 = vadd.f32 %v1358_v13, %v648_v50 }
 0x53c   :  { %v1390_v16 = vsel %vm1368_vm2, %v1367_v14, -inf }
 0x53d   :  { %1391 = vmax.xlane.f32.xlu1 %v1390_v16  ;;  %v1387_v17 = vsel %vm1368_vm2, %v1366_v15, -inf }
 0x53e   :  { %1388 = vmax.xlane.f32.xlu0 %v1387_v17 }
 0x543   :  { %v1374_v18 = vpop.xlane.xlu0 %1373 }
 0x544   :  { %v1394_v19 = vsub.f32 %v1361_v52, %v1374_v18  ;;  %v1371_v20 = vpop.xlane.xlu1 %1370 }
 0x545   :  { %v1393_v21 = vsub.f32 %v1360_v54, %v1371_v20  ;;  %v711_v20 = vld [vmem:[#allocation8] sm:$0xff] }
 0x546   :  { %v1403_v22 = vmul.f32 1.442695, %v1394_v19 }
 0x547   :  { %v1401_v23 = vmul.f32 1.442695, %v1393_v21  ;;  %v712_v21 = vld [vmem:[#allocation8 + $0x8] sm:$0xff] }
 0x548   :  { %15048 = vpow2.f32 %v1403_v22  ;;  %v13564_v29 = vpack.c.bf16 %v712_v21, %v711_v20  ;;  %v2162_v20 = vld [vmem:[%s17725_s23] sm:$0xff] }
 0x549   :  { %15050 = vpow2.f32 %v1401_v23 }
 0x552   :  { %v16774_v24 = vpop.eup %15048 }
 0x553   :  { %v16776_v25 = vpop.eup %15050  ;;  %v1420_v26 = vsel %vm1368_vm2, %v16774_v24, 0.0 }
 0x554   :  { %1421 = vadd.xlane.f32.xlu1 %v1420_v26  ;;  %v1417_v27 = vsel %vm1368_vm2, %v16776_v25, 0.0 }
 0x555   :  { %1418 = vadd.xlane.f32.xlu0 %v1417_v27 }
 0x5ba   :  { %v1380_v36 = vpop.xlane.xlu1 %1379 }
 0x5bb   :  { %v1396_v37 = vsub.f32 %v1363_v61, %v1380_v36  ;;  %v1377_v38 = vpop.xlane.xlu0 %1376 }
 0x5bc   :  { %v1395_v39 = vsub.f32 %v1362_v62, %v1377_v38  ;;  %v714_v38 = vld [vmem:[#allocation8 + $0x18] sm:$0xff] }
 0x5bd   :  { %v1407_v40 = vmul.f32 1.442695, %v1396_v37  ;;  %v713_v37 = vld [vmem:[#allocation8 + $0x10] sm:$0xff] }
 0x5be   :  { %v1405_v41 = vmul.f32 1.442695, %v1395_v39 }
 0x5bf   :  { %15052 = vpow2.f32 %v1407_v40 }
 0x5c0   :  { %15054 = vpow2.f32 %v1405_v41 }
 0x5c2   :  { %v1386_v42 = vpop.xlane.xlu1 %1385 }
 0x5c3   :  { %v1398_v43 = vsub.f32 %v1365_v6, %v1386_v42  ;;  %v1383_v44 = vpop.xlane.xlu0 %1382 }
 0x5c4   :  { %v1397_v45 = vsub.f32 %v1364_v7, %v1383_v44  ;;  %v715_v44 = vld [vmem:[#allocation8 + $0x20] sm:$0xff] }
 0x5c5   :  { %v1411_v46 = vmul.f32 1.442695, %v1398_v43  ;;  %v13568_v43 = vpack.c.bf16 %v714_v38, %v713_v37 }
 0x5c6   :  { %v1409_v47 = vmul.f32 1.442695, %v1397_v45  ;;  %v716_v45 = vld [vmem:[#allocation8 + $0x28] sm:$0xff] }
 0x5c7   :  { %15056 = vpow2.f32 %v1411_v46 }
 0x5c8   :  { %15058 = vpow2.f32 %v1409_v47 }
 0x5c9   :  { %v16783_v48 = vpop.eup %15052 }
 0x5ca   :  { %v15055_v49 = vpop.eup %15054  ;;  %v1392_v50 = vpop.xlane.xlu1 %1391  ;;  %v1426_v51 = vsel %vm1368_vm2, %v16783_v48, 0.0 }
 0x5cb   :  { %v1400_v52 = vsub.f32 %v1367_v14, %v1392_v50  ;;  %v1389_v54 = vpop.xlane.xlu0 %1388  ;;  %1427 = vadd.xlane.f32.xlu1 %v1426_v51  ;;  %v1423_v55 = vsel %vm1368_vm2, %v15055_v49, 0.0 }
 0x5cc   :  { %v1399_v56 = vsub.f32 %v1366_v15, %v1389_v54  ;;  %1424 = vadd.xlane.f32.xlu0 %v1423_v55  ;;  %v718_v54 = vld [vmem:[#allocation8 + $0x38] sm:$0xff] }
 0x5cd   :  { %v1415_v57 = vmul.f32 1.442695, %v1400_v52  ;;  %v717_v52 = vld [vmem:[#allocation8 + $0x30] sm:$0xff] }
 0x5ce   :  { %v1413_v58 = vmul.f32 1.442695, %v1399_v56  ;;  %v13576_v55 = vpack.c.bf16 %v718_v54, %v717_v52  ;;  %v719_v56 = vld [vmem:[#allocation8 + $0x40] sm:$0xff]  ;;  %v2180_v54 = vld [vmem:[%s17725_s23 + $0x90] sm:$0xff] }
 0x5cf   :  { %15060 = vpow2.f32 %v1415_v57  ;;  %v720_v57 = vld [vmem:[#allocation8 + $0x48] sm:$0xff]  ;;  %v2178_v52 = vld [vmem:[%s17725_s23 + $0x80] sm:$0xff] }
 0x5d0   :  { %15062 = vpow2.f32 %v1413_v58  ;;  %v13580_v58 = vpack.c.bf16 %v720_v57, %v719_v56  ;;  %v2183_v56 = vld [vmem:[%s17725_s23 + $0xa8] sm:$0xff]  ;;  %v2185_v57 = vld [vmem:[%s17725_s23 + $0xb8] sm:$0xff] }
 0x5d1   :  { %v16788_v59 = vpop.eup %15056 }
 0x5d2   :  { %v15059_v60 = vpop.eup %15058  ;;  %v1432_v61 = vsel %vm1368_vm2, %v16788_v59, 0.0 }
 0x5d3   :  { %1433 = vadd.xlane.f32.xlu1 %v1432_v61  ;;  %v1429_v62 = vsel %vm1368_vm2, %v15059_v60, 0.0 }
 0x5d4   :  { %1430 = vadd.xlane.f32.xlu0 %v1429_v62 }
 0x5d9   :  { %v16793_v63 = vpop.eup %15060 }
 0x5da   :  { %v16795_v1 = vpop.eup %15062  ;;  %v1438_v2 = vsel %vm1368_vm2, %v16793_v63, 0.0 }
 0x5db   :  { %1439 = vadd.xlane.f32.xlu1 %v1438_v2  ;;  %v1435_v3 = vsel %vm1368_vm2, %v16795_v1, 0.0 }
 0x5dc   :  { %1436 = vadd.xlane.f32.xlu0 %v1435_v3  ;;  %v723_v3 = vld [vmem:[#allocation8 + $0x60] sm:$0xff] }
 0x5e1   :  { %v1422_v4 = vpop.xlane.xlu1 %1421 }
 0x5e2   :  { %15064 = vrcp.f32 %v1422_v4  ;;  %v1419_v5 = vpop.xlane.xlu0 %1418  ;;  %v724_v4 = vld [vmem:[#allocation8 + $0x68] sm:$0xff] }
 0x5e3   :  { %15066 = vrcp.f32 %v1419_v5 }
 0x5ec   :  { %v15065_v6 = vpop.eup %15064  ;;  %14889 = vrot.lane.b32.xlu1 %v14888_v35, %s16162_s14 }
 0x5ed   :  { %v15067_v7 = vpop.eup %15066  ;;  %v1450_v9 = vmul.f32 %v15065_v6, %v16774_v24 }
 0x5ee   :  { %v1449_v8 = vmul.f32 %v15067_v7, %v16776_v25  ;;  %v13588_v7 = vpack.c.bf16 %v724_v4, %v723_v3  ;;  %v2188_v3 = vld [vmem:[%s17725_s23 + $0xd0] sm:$0xff]  ;;  %v2191_v4 = vld [vmem:[%s17725_s23 + $0xe8] sm:$0xff] }
 0x5f0   :  { %12300 = vmatprep.mubr.msk.f32.mxu0 %vm1368_vm2, %v1449_v8  ;;  %14894 = vrot.lane.b32.xlu1 %v14888_v35, %s16163_s22  ;;  %v725_v8 = vld [vmem:[#allocation8 + $0x70] sm:$0xff] }
 0x5f1   :  { %12301 = vmatmul.mubr.msk.f32.vlgmr.msra.gmra.mrb[4].mxu0 %vm1368_vm2, %v1450_v9  ;;  %v726_v9 = vld [vmem:[#allocation8 + $0x78] sm:$0xff] }
 0x5f2   :  { %14884 = vrot.lane.b32.xlu0 %v14888_v35, %s16161_s18 }
 0x658   :  { %v1428_v11 = vpop.xlane.xlu1 %1427 }
 0x659   :  { %v1425_v10 = vpop.xlane.xlu0 %1424 }
 0x65a   :  { %15068 = vrcp.f32 %v1425_v10  ;;  %v13592_v10 = vpack.c.bf16 %v726_v9, %v725_v8  ;;  %v2190_v9 = vld [vmem:[%s17725_s23 + $0xe0] sm:$0xff] }
 0x660   :  { %v1434_v13 = vpop.xlane.xlu1 %1433 }
 0x661   :  { %v1431_v12 = vpop.xlane.xlu0 %1430 }
 0x662   :  { %15070 = vrcp.f32 %v1431_v12 }
 0x663   :  { %15072 = vrcp.f32 %v1434_v13 }
 0x664   :  { %v15069_v14 = vpop.eup %15068  ;;  %15074 = vrcp.f32 %v1428_v11  ;;  %v11080_v11 = vld [vmem:[%s17724_s5] ss:$0 sm:$0xff] }
 0x665   :  { %v1451_v15 = vmul.f32 %v15069_v14, %v15055_v49  ;;  %v13572_v49 = vpack.c.bf16 %v716_v45, %v715_v44  ;;  %v2177_v44 = vld [vmem:[%s17725_s23 + $0x78] sm:$0xff] }
 0x667   :  { %12307 = vmatprep.mubr.msk.f32.mxu1 %vm1368_vm2, %v1451_v15 }
 0x668   :  { %v1440_v16 = vpop.xlane.xlu1 %1439 }
 0x669   :  { %v1437_v17 = vpop.xlane.xlu0 %1436 }
 0x66a   :  { %15076 = vrcp.f32 %v1437_v17 }
 0x66b   :  { %15078 = vrcp.f32 %v1440_v16 }
 0x66c   :  { %v15071_v18 = vpop.eup %15070  ;;  %v14890_v19 = vpop.permute.xlu1 %14889 }
 0x66d   :  { %v14892_v22 = vunpack.i.h.bf16 %v14890_v19  ;;  %v14891_v23 = vunpack.i.l.bf16 %v14890_v19  ;;  %v14885_v24 = vpop.permute.xlu0 %14884  ;;  %v1453_v25 = vmul.f32 %v15071_v18, %v15059_v60  ;;  %v15073_v31 = vpop.eup %15072  ;;  %v722_v60 = vld [vmem:[#allocation8 + $0x58] sm:$0xff]  ;;  %v2163_v18 = vld [vmem:[%s17725_s23 + $0x8] sm:$0xff] }
 0x66e   :  { %v14887_v26 = vunpack.i.h.bf16 %v14885_v24  ;;  %v14886_v27 = vunpack.i.l.bf16 %v14885_v24  ;;  %v15075_v34 = vpop.eup %15074  ;;  %v1454_v39 = vmul.f32 %v15073_v31, %v16788_v59  ;;  %v721_v59 = vld [vmem:[#allocation8 + $0x50] sm:$0xff]  ;;  %v2165_v19 = vld [vmem:[%s17725_s23 + $0x18] sm:$0xff] }
 0x66f   :  { %12314 = vmatprep.mubr.msk.f32.mxu0 %vm1368_vm2, %v1453_v25  ;;  %v13556_v28 = vpack.c.bf16 %v14892_v22, %v14891_v23  ;;  %v1452_v42 = vmul.f32 %v15075_v34, %v16783_v48  ;;  %v13584_v2 = vpack.c.bf16 %v722_v60, %v721_v59  ;;  %v13596_v21 = vpack.c.bf16 %v2165_v19, %v2163_v18  ;;  %v2164_v22 = vld [vmem:[%s17725_s23 + $0x10] sm:$0xff]  ;;  %v2167_v23 = vld [vmem:[%s17725_s23 + $0x28] sm:$0xff]  ;;  %v2169_v24 = vld [vmem:[%s17725_s23 + $0x38] sm:$0xff] }
 0x670   :  { %v14895_v32 = vpop.permute.xlu1 %14894  ;;  %v13552_v33 = vpack.c.bf16 %v14887_v26, %v14886_v27  ;;  %v13598_v25 = vpack.c.bf16 %v2164_v22, %v2162_v20  ;;  %v13600_v26 = vpack.c.bf16 %v2169_v24, %v2167_v23  ;;  %v2166_v27 = vld [vmem:[%s17725_s23 + $0x20] sm:$0xff]  ;;  %v2184_v60 = vld [vmem:[%s17725_s23 + $0xb0] sm:$0xff] }
 0x671   :  { %v14897_v35 = vunpack.i.h.bf16 %v14895_v32  ;;  %v14896_v36 = vunpack.i.l.bf16 %v14895_v32  ;;  %13557 = vmatprep.subr.bf16.mxu0 %v13556_v28  ;;  %v2170_v32 = vld [vmem:[%s17725_s23 + $0x40] sm:$0xff]  ;;  %v2216_v24 = vld [vmem:[#allocation13 + $0xa8] sm:$0xff] }
 0x672   :  { %13553 = vmatprep.subr.bf16.mxu1 %v13552_v33  ;;  %13559 = vmatpush3.bf16.msra.mxu0 %v13556_v28  ;;  %v2168_v28 = vld [vmem:[%s17725_s23 + $0x30] sm:$0xff]  ;;  %v2182_v59 = vld [vmem:[%s17725_s23 + $0xa0] sm:$0xff] }
 0x673   :  { %13555 = vmatpush3.bf16.msra.mxu1 %v13552_v33  ;;  %v13560_v40 = vpack.c.bf16 %v14897_v35, %v14896_v36  ;;  %13565 = vmatprep.subr.bf16.mxu0 %v13564_v29  ;;  %v2172_v33 = vld [vmem:[%s17725_s23 + $0x50] sm:$0xff]  ;;  %v2214_v18 = vld [vmem:[#allocation13 + $0x98] sm:$0xff]  ;;  %v2215_v23 = vld [vmem:[#allocation13 + $0xa0] sm:$0xff] }
 0x674   :  { %v15077_v41 = vpop.eup %15076  ;;  %v13606_v34 = vpack.c.bf16 %v2172_v33, %v2170_v32  ;;  %v2198_v22 = vld [vmem:[#allocation13 + $0x18] sm:$0xff]  ;;  %v2201_v32 = vld [vmem:[#allocation13 + $0x30] sm:$0xff] }
 0x675   :  { %v15079_v46 = vpop.eup %15078  ;;  %12315 = vmatmul.mubr.msk.f32.vlgmr.msra.gmra.mrb[6].mxu0 %vm1368_vm2, %v1454_v39  ;;  %13561 = vmatprep.subr.bf16.mxu1 %v13560_v40  ;;  %v1455_v47 = vmul.f32 %v15077_v41, %v16795_v1  ;;  %v2202_v33 = vld [vmem:[#allocation13 + $0x38] sm:$0xff] }
 0x676   :  { %12308 = vmatmul.mubr.msk.f32.vlgmr.msra.gmra.mrb[10].mxu1 %vm1368_vm2, %v1452_v42  ;;  %13567 = vmatpush3.bf16.msra.mxu0 %v13564_v29  ;;  %v1456_v50 = vmul.f32 %v15079_v46, %v16793_v63  ;;  %v2171_v29 = vld [vmem:[%s17725_s23 + $0x48] sm:$0xff]  ;;  %v2174_v46 = vld [vmem:[%s17725_s23 + $0x60] sm:$0xff] }
 0x677   :  { %13563 = vmatpush3.bf16.msra.mxu1 %v13560_v40  ;;  %12321 = vmatprep.mubr.msk.f32.mxu1 %vm1368_vm2, %v1455_v47  ;;  %v2176_v47 = vld [vmem:[%s17725_s23 + $0x70] sm:$0xff] }
 0x678   :  { %13569 = vmatprep.subr.bf16.mxu0 %v13568_v43  ;;  %13597 = vmatprep.subr.bf16.mxu1 %v13596_v21  ;;  %v2197_v21 = vld [vmem:[#allocation13 + $0x10] sm:$0xff] }
 0x67a   :  { %12322 = vmatmul.mubr.msk.f32.vlgmr.msra.gmra.mrb[12].mxu1 %vm1368_vm2, %v1456_v50  ;;  %13571 = vmatpush3.bf16.msra.mxu0 %v13568_v43  ;;  %v2175_v43 = vld [vmem:[%s17725_s23 + $0x68] sm:$0xff] }
 0x67b   :  { %13573 = vmatprep.subr.bf16.mxu0 %v13572_v49  ;;  %13599 = vmatpush1.bf16.msra.mxu1 %v13598_v25  ;;  %v13608_v45 = vpack.c.bf16 %v2177_v44, %v2175_v43  ;;  %v2179_v50 = vld [vmem:[%s17725_s23 + $0x88] sm:$0xff]  ;;  %v13634_v25 = vpack.c.bf16 %v2198_v22, %v2197_v21  ;;  %v2222_v43 = vld [vmem:[#allocation13 + $0xd8] sm:$0xff] }
 0x67c   :  { %13601 = vmatprep.subr.bf16.mxu1 %v13600_v26  ;;  %v13636_v26 = vpack.c.bf16 %v2216_v24, %v2215_v23 }
 0x6c4   :  { %v12302_v48 = vpop.f32.mrb[4].mxu0 }
 0x6c5   :  { %v1529_v51 = vpop.f32.mrb[5].mxu0 }
 0x6c6   :  { %12332 = vmatprep.mubr.msk.f32.mxu0 %vm1019_vm0, %v1529_v51 }
 0x6c7   :  { %12333 = vmatmul.mubr.msk.f32.vlgmr.msra.gmra.mrb[8].mxu0 %vm1019_vm0, %v12302_v48  ;;  %v2181_v48 = vld [vmem:[%s17725_s23 + $0x98] sm:$0xff] }
 0x6c8   :  { %13575 = vmatpush3.bf16.msra.mxu0 %v13572_v49  ;;  %v13610_v49 = vpack.c.bf16 %v2176_v47, %v2174_v46  ;;  %v13612_v51 = vpack.c.bf16 %v2181_v48, %v2179_v50  ;;  %v2205_v46 = vld [vmem:[#allocation13 + $0x50] sm:$0xff]  ;;  %v2206_v47 = vld [vmem:[#allocation13 + $0x58] sm:$0xff]  ;;  %v2224_v50 = vld [vmem:[#allocation13 + $0xe8] sm:$0xff] }
 0x6c9   :  { %13577 = vmatprep.subr.bf16.mxu0 %v13576_v55  ;;  %v13650_v48 = vpack.c.bf16 %v2206_v47, %v2205_v46  ;;  %v2445_v46 = vld [vmem:[#allocation2 + $0x88] sm:$0xff]  ;;  %v2463_v47 = vld [vmem:[#allocation5 + $0x80] sm:$0xff] }
 0x6cc   :  { %13579 = vmatpush3.bf16.msra.mxu0 %v13576_v55  ;;  %v13614_v55 = vpack.c.bf16 %v2180_v54, %v2178_v52 }
 0x6cd   :  { %13581 = vmatprep.subr.bf16.mxu0 %v13580_v58 }
 0x748   :  { %v12316_v61 = vpop.f32.mrb[6].mxu0 }
 0x749   :  { %v12309_v62 = vpop.f32.mrb[10].mxu1  ;;  %v1691_v63 = vpop.f32.mrb[7].mxu0 }
 0x74a   :  { %v1610_v1 = vpop.f32.mrb[11].mxu1 }
 0x74b   :  { %12343 = vmatprep.mubr.msk.f32.mxu0 %vm1019_vm0, %v1610_v1  ;;  %v2186_v1 = vld [vmem:[%s17725_s23 + $0xc0] sm:$0xff] }
 0x74c   :  { %12344 = vmatmul.mubr.msk.f32.vlgmr.msra.gmra.mrb[8].mxu0 %vm1019_vm0, %v12309_v62  ;;  %v2187_v62 = vld [vmem:[%s17725_s23 + $0xc8] sm:$0xff] }
 0x74d   :  { %v12323_v5 = vpop.f32.mrb[12].mxu1  ;;  %13583 = vmatpush3.bf16.msra.mxu0 %v13580_v58  ;;  %12354 = vmatprep.mubr.msk.f32.mxu0 %vm1019_vm0, %v1691_v63  ;;  %v13616_v58 = vpack.c.bf16 %v2185_v57, %v2183_v56  ;;  %v2189_v63 = vld [vmem:[%s17725_s23 + $0xd8] sm:$0xff] }
 0x74e   :  { %v1772_v6 = vpop.f32.mrb[13].mxu1  ;;  %13585 = vmatprep.subr.bf16.mxu0 %v13584_v2 }
 0x751   :  { %13587 = vmatpush3.bf16.msra.mxu0 %v13584_v2  ;;  %v13620_v2 = vpack.c.bf16 %v2189_v63, %v2187_v62  ;;  %v11088_v62 = vld [vmem:[#allocation11] ss:$0 sm:$0xff] }
 0x752   :  { %13589 = vmatprep.subr.bf16.mxu0 %v13588_v7 }
 0x754   :  { %12355 = vmatmul.mubr.msk.f32.vlgmr.msra.gmra.mrb[8].mxu0 %vm1019_vm0, %v12316_v61  ;;  %v13618_v61 = vpack.c.bf16 %v2184_v60, %v2182_v59  ;;  %v11087_v60 = vld [vmem:[#allocation10] ss:$0 sm:$0xff] }
 0x755   :  { %13591 = vmatpush3.bf16.msra.mxu0 %v13588_v7  ;;  %12365 = vmatprep.mubr.msk.f32.mxu0 %vm1019_vm0, %v1772_v6  ;;  %v16164_v6 = vmov 0.0   ;;  %v13622_v7 = vpack.c.bf16 %v2188_v3, %v2186_v1 }
 0x756   :  { %13593 = vmatprep.subr.bf16.mxu0 %v13592_v10  ;;  %2303 = vmatprep.mubr.f32.mxu1 %v16164_v6 }
 0x759   :  { %13595 = vmatpush3.bf16.msra.mxu0 %v13592_v10  ;;  %v2192_v10 = vld [vmem:[%s17725_s23 + $0xf0] sm:$0xff] }
 0x75c   :  { %12366 = vmatmul.mubr.msk.f32.vlgmr.msra.gmra.mrb[8].mxu0 %vm1019_vm0, %v12323_v5  ;;  %v2193_v5 = vld [vmem:[%s17725_s23 + $0xf8] sm:$0xff] }
 0x75d   :  { %v13624_v8 = vpack.c.bf16 %v2193_v5, %v2191_v4 }
 0x82f   :  { %v12367_v12 = vpop.f32.mrb[8].mxu0 }
 0x830   :  { %v14724_v13 = vadd.f32 %v12367_v12, %v11080_v11  ;;  %v2108_v14 = vpop.f32.mrb[9].mxu0  ;;  %v2211_v12 = vld [vmem:[#allocation13 + $0x80] sm:$0xff] }
 0x831   :  { %v14725_v15 = vadd.f32 %v11080_v11, %v2108_v14  ;;  %v13626_v11 = vpack.c.bf16 %v2192_v10, %v2190_v9  ;;  %v2195_v14 = vld [vmem:[#allocation13] sm:$0xff]  ;;  %v2225_v10 = vld [vmem:[#allocation13 + $0xf0] sm:$0xff] }
 0x832   :  { %v2120_v16 = vadd.f32 %v14724_v13, %v16717_v53  ;;  %v2173_v53 = vld [vmem:[%s17725_s23 + $0x58] sm:$0xff]  ;;  %v2212_v13 = vld [vmem:[#allocation13 + $0x88] sm:$0xff] }
 0x833   :  { %v2119_v17 = vadd.f32 %v14725_v15, %v16711_v30  ;;  %v13602_v30 = vpack.c.bf16 %v2168_v28, %v2166_v27  ;;  %v13604_v31 = vpack.c.bf16 %v2173_v53, %v2171_v29  ;;  %v13628_v15 = vpack.c.bf16 %v2212_v13, %v2211_v12  ;;  %v2199_v27 = vld [vmem:[#allocation13 + $0x20] sm:$0xff]  ;;  %v2200_v28 = vld [vmem:[#allocation13 + $0x28] sm:$0xff]  ;;  %v2217_v29 = vld [vmem:[#allocation13 + $0xb0] sm:$0xff] }
 0x834   :  { %2125 = vadd.xlane.f32.xlu1 %v2120_v16  ;;  %v2218_v53 = vld [vmem:[#allocation13 + $0xb8] sm:$0xff]  ;;  %v2209_v12 = vld [vmem:[#allocation13 + $0x70] sm:$0xff] }
 0x835   :  { %2123 = vadd.xlane.f32.xlu0 %v2119_v17  ;;  %13603 = vmatpush1.bf16.msra.mxu1 %v13602_v30  ;;  %v13638_v30 = vpack.c.bf16 %v2200_v28, %v2199_v27  ;;  %v2210_v13 = vld [vmem:[#allocation13 + $0x78] sm:$0xff] }
 0x836   :  { %13605 = vmatprep.subr.bf16.mxu1 %v13604_v31  ;;  %13629 = vmatprep.subr.bf16.mxu0 %v13628_v15  ;;  %v13640_v31 = vpack.c.bf16 %v2218_v53, %v2217_v29 }
 0x839   :  { %13607 = vmatpush1.bf16.msra.mxu1 %v13606_v34  ;;  %v2219_v34 = vld [vmem:[#allocation13 + $0xc0] sm:$0xff] }
 0x83a   :  { %13609 = vmatprep.subr.bf16.mxu1 %v13608_v45 }
 0x83d   :  { %13611 = vmatpush1.bf16.msra.mxu1 %v13610_v49  ;;  %v2223_v49 = vld [vmem:[#allocation13 + $0xe0] sm:$0xff] }
 0x83e   :  { %13613 = vmatprep.subr.bf16.mxu1 %v13612_v51  ;;  %v13652_v51 = vpack.c.bf16 %v2224_v50, %v2223_v49  ;;  %v2464_v50 = vld [vmem:[#allocation5 + $0x88] sm:$0xff] }
 0x841   :  { %13615 = vmatpush1.bf16.msra.mxu1 %v13614_v55 }
 0x842   :  { %13617 = vmatprep.subr.bf16.mxu1 %v13616_v58 }
 0x845   :  { %13619 = vmatpush1.bf16.msra.mxu1 %v13618_v61 }
 0x846   :  { %13621 = vmatprep.subr.bf16.mxu1 %v13620_v2 }
 0x849   :  { %13623 = vmatpush1.bf16.msra.mxu1 %v13622_v7  ;;  %v2207_v7 = vld [vmem:[#allocation13 + $0x60] sm:$0xff] }
 0x84a   :  { %13625 = vmatprep.subr.bf16.mxu1 %v13624_v8  ;;  %v2208_v8 = vld [vmem:[#allocation13 + $0x68] sm:$0xff] }
 0x84b   :  { %v13654_v9 = vpack.c.bf16 %v2208_v8, %v2207_v7  ;;  %v2467_v7 = vld [vmem:[#allocation5 + $0xa0] sm:$0xff]  ;;  %v2468_v8 = vld [vmem:[#allocation5 + $0xa8] sm:$0xff] }
 0x84d   :  { %13627 = vmatpush1.bf16.msra.mxu1 %v13626_v11  ;;  %v2226_v11 = vld [vmem:[#allocation13 + $0xf8] sm:$0xff] }
 0x8c1   :  { %v2126_v35 = vpop.xlane.xlu1 %2125 }
 0x8c2   :  { %v2124_v36 = vpop.xlane.xlu0 %2123  ;;  %v2129_v37 = vmul.f32 0.0078125, %v2126_v35  ;;  %v2220_v35 = vld [vmem:[#allocation13 + $0xc8] sm:$0xff] }
 0x8c3   :  { %v2128_v38 = vmul.f32 0.0078125, %v2124_v36  ;;  %v13642_v36 = vpack.c.bf16 %v2202_v33, %v2201_v32  ;;  %v11089_v33 = vld [vmem:[%s17727_s9] ss:$0 sm:$0xff] }
 0x8c4   :  { %v16845_v41 = vsub.f32 %v2120_v16, %v2129_v37  ;;  %v2196_v16 = vld [vmem:[#allocation13 + $0x8] sm:$0xff]  ;;  %v13644_v37 = vpack.c.bf16 %v2220_v35, %v2219_v34 }
 0x8c5   :  { %v16841_v39 = vsub.f32 %v2119_v17, %v2128_v38  ;;  %v2213_v17 = vld [vmem:[#allocation13 + $0x90] sm:$0xff]  ;;  %v13630_v19 = vpack.c.bf16 %v2196_v16, %v2195_v14  ;;  %v2203_v38 = vld [vmem:[#allocation13 + $0x40] sm:$0xff]  ;;  %v13658_v14 = vpack.c.bf16 %v2210_v13, %v2209_v12 }
 0x8c6   :  { %v2133_v42 = vmul.f32 %v16845_v41, %v16845_v41  ;;  %v13632_v20 = vpack.c.bf16 %v2214_v18, %v2213_v17  ;;  %v2194_v17 = vld [vmem:[%s17726_s20] sm:$0x3]  ;;  %v2469_v12 = vld [vmem:[#allocation5 + $0xb0] sm:$0xff]  ;;  %v2470_v13 = vld [vmem:[#allocation5 + $0xb8] sm:$0xff] }
 0x8c7   :  { %v2132_v40 = vmul.f32 %v16841_v39, %v16841_v39  ;;  %13631 = vmatpush3.bf16.msra.mxu0 %v13630_v19 }
 0x8c8   :  { %13633 = vmatprep.subr.bf16.mxu0 %v13632_v20 }
 0x8c9   :  { %2134 = vadd.xlane.f32.xlu0 %v2132_v40  ;;  %v2204_v40 = vld [vmem:[#allocation13 + $0x48] sm:$0xff] }
 0x8ca   :  { %v13646_v44 = vpack.c.bf16 %v2204_v40, %v2203_v38 }
 0x8cb   :  { %13635 = vmatpush3.bf16.msra.mxu0 %v13634_v25 }
 0x8cc   :  { %13637 = vmatprep.subr.bf16.mxu0 %v13636_v26 }
 0x8cd   :  { %2136 = vadd.xlane.f32.xlu0 %v2133_v42  ;;  %v2221_v42 = vld [vmem:[#allocation13 + $0xd0] sm:$0xff] }
 0x8ce   :  { %v13648_v45 = vpack.c.bf16 %v2222_v43, %v2221_v42 }
 0x8cf   :  { %13639 = vmatpush3.bf16.msra.mxu0 %v13638_v30 }
 0x8d0   :  { %13641 = vmatprep.subr.bf16.mxu0 %v13640_v31 }
 0x8d3   :  { %13643 = vmatpush3.bf16.msra.mxu0 %v13642_v36 }
 0x8d4   :  { %13645 = vmatprep.subr.bf16.mxu0 %v13644_v37 }
 0x8d7   :  { %13647 = vmatpush3.bf16.msra.mxu0 %v13646_v44 }
 0x8d8   :  { %13649 = vmatprep.subr.bf16.mxu0 %v13648_v45  ;;  %v2444_v45 = vld [vmem:[#allocation2 + $0x80] sm:$0xff] }
 0x8d9   :  { %v13660_v49 = vpack.c.bf16 %v2445_v46, %v2444_v45 }
 0x8db   :  { %13651 = vmatpush3.bf16.msra.mxu0 %v13650_v48  ;;  %v2446_v48 = vld [vmem:[#allocation2 + $0x90] sm:$0xff]  ;;  %13661 = vmatprep.subr.bf16.mxu1 %v13660_v49 }
 0x8dc   :  { %13653 = vmatprep.subr.bf16.mxu0 %v13652_v51  ;;  %v2447_v51 = vld [vmem:[#allocation2 + $0x98] sm:$0xff] }
 0x8df   :  { %13655 = vmatpush3.bf16.msra.mxu0 %v13654_v9  ;;  %v13700_v9 = vpack.c.bf16 %v2468_v8, %v2467_v7  ;;  %v2490_v8 = vld [vmem:[#allocation7 + $0xc0] sm:$0xff] }
 0x956   :  { %v2135_v52 = vpop.xlane.xlu0 %2134 }
 0x957   :  { %v2138_v54 = vmul.f32 0.0078125, %v2135_v52  ;;  %v13692_v52 = vpack.c.bf16 %v2464_v50, %v2463_v47 }
 0x959   :  { %v2140_v55 = vadd.f32 1e-05, %v2138_v54  ;;  %v13664_v54 = vpack.c.bf16 %v2447_v51, %v2446_v48  ;;  %v11090_v51 = vld [vmem:[%s17728_s26] ss:$0 sm:$0xff] }
 0x95a   :  { %v2137_v56 = vpop.xlane.xlu0 %2136 }
 0x95b   :  { %15080 = vrsqrt.f32 %v2140_v55  ;;  %v2139_v57 = vmul.f32 0.0078125, %v2137_v56  ;;  %v2465_v55 = vld [vmem:[#allocation5 + $0x90] sm:$0xff]  ;;  %v2466_v56 = vld [vmem:[#allocation5 + $0x98] sm:$0xff] }
 0x95d   :  { %v2141_v58 = vadd.f32 1e-05, %v2139_v57  ;;  %v13696_v57 = vpack.c.bf16 %v2466_v56, %v2465_v55 }
 0x95f   :  { %15082 = vrsqrt.f32 %v2141_v58 }
 0x965   :  { %v15081_v59 = vpop.eup %15080 }
 0x966   :  { %v2144_v61 = vmul.f32 %v15081_v59, %v16841_v39  ;;  %v13656_v39 = vpack.c.bf16 %v2226_v11, %v2225_v10  ;;  %v2450_v10 = vld [vmem:[#allocation2 + $0xb0] sm:$0xff]  ;;  %v2451_v11 = vld [vmem:[#allocation2 + $0xb8] sm:$0xff] }
 0x968   :  { %v2152_v63 = vmul.f32 %v11087_v60, %v2144_v61  ;;  %13657 = vmatprep.subr.bf16.mxu0 %v13656_v39  ;;  %v13672_v39 = vpack.c.bf16 %v2451_v11, %v2450_v10  ;;  %v2492_v11 = vld [vmem:[#allocation7 + $0xd0] sm:$0xff] }
 0x969   :  { %v15083_v1 = vpop.eup %15082  ;;  %13659 = vmatpush3.bf16.msra.mxu0 %v13658_v14  ;;  %v13704_v14 = vpack.c.bf16 %v2470_v13, %v2469_v12  ;;  %v2494_v13 = vld [vmem:[#allocation7 + $0xe0] sm:$0xff] }
 0x96a   :  { %v2160_v2 = vadd.f32 %v11088_v62, %v2152_v63  ;;  %v2145_v3 = vmul.f32 %v15083_v1, %v16845_v41  ;;  %v2229_v41 = vlaneseq  ;;  %13693 = vmatprep.subr.bf16.mxu0 %v13692_v52 }
 0x96c   :  { %2304 = vmatmul.mubr.f32.vlgmr.msra.gmra.mrb[14].mxu1 %v2160_v2  ;;  %v2153_v4 = vmul.f32 %v11087_v60, %v2145_v3  ;;  %v2230_v15 = vshrl.u32 %v2229_v41, 7  ;;  %v2448_v3 = vld [vmem:[#allocation2 + $0xa0] sm:$0xff] }
 0x96d   :  { %2309 = vmatprep.mubr.f32.mxu1 %v16164_v6  ;;  %13663 = vmatpush3.bf16.msra.mxu1 %v13660_v49  ;;  %v2452_v41 = vld [vmem:[#allocation2 + $0xc0] sm:$0xff] }
 0x96e   :  { %v2161_v5 = vadd.f32 %v11088_v62, %v2153_v4  ;;  %v16873_v16 = vsub.s32 0, %v2230_v15  ;;  %v16876_v18 = vsub.s32 1, %v2230_v15  ;;  %13665 = vmatprep.subr.bf16.mxu1 %v13664_v54  ;;  %v2449_v4 = vld [vmem:[#allocation2 + $0xa8] sm:$0xff] }
 0x96f   :  { %v2453_v15 = vld [vmem:[#allocation2 + $0xc8] sm:$0xff] }
 0x970   :  { %2310 = vmatmul.mubr.f32.gmra.mrb[16].mxu1 %v2161_v5  ;;  %v2232_v19 = vrot.slane %v2194_v17, %v16873_v16  ;;  %v2236_v20 = vrot.slane %v2194_v17, %v16876_v18  ;;  %v13676_v17 = vpack.c.bf16 %v2453_v15, %v2452_v41  ;;  %v2496_v15 = vld [vmem:[#allocation7 + $0xf0] sm:$0xff] }
 0x971   :  { %13667 = vmatpush3.bf16.msra.mxu1 %v13664_v54  ;;  %v11091_v54 = vld [vmem:[%s17729_s0] ss:$0 sm:$0xff] }
 0xa3f   :  { %v2305_v21 = vpop.f32.mrb[14].mxu1 }
 0xa40   :  { %v2306_v22 = vadd.f32 %v2305_v21, %v2232_v19  ;;  %v2307_v23 = vpop.f32.mrb[15].mxu1 }
 0xa41   :  { %v2308_v24 = vadd.f32 %v2307_v23, %v2236_v20  ;;  %v2455_v23 = vld [vmem:[#allocation2 + $0xd8] sm:$0xff] }
 0xa42   :  { %v2316_v27 = vmax.f32 %v2306_v22, 0.0  ;;  %v2454_v22 = vld [vmem:[#allocation2 + $0xd0] sm:$0xff] }
 0xa43   :  { %v2317_v25 = vmax.f32 %v2308_v24, 0.0  ;;  %v2311_v26 = vpop.f32.mrb[16].mxu1  ;;  %v2473_v24 = vld [vmem:[#allocation5 + $0xd0] sm:$0xff] }
 0xa44   :  { %v2312_v28 = vadd.f32 %v2311_v26, %v2232_v19  ;;  %v2313_v29 = vpop.f32.mrb[17].mxu1  ;;  %v2471_v19 = vld [vmem:[#allocation5 + $0xc0] sm:$0xff]  ;;  %v2474_v26 = vld [vmem:[#allocation5 + $0xd8] sm:$0xff] }
 0xa45   :  { %v2314_v53 = vadd.f32 %v2313_v29, %v2236_v20  ;;  %2390 = vmatprep.mubr.f32.mxu0 %v2317_v25  ;;  %v2472_v20 = vld [vmem:[#allocation5 + $0xc8] sm:$0xff]  ;;  %v13680_v25 = vpack.c.bf16 %v2455_v23, %v2454_v22  ;;  %v13712_v29 = vpack.c.bf16 %v2474_v26, %v2473_v24 }
 0xa46   :  { %2391 = vmatmul.mubr.f32.vlgmr.msra.gmra.mrb[10].mxu0 %v2316_v27  ;;  %v2318_v31 = vmax.f32 %v2312_v28, 0.0  ;;  %v13708_v21 = vpack.c.bf16 %v2472_v20, %v2471_v19  ;;  %v2456_v27 = vld [vmem:[#allocation2 + $0xe0] sm:$0xff]  ;;  %v2457_v28 = vld [vmem:[#allocation2 + $0xe8] sm:$0xff] }
 0xa47   :  { %v2319_v30 = vmax.f32 %v2314_v53, 0.0  ;;  %13695 = vmatpush3.bf16.msra.mxu0 %v13692_v52  ;;  %v13684_v53 = vpack.c.bf16 %v2457_v28, %v2456_v27  ;;  %v11097_v20 = vld [vmem:[%s17719_s25 + $0x1] ss:$0 sm:$0xff] }
 0xa48   :  { %13697 = vmatprep.subr.bf16.mxu0 %v13696_v57 }
 0xa49   :  { %2395 = vmatprep.mubr.f32.mxu0 %v2319_v30  ;;  %v2475_v30 = vld [vmem:[#allocation5 + $0xe0] sm:$0xff] }
 0xa4a   :  { %2396 = vmatmul.mubr.f32.gmra.mrb[12].mxu0 %v2318_v31  ;;  %v2476_v31 = vld [vmem:[#allocation5 + $0xe8] sm:$0xff] }
 0xa4b   :  { %13699 = vmatpush3.bf16.msra.mxu0 %v13696_v57 }
 0xa4c   :  { %13701 = vmatprep.subr.bf16.mxu0 %v13700_v9 }
 0xa4f   :  { %13703 = vmatpush3.bf16.msra.mxu0 %v13700_v9  ;;  %v2491_v9 = vld [vmem:[#allocation7 + $0xc8] sm:$0xff] }
 0xa50   :  { %13705 = vmatprep.subr.bf16.mxu0 %v13704_v14  ;;  %v13740_v10 = vpack.c.bf16 %v2491_v9, %v2490_v8 }
 0xa53   :  { %13707 = vmatpush3.bf16.msra.mxu0 %v13704_v14  ;;  %v2495_v14 = vld [vmem:[#allocation7 + $0xe8] sm:$0xff] }
 0xa54   :  { %13709 = vmatprep.subr.bf16.mxu0 %v13708_v21  ;;  %v13748_v41 = vpack.c.bf16 %v2495_v14, %v2494_v13 }
 0xa57   :  { %13711 = vmatpush3.bf16.msra.mxu0 %v13708_v21  ;;  %v11096_v21 = vld [vmem:[%s17718_s16 + $0x1] ss:$0 sm:$0xff] }
 0xa58   :  { %13713 = vmatprep.subr.bf16.mxu0 %v13712_v29 }
 0xa5b   :  { %13715 = vmatpush3.bf16.msra.mxu0 %v13712_v29 }
 0xb19   :  { %v11475_v32 = vpop.f32.mrb[10].mxu0 }
 0xb1a   :  { %v11476_v34 = vpop.f32.mrb[11].mxu0 }
 0xb1b   :  { %v11477_v35 = vadd.f32 %v11476_v34, %v11475_v32  ;;  %v13716_v32 = vpack.c.bf16 %v2476_v31, %v2475_v30  ;;  %v2459_v34 = vld [vmem:[#allocation2 + $0xf8] sm:$0xff]  ;;  %v11098_v31 = vld [vmem:[%s17723_s4 + $0x1] ss:$0 sm:$0xff] }
 0xb1d   :  { %v2393_v36 = vadd.f32 %v11477_v35, %v11089_v33  ;;  %v11478_v37 = vpop.f32.mrb[12].mxu0  ;;  %13717 = vmatprep.subr.bf16.mxu0 %v13716_v32 }
 0xb1e   :  { %v11479_v38 = vpop.f32.mrb[13].mxu0  ;;  %13719 = vmatpush3.bf16.msra.mxu0 %v13716_v32 }
 0xb1f   :  { %v11480_v40 = vadd.f32 %v11479_v38, %v11478_v37  ;;  %v2401_v42 = vadd.f32 %v2393_v36, %v2160_v2  ;;  %v2477_v36 = vld [vmem:[#allocation5 + $0xf0] sm:$0xff]  ;;  %v2478_v37 = vld [vmem:[#allocation5 + $0xf8] sm:$0xff] }
 0xb20   :  { %v13720_v38 = vpack.c.bf16 %v2478_v37, %v2477_v36 }
 0xb21   :  { %v2398_v43 = vadd.f32 %v11480_v40, %v11089_v33  ;;  %2405 = vadd.xlane.f32.xlu1 %v2401_v42  ;;  %v2458_v33 = vld [vmem:[#allocation2 + $0xf0] sm:$0xff]  ;;  %v2482_v40 = vld [vmem:[#allocation7 + $0x80] sm:$0xff] }
 0xb22   :  { %v13688_v35 = vpack.c.bf16 %v2459_v34, %v2458_v33  ;;  %13721 = vmatprep.subr.bf16.mxu0 %v13720_v38 }
 0xb23   :  { %v2402_v44 = vadd.f32 %v2398_v43, %v2161_v5  ;;  %v13668_v5 = vpack.c.bf16 %v2449_v4, %v2448_v3  ;;  %13723 = vmatpush3.bf16.msra.mxu0 %v13720_v38  ;;  %v2486_v3 = vld [vmem:[#allocation7 + $0xa0] sm:$0xff]  ;;  %v2487_v4 = vld [vmem:[#allocation7 + $0xa8] sm:$0xff] }
 0xb25   :  { %2407 = vadd.xlane.f32.xlu0 %v2402_v44  ;;  %13669 = vmatprep.subr.bf16.mxu1 %v13668_v5 }
 0xb26   :  { %13671 = vmatpush3.bf16.msra.mxu1 %v13668_v5  ;;  %v2489_v5 = vld [vmem:[#allocation7 + $0xb8] sm:$0xff] }
 0xb27   :  { %13673 = vmatprep.subr.bf16.mxu1 %v13672_v39 }
 0xb2a   :  { %13675 = vmatpush3.bf16.msra.mxu1 %v13672_v39  ;;  %v2493_v39 = vld [vmem:[#allocation7 + $0xd8] sm:$0xff] }
 0xb2b   :  { %13677 = vmatprep.subr.bf16.mxu1 %v13676_v17  ;;  %v13744_v12 = vpack.c.bf16 %v2493_v39, %v2492_v11 }
 0xb2e   :  { %13679 = vmatpush3.bf16.msra.mxu1 %v13676_v17  ;;  %v2497_v17 = vld [vmem:[#allocation7 + $0xf8] sm:$0xff] }
 0xb2f   :  { %13681 = vmatprep.subr.bf16.mxu1 %v13680_v25  ;;  %v13752_v19 = vpack.c.bf16 %v2497_v17, %v2496_v15 }
 0xb32   :  { %13683 = vmatpush3.bf16.msra.mxu1 %v13680_v25 }
 0xb33   :  { %13685 = vmatprep.subr.bf16.mxu1 %v13684_v53 }
 0xb36   :  { %13687 = vmatpush3.bf16.msra.mxu1 %v13684_v53 }
 0xb37   :  { %13689 = vmatprep.subr.bf16.mxu1 %v13688_v35 }
 0xb3a   :  { %13691 = vmatpush3.bf16.msra.mxu1 %v13688_v35 }
 0xbae   :  { %v2406_v58 = vpop.xlane.xlu1 %2405 }
 0xbaf   :  { %v2409_v59 = vmul.f32 0.0078125, %v2406_v58 }
 0xbb1   :  { %v16881_v60 = vsub.f32 %v2401_v42, %v2409_v59  ;;  %v2483_v42 = vld [vmem:[#allocation7 + $0x88] sm:$0xff]  ;;  %v2484_v59 = vld [vmem:[#allocation7 + $0x90] sm:$0xff] }
 0xbb2   :  { %v2408_v61 = vpop.xlane.xlu0 %2407  ;;  %v13724_v43 = vpack.c.bf16 %v2483_v42, %v2482_v40 }
 0xbb3   :  { %v2410_v62 = vmul.f32 0.0078125, %v2408_v61  ;;  %v2413_v63 = vmul.f32 %v16881_v60, %v16881_v60  ;;  %v2485_v61 = vld [vmem:[#allocation7 + $0x98] sm:$0xff] }
 0xbb4   :  { %13725 = vmatprep.subr.bf16.mxu1 %v13724_v43 }
 0xbb5   :  { %2415 = vadd.xlane.f32.xlu1 %v2413_v63  ;;  %v16885_v1 = vsub.f32 %v2402_v44, %v2410_v62 }
 0xbb7   :  { %v2414_v2 = vmul.f32 %v16885_v1, %v16885_v1 }
 0xbb9   :  { %2417 = vadd.xlane.f32.xlu0 %v2414_v2  ;;  %v13728_v2 = vpack.c.bf16 %v2485_v61, %v2484_v59 }
 0xc42   :  { %v2416_v44 = vpop.xlane.xlu1 %2415 }
 0xc43   :  { %v2419_v45 = vmul.f32 0.0078125, %v2416_v44 }
 0xc45   :  { %v2421_v46 = vadd.f32 1e-05, %v2419_v45 }
 0xc46   :  { %v2418_v47 = vpop.xlane.xlu0 %2417 }
 0xc47   :  { %15084 = vrsqrt.f32 %v2421_v46  ;;  %v2420_v49 = vmul.f32 0.0078125, %v2418_v47 }
 0xc49   :  { %v2422_v50 = vadd.f32 1e-05, %v2420_v49 }
 0xc4b   :  { %15086 = vrsqrt.f32 %v2422_v50 }
 0xc51   :  { %v15085_v48 = vpop.eup %15084 }
 0xc52   :  { %v2425_v52 = vmul.f32 %v15085_v48, %v16881_v60  ;;  %v13732_v60 = vpack.c.bf16 %v2487_v4, %v2486_v3  ;;  %v15280_v4 = vld [vmem:[%s17722_s8 + $0x8] sm:$0xff] }
 0xc54   :  { %v2433_v55 = vmul.f32 %v11090_v51, %v2425_v52 }
 0xc55   :  { %v15087_v56 = vpop.eup %15086 }
 0xc56   :  { %v2426_v57 = vmul.f32 %v15087_v56, %v16885_v1  ;;  %v16893_v58 = vadd.f32 %v11091_v54, %v2433_v55  ;;  %v2488_v1 = vld [vmem:[#allocation7 + $0xb0] sm:$0xff] }
 0xc57   :  { %v13736_v7 = vpack.c.bf16 %v2489_v5, %v2488_v1  ;;  %v15281_v1 = vld [vmem:[%s17722_s8] sm:$0xff] }
 0xc58   :  { %v2434_v62 = vmul.f32 %v11090_v51, %v2426_v57  ;;  %12400 = vmatprep.mubr.f32.mxu1 %v16893_v58  ;;  %12435 = vmatprep.mubr.f32.mxu0 %v16893_v58 }
 0xc5a   :  { %v16897_v63 = vadd.f32 %v11091_v54, %v2434_v62 }
 0xc5c   :  { %12401 = vmatmul.mubr.f32.vlgmr.msra.gmra.mrb[18].mxu1 %v16897_v63  ;;  %12436 = vmatmul.mubr.f32.vlgmr.msra.gmra.mrb[14].mxu0 %v16897_v63 }
 0xc5d   :  { %13727 = vmatpush3.bf16.msra.mxu1 %v13724_v43  ;;  %12470 = vmatprep.mubr.f32.mxu1 %v16893_v58 }
 0xc5e   :  { %13729 = vmatprep.subr.bf16.mxu1 %v13728_v2 }
 0xc61   :  { %13731 = vmatpush3.bf16.msra.mxu1 %v13728_v2 }
 0xc62   :  { %13733 = vmatprep.subr.bf16.mxu1 %v13732_v60 }
 0xc65   :  { %13735 = vmatpush3.bf16.msra.mxu1 %v13732_v60 }
 0xc66   :  { %13737 = vmatprep.subr.bf16.mxu1 %v13736_v7 }
 0xc69   :  { %13739 = vmatpush3.bf16.msra.mxu1 %v13736_v7 }
 0xc6a   :  { %13741 = vmatprep.subr.bf16.mxu1 %v13740_v10 }
 0xc6d   :  { %13743 = vmatpush3.bf16.msra.mxu1 %v13740_v10 }
 0xc6e   :  { %13745 = vmatprep.subr.bf16.mxu1 %v13744_v12 }
 0xc71   :  { %13747 = vmatpush3.bf16.msra.mxu1 %v13744_v12 }
 0xc72   :  { %13749 = vmatprep.subr.bf16.mxu1 %v13748_v41 }
 0xc75   :  { %13751 = vmatpush3.bf16.msra.mxu1 %v13748_v41 }
 0xc76   :  { %13753 = vmatprep.subr.bf16.mxu1 %v13752_v19 }
 0xc79   :  { %13755 = vmatpush3.bf16.msra.mxu1 %v13752_v19 }
 0xc7c   :  { %12471 = vmatmul.mubr.f32.vlgmr.msra.gmra.mrb[20].mxu1 %v16897_v63 }
 0xd2f   :  { %v12402_v22 = vpop.f32.mrb[18].mxu1  ;;  %v12437_v23 = vpop.f32.mrb[14].mxu0 }
 0xd30   :  { %v2678_v24 = vadd.f32 %v12437_v23, %v11097_v20  ;;  %v2591_v25 = vpop.f32.mrb[19].mxu1  ;;  %v2672_v26 = vpop.f32.mrb[15].mxu0  ;;  %v2597_v30 = vadd.f32 %v12402_v22, %v11096_v21 }
 0xd31   :  { %v2592_v27 = vadd.f32 %v11096_v21, %v2591_v25  ;;  %v2673_v28 = vadd.f32 %v11097_v20, %v2672_v26 }
 0xd33   :  { %12477 = vmatprep.mubr.msk.f32.mxu0 %vm1019_vm0, %v2592_v27  ;;  %v14903_v29 = vpack.i.bf16 %v2678_v24, %v2673_v28  ;;  %v13756_v53 = vpack.c.bf16 %v2678_v24, %v2673_v28 }
 0xd35   :  { %14904 = vrot.lane.b32.xlu0 %v14903_v29, %s16162_s14  ;;  %14899 = vrot.lane.b32.xlu1 %v14903_v29, %s16161_s18 }
 0xd36   :  { %13758 = vmatprep.subr.msk.bf16.mxu0 %vm16727_vm1, %v13756_v53 }
 0xd37   :  { %13761 = vmatpush3.bf16.xpose.msk.msra.mxu0 %vm16727_vm1, %v13756_v53 }
 0xd39   :  { %14909 = vrot.lane.b32.xlu0 %v14903_v29, %s16163_s22  ;;  %2764 = vrot.lane.b32.xlu1 %v2592_v27, %s16161_s18 }
 0xd3d   :  { %2770 = vrot.lane.b32.xlu0 %v2597_v30, %s16162_s14  ;;  %2766 = vrot.lane.b32.xlu1 %v2597_v30, %s16161_s18 }
 0xd3e   :  { %12478 = vmatmul.mubr.msk.f32.vlgmr.msra.gmra.mrb[16].mxu0 %vm1019_vm0, %v2597_v30 }
 0xd41   :  { %2774 = vrot.lane.b32.xlu0 %v2597_v30, %s16163_s22  ;;  %2768 = vrot.lane.b32.xlu1 %v2592_v27, %s16162_s14 }
 0xd45   :  { %2772 = vrot.lane.b32.xlu1 %v2592_v27, %s16163_s22 }
 0xd4f   :  { %v12472_v32 = vpop.f32.mrb[20].mxu1 }
 0xd50   :  { %v2759_v33 = vadd.f32 %v12472_v32, %v11098_v31  ;;  %v2753_v34 = vpop.f32.mrb[21].mxu1 }
 0xd51   :  { %v2754_v35 = vadd.f32 %v11098_v31, %v2753_v34 }
 0xd53   :  { %v13780_v36 = vpack.c.bf16 %v2759_v33, %v2754_v35  ;;  %v16921_v37 = vpack.i.bf16 %v2759_v33, %v2754_v35 }
 0xda7   :  { %v14905_v38 = vpop.permute.xlu0 %14904  ;;  %v14900_v40 = vpop.permute.xlu1 %14899 }
 0xda8   :  { %v14907_v42 = vunpack.i.h.bf16 %v14905_v38  ;;  %v14906_v43 = vunpack.i.l.bf16 %v14905_v38  ;;  %v14902_v44 = vunpack.i.h.bf16 %v14900_v40  ;;  %v14901_v45 = vunpack.i.l.bf16 %v14900_v40 }
 0xdaa   :  { %v13768_v46 = vpack.c.bf16 %v14907_v42, %v14906_v43  ;;  %v13762_v47 = vpack.c.bf16 %v14902_v44, %v14901_v45 }
 0xdab   :  { %v14910_v49 = vpop.permute.xlu0 %14909  ;;  %v2765_v50 = vpop.permute.xlu1 %2764 }
 0xdac   :  { %v14912_v48 = vunpack.i.h.bf16 %v14910_v49  ;;  %v14911_v51 = vunpack.i.l.bf16 %v14910_v49  ;;  %13764 = vmatprep.subr.msk.bf16.mxu1 %vm16727_vm1, %v13762_v47  ;;  %12484 = vmatprep.mubr.msk.f32.mxu1 %vm1019_vm0, %v2765_v50 }
 0xdad   :  { %13770 = vmatprep.subr.msk.bf16.mxu0 %vm16727_vm1, %v13768_v46  ;;  %13767 = vmatpush3.bf16.xpose.msk.msra.mxu1 %vm16727_vm1, %v13762_v47 }
 0xdae   :  { %v13774_v52 = vpack.c.bf16 %v14912_v48, %v14911_v51  ;;  %13773 = vmatpush3.bf16.xpose.msk.msra.mxu0 %vm16727_vm1, %v13768_v46 }
 0xdaf   :  { %13781 = vmatprep.subr.bf16.mxu0 %v13780_v36  ;;  %v2767_v54 = vpop.permute.xlu1 %2766  ;;  %v2771_v56 = vpop.permute.xlu0 %2770 }
 0xdb0   :  { %13776 = vmatprep.subr.msk.bf16.mxu1 %vm16727_vm1, %v13774_v52 }
 0xdb3   :  { %v2769_v55 = vpop.permute.xlu1 %2768  ;;  %v2775_v59 = vpop.permute.xlu0 %2774 }
 0xdb4   :  { %12485 = vmatmul.mubr.msk.f32.vlgmr.msra.gmra.mrb[22].mxu1 %vm1019_vm0, %v2767_v54  ;;  %12491 = vmatprep.mubr.msk.f32.mxu0 %vm1019_vm0, %v2769_v55 }
 0xdb5   :  { %12492 = vmatmul.mubr.msk.f32.vlgmr.msra.gmra.mrb[18].mxu0 %vm1019_vm0, %v2771_v56  ;;  %13779 = vmatpush3.bf16.xpose.msk.msra.mxu1 %vm16727_vm1, %v13774_v52 }
 0xdb6   :  { %13783 = vmatpush3.bf16.msra.mxu0 %v13780_v36 }
 0xdb7   :  { %v2773_v57 = vpop.permute.xlu1 %2772 }
 0xdb8   :  { %12498 = vmatprep.mubr.msk.f32.mxu1 %vm1019_vm0, %v2773_v57 }
 0xdbc   :  { %12499 = vmatmul.mubr.msk.f32.vlgmr.msra.gmra.mrb[24].mxu1 %vm1019_vm0, %v2775_v59 }
 0xe11   :  { %v12479_v61 = vpop.f32.mrb[16].mxu0 }
 0xe12   :  { %v3143_v62 = vmul.f32 0.17677669, %v12479_v61  ;;  %v2884_v2 = vpop.f32.mrb[17].mxu0 }
 0xe13   :  { %v3142_v3 = vmul.f32 0.17677669, %v2884_v2 }
 0xe14   :  { %v3151_v60 = vadd.f32 %v15280_v4, %v3143_v62 }
 0xe15   :  { %v3150_v5 = vadd.f32 %v15281_v1, %v3142_v3 }
 0xe16   :  { %v3161_v7 = vsel %vm1368_vm2, %v3151_v60, -inf }
 0xe17   :  { %3162 = vmax.xlane.f32.xlu0 %v3161_v7  ;;  %v3158_v8 = vsel %vm1368_vm2, %v3150_v5, -inf }
 0xe18   :  { %3159 = vmax.xlane.f32.xlu1 %v3158_v8 }
 0xe87   :  { %v12486_v9 = vpop.f32.mrb[22].mxu1 }
 0xe88   :  { %v3145_v10 = vmul.f32 0.17677669, %v12486_v9  ;;  %v2967_v11 = vpop.f32.mrb[23].mxu1  ;;  %v12493_v39 = vpop.f32.mrb[18].mxu0 }
 0xe89   :  { %v3144_v12 = vmul.f32 0.17677669, %v2967_v11  ;;  %v3147_v13 = vmul.f32 0.17677669, %v12493_v39  ;;  %v3050_v14 = vpop.f32.mrb[19].mxu0 }
 0xe8a   :  { %v3146_v41 = vmul.f32 0.17677669, %v3050_v14  ;;  %v3153_v15 = vadd.f32 %v15280_v4, %v3145_v10 }
 0xe8b   :  { %v3152_v17 = vadd.f32 %v15281_v1, %v3144_v12  ;;  %v3155_v20 = vadd.f32 %v15280_v4, %v3147_v13 }
 0xe8c   :  { %v3167_v19 = vsel %vm1368_vm2, %v3153_v15, -inf  ;;  %v3154_v22 = vadd.f32 %v15281_v1, %v3146_v41 }
 0xe8d   :  { %3168 = vmax.xlane.f32.xlu1 %v3167_v19  ;;  %v3164_v21 = vsel %vm1368_vm2, %v3152_v17, -inf  ;;  %v3173_v26 = vsel %vm1368_vm2, %v3155_v20, -inf }
 0xe8e   :  { %3165 = vmax.xlane.f32.xlu0 %v3164_v21  ;;  %v3170_v28 = vsel %vm1368_vm2, %v3154_v22, -inf }
 0xe8f   :  { %v12500_v23 = vpop.f32.mrb[24].mxu1 }
 0xe90   :  { %v3149_v24 = vmul.f32 0.17677669, %v12500_v23  ;;  %v3133_v25 = vpop.f32.mrb[25].mxu1 }
 0xe91   :  { %v3148_v27 = vmul.f32 0.17677669, %v3133_v25  ;;  %3174 = vmax.xlane.f32.xlu1 %v3173_v26 }
 0xe92   :  { %3171 = vmax.xlane.f32.xlu0 %v3170_v28  ;;  %v3157_v29 = vadd.f32 %v15280_v4, %v3149_v24 }
 0xe93   :  { %v3156_v53 = vadd.f32 %v15281_v1, %v3148_v27 }
 0xe94   :  { %v3179_v30 = vsel %vm1368_vm2, %v3157_v29, -inf }
 0xe95   :  { %3180 = vmax.xlane.f32.xlu1 %v3179_v30  ;;  %v3176_v31 = vsel %vm1368_vm2, %v3156_v53, -inf }
 0xe96   :  { %3177 = vmax.xlane.f32.xlu0 %v3176_v31 }
 0xea4   :  { %v3163_v32 = vpop.xlane.xlu0 %3162 }
 0xea5   :  { %v3183_v33 = vsub.f32 %v3151_v60, %v3163_v32  ;;  %v3160_v34 = vpop.xlane.xlu1 %3159  ;;  %v2501_v32 = vld [vmem:[#allocation8 + $0x80] sm:$0xff] }
 0xea6   :  { %v3182_v35 = vsub.f32 %v3150_v5, %v3160_v34 }
 0xea7   :  { %v3192_v36 = vmul.f32 1.442695, %v3183_v33  ;;  %v2502_v33 = vld [vmem:[#allocation8 + $0x88] sm:$0xff] }
 0xea8   :  { %v3190_v38 = vmul.f32 1.442695, %v3182_v35 }
 0xea9   :  { %15088 = vpow2.f32 %v3192_v36 }
 0xeaa   :  { %15090 = vpow2.f32 %v3190_v38 }
 0xeb3   :  { %v15089_v40 = vpop.eup %15088 }
 0xeb4   :  { %v15091_v42 = vpop.eup %15090  ;;  %v3209_v43 = vsel %vm1368_vm2, %v15089_v40, 0.0 }
 0xeb5   :  { %3210 = vadd.xlane.f32.xlu1 %v3209_v43  ;;  %v3206_v44 = vsel %vm1368_vm2, %v15091_v42, 0.0 }
 0xeb6   :  { %3207 = vadd.xlane.f32.xlu0 %v3206_v44  ;;  %v13796_v44 = vpack.c.bf16 %v2502_v33, %v2501_v32  ;;  %v11137_v32 = vld [vmem:[%s17725_s23 + $0x118] sm:$0xff]  ;;  %v11134_v33 = vld [vmem:[%s17725_s23 + $0x100] sm:$0xff] }
 0xf1a   :  { %v3169_v45 = vpop.xlane.xlu1 %3168 }
 0xf1b   :  { %v3185_v46 = vsub.f32 %v3153_v15, %v3169_v45  ;;  %v3166_v47 = vpop.xlane.xlu0 %3165 }
 0xf1c   :  { %v3184_v49 = vsub.f32 %v3152_v17, %v3166_v47 }
 0xf1d   :  { %v3196_v50 = vmul.f32 1.442695, %v3185_v46 }
 0xf1e   :  { %v3194_v48 = vmul.f32 1.442695, %v3184_v49  ;;  %v3175_v51 = vpop.xlane.xlu1 %3174 }
 0xf1f   :  { %15092 = vpow2.f32 %v3196_v50  ;;  %v3187_v52 = vsub.f32 %v3155_v20, %v3175_v51  ;;  %v3172_v54 = vpop.xlane.xlu0 %3171  ;;  %v2503_v50 = vld [vmem:[#allocation8 + $0x90] sm:$0xff] }
 0xf20   :  { %15094 = vpow2.f32 %v3194_v48  ;;  %v3186_v55 = vsub.f32 %v3154_v22, %v3172_v54  ;;  %v2504_v48 = vld [vmem:[#allocation8 + $0x98] sm:$0xff] }
 0xf21   :  { %v3200_v56 = vmul.f32 1.442695, %v3187_v52 }
 0xf22   :  { %v3198_v57 = vmul.f32 1.442695, %v3186_v55  ;;  %v3181_v59 = vpop.xlane.xlu1 %3180 }
 0xf23   :  { %15096 = vpow2.f32 %v3200_v56  ;;  %v3189_v61 = vsub.f32 %v3157_v29, %v3181_v59  ;;  %v3178_v62 = vpop.xlane.xlu0 %3177  ;;  %v13800_v56 = vpack.c.bf16 %v2504_v48, %v2503_v50  ;;  %v2506_v59 = vld [vmem:[#allocation8 + $0xa8] sm:$0xff] }
 0xf24   :  { %15098 = vpow2.f32 %v3198_v57  ;;  %v3188_v2 = vsub.f32 %v3156_v53, %v3178_v62  ;;  %v2505_v57 = vld [vmem:[#allocation8 + $0xa0] sm:$0xff] }
 0xf25   :  { %v3204_v3 = vmul.f32 1.442695, %v3189_v61 }
 0xf26   :  { %v3202_v4 = vmul.f32 1.442695, %v3188_v2  ;;  %v13804_v2 = vpack.c.bf16 %v2506_v59, %v2505_v57 }
 0xf27   :  { %15100 = vpow2.f32 %v3204_v3 }
 0xf28   :  { %15102 = vpow2.f32 %v3202_v4  ;;  %v2507_v4 = vld [vmem:[#allocation8 + $0xb0] sm:$0xff] }
 0xf29   :  { %v16953_v60 = vpop.eup %15092 }
 0xf2a   :  { %v15095_v1 = vpop.eup %15094  ;;  %v3215_v5 = vsel %vm1368_vm2, %v16953_v60, 0.0 }
 0xf2b   :  { %3216 = vadd.xlane.f32.xlu1 %v3215_v5  ;;  %v3212_v7 = vsel %vm1368_vm2, %v15095_v1, 0.0 }
 0xf2c   :  { %3213 = vadd.xlane.f32.xlu0 %v3212_v7 }
 0xf2d   :  { %v16958_v8 = vpop.eup %15096 }
 0xf2e   :  { %v15099_v9 = vpop.eup %15098  ;;  %v3221_v10 = vsel %vm1368_vm2, %v16958_v8, 0.0 }
 0xf2f   :  { %3222 = vadd.xlane.f32.xlu1 %v3221_v10  ;;  %v3218_v11 = vsel %vm1368_vm2, %v15099_v9, 0.0 }
 0xf30   :  { %3219 = vadd.xlane.f32.xlu0 %v3218_v11  ;;  %v2511_v11 = vld [vmem:[#allocation8 + $0xd0] sm:$0xff] }
 0xf31   :  { %v16963_v39 = vpop.eup %15100 }
 0xf32   :  { %v16965_v12 = vpop.eup %15102  ;;  %v3227_v13 = vsel %vm1368_vm2, %v16963_v39, 0.0 }
 0xf33   :  { %3228 = vadd.xlane.f32.xlu1 %v3227_v13  ;;  %v3224_v14 = vsel %vm1368_vm2, %v16965_v12, 0.0 }
 0xf34   :  { %3225 = vadd.xlane.f32.xlu0 %v3224_v14 }
 0xf42   :  { %v3211_v41 = vpop.xlane.xlu1 %3210 }
 0xf43   :  { %15104 = vrcp.f32 %v3211_v41  ;;  %v3208_v15 = vpop.xlane.xlu0 %3207 }
 0xf44   :  { %15106 = vrcp.f32 %v3208_v15  ;;  %14919 = vrot.lane.b32.xlu1 %v16921_v37, %s16162_s14 }
 0xf48   :  { %14924 = vrot.lane.b32.xlu1 %v16921_v37, %s16163_s22 }
 0xf4a   :  { %14914 = vrot.lane.b32.xlu0 %v16921_v37, %s16161_s18 }
 0xf4d   :  { %v15105_v17 = vpop.eup %15104 }
 0xf4e   :  { %v15107_v19 = vpop.eup %15106  ;;  %v3239_v21 = vmul.f32 %v15105_v17, %v15089_v40  ;;  %v2513_v17 = vld [vmem:[#allocation8 + $0xe0] sm:$0xff] }
 0xf4f   :  { %v3238_v20 = vmul.f32 %v15107_v19, %v15091_v42  ;;  %v2514_v19 = vld [vmem:[#allocation8 + $0xe8] sm:$0xff] }
 0xf51   :  { %12505 = vmatprep.mubr.msk.f32.mxu0 %vm1368_vm2, %v3238_v20 }
 0xf52   :  { %12506 = vmatmul.mubr.msk.f32.vlgmr.msra.gmra.mrb[20].mxu0 %vm1368_vm2, %v3239_v21 }
 0xfb8   :  { %v3217_v22 = vpop.xlane.xlu1 %3216 }
 0xfb9   :  { %v3214_v23 = vpop.xlane.xlu0 %3213 }
 0xfba   :  { %15108 = vrcp.f32 %v3214_v23  ;;  %v2515_v23 = vld [vmem:[#allocation8 + $0xf0] sm:$0xff] }
 0xfbc   :  { %v3223_v24 = vpop.xlane.xlu1 %3222 }
 0xfbd   :  { %15110 = vrcp.f32 %v3223_v24  ;;  %v3220_v25 = vpop.xlane.xlu0 %3219  ;;  %v2516_v24 = vld [vmem:[#allocation8 + $0xf8] sm:$0xff] }
 0xfbe   :  { %15112 = vrcp.f32 %v3220_v25  ;;  %v13824_v25 = vpack.c.bf16 %v2516_v24, %v2515_v23  ;;  %v11165_v23 = vld [vmem:[%s17725_s23 + $0x1f8] sm:$0xff] }
 0xfbf   :  { %15114 = vrcp.f32 %v3217_v22  ;;  %v13820_v22 = vpack.c.bf16 %v2514_v19, %v2513_v17  ;;  %v11161_v17 = vld [vmem:[%s17725_s23 + $0x1d8] sm:$0xff]  ;;  %v11158_v19 = vld [vmem:[%s17725_s23 + $0x1c0] sm:$0xff] }
 0xfc0   :  { %v3229_v26 = vpop.xlane.xlu1 %3228 }
 0xfc1   :  { %v3226_v27 = vpop.xlane.xlu0 %3225 }
 0xfc2   :  { %15116 = vrcp.f32 %v3226_v27 }
 0xfc3   :  { %15118 = vrcp.f32 %v3229_v26  ;;  %v11125_v26 = vld [vmem:[%s17724_s5 + $0x1] ss:$0 sm:$0xff] }
 0xfc4   :  { %v15109_v37 = vpop.eup %15108  ;;  %v14920_v28 = vpop.permute.xlu1 %14919 }
 0xfc5   :  { %v14922_v29 = vunpack.i.h.bf16 %v14920_v28  ;;  %v14921_v53 = vunpack.i.l.bf16 %v14920_v28  ;;  %v14915_v30 = vpop.permute.xlu0 %14914  ;;  %v3240_v31 = vmul.f32 %v15109_v37, %v15095_v1 }
 0xfc6   :  { %v14917_v34 = vunpack.i.h.bf16 %v14915_v30  ;;  %v14916_v35 = vunpack.i.l.bf16 %v14915_v30 }
 0xfc7   :  { %v15111_v36 = vpop.eup %15110  ;;  %12512 = vmatprep.mubr.msk.f32.mxu1 %vm1368_vm2, %v3240_v31  ;;  %v13788_v38 = vpack.c.bf16 %v14922_v29, %v14921_v53  ;;  %v11135_v31 = vld [vmem:[%s17725_s23 + $0x108] sm:$0xff] }
 0xfc8   :  { %v15113_v40 = vpop.eup %15112  ;;  %v14925_v42 = vpop.permute.xlu1 %14924  ;;  %v13784_v43 = vpack.c.bf16 %v14917_v34, %v14916_v35  ;;  %v3243_v51 = vmul.f32 %v15111_v36, %v16958_v8  ;;  %v2509_v8 = vld [vmem:[#allocation8 + $0xc0] sm:$0xff]  ;;  %v13828_v34 = vpack.c.bf16 %v11137_v32, %v11135_v31  ;;  %v11136_v35 = vld [vmem:[%s17725_s23 + $0x110] sm:$0xff]  ;;  %v11139_v36 = vld [vmem:[%s17725_s23 + $0x128] sm:$0xff] }
 0xfc9   :  { %v15115_v45 = vpop.eup %15114  ;;  %v14927_v46 = vunpack.i.h.bf16 %v14925_v42  ;;  %v14926_v47 = vunpack.i.l.bf16 %v14925_v42  ;;  %13789 = vmatprep.subr.bf16.mxu0 %v13788_v38  ;;  %v3242_v49 = vmul.f32 %v15113_v40, %v15099_v9  ;;  %v2510_v9 = vld [vmem:[#allocation8 + $0xc8] sm:$0xff]  ;;  %v13830_v40 = vpack.c.bf16 %v11136_v35, %v11134_v33  ;;  %v4006_v32 = vld [vmem:[#allocation13 + $0x190] sm:$0xff]  ;;  %v4007_v33 = vld [vmem:[#allocation13 + $0x198] sm:$0xff] }
 0xfca   :  { %13785 = vmatprep.subr.bf16.mxu1 %v13784_v43  ;;  %13791 = vmatpush3.bf16.msra.mxu0 %v13788_v38  ;;  %v3241_v55 = vmul.f32 %v15115_v45, %v16953_v60  ;;  %v2508_v60 = vld [vmem:[#allocation8 + $0xb8] sm:$0xff]  ;;  %v13812_v10 = vpack.c.bf16 %v2510_v9, %v2509_v8  ;;  %v11143_v45 = vld [vmem:[%s17725_s23 + $0x148] sm:$0xff]  ;;  %v11150_v8 = vld [vmem:[%s17725_s23 + $0x180] sm:$0xff]  ;;  %v13864_v35 = vpack.c.bf16 %v4007_v33, %v4006_v32 }
 0xfcb   :  { %13787 = vmatpush3.bf16.msra.mxu1 %v13784_v43  ;;  %12519 = vmatprep.mubr.msk.f32.mxu0 %vm1368_vm2, %v3242_v49  ;;  %v13792_v52 = vpack.c.bf16 %v14927_v46, %v14926_v47  ;;  %v13808_v7 = vpack.c.bf16 %v2508_v60, %v2507_v4  ;;  %v11141_v38 = vld [vmem:[%s17725_s23 + $0x138] sm:$0xff]  ;;  %v11138_v43 = vld [vmem:[%s17725_s23 + $0x120] sm:$0xff]  ;;  %v11144_v49 = vld [vmem:[%s17725_s23 + $0x150] sm:$0xff] }
 0xfcc   :  { %v15117_v54 = vpop.eup %15116  ;;  %13797 = vmatprep.subr.bf16.mxu0 %v13796_v44  ;;  %v13832_v42 = vpack.c.bf16 %v11141_v38, %v11139_v36  ;;  %v11142_v47 = vld [vmem:[%s17725_s23 + $0x140] sm:$0xff]  ;;  %v11148_v4 = vld [vmem:[%s17725_s23 + $0x170] sm:$0xff] }
 0xfcd   :  { %v15119_v61 = vpop.eup %15118  ;;  %12520 = vmatmul.mubr.msk.f32.vlgmr.msra.gmra.mrb[22].mxu0 %vm1368_vm2, %v3243_v51  ;;  %13793 = vmatprep.subr.bf16.mxu1 %v13792_v52  ;;  %v3244_v62 = vmul.f32 %v15117_v54, %v16965_v12  ;;  %v13838_v50 = vpack.c.bf16 %v11144_v49, %v11142_v47  ;;  %v11152_v9 = vld [vmem:[%s17725_s23 + $0x190] sm:$0xff]  ;;  %v3991_v38 = vld [vmem:[#allocation13 + $0x118] sm:$0xff]  ;;  %v4262_v32 = vld [vmem:[#allocation17] sm:$0xff] }
 0xfce   :  { %12513 = vmatmul.mubr.msk.f32.vlgmr.msra.gmra.mrb[26].mxu1 %vm1368_vm2, %v3241_v55  ;;  %13799 = vmatpush3.bf16.msra.mxu0 %v13796_v44  ;;  %v3245_v3 = vmul.f32 %v15119_v61, %v16963_v39  ;;  %v2512_v39 = vld [vmem:[#allocation8 + $0xd8] sm:$0xff]  ;;  %v11140_v44 = vld [vmem:[%s17725_s23 + $0x130] sm:$0xff]  ;;  %v11147_v61 = vld [vmem:[%s17725_s23 + $0x168] sm:$0xff] }
 0xfcf   :  { %13795 = vmatpush3.bf16.msra.mxu1 %v13792_v52  ;;  %12526 = vmatprep.mubr.msk.f32.mxu1 %vm1368_vm2, %v3244_v62  ;;  %v13816_v15 = vpack.c.bf16 %v2512_v39, %v2511_v11  ;;  %v11149_v62 = vld [vmem:[%s17725_s23 + $0x178] sm:$0xff]  ;;  %v11155_v11 = vld [vmem:[%s17725_s23 + $0x1a8] sm:$0xff] }
 0xfd0   :  { %13801 = vmatprep.subr.bf16.mxu0 %v13800_v56  ;;  %13829 = vmatprep.subr.bf16.mxu1 %v13828_v34  ;;  %v11157_v39 = vld [vmem:[%s17725_s23 + $0x1b8] sm:$0xff]  ;;  %v3989_v31 = vld [vmem:[#allocation13 + $0x108] sm:$0xff] }
 0xfd1   :  { %v3990_v36 = vld [vmem:[#allocation13 + $0x110] sm:$0xff] }
 0xfd2   :  { %12527 = vmatmul.mubr.msk.f32.vlgmr.msra.gmra.mrb[28].mxu1 %vm1368_vm2, %v3245_v3  ;;  %13803 = vmatpush3.bf16.msra.mxu0 %v13800_v56  ;;  %v11146_v3 = vld [vmem:[%s17725_s23 + $0x160] sm:$0xff]  ;;  %v4263_v33 = vld [vmem:[#allocation17 + $0x8] sm:$0xff] }
 0xfd3   :  { %13805 = vmatprep.subr.bf16.mxu0 %v13804_v2  ;;  %4097 = vmatprep.mubr.f32.mxu1 %v16164_v6  ;;  %v13842_v60 = vpack.c.bf16 %v11148_v4, %v11146_v3 }
 0xfd4   :  { %13831 = vmatpush1.bf16.msra.mxu1 %v13830_v40  ;;  %v4008_v40 = vld [vmem:[#allocation13 + $0x1a0] sm:$0xff] }
 0xfd5   :  { %13833 = vmatprep.subr.bf16.mxu1 %v13832_v42  ;;  %v4009_v42 = vld [vmem:[#allocation13 + $0x1a8] sm:$0xff] }
0x1025   :  { %v12507_v1 = vpop.f32.mrb[20].mxu0 }
0x1026   :  { %v3318_v5 = vpop.f32.mrb[21].mxu0 }
0x1027   :  { %12537 = vmatprep.mubr.msk.f32.mxu0 %vm1019_vm0, %v3318_v5  ;;  %v11153_v5 = vld [vmem:[%s17725_s23 + $0x198] sm:$0xff] }
0x1028   :  { %12538 = vmatmul.mubr.msk.f32.vlgmr.msra.gmra.mrb[24].mxu0 %vm1019_vm0, %v12507_v1  ;;  %v11151_v1 = vld [vmem:[%s17725_s23 + $0x188] sm:$0xff] }
0x1029   :  { %13807 = vmatpush3.bf16.msra.mxu0 %v13804_v2  ;;  %v13840_v2 = vpack.c.bf16 %v11149_v62, %v11147_v61  ;;  %v3997_v61 = vld [vmem:[#allocation13 + $0x148] sm:$0xff]  ;;  %v4014_v62 = vld [vmem:[#allocation13 + $0x1d0] sm:$0xff] }
0x102a   :  { %13809 = vmatprep.subr.bf16.mxu0 %v13808_v7 }
0x102d   :  { %13811 = vmatpush3.bf16.msra.mxu0 %v13808_v7  ;;  %v13844_v7 = vpack.c.bf16 %v11153_v5, %v11151_v1  ;;  %v3999_v1 = vld [vmem:[#allocation13 + $0x158] sm:$0xff]  ;;  %v4016_v5 = vld [vmem:[#allocation13 + $0x1e0] sm:$0xff] }
0x102e   :  { %13813 = vmatprep.subr.bf16.mxu0 %v13812_v10 }
0x10a0   :  { %v12521_v12 = vpop.f32.mrb[22].mxu0 }
0x10a1   :  { %v12514_v13 = vpop.f32.mrb[26].mxu1  ;;  %v3480_v14 = vpop.f32.mrb[23].mxu0 }
0x10a2   :  { %v3399_v41 = vpop.f32.mrb[27].mxu1 }
0x10a3   :  { %12548 = vmatprep.mubr.msk.f32.mxu0 %vm1019_vm0, %v3399_v41  ;;  %v11159_v41 = vld [vmem:[%s17725_s23 + $0x1c8] sm:$0xff] }
0x10a4   :  { %12549 = vmatmul.mubr.msk.f32.vlgmr.msra.gmra.mrb[24].mxu0 %vm1019_vm0, %v12514_v13  ;;  %v11154_v13 = vld [vmem:[%s17725_s23 + $0x1a0] sm:$0xff] }
0x10a5   :  { %v12528_v20 = vpop.f32.mrb[28].mxu1  ;;  %13815 = vmatpush3.bf16.msra.mxu0 %v13812_v10  ;;  %12559 = vmatprep.mubr.msk.f32.mxu0 %vm1019_vm0, %v3480_v14  ;;  %v13846_v10 = vpack.c.bf16 %v11152_v9, %v11150_v8  ;;  %v11156_v14 = vld [vmem:[%s17725_s23 + $0x1b0] sm:$0xff] }
0x10a6   :  { %v3561_v21 = vpop.f32.mrb[29].mxu1  ;;  %13817 = vmatprep.subr.bf16.mxu0 %v13816_v15 }
0x10a9   :  { %13819 = vmatpush3.bf16.msra.mxu0 %v13816_v15  ;;  %v13850_v15 = vpack.c.bf16 %v11156_v14, %v11154_v13 }
0x10aa   :  { %13821 = vmatprep.subr.bf16.mxu0 %v13820_v22 }
0x10ac   :  { %12560 = vmatmul.mubr.msk.f32.vlgmr.msra.gmra.mrb[24].mxu0 %vm1019_vm0, %v12521_v12  ;;  %v13848_v12 = vpack.c.bf16 %v11157_v39, %v11155_v11  ;;  %v4001_v11 = vld [vmem:[#allocation13 + $0x168] sm:$0xff] }
0x10ad   :  { %13823 = vmatpush3.bf16.msra.mxu0 %v13820_v22  ;;  %12570 = vmatprep.mubr.msk.f32.mxu0 %vm1019_vm0, %v3561_v21  ;;  %v13852_v21 = vpack.c.bf16 %v11161_v17, %v11159_v41  ;;  %v11163_v22 = vld [vmem:[%s17725_s23 + $0x1e8] sm:$0xff] }
0x10ae   :  { %13825 = vmatprep.subr.bf16.mxu0 %v13824_v25 }
0x10b1   :  { %13827 = vmatpush3.bf16.msra.mxu0 %v13824_v25  ;;  %v13856_v25 = vpack.c.bf16 %v11165_v23, %v11163_v22  ;;  %v11133_v22 = vld [vmem:[#allocation11 + $0x1] ss:$0 sm:$0xff] }
0x10b4   :  { %12571 = vmatmul.mubr.msk.f32.vlgmr.msra.gmra.mrb[24].mxu0 %vm1019_vm0, %v12528_v20  ;;  %v11160_v20 = vld [vmem:[%s17725_s23 + $0x1d0] sm:$0xff] }
0x10b5   :  { %v13854_v24 = vpack.c.bf16 %v11160_v20, %v11158_v19  ;;  %v11132_v20 = vld [vmem:[#allocation10 + $0x1] ss:$0 sm:$0xff] }
0x1187   :  { %v12572_v27 = vpop.f32.mrb[24].mxu0 }
0x1188   :  { %v14726_v37 = vadd.f32 %v12572_v27, %v11125_v26  ;;  %v3897_v28 = vpop.f32.mrb[25].mxu0  ;;  %v11164_v27 = vld [vmem:[%s17725_s23 + $0x1f0] sm:$0xff] }
0x1189   :  { %v14727_v29 = vadd.f32 %v11125_v26, %v3897_v28  ;;  %v11162_v26 = vld [vmem:[%s17725_s23 + $0x1e0] sm:$0xff] }
0x118a   :  { %v3909_v53 = vadd.f32 %v14726_v37, %v16897_v63  ;;  %v11145_v63 = vld [vmem:[%s17725_s23 + $0x158] sm:$0xff]  ;;  %v13858_v37 = vpack.c.bf16 %v11164_v27, %v11162_v26  ;;  %v4004_v28 = vld [vmem:[#allocation13 + $0x180] sm:$0xff] }
0x118b   :  { %v3908_v30 = vadd.f32 %v14727_v29, %v16893_v58  ;;  %v13834_v58 = vpack.c.bf16 %v11140_v44, %v11138_v43  ;;  %v13836_v46 = vpack.c.bf16 %v11145_v63, %v11143_v45  ;;  %v4005_v29 = vld [vmem:[#allocation13 + $0x188] sm:$0xff]  ;;  %v13866_v43 = vpack.c.bf16 %v3991_v38, %v3990_v36  ;;  %v3992_v45 = vld [vmem:[#allocation13 + $0x120] sm:$0xff]  ;;  %v4247_v38 = vld [vmem:[#allocation14 + $0x10] sm:$0xff] }
0x118c   :  { %3916 = vadd.xlane.f32.xlu1 %v3909_v53  ;;  %v13868_v44 = vpack.c.bf16 %v4009_v42, %v4008_v40  ;;  %v3993_v63 = vld [vmem:[#allocation13 + $0x128] sm:$0xff]  ;;  %v4248_v40 = vld [vmem:[#allocation14 + $0x18] sm:$0xff] }
0x118d   :  { %3914 = vadd.xlane.f32.xlu0 %v3908_v30  ;;  %13835 = vmatpush1.bf16.msra.mxu1 %v13834_v58  ;;  %v4010_v58 = vld [vmem:[#allocation13 + $0x1b0] sm:$0xff]  ;;  %v13870_v47 = vpack.c.bf16 %v3993_v63, %v3992_v45  ;;  %v13896_v42 = vpack.c.bf16 %v4248_v40, %v4247_v38 }
0x118e   :  { %13837 = vmatprep.subr.bf16.mxu1 %v13836_v46  ;;  %v4011_v46 = vld [vmem:[#allocation13 + $0x1b8] sm:$0xff]  ;;  %v4251_v63 = vld [vmem:[#allocation14 + $0x30] sm:$0xff] }
0x118f   :  { %v13872_v49 = vpack.c.bf16 %v4011_v46, %v4010_v58  ;;  %v4252_v58 = vld [vmem:[#allocation14 + $0x38] sm:$0xff]  ;;  %v4275_v38 = vld [vmem:[#allocation17 + $0x68] sm:$0xff] }
0x1190   :  { %v13904_v46 = vpack.c.bf16 %v4252_v58, %v4251_v63 }
0x1191   :  { %13839 = vmatpush1.bf16.msra.mxu1 %v13838_v50  ;;  %v3994_v50 = vld [vmem:[#allocation13 + $0x130] sm:$0xff] }
0x1192   :  { %13841 = vmatprep.subr.bf16.mxu1 %v13840_v2  ;;  %v4015_v2 = vld [vmem:[#allocation13 + $0x1d8] sm:$0xff] }
0x1193   :  { %v13880_v4 = vpack.c.bf16 %v4015_v2, %v4014_v62  ;;  %v4241_v62 = vld [vmem:[%s17731_s30] sm:$0xff] }
0x1195   :  { %13843 = vmatpush1.bf16.msra.mxu1 %v13842_v60  ;;  %v3998_v60 = vld [vmem:[#allocation13 + $0x150] sm:$0xff] }
0x1196   :  { %13845 = vmatprep.subr.bf16.mxu1 %v13844_v7  ;;  %v4017_v7 = vld [vmem:[#allocation13 + $0x1e8] sm:$0xff]  ;;  %v13882_v8 = vpack.c.bf16 %v3999_v1, %v3998_v60 }
0x1197   :  { %v13884_v9 = vpack.c.bf16 %v4017_v7, %v4016_v5  ;;  %v4240_v1 = vld [vmem:[%s17730_s28 + $0x8] sm:$0xff] }
0x1198   :  { %v4242_v5 = vld [vmem:[%s17731_s30 + $0x8] sm:$0xff] }
0x1199   :  { %13847 = vmatpush1.bf16.msra.mxu1 %v13846_v10  ;;  %v4000_v10 = vld [vmem:[#allocation13 + $0x160] sm:$0xff]  ;;  %v17060_v7 = vadd.f32 %v4242_v5, %v4240_v1  ;;  %v4288_v1 = vld [vmem:[#allocation20 + $0x48] sm:$0xff] }
0x119a   :  { %13849 = vmatprep.subr.bf16.mxu1 %v13848_v12  ;;  %v13886_v39 = vpack.c.bf16 %v4001_v11, %v4000_v10 }
0x119d   :  { %13851 = vmatpush1.bf16.msra.mxu1 %v13850_v15 }
0x119e   :  { %13853 = vmatprep.subr.bf16.mxu1 %v13852_v21 }
0x11a1   :  { %13855 = vmatpush1.bf16.msra.mxu1 %v13854_v24 }
0x11a2   :  { %13857 = vmatprep.subr.bf16.mxu1 %v13856_v25 }
0x11a5   :  { %13859 = vmatpush1.bf16.msra.mxu1 %v13858_v37 }
0x1219   :  { %v3917_v48 = vpop.xlane.xlu1 %3916 }
0x121a   :  { %v3915_v51 = vpop.xlane.xlu0 %3914  ;;  %v3919_v52 = vmul.f32 0.0078125, %v3917_v48  ;;  %v3995_v48 = vld [vmem:[#allocation13 + $0x138] sm:$0xff] }
0x121b   :  { %v3918_v54 = vmul.f32 0.0078125, %v3915_v51  ;;  %v4012_v51 = vld [vmem:[#allocation13 + $0x1c0] sm:$0xff] }
0x121c   :  { %v17017_v57 = vsub.f32 %v3909_v53, %v3919_v52  ;;  %v3988_v53 = vld [vmem:[#allocation13 + $0x100] sm:$0xff]  ;;  %v4013_v52 = vld [vmem:[#allocation13 + $0x1c8] sm:$0xff] }
0x121d   :  { %v17013_v55 = vsub.f32 %v3908_v30, %v3918_v54  ;;  %v13860_v30 = vpack.c.bf16 %v4005_v29, %v4004_v28  ;;  %v13862_v34 = vpack.c.bf16 %v3989_v31, %v3988_v53  ;;  %v13874_v54 = vpack.c.bf16 %v3995_v48, %v3994_v50  ;;  %v4018_v28 = vld [vmem:[#allocation13 + $0x1f0] sm:$0xff]  ;;  %v4019_v29 = vld [vmem:[#allocation13 + $0x1f8] sm:$0xff] }
0x121e   :  { %v3923_v59 = vmul.f32 %v17017_v57, %v17017_v57  ;;  %v13888_v53 = vpack.c.bf16 %v4019_v29, %v4018_v28  ;;  %v4255_v48 = vld [vmem:[#allocation14 + $0x50] sm:$0xff] }
0x121f   :  { %v3922_v56 = vmul.f32 %v17013_v55, %v17013_v55  ;;  %13861 = vmatprep.subr.bf16.mxu0 %v13860_v30  ;;  %v4003_v30 = vld [vmem:[#allocation13 + $0x178] sm:$0xff] }
0x1220   :  { %13863 = vmatpush3.bf16.msra.mxu0 %v13862_v34  ;;  %v4245_v34 = vld [vmem:[#allocation14] sm:$0xff] }
0x1221   :  { %3924 = vadd.xlane.f32.xlu0 %v3922_v56  ;;  %13865 = vmatprep.subr.bf16.mxu0 %v13864_v35  ;;  %v13876_v56 = vpack.c.bf16 %v4013_v52, %v4012_v51  ;;  %v4246_v35 = vld [vmem:[#allocation14 + $0x8] sm:$0xff]  ;;  %v4256_v51 = vld [vmem:[#allocation14 + $0x58] sm:$0xff] }
0x1222   :  { %v13892_v36 = vpack.c.bf16 %v4246_v35, %v4245_v34  ;;  %v13912_v52 = vpack.c.bf16 %v4256_v51, %v4255_v48  ;;  %v4272_v34 = vld [vmem:[#allocation17 + $0x50] sm:$0xff]  ;;  %v4273_v35 = vld [vmem:[#allocation17 + $0x58] sm:$0xff] }
0x1223   :  { %v4281_v48 = vld [vmem:[#allocation20 + $0x10] sm:$0xff] }
0x1224   :  { %13867 = vmatpush3.bf16.msra.mxu0 %v13866_v43  ;;  %13893 = vmatprep.subr.bf16.mxu1 %v13892_v36  ;;  %v4249_v43 = vld [vmem:[#allocation14 + $0x20] sm:$0xff] }
0x1225   :  { %3926 = vadd.xlane.f32.xlu0 %v3923_v59  ;;  %13869 = vmatprep.subr.bf16.mxu0 %v13868_v44  ;;  %v3996_v59 = vld [vmem:[#allocation13 + $0x140] sm:$0xff]  ;;  %v4250_v44 = vld [vmem:[#allocation14 + $0x28] sm:$0xff] }
0x1226   :  { %v13878_v3 = vpack.c.bf16 %v3997_v61, %v3996_v59  ;;  %v13900_v45 = vpack.c.bf16 %v4250_v44, %v4249_v43  ;;  %v4239_v61 = vld [vmem:[%s17730_s28] sm:$0xff] }
0x1227   :  { %v17055_v2 = vadd.f32 %v4241_v62, %v4239_v61  ;;  %v4277_v43 = vld [vmem:[#allocation17 + $0x78] sm:$0xff] }
0x1228   :  { %13871 = vmatpush3.bf16.msra.mxu0 %v13870_v47  ;;  %v4253_v47 = vld [vmem:[#allocation14 + $0x40] sm:$0xff]  ;;  %v4285_v62 = vld [vmem:[#allocation20 + $0x30] sm:$0xff] }
0x1229   :  { %13873 = vmatprep.subr.bf16.mxu0 %v13872_v49  ;;  %v4254_v49 = vld [vmem:[#allocation14 + $0x48] sm:$0xff] }
0x122a   :  { %v13908_v50 = vpack.c.bf16 %v4254_v49, %v4253_v47  ;;  %v4279_v49 = vld [vmem:[#allocation20] sm:$0xff] }
0x122c   :  { %13875 = vmatpush3.bf16.msra.mxu0 %v13874_v54  ;;  %v4257_v54 = vld [vmem:[#allocation14 + $0x60] sm:$0xff] }
0x122d   :  { %13877 = vmatprep.subr.bf16.mxu0 %v13876_v56  ;;  %v4258_v56 = vld [vmem:[#allocation14 + $0x68] sm:$0xff] }
0x122e   :  { %v13916_v59 = vpack.c.bf16 %v4258_v56, %v4257_v54  ;;  %v4283_v56 = vld [vmem:[#allocation20 + $0x20] sm:$0xff] }
0x1230   :  { %13879 = vmatpush3.bf16.msra.mxu0 %v13878_v3  ;;  %v4259_v3 = vld [vmem:[#allocation14 + $0x70] sm:$0xff] }
0x1231   :  { %13881 = vmatprep.subr.bf16.mxu0 %v13880_v4  ;;  %v4260_v4 = vld [vmem:[#allocation14 + $0x78] sm:$0xff] }
0x1232   :  { %v13920_v60 = vpack.c.bf16 %v4260_v4, %v4259_v3  ;;  %v4286_v3 = vld [vmem:[#allocation20 + $0x38] sm:$0xff] }
0x1233   :  { %v13968_v4 = vpack.c.bf16 %v4286_v3, %v4285_v62  ;;  %v650_v62 = vld [vmem:[%s17732_s2] sm:$0xff] }
0x1234   :  { %13883 = vmatpush3.bf16.msra.mxu0 %v13882_v8  ;;  %v11166_v8 = vld [vmem:[%s17726_s20 + $0x2] sm:$0x3] }
0x1235   :  { %13885 = vmatprep.subr.bf16.mxu0 %v13884_v9  ;;  %v4026_v9 = vrot.slane %v11166_v8, %v16873_v16  ;;  %v4030_v10 = vrot.slane %v11166_v8, %v16876_v18  ;;  %v4289_v8 = vld [vmem:[#allocation20 + $0x50] sm:$0xff] }
0x1238   :  { %13887 = vmatpush3.bf16.msra.mxu0 %v13886_v39 }
0x1239   :  { %13889 = vmatprep.subr.bf16.mxu0 %v13888_v53  ;;  %v4268_v53 = vld [vmem:[#allocation17 + $0x30] sm:$0xff] }
0x12ae   :  { %v3925_v12 = vpop.xlane.xlu0 %3924 }
0x12af   :  { %v3928_v13 = vmul.f32 0.0078125, %v3925_v12 }
0x12b1   :  { %v3930_v14 = vadd.f32 1e-05, %v3928_v13 }
0x12b2   :  { %v3927_v41 = vpop.xlane.xlu0 %3926 }
0x12b3   :  { %15120 = vrsqrt.f32 %v3930_v14  ;;  %v3929_v15 = vmul.f32 0.0078125, %v3927_v41  ;;  %v4264_v14 = vld [vmem:[#allocation17 + $0x10] sm:$0xff]  ;;  %v4265_v41 = vld [vmem:[#allocation17 + $0x18] sm:$0xff] }
0x12b5   :  { %v3931_v17 = vadd.f32 1e-05, %v3929_v15 }
0x12b7   :  { %15122 = vrsqrt.f32 %v3931_v17 }
0x12bd   :  { %v15121_v19 = vpop.eup %15120 }
0x12be   :  { %v3934_v21 = vmul.f32 %v15121_v19, %v17013_v55  ;;  %v4002_v55 = vld [vmem:[#allocation13 + $0x170] sm:$0xff] }
0x12bf   :  { %v13890_v31 = vpack.c.bf16 %v4003_v30, %v4002_v55  ;;  %v4269_v55 = vld [vmem:[#allocation17 + $0x38] sm:$0xff] }
0x12c0   :  { %v3942_v23 = vmul.f32 %v11132_v20, %v3934_v21  ;;  %v13936_v30 = vpack.c.bf16 %v4269_v55, %v4268_v53 }
0x12c1   :  { %v15123_v24 = vpop.eup %15122  ;;  %13891 = vmatpush3.bf16.msra.mxu0 %v13890_v31  ;;  %v4270_v31 = vld [vmem:[#allocation17 + $0x40] sm:$0xff] }
0x12c2   :  { %v17042_v25 = vadd.f32 %v11133_v22, %v3942_v23  ;;  %v3935_v26 = vmul.f32 %v15123_v24, %v17017_v57  ;;  %v17050_v57 = vpack.c.bf16 %v4263_v33, %v4262_v32  ;;  %v4266_v24 = vld [vmem:[#allocation17 + $0x20] sm:$0xff]  ;;  %v4271_v32 = vld [vmem:[#allocation17 + $0x48] sm:$0xff] }
0x12c3   :  { %v13940_v33 = vpack.c.bf16 %v4271_v32, %v4270_v31 }
0x12c4   :  { %4098 = vmatmul.mubr.f32.vlgmr.msra.gmra.mrb[30].mxu1 %v17042_v25  ;;  %v3943_v27 = vmul.f32 %v11132_v20, %v3935_v26  ;;  %13925 = vmatprep.subr.bf16.mxu0 %v17050_v57  ;;  %v4267_v26 = vld [vmem:[#allocation17 + $0x28] sm:$0xff] }
0x12c5   :  { %4103 = vmatprep.mubr.f32.mxu1 %v16164_v6  ;;  %13895 = vmatpush3.bf16.msra.mxu1 %v13892_v36  ;;  %v13932_v29 = vpack.c.bf16 %v4267_v26, %v4266_v24  ;;  %v4274_v36 = vld [vmem:[#allocation17 + $0x60] sm:$0xff] }
0x12c6   :  { %v17047_v37 = vadd.f32 %v11133_v22, %v3943_v27  ;;  %13897 = vmatprep.subr.bf16.mxu1 %v13896_v42  ;;  %v13928_v22 = vpack.c.bf16 %v4265_v41, %v4264_v14  ;;  %v13948_v40 = vpack.c.bf16 %v4275_v38, %v4274_v36  ;;  %v4294_v14 = vld [vmem:[#allocation20 + $0x78] sm:$0xff] }
0x12c8   :  { %4104 = vmatmul.mubr.f32.gmra.mrb[32].mxu1 %v17047_v37 }
0x12c9   :  { %13899 = vmatpush3.bf16.msra.mxu1 %v13896_v42  ;;  %12605 = vmatprep.mubr.f32.mxu1 %v17055_v2  ;;  %v4276_v42 = vld [vmem:[#allocation17 + $0x70] sm:$0xff] }
0x12ca   :  { %13901 = vmatprep.subr.bf16.mxu1 %v13900_v45  ;;  %v13952_v44 = vpack.c.bf16 %v4277_v43, %v4276_v42 }
0x12cd   :  { %13903 = vmatpush3.bf16.msra.mxu1 %v13900_v45  ;;  %v11173_v45 = vld [vmem:[#allocation16] ss:$0 sm:$0xff] }
0x12ce   :  { %13905 = vmatprep.subr.bf16.mxu1 %v13904_v46 }
0x12d1   :  { %13907 = vmatpush3.bf16.msra.mxu1 %v13904_v46 }
0x12d2   :  { %13909 = vmatprep.subr.bf16.mxu1 %v13908_v50 }
0x12d5   :  { %13911 = vmatpush3.bf16.msra.mxu1 %v13908_v50  ;;  %v4280_v50 = vld [vmem:[#allocation20 + $0x8] sm:$0xff] }
0x12d6   :  { %13913 = vmatprep.subr.bf16.mxu1 %v13912_v52  ;;  %v13956_v51 = vpack.c.bf16 %v4280_v50, %v4279_v49 }
0x12d9   :  { %13915 = vmatpush3.bf16.msra.mxu1 %v13912_v52  ;;  %v4282_v52 = vld [vmem:[#allocation20 + $0x18] sm:$0xff] }
0x12da   :  { %13917 = vmatprep.subr.bf16.mxu1 %v13916_v59  ;;  %v13960_v54 = vpack.c.bf16 %v4282_v52, %v4281_v48 }
0x12dd   :  { %13919 = vmatpush3.bf16.msra.mxu1 %v13916_v59  ;;  %v4284_v59 = vld [vmem:[#allocation20 + $0x28] sm:$0xff] }
0x12de   :  { %13921 = vmatprep.subr.bf16.mxu1 %v13920_v60  ;;  %v13964_v61 = vpack.c.bf16 %v4284_v59, %v4283_v56  ;;  %v651_v56 = vld [vmem:[%s17732_s2 + $0x8] sm:$0xff] }
0x12e1   :  { %13923 = vmatpush3.bf16.msra.mxu1 %v13920_v60  ;;  %v4287_v60 = vld [vmem:[#allocation20 + $0x40] sm:$0xff] }
0x12e2   :  { %13957 = vmatprep.subr.bf16.mxu1 %v13956_v51  ;;  %v13972_v5 = vpack.c.bf16 %v4288_v1, %v4287_v60 }
0x12e4   :  { %12606 = vmatmul.mubr.f32.vlgmr.msra.gmra.mrb[34].mxu1 %v17060_v7 }
0x12e5   :  { %12675 = vmatprep.mubr.f32.mxu1 %v17055_v2  ;;  %13959 = vmatpush3.bf16.msra.mxu1 %v13956_v51 }
0x12e6   :  { %13961 = vmatprep.subr.bf16.mxu1 %v13960_v54 }
0x12e9   :  { %13963 = vmatpush3.bf16.msra.mxu1 %v13960_v54 }
0x12ea   :  { %13965 = vmatprep.subr.bf16.mxu1 %v13964_v61 }
0x12ed   :  { %13967 = vmatpush3.bf16.msra.mxu1 %v13964_v61 }
0x12ee   :  { %13969 = vmatprep.subr.bf16.mxu1 %v13968_v4 }
0x12f1   :  { %13971 = vmatpush3.bf16.msra.mxu1 %v13968_v4 }
0x12f2   :  { %13973 = vmatprep.subr.bf16.mxu1 %v13972_v5 }
0x12f5   :  { %13975 = vmatpush3.bf16.msra.mxu1 %v13972_v5 }
0x1397   :  { %v4099_v11 = vpop.f32.mrb[30].mxu1 }
0x1398   :  { %v4100_v39 = vadd.f32 %v4099_v11, %v4026_v9  ;;  %v4101_v12 = vpop.f32.mrb[31].mxu1  ;;  %v4291_v11 = vld [vmem:[#allocation20 + $0x60] sm:$0xff] }
0x1399   :  { %v4102_v13 = vadd.f32 %v4101_v12, %v4030_v10 }
0x139a   :  { %v4110_v19 = vmax.f32 %v4100_v39, 0.0  ;;  %v4292_v39 = vld [vmem:[#allocation20 + $0x68] sm:$0xff] }
0x139b   :  { %v4111_v15 = vmax.f32 %v4102_v13, 0.0  ;;  %v4105_v17 = vpop.f32.mrb[32].mxu1  ;;  %v13980_v12 = vpack.c.bf16 %v4292_v39, %v4291_v11  ;;  %v4293_v13 = vld [vmem:[#allocation20 + $0x70] sm:$0xff] }
0x139c   :  { %v4106_v20 = vadd.f32 %v4105_v17, %v4026_v9  ;;  %v4107_v21 = vpop.f32.mrb[33].mxu1  ;;  %v4290_v9 = vld [vmem:[#allocation20 + $0x58] sm:$0xff]  ;;  %v13984_v41 = vpack.c.bf16 %v4294_v14, %v4293_v13 }
0x139d   :  { %v4108_v23 = vadd.f32 %v4107_v21, %v4030_v10  ;;  %4184 = vmatprep.mubr.f32.mxu0 %v4111_v15  ;;  %v13976_v10 = vpack.c.bf16 %v4290_v9, %v4289_v8 }
0x139e   :  { %4185 = vmatmul.mubr.f32.vlgmr.msra.gmra.mrb[26].mxu0 %v4110_v19  ;;  %v4112_v28 = vmax.f32 %v4106_v20, 0.0 }
0x139f   :  { %v4113_v27 = vmax.f32 %v4108_v23, 0.0  ;;  %13927 = vmatpush3.bf16.msra.mxu0 %v17050_v57  ;;  %v13944_v57 = vpack.c.bf16 %v4273_v35, %v4272_v34  ;;  %13977 = vmatprep.subr.bf16.mxu1 %v13976_v10  ;;  %v11174_v23 = vld [vmem:[#allocation19] ss:$0 sm:$0xff] }
0x13a0   :  { %13929 = vmatprep.subr.bf16.mxu0 %v13928_v22  ;;  %13979 = vmatpush3.bf16.msra.mxu1 %v13976_v10 }
0x13a1   :  { %4189 = vmatprep.mubr.f32.mxu0 %v4113_v27  ;;  %13981 = vmatprep.subr.bf16.mxu1 %v13980_v12 }
0x13a2   :  { %4190 = vmatmul.mubr.f32.gmra.mrb[28].mxu0 %v4112_v28 }
0x13a3   :  { %13931 = vmatpush3.bf16.msra.mxu0 %v13928_v22  ;;  %12640 = vmatprep.mubr.f32.mxu0 %v17055_v2 }
0x13a4   :  { %13933 = vmatprep.subr.bf16.mxu0 %v13932_v29  ;;  %13983 = vmatpush3.bf16.msra.mxu1 %v13980_v12 }
0x13a5   :  { %13985 = vmatprep.subr.bf16.mxu1 %v13984_v41 }
0x13a7   :  { %13935 = vmatpush3.bf16.msra.mxu0 %v13932_v29 }
0x13a8   :  { %13937 = vmatprep.subr.bf16.mxu0 %v13936_v30  ;;  %13987 = vmatpush3.bf16.msra.mxu1 %v13984_v41 }
0x13ab   :  { %13939 = vmatpush3.bf16.msra.mxu0 %v13936_v30  ;;  %12676 = vmatmul.mubr.f32.vlgmr.msra.gmra.mrb[36].mxu1 %v17060_v7 }
0x13ac   :  { %13941 = vmatprep.subr.bf16.mxu0 %v13940_v33 }
0x13af   :  { %13943 = vmatpush3.bf16.msra.mxu0 %v13940_v33 }
0x13b0   :  { %13945 = vmatprep.subr.bf16.mxu0 %v13944_v57 }
0x13b3   :  { %13947 = vmatpush3.bf16.msra.mxu0 %v13944_v57 }
0x13b4   :  { %13949 = vmatprep.subr.bf16.mxu0 %v13948_v40 }
0x13b7   :  { %13951 = vmatpush3.bf16.msra.mxu0 %v13948_v40  ;;  %v12607_v63 = vpop.f32.mrb[34].mxu1 }
0x13b8   :  { %13953 = vmatprep.subr.bf16.mxu0 %v13952_v44  ;;  %v17070_v58 = vadd.f32 %v12607_v63, %v11173_v45  ;;  %v4385_v46 = vpop.f32.mrb[35].mxu1 }
0x13b9   :  { %v17072_v47 = vadd.f32 %v11173_v45, %v4385_v46  ;;  %v11175_v46 = vld [vmem:[#allocation22] ss:$0 sm:$0xff] }
0x13bb   :  { %13955 = vmatpush3.bf16.msra.mxu0 %v13952_v44 }
0x13be   :  { %12641 = vmatmul.mubr.f32.vlgmr.msra.gmra.mrb[30].mxu0 %v17060_v7 }
0x13bf   :  { %12682 = vmatprep.mubr.msk.f32.mxu0 %vm1019_vm0, %v17072_v47 }
0x1471   :  { %v11623_v15 = vpop.f32.mrb[26].mxu0 }
0x1472   :  { %v11624_v17 = vpop.f32.mrb[27].mxu0 }
0x1473   :  { %v17077_v19 = vadd.f32 %v11624_v17, %v11623_v15 }
0x1475   :  { %v11626_v20 = vpop.f32.mrb[28].mxu0 }
0x1476   :  { %v11627_v21 = vpop.f32.mrb[29].mxu0 }
0x1477   :  { %v17079_v22 = vadd.f32 %v11627_v21, %v11626_v20 }
0x147e   :  { %v12677_v49 = vpop.f32.mrb[36].mxu1 }
0x147f   :  { %v17120_v50 = vadd.f32 %v12677_v49, %v11175_v46  ;;  %v4547_v48 = vpop.f32.mrb[37].mxu1 }
0x1480   :  { %v17122_v51 = vadd.f32 %v11175_v46, %v4547_v48 }
0x1482   :  { %v14012_v52 = vpack.c.bf16 %v17120_v50, %v17122_v51 }
0x1491   :  { %v12642_v24 = vpop.f32.mrb[30].mxu0 }
0x1492   :  { %v4472_v26 = vadd.f32 %v12642_v24, %v11174_v23  ;;  %v4466_v27 = vpop.f32.mrb[31].mxu0 }
0x1493   :  { %v4467_v28 = vadd.f32 %v11174_v23, %v4466_v27 }
0x1495   :  { %v14933_v29 = vpack.i.bf16 %v4472_v26, %v4467_v28  ;;  %v13988_v53 = vpack.c.bf16 %v4472_v26, %v4467_v28 }
0x1497   :  { %14934 = vrot.lane.b32.xlu0 %v14933_v29, %s16162_s14  ;;  %14929 = vrot.lane.b32.xlu1 %v14933_v29, %s16161_s18 }
0x1498   :  { %13990 = vmatprep.subr.msk.bf16.mxu0 %vm16727_vm1, %v13988_v53 }
0x1499   :  { %13993 = vmatpush3.bf16.xpose.msk.msra.mxu0 %vm16727_vm1, %v13988_v53 }
0x149b   :  { %14939 = vrot.lane.b32.xlu0 %v14933_v29, %s16163_s22  ;;  %4558 = vrot.lane.b32.xlu1 %v17072_v47, %s16161_s18 }
0x149f   :  { %4564 = vrot.lane.b32.xlu0 %v17070_v58, %s16162_s14  ;;  %4560 = vrot.lane.b32.xlu1 %v17070_v58, %s16161_s18 }
0x14a0   :  { %12683 = vmatmul.mubr.msk.f32.vlgmr.msra.gmra.mrb[32].mxu0 %vm1019_vm0, %v17070_v58 }
0x14a3   :  { %4568 = vrot.lane.b32.xlu0 %v17070_v58, %s16163_s22  ;;  %4562 = vrot.lane.b32.xlu1 %v17072_v47, %s16162_s14 }
0x14a7   :  { %4566 = vrot.lane.b32.xlu1 %v17072_v47, %s16163_s22 }
0x1509   :  { %v14935_v55 = vpop.permute.xlu0 %14934  ;;  %v14930_v30 = vpop.permute.xlu1 %14929 }
0x150a   :  { %v14937_v31 = vunpack.i.h.bf16 %v14935_v55  ;;  %v14936_v32 = vunpack.i.l.bf16 %v14935_v55  ;;  %v14932_v33 = vunpack.i.h.bf16 %v14930_v30  ;;  %v14931_v34 = vunpack.i.l.bf16 %v14930_v30 }
0x150c   :  { %v14000_v35 = vpack.c.bf16 %v14937_v31, %v14936_v32  ;;  %v13994_v57 = vpack.c.bf16 %v14932_v33, %v14931_v34 }
0x150d   :  { %v14940_v36 = vpop.permute.xlu0 %14939  ;;  %v4559_v38 = vpop.permute.xlu1 %4558 }
0x150e   :  { %v14942_v40 = vunpack.i.h.bf16 %v14940_v36  ;;  %v14941_v42 = vunpack.i.l.bf16 %v14940_v36  ;;  %13996 = vmatprep.subr.msk.bf16.mxu1 %vm16727_vm1, %v13994_v57  ;;  %14002 = vmatprep.subr.msk.bf16.mxu0 %vm16727_vm1, %v14000_v35 }
0x150f   :  { %13999 = vmatpush3.bf16.xpose.msk.msra.mxu1 %vm16727_vm1, %v13994_v57  ;;  %14005 = vmatpush3.bf16.xpose.msk.msra.mxu0 %vm16727_vm1, %v14000_v35 }
0x1510   :  { %v14006_v43 = vpack.c.bf16 %v14942_v40, %v14941_v42  ;;  %12689 = vmatprep.mubr.msk.f32.mxu1 %vm1019_vm0, %v4559_v38  ;;  %14013 = vmatprep.subr.bf16.mxu0 %v14012_v52 }
0x1511   :  { %v4561_v44 = vpop.permute.xlu1 %4560  ;;  %v4565_v63 = vpop.permute.xlu0 %4564 }
0x1512   :  { %14008 = vmatprep.subr.msk.bf16.mxu1 %vm16727_vm1, %v14006_v43 }
0x1515   :  { %v4563_v45 = vpop.permute.xlu1 %4562  ;;  %v4569_v47 = vpop.permute.xlu0 %4568 }
0x1516   :  { %12690 = vmatmul.mubr.msk.f32.vlgmr.msra.gmra.mrb[38].mxu1 %vm1019_vm0, %v4561_v44  ;;  %12696 = vmatprep.mubr.msk.f32.mxu0 %vm1019_vm0, %v4563_v45 }
0x1517   :  { %12697 = vmatmul.mubr.msk.f32.vlgmr.msra.gmra.mrb[34].mxu0 %vm1019_vm0, %v4565_v63  ;;  %14011 = vmatpush3.bf16.xpose.msk.msra.mxu1 %vm16727_vm1, %v14006_v43 }
0x1518   :  { %14015 = vmatpush3.bf16.msra.mxu0 %v14012_v52 }
0x1519   :  { %v4567_v58 = vpop.permute.xlu1 %4566 }
0x151a   :  { %12703 = vmatprep.mubr.msk.f32.mxu1 %vm1019_vm0, %v4567_v58 }
0x151e   :  { %12704 = vmatmul.mubr.msk.f32.vlgmr.msra.gmra.mrb[40].mxu1 %vm1019_vm0, %v4569_v47 }
0x1573   :  { %v12684_v54 = vpop.f32.mrb[32].mxu0 }
0x1574   :  { %v4937_v59 = vmul.f32 0.17677669, %v12684_v54  ;;  %v4678_v61 = vpop.f32.mrb[33].mxu0 }
0x1575   :  { %v4936_v3 = vmul.f32 0.17677669, %v4678_v61 }
0x1576   :  { %v4945_v4 = vadd.f32 %v4937_v59, %v651_v56 }
0x1577   :  { %v4944_v60 = vadd.f32 %v4936_v3, %v650_v62 }
0x1578   :  { %v4955_v1 = vsel %vm1368_vm2, %v4945_v4, -inf }
0x1579   :  { %4956 = vmax.xlane.f32.xlu0 %v4955_v1  ;;  %v4952_v5 = vsel %vm1368_vm2, %v4944_v60, -inf }
0x157a   :  { %4953 = vmax.xlane.f32.xlu1 %v4952_v5 }
0x15e9   :  { %v12691_v8 = vpop.f32.mrb[38].mxu1 }
0x15ea   :  { %v4939_v9 = vmul.f32 0.17677669, %v12691_v8  ;;  %v4761_v10 = vpop.f32.mrb[39].mxu1  ;;  %v12698_v11 = vpop.f32.mrb[34].mxu0 }
0x15eb   :  { %v4938_v39 = vmul.f32 0.17677669, %v4761_v10  ;;  %v4941_v12 = vmul.f32 0.17677669, %v12698_v11  ;;  %v4844_v13 = vpop.f32.mrb[35].mxu0 }
0x15ec   :  { %v4940_v14 = vmul.f32 0.17677669, %v4844_v13  ;;  %v4947_v41 = vadd.f32 %v4939_v9, %v651_v56 }
0x15ed   :  { %v4946_v15 = vadd.f32 %v4938_v39, %v650_v62  ;;  %v4949_v20 = vadd.f32 %v4941_v12, %v651_v56 }
0x15ee   :  { %v4961_v17 = vsel %vm1368_vm2, %v4947_v41, -inf  ;;  %v4948_v23 = vadd.f32 %v4940_v14, %v650_v62 }
0x15ef   :  { %4962 = vmax.xlane.f32.xlu1 %v4961_v17  ;;  %v4958_v21 = vsel %vm1368_vm2, %v4946_v15, -inf  ;;  %v4967_v28 = vsel %vm1368_vm2, %v4949_v20, -inf }
0x15f0   :  { %4959 = vmax.xlane.f32.xlu0 %v4958_v21  ;;  %v4964_v53 = vsel %vm1368_vm2, %v4948_v23, -inf }
0x15f1   :  { %v12705_v24 = vpop.f32.mrb[40].mxu1 }
0x15f2   :  { %v4943_v26 = vmul.f32 0.17677669, %v12705_v24  ;;  %v4927_v27 = vpop.f32.mrb[41].mxu1 }
0x15f3   :  { %v4942_v29 = vmul.f32 0.17677669, %v4927_v27  ;;  %4968 = vmax.xlane.f32.xlu1 %v4967_v28 }
0x15f4   :  { %4965 = vmax.xlane.f32.xlu0 %v4964_v53  ;;  %v4951_v55 = vadd.f32 %v4943_v26, %v651_v56  ;;  %v11168_v53 = vld [vmem:[%s17727_s9 + $0x1] ss:$0 sm:$0xff] }
0x15f5   :  { %v4950_v30 = vadd.f32 %v4942_v29, %v650_v62 }
0x15f6   :  { %v4973_v31 = vsel %vm1368_vm2, %v4951_v55, -inf }
0x15f7   :  { %4974 = vmax.xlane.f32.xlu1 %v4973_v31  ;;  %v4970_v32 = vsel %vm1368_vm2, %v4950_v30, -inf }
0x15f8   :  { %4971 = vmax.xlane.f32.xlu0 %v4970_v32 }
0x1606   :  { %v4957_v33 = vpop.xlane.xlu0 %4956 }
0x1607   :  { %v4977_v34 = vsub.f32 %v4945_v4, %v4957_v33  ;;  %v4954_v35 = vpop.xlane.xlu1 %4953 }
0x1608   :  { %v4976_v57 = vsub.f32 %v4944_v60, %v4954_v35 }
0x1609   :  { %v4986_v36 = vmul.f32 1.442695, %v4977_v34 }
0x160a   :  { %v4984_v38 = vmul.f32 1.442695, %v4976_v57 }
0x160b   :  { %15124 = vpow2.f32 %v4986_v36 }
0x160c   :  { %15126 = vpow2.f32 %v4984_v38 }
0x1615   :  { %v15125_v40 = vpop.eup %15124 }
0x1616   :  { %v15127_v42 = vpop.eup %15126  ;;  %v5003_v43 = vsel %vm1368_vm2, %v15125_v40, 0.0 }
0x1617   :  { %5004 = vadd.xlane.f32.xlu1 %v5003_v43  ;;  %v5000_v44 = vsel %vm1368_vm2, %v15127_v42, 0.0 }
0x1618   :  { %5001 = vadd.xlane.f32.xlu0 %v5000_v44 }
0x167c   :  { %v4963_v45 = vpop.xlane.xlu1 %4962 }
0x167d   :  { %v4979_v63 = vsub.f32 %v4947_v41, %v4963_v45  ;;  %v4960_v58 = vpop.xlane.xlu0 %4959 }
0x167e   :  { %v4978_v46 = vsub.f32 %v4946_v15, %v4960_v58 }
0x167f   :  { %v4990_v47 = vmul.f32 1.442695, %v4979_v63 }
0x1680   :  { %v4988_v49 = vmul.f32 1.442695, %v4978_v46  ;;  %v4969_v48 = vpop.xlane.xlu1 %4968 }
0x1681   :  { %15128 = vpow2.f32 %v4990_v47  ;;  %v4981_v52 = vsub.f32 %v4949_v20, %v4969_v48  ;;  %v4966_v54 = vpop.xlane.xlu0 %4965 }
0x1682   :  { %15130 = vpow2.f32 %v4988_v49  ;;  %v4980_v56 = vsub.f32 %v4948_v23, %v4966_v54  ;;  %v14948_v23 = vpack.i.bf16 %v17120_v50, %v17122_v51  ;;  %v4187_v50 = vadd.f32 %v17077_v19, %v11168_v53 }
0x1683   :  { %v4994_v59 = vmul.f32 1.442695, %v4981_v52  ;;  %v4192_v51 = vadd.f32 %v17079_v22, %v11168_v53 }
0x1684   :  { %v4992_v61 = vmul.f32 1.442695, %v4980_v56  ;;  %v4975_v62 = vpop.xlane.xlu1 %4974 }
0x1685   :  { %15132 = vpow2.f32 %v4994_v59  ;;  %v4983_v3 = vsub.f32 %v4951_v55, %v4975_v62  ;;  %v4972_v4 = vpop.xlane.xlu0 %4971  ;;  %v17170_v55 = vadd.f32 %v4187_v50, %v17042_v25  ;;  %v4298_v59 = vld [vmem:[#allocation23 + $0x10] sm:$0xff] }
0x1686   :  { %15134 = vpow2.f32 %v4992_v61  ;;  %v4982_v60 = vsub.f32 %v4950_v30, %v4972_v4  ;;  %v17174_v30 = vadd.f32 %v4192_v51, %v17047_v37  ;;  %v4299_v61 = vld [vmem:[#allocation23 + $0x18] sm:$0xff]  ;;  %v4306_v51 = vld [vmem:[#allocation23 + $0x50] sm:$0xff] }
0x1687   :  { %v4998_v1 = vmul.f32 1.442695, %v4983_v3 }
0x1688   :  { %v4996_v5 = vmul.f32 1.442695, %v4982_v60 }
0x1689   :  { %15136 = vpow2.f32 %v4998_v1  ;;  %v14032_v1 = vpack.c.bf16 %v4299_v61, %v4298_v59 }
0x168a   :  { %15138 = vpow2.f32 %v4996_v5 }
0x168b   :  { %v17138_v8 = vpop.eup %15128 }
0x168c   :  { %v15131_v9 = vpop.eup %15130  ;;  %v5009_v10 = vsel %vm1368_vm2, %v17138_v8, 0.0 }
0x168d   :  { %5010 = vadd.xlane.f32.xlu1 %v5009_v10  ;;  %v5006_v11 = vsel %vm1368_vm2, %v15131_v9, 0.0 }
0x168e   :  { %5007 = vadd.xlane.f32.xlu0 %v5006_v11 }
0x168f   :  { %v17143_v39 = vpop.eup %15132 }
0x1690   :  { %v17145_v12 = vpop.eup %15134  ;;  %v5015_v13 = vsel %vm1368_vm2, %v17143_v39, 0.0 }
0x1691   :  { %5016 = vadd.xlane.f32.xlu1 %v5015_v13  ;;  %v5012_v14 = vsel %vm1368_vm2, %v17145_v12, 0.0  ;;  %v4300_v13 = vld [vmem:[#allocation23 + $0x20] sm:$0xff] }
0x1692   :  { %5013 = vadd.xlane.f32.xlu0 %v5012_v14  ;;  %v4301_v14 = vld [vmem:[#allocation23 + $0x28] sm:$0xff] }
0x1693   :  { %v17151_v41 = vpop.eup %15136 }
0x1694   :  { %v17153_v15 = vpop.eup %15138  ;;  %v5021_v17 = vsel %vm1368_vm2, %v17151_v41, 0.0 }
0x1695   :  { %5022 = vadd.xlane.f32.xlu1 %v5021_v17  ;;  %v5018_v20 = vsel %vm1368_vm2, %v17153_v15, 0.0  ;;  %v4302_v17 = vld [vmem:[#allocation23 + $0x30] sm:$0xff] }
0x1696   :  { %5019 = vadd.xlane.f32.xlu0 %v5018_v20  ;;  %v4303_v20 = vld [vmem:[#allocation23 + $0x38] sm:$0xff] }
0x16a4   :  { %v5005_v21 = vpop.xlane.xlu1 %5004 }
0x16a5   :  { %15140 = vrcp.f32 %v5005_v21  ;;  %v5002_v24 = vpop.xlane.xlu0 %5001 }
0x16a6   :  { %15142 = vrcp.f32 %v5002_v24  ;;  %14949 = vrot.lane.b32.xlu1 %v14948_v23, %s16162_s14  ;;  %v14040_v24 = vpack.c.bf16 %v4303_v20, %v4302_v17  ;;  %v5773_v20 = vld [vmem:[#allocation29 + $0x60] sm:$0xff] }
0x16aa   :  { %14954 = vrot.lane.b32.xlu1 %v14948_v23, %s16163_s22 }
0x16ac   :  { %14944 = vrot.lane.b32.xlu0 %v14948_v23, %s16161_s18 }
0x16af   :  { %v15141_v26 = vpop.eup %15140 }
0x16b0   :  { %v15143_v27 = vpop.eup %15142  ;;  %v5033_v29 = vmul.f32 %v15141_v26, %v15125_v40  ;;  %v4296_v40 = vld [vmem:[#allocation23] sm:$0xff]  ;;  %v4305_v26 = vld [vmem:[#allocation23 + $0x48] sm:$0xff] }
0x16b1   :  { %v5032_v28 = vmul.f32 %v15143_v27, %v15127_v42  ;;  %v4297_v42 = vld [vmem:[#allocation23 + $0x8] sm:$0xff] }
0x16b2   :  { %v14028_v49 = vpack.c.bf16 %v4297_v42, %v4296_v40 }
0x16b3   :  { %12710 = vmatprep.mubr.msk.f32.mxu0 %vm1368_vm2, %v5032_v28 }
0x16b4   :  { %12711 = vmatmul.mubr.msk.f32.vlgmr.msra.gmra.mrb[36].mxu0 %vm1368_vm2, %v5033_v29 }
0x16cb   :  { %4201 = vadd.xlane.f32.xlu0 %v17170_v55 }
0x16ce   :  { %4203 = vadd.xlane.f32.xlu1 %v17174_v30 }
0x171a   :  { %v5011_v31 = vpop.xlane.xlu1 %5010 }
0x171b   :  { %v5008_v32 = vpop.xlane.xlu0 %5007 }
0x171c   :  { %15144 = vrcp.f32 %v5008_v32 }
0x171e   :  { %v5017_v33 = vpop.xlane.xlu1 %5016 }
0x171f   :  { %15146 = vrcp.f32 %v5017_v33  ;;  %v5014_v34 = vpop.xlane.xlu0 %5013 }
0x1720   :  { %15148 = vrcp.f32 %v5014_v34 }
0x1721   :  { %15150 = vrcp.f32 %v5011_v31 }
0x1722   :  { %v5023_v19 = vpop.xlane.xlu1 %5022 }
0x1723   :  { %v5020_v22 = vpop.xlane.xlu0 %5019 }
0x1724   :  { %15152 = vrcp.f32 %v5020_v22  ;;  %v4308_v22 = vld [vmem:[#allocation23 + $0x60] sm:$0xff] }
0x1725   :  { %15154 = vrcp.f32 %v5023_v19 }
0x1726   :  { %v15145_v25 = vpop.eup %15144  ;;  %v14950_v35 = vpop.permute.xlu1 %14949 }
0x1727   :  { %v14952_v57 = vunpack.i.h.bf16 %v14950_v35  ;;  %v14951_v36 = vunpack.i.l.bf16 %v14950_v35  ;;  %v14945_v37 = vpop.permute.xlu0 %14944  ;;  %v5034_v38 = vmul.f32 %v15145_v25, %v15131_v9  ;;  %v4309_v25 = vld [vmem:[#allocation23 + $0x68] sm:$0xff] }
0x1728   :  { %v14947_v43 = vunpack.i.h.bf16 %v14945_v37  ;;  %v14946_v44 = vunpack.i.l.bf16 %v14945_v37  ;;  %v4310_v37 = vld [vmem:[#allocation23 + $0x70] sm:$0xff] }
0x1729   :  { %v15147_v45 = vpop.eup %15146  ;;  %12717 = vmatprep.mubr.msk.f32.mxu1 %vm1368_vm2, %v5034_v38  ;;  %v14020_v63 = vpack.c.bf16 %v14952_v57, %v14951_v36  ;;  %v14052_v36 = vpack.c.bf16 %v4309_v25, %v4308_v22  ;;  %v4311_v38 = vld [vmem:[#allocation23 + $0x78] sm:$0xff] }
0x172a   :  { %v15149_v58 = vpop.eup %15148  ;;  %v14955_v46 = vpop.permute.xlu1 %14954  ;;  %v14016_v47 = vpack.c.bf16 %v14947_v43, %v14946_v44  ;;  %v5037_v62 = vmul.f32 %v15147_v45, %v17143_v39  ;;  %v14056_v42 = vpack.c.bf16 %v4311_v38, %v4310_v37  ;;  %v17196_v44 = vld [vmem:[%s17728_s26 + $0x1] ss:$0 sm:$0xff]  ;;  %v5748_v37 = vld [vmem:[#allocation26 + $0x20] sm:$0xff]  ;;  %v5749_v38 = vld [vmem:[#allocation26 + $0x28] sm:$0xff] }
0x172b   :  { %v15151_v48 = vpop.eup %15150  ;;  %v14957_v52 = vunpack.i.h.bf16 %v14955_v46  ;;  %v14956_v54 = vunpack.i.l.bf16 %v14955_v46  ;;  %14021 = vmatprep.subr.bf16.mxu0 %v14020_v63  ;;  %v5036_v56 = vmul.f32 %v15149_v58, %v17145_v12  ;;  %v5761_v46 = vld [vmem:[#allocation29] sm:$0xff] }
0x172c   :  { %14017 = vmatprep.subr.bf16.mxu1 %v14016_v47  ;;  %14023 = vmatpush3.bf16.msra.mxu0 %v14020_v63  ;;  %v5035_v60 = vmul.f32 %v15151_v48, %v17138_v8  ;;  %v17201_v63 = vld [vmem:[%s17729_s0 + $0x1] ss:$0 sm:$0xff]  ;;  %v11202_v48 = vld [vmem:[#allocation25] ss:$0 sm:$0xff] }
0x172d   :  { %14019 = vmatpush3.bf16.msra.mxu1 %v14016_v47  ;;  %12724 = vmatprep.mubr.msk.f32.mxu0 %vm1368_vm2, %v5036_v56  ;;  %v14024_v3 = vpack.c.bf16 %v14957_v52, %v14956_v54  ;;  %v5762_v47 = vld [vmem:[#allocation29 + $0x8] sm:$0xff] }
0x172e   :  { %v15153_v4 = vpop.eup %15152  ;;  %14029 = vmatprep.subr.bf16.mxu0 %v14028_v49 }
0x172f   :  { %v15155_v5 = vpop.eup %15154  ;;  %12725 = vmatmul.mubr.msk.f32.vlgmr.msra.gmra.mrb[38].mxu0 %vm1368_vm2, %v5037_v62  ;;  %14025 = vmatprep.subr.bf16.mxu1 %v14024_v3  ;;  %v5038_v9 = vmul.f32 %v15153_v4, %v17153_v15  ;;  %v14036_v15 = vpack.c.bf16 %v4301_v14, %v4300_v13  ;;  %v5771_v14 = vld [vmem:[#allocation29 + $0x50] sm:$0xff] }
0x1730   :  { %12718 = vmatmul.mubr.msk.f32.vlgmr.msra.gmra.mrb[42].mxu1 %vm1368_vm2, %v5035_v60  ;;  %14031 = vmatpush3.bf16.msra.mxu0 %v14028_v49  ;;  %v5039_v10 = vmul.f32 %v15155_v5, %v17151_v41  ;;  %v4304_v41 = vld [vmem:[#allocation23 + $0x40] sm:$0xff]  ;;  %v14092_v49 = vpack.c.bf16 %v5762_v47, %v5761_v46 }
0x1731   :  { %14027 = vmatpush3.bf16.msra.mxu1 %v14024_v3  ;;  %12731 = vmatprep.mubr.msk.f32.mxu1 %vm1368_vm2, %v5038_v9  ;;  %v14044_v27 = vpack.c.bf16 %v4305_v26, %v4304_v41  ;;  %v5764_v5 = vld [vmem:[#allocation29 + $0x18] sm:$0xff] }
0x1732   :  { %14033 = vmatprep.subr.bf16.mxu0 %v14032_v1  ;;  %v5776_v41 = vld [vmem:[#allocation29 + $0x78] sm:$0xff] }
0x1734   :  { %12732 = vmatmul.mubr.msk.f32.vlgmr.msra.gmra.mrb[44].mxu1 %vm1368_vm2, %v5039_v10  ;;  %14035 = vmatpush3.bf16.msra.mxu0 %v14032_v1  ;;  %v5763_v1 = vld [vmem:[#allocation29 + $0x10] sm:$0xff]  ;;  %v5765_v10 = vld [vmem:[#allocation29 + $0x20] sm:$0xff] }
0x1735   :  { %14037 = vmatprep.subr.bf16.mxu0 %v14036_v15  ;;  %v14096_v9 = vpack.c.bf16 %v5764_v5, %v5763_v1  ;;  %v5759_v1 = vld [vmem:[#allocation26 + $0x78] sm:$0xff] }
0x1758   :  { %v4202_v8 = vpop.xlane.xlu0 %4201 }
0x1759   :  { %v4205_v11 = vmul.f32 0.0078125, %v4202_v8  ;;  %v5766_v8 = vld [vmem:[#allocation29 + $0x28] sm:$0xff] }
0x175b   :  { %v4207_v39 = vsub.f32 %v17170_v55, %v4205_v11  ;;  %v4204_v28 = vpop.xlane.xlu1 %4203  ;;  %v4307_v55 = vld [vmem:[#allocation23 + $0x58] sm:$0xff]  ;;  %v14100_v11 = vpack.c.bf16 %v5766_v8, %v5765_v10 }
0x175c   :  { %v14048_v19 = vpack.c.bf16 %v4307_v55, %v4306_v51  ;;  %v4206_v59 = vmul.f32 0.0078125, %v4204_v28  ;;  %v5745_v28 = vld [vmem:[#allocation26 + $0x8] sm:$0xff] }
0x175d   :  { %v4209_v12 = vmul.f32 %v4207_v39, %v4207_v39 }
0x175e   :  { %v17210_v3 = vsub.f32 %v17174_v30, %v4206_v59  ;;  %v5768_v30 = vld [vmem:[#allocation29 + $0x38] sm:$0xff]  ;;  %v5754_v59 = vld [vmem:[#allocation26 + $0x50] sm:$0xff] }
0x175f   :  { %4211 = vadd.xlane.f32.xlu1 %v4209_v12  ;;  %v5770_v12 = vld [vmem:[#allocation29 + $0x48] sm:$0xff] }
0x1760   :  { %v4210_v60 = vmul.f32 %v17210_v3, %v17210_v3 }
0x1787   :  { %v12712_v21 = vpop.f32.mrb[36].mxu0 }
0x1788   :  { %v5112_v23 = vpop.f32.mrb[37].mxu0 }
0x1789   :  { %12742 = vmatprep.mubr.msk.f32.mxu0 %vm1019_vm0, %v5112_v23 }
0x178a   :  { %12743 = vmatmul.mubr.msk.f32.vlgmr.msra.gmra.mrb[40].mxu0 %vm1019_vm0, %v12712_v21  ;;  %v5774_v21 = vld [vmem:[#allocation29 + $0x68] sm:$0xff] }
0x178b   :  { %14039 = vmatpush3.bf16.msra.mxu0 %v14036_v15  ;;  %v5772_v15 = vld [vmem:[#allocation29 + $0x58] sm:$0xff]  ;;  %v14116_v23 = vpack.c.bf16 %v5774_v21, %v5773_v20 }
0x178c   :  { %14041 = vmatprep.subr.bf16.mxu0 %v14040_v24  ;;  %v14112_v17 = vpack.c.bf16 %v5772_v15, %v5771_v14  ;;  %v11210_v15 = vld [vmem:[#allocation40] ss:$0 sm:$0xff] }
0x178f   :  { %14043 = vmatpush3.bf16.msra.mxu0 %v14040_v24  ;;  %v5775_v24 = vld [vmem:[#allocation29 + $0x70] sm:$0xff] }
0x1790   :  { %14045 = vmatprep.subr.bf16.mxu0 %v14044_v27  ;;  %v14120_v26 = vpack.c.bf16 %v5776_v41, %v5775_v24  ;;  %v5780_v24 = vld [vmem:[#allocation32 + $0x10] sm:$0xff]  ;;  %v5781_v41 = vld [vmem:[#allocation32 + $0x18] sm:$0xff] }
0x17ec   :  { %v4212_v29 = vpop.xlane.xlu1 %4211 }
0x17ed   :  { %v4215_v53 = vmul.f32 0.0078125, %v4212_v29  ;;  %v5746_v29 = vld [vmem:[#allocation26 + $0x10] sm:$0xff] }
0x17ef   :  { %v4217_v50 = vadd.f32 1e-05, %v4215_v53 }
0x17f1   :  { %15156 = vrsqrt.f32 %v4217_v50  ;;  %v5747_v50 = vld [vmem:[#allocation26 + $0x18] sm:$0xff] }
0x17f2   :  { %v14064_v51 = vpack.c.bf16 %v5747_v50, %v5746_v29  ;;  %v5782_v29 = vld [vmem:[#allocation32 + $0x20] sm:$0xff] }
0x17fb   :  { %v15157_v40 = vpop.eup %15156 }
0x17fc   :  { %v4221_v43 = vmul.f32 %v15157_v40, %v4207_v39  ;;  %v14068_v40 = vpack.c.bf16 %v5749_v38, %v5748_v37  ;;  %v5792_v37 = vld [vmem:[#allocation32 + $0x70] sm:$0xff]  ;;  %v5793_v38 = vld [vmem:[#allocation32 + $0x78] sm:$0xff] }
0x17fe   :  { %v4229_v45 = vmul.f32 %v17196_v44, %v4221_v43  ;;  %v5750_v43 = vld [vmem:[#allocation26 + $0x30] sm:$0xff] }
0x1800   :  { %v17204_v58 = vadd.f32 %v17201_v63, %v4229_v45  ;;  %v5751_v45 = vld [vmem:[#allocation26 + $0x38] sm:$0xff] }
0x1801   :  { %v14072_v47 = vpack.c.bf16 %v5751_v45, %v5750_v43 }
0x1802   :  { %v12726_v31 = vpop.f32.mrb[38].mxu0 }
0x1803   :  { %v12719_v32 = vpop.f32.mrb[42].mxu1  ;;  %v5274_v33 = vpop.f32.mrb[39].mxu0 }
0x1804   :  { %v5193_v34 = vpop.f32.mrb[43].mxu1 }
0x1805   :  { %12753 = vmatprep.mubr.msk.f32.mxu0 %vm1019_vm0, %v5193_v34 }
0x1806   :  { %12754 = vmatmul.mubr.msk.f32.vlgmr.msra.gmra.mrb[40].mxu0 %vm1019_vm0, %v12719_v32 }
0x1807   :  { %v12733_v35 = vpop.f32.mrb[44].mxu1  ;;  %14047 = vmatpush3.bf16.msra.mxu0 %v14044_v27  ;;  %12764 = vmatprep.mubr.msk.f32.mxu0 %vm1019_vm0, %v5274_v33  ;;  %v5744_v27 = vld [vmem:[#allocation26] sm:$0xff] }
0x1808   :  { %v5355_v57 = vpop.f32.mrb[45].mxu1  ;;  %14049 = vmatprep.subr.bf16.mxu0 %v14048_v19  ;;  %v14060_v53 = vpack.c.bf16 %v5745_v28, %v5744_v27  ;;  %v14128_v28 = vpack.c.bf16 %v5781_v41, %v5780_v24 }
0x180a   :  { %14061 = vmatprep.subr.bf16.mxu1 %v14060_v53 }
0x180b   :  { %14051 = vmatpush3.bf16.msra.mxu0 %v14048_v19  ;;  %14063 = vmatpush3.bf16.msra.mxu1 %v14060_v53  ;;  %v5783_v53 = vld [vmem:[#allocation32 + $0x28] sm:$0xff] }
0x180c   :  { %14053 = vmatprep.subr.bf16.mxu0 %v14052_v36  ;;  %14065 = vmatprep.subr.bf16.mxu1 %v14064_v51  ;;  %v14132_v50 = vpack.c.bf16 %v5783_v53, %v5782_v29 }
0x180e   :  { %12765 = vmatmul.mubr.msk.f32.vlgmr.msra.gmra.mrb[40].mxu0 %vm1019_vm0, %v12726_v31 }
0x180f   :  { %14055 = vmatpush3.bf16.msra.mxu0 %v14052_v36  ;;  %12775 = vmatprep.mubr.msk.f32.mxu0 %vm1019_vm0, %v5355_v57 }
0x1810   :  { %14057 = vmatprep.subr.bf16.mxu0 %v14056_v42  ;;  %14067 = vmatpush3.bf16.msra.mxu1 %v14064_v51  ;;  %v5784_v51 = vld [vmem:[#allocation32 + $0x30] sm:$0xff] }
0x1811   :  { %14069 = vmatprep.subr.bf16.mxu1 %v14068_v40 }
0x1813   :  { %14059 = vmatpush3.bf16.msra.mxu0 %v14056_v42 }
0x1814   :  { %14093 = vmatprep.subr.bf16.mxu0 %v14092_v49  ;;  %14071 = vmatpush3.bf16.msra.mxu1 %v14068_v40  ;;  %v14152_v40 = vpack.c.bf16 %v5793_v38, %v5792_v37 }
0x1815   :  { %14073 = vmatprep.subr.bf16.mxu1 %v14072_v47 }
0x1816   :  { %12776 = vmatmul.mubr.msk.f32.vlgmr.msra.gmra.mrb[40].mxu0 %vm1019_vm0, %v12733_v35 }
0x1817   :  { %12845 = vmatprep.mubr.f32.mxu0 %v17204_v58  ;;  %14095 = vmatpush3.bf16.msra.mxu0 %v14092_v49 }
0x1818   :  { %14097 = vmatprep.subr.bf16.mxu0 %v14096_v9  ;;  %14075 = vmatpush3.bf16.msra.mxu1 %v14072_v47 }
0x181b   :  { %14099 = vmatpush3.bf16.msra.mxu0 %v14096_v9  ;;  %v5779_v9 = vld [vmem:[#allocation32 + $0x8] sm:$0xff] }
0x181c   :  { %14101 = vmatprep.subr.bf16.mxu0 %v14100_v11 }
0x181f   :  { %14103 = vmatpush3.bf16.msra.mxu0 %v14100_v11 }
0x18e9   :  { %v12777_v52 = vpop.f32.mrb[40].mxu0 }
0x18ea   :  { %v5691_v54 = vpop.f32.mrb[41].mxu0  ;;  %v14728_v61 = vadd.f32 %v12777_v52, %v11202_v48  ;;  %v5753_v52 = vld [vmem:[#allocation26 + $0x48] sm:$0xff] }
0x18eb   :  { %v14729_v56 = vadd.f32 %v11202_v48, %v5691_v54  ;;  %v5752_v48 = vld [vmem:[#allocation26 + $0x40] sm:$0xff] }
0x18ec   :  { %v5703_v4 = vadd.f32 %v14728_v61, %v17060_v7  ;;  %v5769_v7 = vld [vmem:[#allocation29 + $0x40] sm:$0xff]  ;;  %v5755_v61 = vld [vmem:[#allocation26 + $0x58] sm:$0xff] }
0x18ed   :  { %v5702_v62 = vadd.f32 %v14729_v56, %v17055_v2  ;;  %v5767_v2 = vld [vmem:[#allocation29 + $0x30] sm:$0xff]  ;;  %v14108_v13 = vpack.c.bf16 %v5770_v12, %v5769_v7  ;;  %v14076_v56 = vpack.c.bf16 %v5753_v52, %v5752_v48 }
0x18ee   :  { %v14104_v39 = vpack.c.bf16 %v5768_v30, %v5767_v2 }
0x18ef   :  { %5706 = vadd.xlane.f32.xlu0 %v5702_v62  ;;  %14077 = vmatprep.subr.bf16.mxu1 %v14076_v56 }
0x18f0   :  { %14105 = vmatprep.subr.bf16.mxu0 %v14104_v39  ;;  %14079 = vmatpush3.bf16.msra.mxu1 %v14076_v56 }
0x18f1   :  { %14107 = vmatpush3.bf16.msra.mxu0 %v14104_v39 }
0x18f2   :  { %14109 = vmatprep.subr.bf16.mxu0 %v14108_v13 }
0x18f3   :  { %5708 = vadd.xlane.f32.xlu0 %v5703_v4 }
0x18f5   :  { %14111 = vmatpush3.bf16.msra.mxu0 %v14108_v13  ;;  %v11209_v13 = vld [vmem:[#allocation38] ss:$0 sm:$0xff] }
0x18f6   :  { %14113 = vmatprep.subr.bf16.mxu0 %v14112_v17 }
0x18f7   :  { %4213 = vadd.xlane.f32.xlu0 %v4210_v60  ;;  %v5757_v60 = vld [vmem:[#allocation26 + $0x68] sm:$0xff] }
0x18f9   :  { %14115 = vmatpush3.bf16.msra.mxu0 %v14112_v17 }
0x18fa   :  { %14117 = vmatprep.subr.bf16.mxu0 %v14116_v23 }
0x18fd   :  { %14119 = vmatpush3.bf16.msra.mxu0 %v14116_v23 }
0x18fe   :  { %14121 = vmatprep.subr.bf16.mxu0 %v14120_v26 }
0x1901   :  { %14123 = vmatpush3.bf16.msra.mxu0 %v14120_v26 }
0x197c   :  { %v5707_v55 = vpop.xlane.xlu0 %5706 }
0x197d   :  { %v5710_v31 = vmul.f32 0.0078125, %v5707_v55  ;;  %v5785_v55 = vld [vmem:[#allocation32 + $0x38] sm:$0xff] }
0x197f   :  { %v5712_v32 = vsub.f32 %v5702_v62, %v5710_v31  ;;  %v5756_v62 = vld [vmem:[#allocation26 + $0x60] sm:$0xff]  ;;  %v14136_v31 = vpack.c.bf16 %v5785_v55, %v5784_v51 }
0x1980   :  { %v5709_v33 = vpop.xlane.xlu0 %5708 }
0x1981   :  { %v5711_v34 = vmul.f32 0.0078125, %v5709_v33  ;;  %v5714_v19 = vmul.f32 %v5712_v32, %v5712_v32  ;;  %v5787_v33 = vld [vmem:[#allocation32 + $0x48] sm:$0xff] }
0x1983   :  { %v5713_v22 = vsub.f32 %v5703_v4, %v5711_v34  ;;  %5716 = vadd.xlane.f32.xlu1 %v5714_v19  ;;  %v14080_v4 = vpack.c.bf16 %v5755_v61, %v5754_v59  ;;  %v5788_v19 = vld [vmem:[#allocation32 + $0x50] sm:$0xff] }
0x1984   :  { %v4214_v25 = vpop.xlane.xlu0 %4213 }
0x1985   :  { %v4216_v35 = vmul.f32 0.0078125, %v4214_v25  ;;  %v5715_v57 = vmul.f32 %v5713_v22, %v5713_v22  ;;  %14081 = vmatprep.subr.bf16.mxu1 %v14080_v4 }
0x1986   :  { %14083 = vmatpush3.bf16.msra.mxu1 %v14080_v4 }
0x1987   :  { %v4218_v36 = vadd.f32 1e-05, %v4216_v35  ;;  %5718 = vadd.xlane.f32.xlu0 %v5715_v57  ;;  %v5790_v35 = vld [vmem:[#allocation32 + $0x60] sm:$0xff]  ;;  %v5791_v57 = vld [vmem:[#allocation32 + $0x68] sm:$0xff] }
0x1989   :  { %15158 = vrsqrt.f32 %v4218_v36  ;;  %v14148_v36 = vpack.c.bf16 %v5791_v57, %v5790_v35 }
0x1993   :  { %v15159_v42 = vpop.eup %15158 }
0x1994   :  { %v4222_v46 = vmul.f32 %v15159_v42, %v17210_v3  ;;  %v14084_v3 = vpack.c.bf16 %v5757_v60, %v5756_v62  ;;  %v11212_v42 = vld [vmem:[#allocation31] ss:$0 sm:$0xff] }
0x1996   :  { %v4230_v49 = vmul.f32 %v17196_v44, %v4222_v46  ;;  %v5758_v44 = vld [vmem:[#allocation26 + $0x70] sm:$0xff]  ;;  %14085 = vmatprep.subr.bf16.mxu1 %v14084_v3 }
0x1997   :  { %v14088_v5 = vpack.c.bf16 %v5759_v1, %v5758_v44  ;;  %14087 = vmatpush3.bf16.msra.mxu1 %v14084_v3 }
0x1998   :  { %v17218_v54 = vadd.f32 %v17201_v63, %v4230_v49  ;;  %v5778_v63 = vld [vmem:[#allocation32] sm:$0xff] }
0x1999   :  { %14089 = vmatprep.subr.bf16.mxu1 %v14088_v5  ;;  %v14124_v10 = vpack.c.bf16 %v5779_v9, %v5778_v63  ;;  %v11211_v9 = vld [vmem:[#allocation28] ss:$0 sm:$0xff] }
0x199a   :  { %12846 = vmatmul.mubr.f32.vlgmr.msra.gmra.mrb[42].mxu0 %v17218_v54 }
0x199b   :  { %14091 = vmatpush3.bf16.msra.mxu1 %v14088_v5 }
0x199c   :  { %14125 = vmatprep.subr.bf16.mxu1 %v14124_v10 }
0x1a10   :  { %v5717_v8 = vpop.xlane.xlu1 %5716 }
0x1a11   :  { %v5720_v11 = vmul.f32 0.0078125, %v5717_v8 }
0x1a13   :  { %v5722_v2 = vadd.f32 1e-05, %v5720_v11 }
0x1a14   :  { %v5719_v30 = vpop.xlane.xlu0 %5718 }
0x1a15   :  { %15160 = vrsqrt.f32 %v5722_v2  ;;  %v5721_v39 = vmul.f32 0.0078125, %v5719_v30  ;;  %v11213_v30 = vld [vmem:[#allocation34] ss:$0 sm:$0xff] }
0x1a17   :  { %v5723_v7 = vadd.f32 1e-05, %v5721_v39 }
0x1a19   :  { %15162 = vrsqrt.f32 %v5723_v7 }
0x1a1f   :  { %v15161_v12 = vpop.eup %15160 }
0x1a20   :  { %v5726_v14 = vmul.f32 %v15161_v12, %v5712_v32  ;;  %v5786_v32 = vld [vmem:[#allocation32 + $0x40] sm:$0xff] }
0x1a21   :  { %v14140_v34 = vpack.c.bf16 %v5787_v33, %v5786_v32 }
0x1a22   :  { %v5734_v17 = vmul.f32 %v11209_v13, %v5726_v14 }
0x1a23   :  { %v15163_v20 = vpop.eup %15162 }
0x1a24   :  { %v5727_v21 = vmul.f32 %v15163_v20, %v5713_v22  ;;  %v17221_v23 = vadd.f32 %v11210_v15, %v5734_v17  ;;  %v5789_v22 = vld [vmem:[#allocation32 + $0x58] sm:$0xff] }
0x1a25   :  { %v14144_v25 = vpack.c.bf16 %v5789_v22, %v5788_v19 }
0x1a26   :  { %v5735_v26 = vmul.f32 %v11209_v13, %v5727_v21  ;;  %12810 = vmatprep.mubr.f32.mxu1 %v17221_v23 }
0x1a28   :  { %v17224_v27 = vadd.f32 %v11210_v15, %v5735_v26 }
0x1a2a   :  { %12811 = vmatmul.mubr.f32.vlgmr.msra.gmra.mrb[46].mxu1 %v17224_v27 }
0x1a2b   :  { %14127 = vmatpush3.bf16.msra.mxu1 %v14124_v10  ;;  %12880 = vmatprep.mubr.f32.mxu1 %v17204_v58 }
0x1a2c   :  { %14129 = vmatprep.subr.bf16.mxu1 %v14128_v28 }
0x1a2f   :  { %14131 = vmatpush3.bf16.msra.mxu1 %v14128_v28  ;;  %v653_v28 = vld [vmem:[%s17733_s29 + $0x8] sm:$0xff] }
0x1a30   :  { %14133 = vmatprep.subr.bf16.mxu1 %v14132_v50 }
0x1a33   :  { %14135 = vmatpush3.bf16.msra.mxu1 %v14132_v50  ;;  %v652_v50 = vld [vmem:[%s17733_s29] sm:$0xff] }
0x1a34   :  { %14137 = vmatprep.subr.bf16.mxu1 %v14136_v31 }
0x1a37   :  { %14139 = vmatpush3.bf16.msra.mxu1 %v14136_v31 }
0x1a38   :  { %14141 = vmatprep.subr.bf16.mxu1 %v14140_v34 }
0x1a3b   :  { %14143 = vmatpush3.bf16.msra.mxu1 %v14140_v34 }
0x1a3c   :  { %14145 = vmatprep.subr.bf16.mxu1 %v14144_v25 }
0x1a3f   :  { %14147 = vmatpush3.bf16.msra.mxu1 %v14144_v25 }
0x1a40   :  { %14149 = vmatprep.subr.bf16.mxu1 %v14148_v36 }
0x1a43   :  { %14151 = vmatpush3.bf16.msra.mxu1 %v14148_v36 }
0x1a44   :  { %14153 = vmatprep.subr.bf16.mxu1 %v14152_v40 }
0x1a47   :  { %14155 = vmatpush3.bf16.msra.mxu1 %v14152_v40 }
0x1a4a   :  { %12881 = vmatmul.mubr.f32.vlgmr.msra.gmra.mrb[48].mxu1 %v17218_v54 }
0x1a6d   :  { %v12847_v43 = vpop.f32.mrb[42].mxu0 }
0x1a6e   :  { %v5971_v45 = vadd.f32 %v12847_v43, %v11212_v42  ;;  %v5965_v46 = vpop.f32.mrb[43].mxu0 }
0x1a6f   :  { %v5966_v47 = vadd.f32 %v11212_v42, %v5965_v46 }
0x1a71   :  { %v14963_v49 = vpack.i.bf16 %v5971_v45, %v5966_v47  ;;  %v14156_v48 = vpack.c.bf16 %v5971_v45, %v5966_v47 }
0x1a73   :  { %14964 = vrot.lane.b32.xlu0 %v14963_v49, %s16162_s14  ;;  %14959 = vrot.lane.b32.xlu1 %v14963_v49, %s16161_s18 }
0x1a74   :  { %14158 = vmatprep.subr.msk.bf16.mxu0 %vm16727_vm1, %v14156_v48 }
0x1a75   :  { %14161 = vmatpush3.bf16.xpose.msk.msra.mxu0 %vm16727_vm1, %v14156_v48 }
0x1a77   :  { %14969 = vrot.lane.b32.xlu0 %v14963_v49, %s16163_s22 }
0x1ae5   :  { %v14965_v52 = vpop.permute.xlu0 %14964  ;;  %v14960_v56 = vpop.permute.xlu1 %14959 }
0x1ae6   :  { %v14967_v59 = vunpack.i.h.bf16 %v14965_v52  ;;  %v14966_v61 = vunpack.i.l.bf16 %v14965_v52  ;;  %v14962_v62 = vunpack.i.h.bf16 %v14960_v56  ;;  %v14961_v4 = vunpack.i.l.bf16 %v14960_v56 }
0x1ae8   :  { %v14168_v60 = vpack.c.bf16 %v14967_v59, %v14966_v61  ;;  %v14162_v3 = vpack.c.bf16 %v14962_v62, %v14961_v4 }
0x1ae9   :  { %v14970_v44 = vpop.permute.xlu0 %14969 }
0x1aea   :  { %v14972_v1 = vunpack.i.h.bf16 %v14970_v44  ;;  %v14971_v5 = vunpack.i.l.bf16 %v14970_v44  ;;  %14164 = vmatprep.subr.msk.bf16.mxu1 %vm16727_vm1, %v14162_v3  ;;  %14170 = vmatprep.subr.msk.bf16.mxu0 %vm16727_vm1, %v14168_v60 }
0x1aeb   :  { %14167 = vmatpush3.bf16.xpose.msk.msra.mxu1 %vm16727_vm1, %v14162_v3 }
0x1aec   :  { %v14174_v63 = vpack.c.bf16 %v14972_v1, %v14971_v5 }
0x1aee   :  { %14176 = vmatprep.subr.msk.bf16.mxu1 %vm16727_vm1, %v14174_v63 }
0x1afd   :  { %v12812_v10 = vpop.f32.mrb[46].mxu1 }
0x1afe   :  { %v5890_v8 = vadd.f32 %v12812_v10, %v11211_v9  ;;  %v5884_v11 = vpop.f32.mrb[47].mxu1 }
0x1aff   :  { %v5885_v2 = vadd.f32 %v11211_v9, %v5884_v11 }
0x1b00   :  { %6063 = vrot.lane.b32.xlu0 %v5890_v8, %s16162_s14 }
0x1b01   :  { %6057 = vrot.lane.b32.xlu1 %v5885_v2, %s16161_s18  ;;  %12887 = vmatprep.mubr.msk.f32.mxu0 %vm1019_vm0, %v5885_v2 }
0x1b02   :  { %12888 = vmatmul.mubr.msk.f32.vlgmr.msra.gmra.mrb[44].mxu0 %vm1019_vm0, %v5890_v8 }
0x1b03   :  { %14173 = vmatpush3.bf16.xpose.msk.msra.mxu0 %vm16727_vm1, %v14168_v60 }
0x1b04   :  { %6067 = vrot.lane.b32.xlu0 %v5890_v8, %s16163_s22 }
0x1b05   :  { %6059 = vrot.lane.b32.xlu1 %v5890_v8, %s16161_s18 }
0x1b09   :  { %6061 = vrot.lane.b32.xlu1 %v5885_v2, %s16162_s14 }
0x1b0d   :  { %6065 = vrot.lane.b32.xlu1 %v5885_v2, %s16163_s22 }
0x1b1d   :  { %v12882_v39 = vpop.f32.mrb[48].mxu1 }
0x1b1e   :  { %v6052_v7 = vadd.f32 %v12882_v39, %v11213_v30  ;;  %v6046_v12 = vpop.f32.mrb[49].mxu1 }
0x1b1f   :  { %v6047_v13 = vadd.f32 %v11213_v30, %v6046_v12 }
0x1b21   :  { %v14180_v14 = vpack.c.bf16 %v6052_v7, %v6047_v13  ;;  %v17254_v15 = vpack.i.bf16 %v6052_v7, %v6047_v13 }
0x1b23   :  { %14181 = vmatprep.subr.bf16.mxu0 %v14180_v14 }
0x1b72   :  { %v6064_v21 = vpop.permute.xlu0 %6063 }
0x1b73   :  { %v6058_v17 = vpop.permute.xlu1 %6057 }
0x1b74   :  { %12894 = vmatprep.mubr.msk.f32.mxu1 %vm1019_vm0, %v6058_v17 }
0x1b76   :  { %v6068_v26 = vpop.permute.xlu0 %6067 }
0x1b77   :  { %v6060_v20 = vpop.permute.xlu1 %6059 }
0x1b78   :  { %12895 = vmatmul.mubr.msk.f32.vlgmr.msra.gmra.mrb[50].mxu1 %vm1019_vm0, %v6060_v20 }
0x1b79   :  { %14179 = vmatpush3.bf16.xpose.msk.msra.mxu1 %vm16727_vm1, %v14174_v63 }
0x1b7b   :  { %v6062_v24 = vpop.permute.xlu1 %6061 }
0x1b7c   :  { %12901 = vmatprep.mubr.msk.f32.mxu0 %vm1019_vm0, %v6062_v24 }
0x1b7d   :  { %12902 = vmatmul.mubr.msk.f32.vlgmr.msra.gmra.mrb[46].mxu0 %vm1019_vm0, %v6064_v21 }
0x1b7e   :  { %14183 = vmatpush3.bf16.msra.mxu0 %v14180_v14 }
0x1b7f   :  { %v6066_v41 = vpop.permute.xlu1 %6065 }
0x1b80   :  { %12908 = vmatprep.mubr.msk.f32.mxu1 %vm1019_vm0, %v6066_v41 }
0x1b81   :  { %12909 = vmatmul.mubr.msk.f32.vlgmr.msra.gmra.mrb[52].mxu1 %vm1019_vm0, %v6068_v26 }
0x1bd5   :  { %v12889_v29 = vpop.f32.mrb[44].mxu0 }
0x1bd6   :  { %v6436_v53 = vmul.f32 0.17677669, %v12889_v29  ;;  %v6177_v51 = vpop.f32.mrb[45].mxu0 }
0x1bd7   :  { %v6435_v55 = vmul.f32 0.17677669, %v6177_v51 }
0x1bd8   :  { %v6444_v31 = vadd.f32 %v6436_v53, %v653_v28 }
0x1bd9   :  { %v6443_v32 = vadd.f32 %v6435_v55, %v652_v50 }
0x1bda   :  { %v6454_v33 = vsel %vm1368_vm2, %v6444_v31, -inf }
0x1bdb   :  { %6455 = vmax.xlane.f32.xlu0 %v6454_v33  ;;  %v6451_v34 = vsel %vm1368_vm2, %v6443_v32, -inf }
0x1bdc   :  { %6452 = vmax.xlane.f32.xlu1 %v6451_v34 }
0x1c4b   :  { %v12896_v19 = vpop.f32.mrb[50].mxu1 }
0x1c4c   :  { %v6438_v22 = vmul.f32 0.17677669, %v12896_v19  ;;  %v6260_v25 = vpop.f32.mrb[51].mxu1 }
0x1c4d   :  { %v6437_v35 = vmul.f32 0.17677669, %v6260_v25 }
0x1c4e   :  { %v6446_v57 = vadd.f32 %v6438_v22, %v653_v28 }
0x1c4f   :  { %v6445_v36 = vadd.f32 %v6437_v35, %v652_v50 }
0x1c50   :  { %v12903_v37 = vpop.f32.mrb[46].mxu0  ;;  %v6460_v38 = vsel %vm1368_vm2, %v6446_v57, -inf }
0x1c51   :  { %v6440_v40 = vmul.f32 0.17677669, %v12903_v37  ;;  %v6343_v42 = vpop.f32.mrb[47].mxu0  ;;  %6461 = vmax.xlane.f32.xlu1 %v6460_v38  ;;  %v6457_v43 = vsel %vm1368_vm2, %v6445_v36, -inf }
0x1c52   :  { %v6439_v45 = vmul.f32 0.17677669, %v6343_v42  ;;  %6458 = vmax.xlane.f32.xlu0 %v6457_v43 }
0x1c53   :  { %v6448_v46 = vadd.f32 %v6440_v40, %v653_v28 }
0x1c54   :  { %v6447_v47 = vadd.f32 %v6439_v45, %v652_v50  ;;  %v12910_v49 = vpop.f32.mrb[52].mxu1 }
0x1c55   :  { %v6442_v48 = vmul.f32 0.17677669, %v12910_v49  ;;  %v6426_v52 = vpop.f32.mrb[53].mxu1  ;;  %v6466_v56 = vsel %vm1368_vm2, %v6448_v46, -inf }
0x1c56   :  { %v6441_v59 = vmul.f32 0.17677669, %v6426_v52  ;;  %6467 = vmax.xlane.f32.xlu1 %v6466_v56  ;;  %v6463_v61 = vsel %vm1368_vm2, %v6447_v47, -inf }
0x1c57   :  { %v6450_v62 = vadd.f32 %v6442_v48, %v653_v28  ;;  %6464 = vmax.xlane.f32.xlu0 %v6463_v61 }
0x1c58   :  { %v6449_v4 = vadd.f32 %v6441_v59, %v652_v50 }
0x1c59   :  { %v6472_v60 = vsel %vm1368_vm2, %v6450_v62, -inf }
0x1c5a   :  { %6473 = vmax.xlane.f32.xlu1 %v6472_v60  ;;  %v6469_v3 = vsel %vm1368_vm2, %v6449_v4, -inf }
0x1c5b   :  { %6470 = vmax.xlane.f32.xlu0 %v6469_v3 }
0x1c68   :  { %v6456_v44 = vpop.xlane.xlu0 %6455 }
0x1c69   :  { %v6476_v1 = vsub.f32 %v6444_v31, %v6456_v44  ;;  %v6453_v5 = vpop.xlane.xlu1 %6452 }
0x1c6a   :  { %v6475_v63 = vsub.f32 %v6443_v32, %v6453_v5  ;;  %v5795_v5 = vld [vmem:[#allocation35] sm:$0xff] }
0x1c6b   :  { %v6485_v9 = vmul.f32 1.442695, %v6476_v1 }
0x1c6c   :  { %v6483_v10 = vmul.f32 1.442695, %v6475_v63  ;;  %v5796_v63 = vld [vmem:[#allocation35 + $0x8] sm:$0xff] }
0x1c6d   :  { %15164 = vpow2.f32 %v6485_v9 }
0x1c6e   :  { %15166 = vpow2.f32 %v6483_v10 }
0x1c77   :  { %v15165_v8 = vpop.eup %15164 }
0x1c78   :  { %v15167_v11 = vpop.eup %15166  ;;  %v6502_v2 = vsel %vm1368_vm2, %v15165_v8, 0.0 }
0x1c79   :  { %6503 = vadd.xlane.f32.xlu1 %v6502_v2  ;;  %v6499_v30 = vsel %vm1368_vm2, %v15167_v11, 0.0 }
0x1c7a   :  { %6500 = vadd.xlane.f32.xlu0 %v6499_v30 }
0x1cde   :  { %v6462_v39 = vpop.xlane.xlu1 %6461 }
0x1cdf   :  { %v6478_v7 = vsub.f32 %v6446_v57, %v6462_v39  ;;  %v6459_v12 = vpop.xlane.xlu0 %6458 }
0x1ce0   :  { %v6477_v13 = vsub.f32 %v6445_v36, %v6459_v12 }
0x1ce1   :  { %v6489_v14 = vmul.f32 1.442695, %v6478_v7  ;;  %v14196_v7 = vpack.c.bf16 %v5796_v63, %v5795_v5  ;;  %v7244_v63 = vld [vmem:[#allocation47 + $0x8] sm:$0xff] }
0x1ce2   :  { %v6487_v17 = vmul.f32 1.442695, %v6477_v13 }
0x1ce3   :  { %15168 = vpow2.f32 %v6489_v14  ;;  %v6468_v20 = vpop.xlane.xlu1 %6467 }
0x1ce4   :  { %15170 = vpow2.f32 %v6487_v17  ;;  %v6480_v21 = vsub.f32 %v6448_v46, %v6468_v20  ;;  %v6465_v24 = vpop.xlane.xlu0 %6464  ;;  %v5797_v20 = vld [vmem:[#allocation35 + $0x10] sm:$0xff] }
0x1ce5   :  { %v6479_v41 = vsub.f32 %v6447_v47, %v6465_v24 }
0x1ce6   :  { %v6493_v26 = vmul.f32 1.442695, %v6480_v21  ;;  %v5798_v21 = vld [vmem:[#allocation35 + $0x18] sm:$0xff] }
0x1ce7   :  { %v6491_v28 = vmul.f32 1.442695, %v6479_v41  ;;  %v6474_v29 = vpop.xlane.xlu1 %6473 }
0x1ce8   :  { %15172 = vpow2.f32 %v6493_v26  ;;  %v6482_v53 = vsub.f32 %v6450_v62, %v6474_v29  ;;  %v6471_v50 = vpop.xlane.xlu0 %6470  ;;  %v14200_v29 = vpack.c.bf16 %v5798_v21, %v5797_v20  ;;  %v7251_v20 = vld [vmem:[#allocation47 + $0x40] sm:$0xff]  ;;  %v7253_v21 = vld [vmem:[#allocation47 + $0x50] sm:$0xff] }
0x1ce9   :  { %15174 = vpow2.f32 %v6491_v28  ;;  %v6481_v51 = vsub.f32 %v6449_v4, %v6471_v50  ;;  %v5800_v50 = vld [vmem:[#allocation35 + $0x28] sm:$0xff] }
0x1cea   :  { %v6497_v55 = vmul.f32 1.442695, %v6482_v53  ;;  %v5799_v53 = vld [vmem:[#allocation35 + $0x20] sm:$0xff] }
0x1ceb   :  { %v6495_v31 = vmul.f32 1.442695, %v6481_v51 }
0x1cec   :  { %15176 = vpow2.f32 %v6497_v55 }
0x1ced   :  { %v17276_v32 = vpop.eup %15168  ;;  %15178 = vpow2.f32 %v6495_v31  ;;  %v14204_v31 = vpack.c.bf16 %v5800_v50, %v5799_v53 }
0x1cee   :  { %v15171_v33 = vpop.eup %15170  ;;  %v6508_v34 = vsel %vm1368_vm2, %v17276_v32, 0.0 }
0x1cef   :  { %6509 = vadd.xlane.f32.xlu1 %v6508_v34  ;;  %v6505_v19 = vsel %vm1368_vm2, %v15171_v33, 0.0  ;;  %v5802_v34 = vld [vmem:[#allocation35 + $0x38] sm:$0xff] }
0x1cf0   :  { %6506 = vadd.xlane.f32.xlu0 %v6505_v19 }
0x1cf2   :  { %v17281_v22 = vpop.eup %15172 }
0x1cf3   :  { %v15175_v25 = vpop.eup %15174  ;;  %v6514_v35 = vsel %vm1368_vm2, %v17281_v22, 0.0 }
0x1cf4   :  { %6515 = vadd.xlane.f32.xlu1 %v6514_v35  ;;  %v6511_v57 = vsel %vm1368_vm2, %v15175_v25, 0.0  ;;  %v5803_v35 = vld [vmem:[#allocation35 + $0x40] sm:$0xff] }
0x1cf5   :  { %6512 = vadd.xlane.f32.xlu0 %v6511_v57  ;;  %v5804_v57 = vld [vmem:[#allocation35 + $0x48] sm:$0xff] }
0x1cf6   :  { %v17286_v36 = vpop.eup %15176 }
0x1cf7   :  { %v17288_v37 = vpop.eup %15178  ;;  %v6520_v38 = vsel %vm1368_vm2, %v17286_v36, 0.0 }
0x1cf8   :  { %6521 = vadd.xlane.f32.xlu1 %v6520_v38  ;;  %v6517_v40 = vsel %vm1368_vm2, %v17288_v37, 0.0  ;;  %v5806_v38 = vld [vmem:[#allocation35 + $0x58] sm:$0xff] }
0x1cf9   :  { %6518 = vadd.xlane.f32.xlu0 %v6517_v40 }
0x1d06   :  { %v6504_v42 = vpop.xlane.xlu1 %6503 }
0x1d07   :  { %15180 = vrcp.f32 %v6504_v42  ;;  %v6501_v43 = vpop.xlane.xlu0 %6500 }
0x1d08   :  { %15182 = vrcp.f32 %v6501_v43 }
0x1d09   :  { %14979 = vrot.lane.b32.xlu1 %v17254_v15, %s16162_s14 }
0x1d0d   :  { %14984 = vrot.lane.b32.xlu1 %v17254_v15, %s16163_s22 }
0x1d0f   :  { %14974 = vrot.lane.b32.xlu0 %v17254_v15, %s16161_s18 }
0x1d11   :  { %v15181_v45 = vpop.eup %15180 }
0x1d12   :  { %v15183_v46 = vpop.eup %15182  ;;  %v6532_v49 = vmul.f32 %v15181_v45, %v15165_v8 }
0x1d13   :  { %v6531_v47 = vmul.f32 %v15183_v46, %v15167_v11 }
0x1d15   :  { %12915 = vmatprep.mubr.msk.f32.mxu0 %vm1368_vm2, %v6531_v47  ;;  %v5807_v47 = vld [vmem:[#allocation35 + $0x60] sm:$0xff] }
0x1d16   :  { %12916 = vmatmul.mubr.msk.f32.vlgmr.msra.gmra.mrb[48].mxu0 %vm1368_vm2, %v6532_v49  ;;  %v5808_v49 = vld [vmem:[#allocation35 + $0x68] sm:$0xff] }
0x1d7c   :  { %v6510_v48 = vpop.xlane.xlu1 %6509 }
0x1d7d   :  { %v6507_v52 = vpop.xlane.xlu0 %6506 }
0x1d7e   :  { %15184 = vrcp.f32 %v6507_v52 }
0x1d81   :  { %v6516_v56 = vpop.xlane.xlu1 %6515 }
0x1d82   :  { %15186 = vrcp.f32 %v6516_v56  ;;  %v6513_v59 = vpop.xlane.xlu0 %6512  ;;  %v14220_v56 = vpack.c.bf16 %v5808_v49, %v5807_v47  ;;  %v7268_v47 = vld [vmem:[#allocation47 + $0xc8] sm:$0xff] }
0x1d83   :  { %15188 = vrcp.f32 %v6513_v59  ;;  %v5809_v59 = vld [vmem:[#allocation35 + $0x70] sm:$0xff] }
0x1d84   :  { %15190 = vrcp.f32 %v6510_v48 }
0x1d85   :  { %v6522_v61 = vpop.xlane.xlu1 %6521 }
0x1d86   :  { %v6519_v62 = vpop.xlane.xlu0 %6518 }
0x1d87   :  { %15192 = vrcp.f32 %v6519_v62 }
0x1d88   :  { %v15185_v15 = vpop.eup %15184  ;;  %15194 = vrcp.f32 %v6522_v61  ;;  %v5810_v61 = vld [vmem:[#allocation35 + $0x78] sm:$0xff] }
0x1d89   :  { %v14980_v4 = vpop.permute.xlu1 %14979  ;;  %v6533_v60 = vmul.f32 %v15185_v15, %v15171_v33  ;;  %v14224_v62 = vpack.c.bf16 %v5810_v61, %v5809_v59  ;;  %v11240_v15 = vld [vmem:[#allocation37] ss:$0 sm:$0xff]  ;;  %v7272_v61 = vld [vmem:[#allocation47 + $0xe8] sm:$0xff] }
0x1d8a   :  { %v14982_v3 = vunpack.i.h.bf16 %v14980_v4  ;;  %v14981_v44 = vunpack.i.l.bf16 %v14980_v4  ;;  %v14975_v1 = vpop.permute.xlu0 %14974 }
0x1d8b   :  { %v14977_v9 = vunpack.i.h.bf16 %v14975_v1  ;;  %v14976_v10 = vunpack.i.l.bf16 %v14975_v1  ;;  %12922 = vmatprep.mubr.msk.f32.mxu1 %vm1368_vm2, %v6533_v60 }
0x1d8c   :  { %v15187_v8 = vpop.eup %15186  ;;  %v14188_v11 = vpack.c.bf16 %v14982_v3, %v14981_v44 }
0x1d8d   :  { %v15189_v2 = vpop.eup %15188  ;;  %v14184_v30 = vpack.c.bf16 %v14977_v9, %v14976_v10  ;;  %v14985_v39 = vpop.permute.xlu1 %14984  ;;  %v6536_v24 = vmul.f32 %v15187_v8, %v17281_v22  ;;  %v7246_v9 = vld [vmem:[#allocation47 + $0x18] sm:$0xff]  ;;  %v7243_v10 = vld [vmem:[#allocation47] sm:$0xff] }
0x1d8e   :  { %v15191_v12 = vpop.eup %15190  ;;  %v14987_v13 = vunpack.i.h.bf16 %v14985_v39  ;;  %v14986_v14 = vunpack.i.l.bf16 %v14985_v39  ;;  %14189 = vmatprep.subr.bf16.mxu0 %v14188_v11  ;;  %v6535_v17 = vmul.f32 %v15189_v2, %v15175_v25  ;;  %v14228_v8 = vpack.c.bf16 %v7246_v9, %v7244_v63  ;;  %v7248_v2 = vld [vmem:[#allocation47 + $0x28] sm:$0xff]  ;;  %v7276_v63 = vld [vmem:[#allocation49] sm:$0xff] }
0x1d8f   :  { %14185 = vmatprep.subr.bf16.mxu1 %v14184_v30  ;;  %14191 = vmatpush3.bf16.msra.mxu0 %v14188_v11  ;;  %v6534_v28 = vmul.f32 %v15191_v12, %v17276_v32  ;;  %v5801_v32 = vld [vmem:[#allocation35 + $0x30] sm:$0xff]  ;;  %v7245_v11 = vld [vmem:[#allocation47 + $0x10] sm:$0xff] }
0x1d90   :  { %v14192_v41 = vpack.c.bf16 %v14987_v13, %v14986_v14  ;;  %14187 = vmatpush3.bf16.msra.mxu1 %v14184_v30  ;;  %12929 = vmatprep.mubr.msk.f32.mxu0 %vm1368_vm2, %v6535_v17  ;;  %v14208_v25 = vpack.c.bf16 %v5802_v34, %v5801_v32  ;;  %v7250_v30 = vld [vmem:[#allocation47 + $0x38] sm:$0xff]  ;;  %v14230_v39 = vpack.c.bf16 %v7245_v11, %v7243_v10  ;;  %v7247_v12 = vld [vmem:[#allocation47 + $0x20] sm:$0xff]  ;;  %v7249_v13 = vld [vmem:[#allocation47 + $0x30] sm:$0xff] }
0x1d91   :  { %v15193_v26 = vpop.eup %15192  ;;  %14197 = vmatprep.subr.bf16.mxu0 %v14196_v7  ;;  %v7252_v14 = vld [vmem:[#allocation47 + $0x48] sm:$0xff]  ;;  %v7254_v17 = vld [vmem:[#allocation47 + $0x58] sm:$0xff]  ;;  %v7255_v34 = vld [vmem:[#allocation47 + $0x60] sm:$0xff] }
0x1d92   :  { %v15195_v51 = vpop.eup %15194  ;;  %12930 = vmatmul.mubr.msk.f32.vlgmr.msra.gmra.mrb[50].mxu0 %vm1368_vm2, %v6536_v24  ;;  %14193 = vmatprep.subr.bf16.mxu1 %v14192_v41  ;;  %v6537_v55 = vmul.f32 %v15193_v26, %v17288_v37  ;;  %v5805_v37 = vld [vmem:[#allocation35 + $0x50] sm:$0xff]  ;;  %v14238_v24 = vpack.c.bf16 %v7253_v21, %v7251_v20  ;;  %v7295_v11 = vld [vmem:[#allocation49 + $0x98] sm:$0xff]  ;;  %v7298_v20 = vld [vmem:[#allocation49 + $0xb0] sm:$0xff] }
0x1d93   :  { %12923 = vmatmul.mubr.msk.f32.vlgmr.msra.gmra.mrb[54].mxu1 %vm1368_vm2, %v6534_v28  ;;  %14199 = vmatpush3.bf16.msra.mxu0 %v14196_v7  ;;  %v6538_v33 = vmul.f32 %v15195_v51, %v17286_v36  ;;  %v14212_v36 = vpack.c.bf16 %v5804_v57, %v5803_v35  ;;  %v14216_v46 = vpack.c.bf16 %v5806_v38, %v5805_v37  ;;  %v7262_v35 = vld [vmem:[#allocation47 + $0x98] sm:$0xff]  ;;  %v7261_v37 = vld [vmem:[#allocation47 + $0x90] sm:$0xff]  ;;  %v7277_v10 = vld [vmem:[#allocation49 + $0x8] sm:$0xff] }
0x1d94   :  { %14195 = vmatpush3.bf16.msra.mxu1 %v14192_v41  ;;  %12936 = vmatprep.mubr.msk.f32.mxu1 %vm1368_vm2, %v6537_v55  ;;  %v14232_v7 = vpack.c.bf16 %v7250_v30, %v7248_v2  ;;  %v14262_v2 = vpack.c.bf16 %v7277_v10, %v7276_v63  ;;  %v7299_v21 = vld [vmem:[#allocation49 + $0xb8] sm:$0xff]  ;;  %v7306_v63 = vld [vmem:[#allocation49 + $0xf0] sm:$0xff] }
0x1d95   :  { %14201 = vmatprep.subr.bf16.mxu0 %v14200_v29  ;;  %14229 = vmatprep.subr.bf16.mxu1 %v14228_v8  ;;  %v7294_v8 = vld [vmem:[#allocation49 + $0x90] sm:$0xff] }
0x1d96   :  { %v14264_v30 = vpack.c.bf16 %v7295_v11, %v7294_v8  ;;  %v7290_v10 = vld [vmem:[#allocation49 + $0x70] sm:$0xff]  ;;  %v7291_v8 = vld [vmem:[#allocation49 + $0x78] sm:$0xff] }
0x1d97   :  { %12937 = vmatmul.mubr.msk.f32.vlgmr.msra.gmra.mrb[56].mxu1 %vm1368_vm2, %v6538_v33  ;;  %14203 = vmatpush3.bf16.msra.mxu0 %v14200_v29  ;;  %v7258_v33 = vld [vmem:[#allocation47 + $0x78] sm:$0xff]  ;;  %v14290_v11 = vpack.c.bf16 %v7291_v8, %v7290_v10 }
0x1d98   :  { %14205 = vmatprep.subr.bf16.mxu0 %v14204_v31  ;;  %7384 = vmatprep.mubr.f32.mxu1 %v16164_v6  ;;  %v7550_v10 = vld [vmem:[#allocation17 + $0xb0] sm:$0xff]  ;;  %v7551_v8 = vld [vmem:[#allocation17 + $0xb8] sm:$0xff] }
0x1d99   :  { %14231 = vmatpush1.bf16.msra.mxu1 %v14230_v39  ;;  %v7278_v39 = vld [vmem:[#allocation49 + $0x10] sm:$0xff] }
0x1d9a   :  { %14233 = vmatprep.subr.bf16.mxu1 %v14232_v7  ;;  %v7279_v7 = vld [vmem:[#allocation49 + $0x18] sm:$0xff] }
0x1de9   :  { %v12917_v19 = vpop.f32.mrb[48].mxu0 }
0x1dea   :  { %v6611_v22 = vpop.f32.mrb[49].mxu0 }
0x1deb   :  { %12947 = vmatprep.mubr.msk.f32.mxu0 %vm1019_vm0, %v6611_v22 }
0x1dec   :  { %12948 = vmatmul.mubr.msk.f32.vlgmr.msra.gmra.mrb[52].mxu0 %vm1019_vm0, %v12917_v19  ;;  %v7257_v19 = vld [vmem:[#allocation47 + $0x70] sm:$0xff] }
0x1ded   :  { %14207 = vmatpush3.bf16.msra.mxu0 %v14204_v31  ;;  %v7256_v31 = vld [vmem:[#allocation47 + $0x68] sm:$0xff]  ;;  %v14242_v22 = vpack.c.bf16 %v7257_v19, %v7255_v34  ;;  %v7302_v34 = vld [vmem:[#allocation49 + $0xd0] sm:$0xff]  ;;  %v7303_v19 = vld [vmem:[#allocation49 + $0xd8] sm:$0xff] }
0x1dee   :  { %14209 = vmatprep.subr.bf16.mxu0 %v14208_v25  ;;  %v14240_v32 = vpack.c.bf16 %v7258_v33, %v7256_v31  ;;  %v7284_v33 = vld [vmem:[#allocation49 + $0x40] sm:$0xff] }
0x1df1   :  { %14211 = vmatpush3.bf16.msra.mxu0 %v14208_v25  ;;  %v7260_v25 = vld [vmem:[#allocation47 + $0x88] sm:$0xff] }
0x1df2   :  { %14213 = vmatprep.subr.bf16.mxu0 %v14212_v36  ;;  %v14244_v57 = vpack.c.bf16 %v7262_v35, %v7260_v25  ;;  %v14280_v25 = vpack.c.bf16 %v7303_v19, %v7302_v34  ;;  %v7286_v35 = vld [vmem:[#allocation49 + $0x50] sm:$0xff] }
0x1e65   :  { %v12931_v40 = vpop.f32.mrb[50].mxu0 }
0x1e66   :  { %v12924_v42 = vpop.f32.mrb[54].mxu1  ;;  %v6773_v43 = vpop.f32.mrb[51].mxu0 }
0x1e67   :  { %v6692_v45 = vpop.f32.mrb[55].mxu1 }
0x1e68   :  { %12958 = vmatprep.mubr.msk.f32.mxu0 %vm1019_vm0, %v6692_v45  ;;  %v7263_v45 = vld [vmem:[#allocation47 + $0xa0] sm:$0xff] }
0x1e69   :  { %12959 = vmatmul.mubr.msk.f32.vlgmr.msra.gmra.mrb[52].mxu0 %vm1019_vm0, %v12924_v42  ;;  %v7266_v42 = vld [vmem:[#allocation47 + $0xb8] sm:$0xff] }
0x1e6a   :  { %v12938_v48 = vpop.f32.mrb[56].mxu1  ;;  %14215 = vmatpush3.bf16.msra.mxu0 %v14212_v36  ;;  %12969 = vmatprep.mubr.msk.f32.mxu0 %vm1019_vm0, %v6773_v43  ;;  %v7259_v36 = vld [vmem:[#allocation47 + $0x80] sm:$0xff] }
0x1e6b   :  { %v6854_v52 = vpop.f32.mrb[57].mxu1  ;;  %14217 = vmatprep.subr.bf16.mxu0 %v14216_v46  ;;  %v14246_v38 = vpack.c.bf16 %v7261_v37, %v7259_v36  ;;  %v7304_v36 = vld [vmem:[#allocation49 + $0xe0] sm:$0xff]  ;;  %v7305_v37 = vld [vmem:[#allocation49 + $0xe8] sm:$0xff] }
0x1e6e   :  { %14219 = vmatpush3.bf16.msra.mxu0 %v14216_v46  ;;  %v7265_v46 = vld [vmem:[#allocation47 + $0xb0] sm:$0xff] }
0x1e6f   :  { %14221 = vmatprep.subr.bf16.mxu0 %v14220_v56  ;;  %v14250_v49 = vpack.c.bf16 %v7265_v46, %v7263_v45 }
0x1e71   :  { %12970 = vmatmul.mubr.msk.f32.vlgmr.msra.gmra.mrb[52].mxu0 %vm1019_vm0, %v12931_v40  ;;  %v7264_v40 = vld [vmem:[#allocation47 + $0xa8] sm:$0xff] }
0x1e72   :  { %14223 = vmatpush3.bf16.msra.mxu0 %v14220_v56  ;;  %12980 = vmatprep.mubr.msk.f32.mxu0 %vm1019_vm0, %v6854_v52  ;;  %v14248_v43 = vpack.c.bf16 %v7266_v42, %v7264_v40  ;;  %v7267_v52 = vld [vmem:[#allocation47 + $0xc0] sm:$0xff]  ;;  %v7269_v56 = vld [vmem:[#allocation47 + $0xd0] sm:$0xff]  ;;  %v14284_v40 = vpack.c.bf16 %v7305_v37, %v7304_v36 }
0x1e73   :  { %14225 = vmatprep.subr.bf16.mxu0 %v14224_v62  ;;  %v7545_v37 = vld [vmem:[#allocation17 + $0x88] sm:$0xff] }
0x1e76   :  { %14227 = vmatpush3.bf16.msra.mxu0 %v14224_v62  ;;  %v7274_v62 = vld [vmem:[#allocation47 + $0xf8] sm:$0xff] }
0x1e79   :  { %12981 = vmatmul.mubr.msk.f32.vlgmr.msra.gmra.mrb[52].mxu0 %vm1019_vm0, %v12938_v48  ;;  %v7270_v48 = vld [vmem:[#allocation47 + $0xd8] sm:$0xff] }
0x1e7a   :  { %v14252_v59 = vpack.c.bf16 %v7270_v48, %v7268_v47 }
0x1f4c   :  { %v12982_v4 = vpop.f32.mrb[52].mxu0 }
0x1f4d   :  { %v14730_v60 = vadd.f32 %v12982_v4, %v11240_v15  ;;  %v7190_v3 = vpop.f32.mrb[53].mxu0  ;;  %v14256_v4 = vpack.c.bf16 %v7274_v62, %v7272_v61 }
0x1f4e   :  { %v14731_v44 = vadd.f32 %v11240_v15, %v7190_v3  ;;  %v14254_v15 = vpack.c.bf16 %v7269_v56, %v7267_v52  ;;  %v7273_v3 = vld [vmem:[#allocation47 + $0xf0] sm:$0xff]  ;;  %v11247_v52 = vld [vmem:[#allocation41] ss:$0 sm:$0xff] }
0x1f4f   :  { %v7202_v1 = vadd.f32 %v14730_v60, %v17224_v27  ;;  %v14234_v27 = vpack.c.bf16 %v7249_v13, %v7247_v12  ;;  %v7271_v60 = vld [vmem:[#allocation47 + $0xe0] sm:$0xff]  ;;  %v7297_v13 = vld [vmem:[#allocation49 + $0xa8] sm:$0xff] }
0x1f50   :  { %v7201_v5 = vadd.f32 %v14731_v44, %v17221_v23  ;;  %v14236_v23 = vpack.c.bf16 %v7254_v17, %v7252_v14  ;;  %v14258_v44 = vpack.c.bf16 %v7273_v3, %v7271_v60  ;;  %v7296_v12 = vld [vmem:[#allocation49 + $0xa0] sm:$0xff]  ;;  %v14266_v14 = vpack.c.bf16 %v7279_v7, %v7278_v39 }
0x1f51   :  { %7207 = vadd.xlane.f32.xlu1 %v7202_v1  ;;  %14235 = vmatpush1.bf16.msra.mxu1 %v14234_v27  ;;  %v14268_v17 = vpack.c.bf16 %v7297_v13, %v7296_v12  ;;  %v7280_v27 = vld [vmem:[#allocation49 + $0x20] sm:$0xff] }
0x1f52   :  { %7205 = vadd.xlane.f32.xlu0 %v7201_v5  ;;  %14237 = vmatprep.subr.bf16.mxu1 %v14236_v23  ;;  %v7281_v23 = vld [vmem:[#allocation49 + $0x28] sm:$0xff] }
0x1f55   :  { %14239 = vmatpush1.bf16.msra.mxu1 %v14238_v24  ;;  %v14270_v24 = vpack.c.bf16 %v7281_v23, %v7280_v27 }
0x1f56   :  { %14241 = vmatprep.subr.bf16.mxu1 %v14240_v32  ;;  %v7285_v32 = vld [vmem:[#allocation49 + $0x48] sm:$0xff] }
0x1f59   :  { %14243 = vmatpush1.bf16.msra.mxu1 %v14242_v22  ;;  %v14278_v22 = vpack.c.bf16 %v7285_v32, %v7284_v33 }
0x1f5a   :  { %14245 = vmatprep.subr.bf16.mxu1 %v14244_v57  ;;  %v7287_v57 = vld [vmem:[#allocation49 + $0x58] sm:$0xff] }
0x1f5d   :  { %14247 = vmatpush1.bf16.msra.mxu1 %v14246_v38  ;;  %v14282_v38 = vpack.c.bf16 %v7287_v57, %v7286_v35  ;;  %v7526_v35 = vld [vmem:[#allocation14 + $0x88] sm:$0xff] }
0x1f5e   :  { %14249 = vmatprep.subr.bf16.mxu1 %v14248_v43  ;;  %v7544_v57 = vld [vmem:[#allocation17 + $0x80] sm:$0xff] }
0x1f61   :  { %14251 = vmatpush1.bf16.msra.mxu1 %v14250_v49 }
0x1f62   :  { %14253 = vmatprep.subr.bf16.mxu1 %v14252_v59  ;;  %v11248_v59 = vld [vmem:[#allocation43] ss:$0 sm:$0xff] }
0x1f65   :  { %14255 = vmatpush1.bf16.msra.mxu1 %v14254_v15 }
0x1f66   :  { %14257 = vmatprep.subr.bf16.mxu1 %v14256_v4 }
0x1f69   :  { %14259 = vmatpush1.bf16.msra.mxu1 %v14258_v44  ;;  %v7288_v44 = vld [vmem:[#allocation49 + $0x60] sm:$0xff] }
0x1fde   :  { %v7208_v41 = vpop.xlane.xlu1 %7207 }
0x1fdf   :  { %v7206_v26 = vpop.xlane.xlu0 %7205  ;;  %v7210_v28 = vmul.f32 0.0078125, %v7208_v41  ;;  %v14272_v41 = vpack.c.bf16 %v7299_v21, %v7298_v20 }
0x1fe0   :  { %v7209_v29 = vmul.f32 0.0078125, %v7206_v26  ;;  %v7282_v26 = vld [vmem:[#allocation49 + $0x30] sm:$0xff] }
0x1fe1   :  { %v17325_v50 = vsub.f32 %v7202_v1, %v7210_v28  ;;  %v7292_v1 = vld [vmem:[#allocation49 + $0x80] sm:$0xff]  ;;  %v7283_v28 = vld [vmem:[#allocation49 + $0x38] sm:$0xff] }
0x1fe2   :  { %v17323_v53 = vsub.f32 %v7201_v5, %v7209_v29  ;;  %v7293_v5 = vld [vmem:[#allocation49 + $0x88] sm:$0xff]  ;;  %v7300_v29 = vld [vmem:[#allocation49 + $0xc0] sm:$0xff] }
0x1fe3   :  { %v7214_v55 = vmul.f32 %v17325_v50, %v17325_v50  ;;  %v14260_v9 = vpack.c.bf16 %v7293_v5, %v7292_v1  ;;  %v7289_v1 = vld [vmem:[#allocation49 + $0x68] sm:$0xff] }
0x1fe4   :  { %v7213_v51 = vmul.f32 %v17323_v53, %v17323_v53  ;;  %v14286_v5 = vpack.c.bf16 %v7289_v1, %v7288_v44  ;;  %v7548_v44 = vld [vmem:[#allocation17 + $0xa0] sm:$0xff]  ;;  %v7549_v1 = vld [vmem:[#allocation17 + $0xa8] sm:$0xff] }
0x1fe5   :  { %14261 = vmatprep.subr.bf16.mxu0 %v14260_v9  ;;  %v7307_v9 = vld [vmem:[#allocation49 + $0xf8] sm:$0xff] }
0x1fe6   :  { %7215 = vadd.xlane.f32.xlu0 %v7213_v51  ;;  %14263 = vmatpush3.bf16.msra.mxu0 %v14262_v2  ;;  %v7301_v51 = vld [vmem:[#allocation49 + $0xc8] sm:$0xff] }
0x1fe7   :  { %14265 = vmatprep.subr.bf16.mxu0 %v14264_v30  ;;  %v14276_v31 = vpack.c.bf16 %v7301_v51, %v7300_v29 }
0x1fea   :  { %7217 = vadd.xlane.f32.xlu0 %v7214_v55  ;;  %14267 = vmatpush3.bf16.msra.mxu0 %v14266_v14  ;;  %v14274_v55 = vpack.c.bf16 %v7283_v28, %v7282_v26  ;;  %v11249_v28 = vld [vmem:[#allocation50] ss:$0 sm:$0xff] }
0x1feb   :  { %14269 = vmatprep.subr.bf16.mxu0 %v14268_v17 }
0x1fee   :  { %14271 = vmatpush3.bf16.msra.mxu0 %v14270_v24 }
0x1fef   :  { %14273 = vmatprep.subr.bf16.mxu0 %v14272_v41 }
0x1ff2   :  { %14275 = vmatpush3.bf16.msra.mxu0 %v14274_v55 }
0x1ff3   :  { %14277 = vmatprep.subr.bf16.mxu0 %v14276_v31 }
0x1ff6   :  { %14279 = vmatpush3.bf16.msra.mxu0 %v14278_v22 }
0x1ff7   :  { %14281 = vmatprep.subr.bf16.mxu0 %v14280_v25  ;;  %v7525_v25 = vld [vmem:[#allocation14 + $0x80] sm:$0xff] }
0x1ff8   :  { %v14292_v36 = vpack.c.bf16 %v7526_v35, %v7525_v25 }
0x1ffa   :  { %14283 = vmatpush3.bf16.msra.mxu0 %v14282_v38  ;;  %v7527_v38 = vld [vmem:[#allocation14 + $0x90] sm:$0xff]  ;;  %14293 = vmatprep.subr.bf16.mxu1 %v14292_v36 }
0x1ffb   :  { %14285 = vmatprep.subr.bf16.mxu0 %v14284_v40  ;;  %v7528_v40 = vld [vmem:[#allocation14 + $0x98] sm:$0xff] }
0x1ffe   :  { %14287 = vmatpush3.bf16.msra.mxu0 %v14286_v5  ;;  %v14332_v5 = vpack.c.bf16 %v7549_v1, %v7548_v44  ;;  %v7568_v44 = vld [vmem:[#allocation20 + $0xa8] sm:$0xff]  ;;  %v7570_v1 = vld [vmem:[#allocation20 + $0xb8] sm:$0xff] }
0x2073   :  { %v7216_v42 = vpop.xlane.xlu0 %7215 }
0x2074   :  { %v7219_v43 = vmul.f32 0.0078125, %v7216_v42  ;;  %v14324_v42 = vpack.c.bf16 %v7545_v37, %v7544_v57 }
0x2076   :  { %v7221_v45 = vadd.f32 1e-05, %v7219_v43  ;;  %v14296_v43 = vpack.c.bf16 %v7528_v40, %v7527_v38 }
0x2077   :  { %v7218_v46 = vpop.xlane.xlu0 %7217 }
0x2078   :  { %15196 = vrsqrt.f32 %v7221_v45  ;;  %v7220_v47 = vmul.f32 0.0078125, %v7218_v46  ;;  %v7546_v45 = vld [vmem:[#allocation17 + $0x90] sm:$0xff]  ;;  %v7547_v46 = vld [vmem:[#allocation17 + $0x98] sm:$0xff] }
0x207a   :  { %v7222_v49 = vadd.f32 1e-05, %v7220_v47  ;;  %v14328_v47 = vpack.c.bf16 %v7547_v46, %v7546_v45  ;;  %v11251_v46 = vld [vmem:[#allocation46] ss:$0 sm:$0xff] }
0x207c   :  { %15198 = vrsqrt.f32 %v7222_v49 }
0x2082   :  { %v15197_v48 = vpop.eup %15196 }
0x2083   :  { %v7225_v56 = vmul.f32 %v15197_v48, %v17323_v53  ;;  %v14288_v53 = vpack.c.bf16 %v7307_v9, %v7306_v63  ;;  %v7531_v63 = vld [vmem:[#allocation14 + $0xb0] sm:$0xff]  ;;  %v7532_v9 = vld [vmem:[#allocation14 + $0xb8] sm:$0xff] }
0x2085   :  { %v7233_v61 = vmul.f32 %v11247_v52, %v7225_v56  ;;  %14289 = vmatprep.subr.bf16.mxu0 %v14288_v53  ;;  %v14304_v53 = vpack.c.bf16 %v7532_v9, %v7531_v63  ;;  %v7571_v63 = vld [vmem:[#allocation20 + $0xc0] sm:$0xff]  ;;  %v7572_v9 = vld [vmem:[#allocation20 + $0xc8] sm:$0xff] }
0x2086   :  { %v15199_v62 = vpop.eup %15198  ;;  %14291 = vmatpush3.bf16.msra.mxu0 %v14290_v11  ;;  %v14336_v11 = vpack.c.bf16 %v7551_v8, %v7550_v10  ;;  %v7573_v10 = vld [vmem:[#allocation20 + $0xd0] sm:$0xff]  ;;  %v7574_v8 = vld [vmem:[#allocation20 + $0xd8] sm:$0xff] }
0x2087   :  { %v7241_v15 = vadd.f32 %v11248_v59, %v7233_v61  ;;  %v7226_v4 = vmul.f32 %v15199_v62, %v17325_v50  ;;  %v7275_v50 = vld [vmem:[%s17734_s7] sm:$0x3]  ;;  %14325 = vmatprep.subr.bf16.mxu0 %v14324_v42 }
0x2088   :  { %v7313_v2 = vrot.slane %v7275_v50, %v16873_v16  ;;  %v7317_v30 = vrot.slane %v7275_v50, %v16876_v18  ;;  %v7533_v50 = vld [vmem:[#allocation14 + $0xc0] sm:$0xff] }
0x2089   :  { %7385 = vmatmul.mubr.f32.vlgmr.msra.gmra.mrb[58].mxu1 %v7241_v15  ;;  %v7234_v60 = vmul.f32 %v11247_v52, %v7226_v4  ;;  %v7529_v4 = vld [vmem:[#allocation14 + $0xa0] sm:$0xff] }
0x208a   :  { %7390 = vmatprep.mubr.f32.mxu1 %v16164_v6  ;;  %14295 = vmatpush3.bf16.msra.mxu1 %v14292_v36 }
0x208b   :  { %v7242_v3 = vadd.f32 %v11248_v59, %v7234_v60  ;;  %14297 = vmatprep.subr.bf16.mxu1 %v14296_v43  ;;  %v7530_v60 = vld [vmem:[#allocation14 + $0xa8] sm:$0xff] }
0x208d   :  { %7391 = vmatmul.mubr.f32.gmra.mrb[60].mxu1 %v7242_v3 }
0x208e   :  { %14299 = vmatpush3.bf16.msra.mxu1 %v14296_v43  ;;  %v11250_v43 = vld [vmem:[#allocation44] ss:$0 sm:$0xff] }
0x215c   :  { %v7386_v39 = vpop.f32.mrb[58].mxu1 }
0x215d   :  { %v7387_v7 = vadd.f32 %v7386_v39, %v7313_v2  ;;  %v7388_v12 = vpop.f32.mrb[59].mxu1  ;;  %v7552_v39 = vld [vmem:[#allocation17 + $0xc0] sm:$0xff] }
0x215e   :  { %v7389_v13 = vadd.f32 %v7388_v12, %v7317_v30 }
0x215f   :  { %v7397_v27 = vmax.f32 %v7387_v7, 0.0  ;;  %v7553_v7 = vld [vmem:[#allocation17 + $0xc8] sm:$0xff] }
0x2160   :  { %v7398_v14 = vmax.f32 %v7389_v13, 0.0  ;;  %v7392_v17 = vpop.f32.mrb[60].mxu1  ;;  %v14340_v12 = vpack.c.bf16 %v7553_v7, %v7552_v39  ;;  %v7535_v13 = vld [vmem:[#allocation14 + $0xd0] sm:$0xff]  ;;  %v7578_v7 = vld [vmem:[#allocation20 + $0xf8] sm:$0xff] }
0x2161   :  { %v7393_v23 = vadd.f32 %v7392_v17, %v7313_v2  ;;  %v7394_v20 = vpop.f32.mrb[61].mxu1  ;;  %v7534_v2 = vld [vmem:[#allocation14 + $0xc8] sm:$0xff]  ;;  %v7577_v39 = vld [vmem:[#allocation20 + $0xf0] sm:$0xff] }
0x2162   :  { %v7395_v21 = vadd.f32 %v7394_v20, %v7317_v30  ;;  %7471 = vmatprep.mubr.f32.mxu0 %v7398_v14  ;;  %v14308_v30 = vpack.c.bf16 %v7534_v2, %v7533_v50  ;;  %v7536_v14 = vld [vmem:[#allocation14 + $0xd8] sm:$0xff]  ;;  %v7575_v50 = vld [vmem:[#allocation20 + $0xe0] sm:$0xff]  ;;  %v7576_v2 = vld [vmem:[#allocation20 + $0xe8] sm:$0xff] }
0x2163   :  { %7472 = vmatmul.mubr.f32.vlgmr.msra.gmra.mrb[54].mxu0 %v7397_v27  ;;  %v7399_v41 = vmax.f32 %v7393_v23, 0.0  ;;  %v14312_v17 = vpack.c.bf16 %v7536_v14, %v7535_v13  ;;  %v7554_v27 = vld [vmem:[#allocation17 + $0xd0] sm:$0xff]  ;;  %v7555_v23 = vld [vmem:[#allocation17 + $0xd8] sm:$0xff]  ;;  %v11253_v13 = vld [vmem:[#allocation19 + $0x1] ss:$0 sm:$0xff] }
0x2164   :  { %v7400_v24 = vmax.f32 %v7395_v21, 0.0  ;;  %14327 = vmatpush3.bf16.msra.mxu0 %v14324_v42  ;;  %v14344_v20 = vpack.c.bf16 %v7555_v23, %v7554_v27  ;;  %v7537_v21 = vld [vmem:[#allocation14 + $0xe0] sm:$0xff] }
0x2165   :  { %14329 = vmatprep.subr.bf16.mxu0 %v14328_v47  ;;  %v11252_v14 = vld [vmem:[#allocation16 + $0x1] ss:$0 sm:$0xff] }
0x2166   :  { %7476 = vmatprep.mubr.f32.mxu0 %v7400_v24  ;;  %v7538_v24 = vld [vmem:[#allocation14 + $0xe8] sm:$0xff] }
0x2167   :  { %7477 = vmatmul.mubr.f32.gmra.mrb[56].mxu0 %v7399_v41  ;;  %v14316_v41 = vpack.c.bf16 %v7538_v24, %v7537_v21 }
0x2168   :  { %14331 = vmatpush3.bf16.msra.mxu0 %v14328_v47 }
0x2169   :  { %14333 = vmatprep.subr.bf16.mxu0 %v14332_v5 }
0x216c   :  { %14335 = vmatpush3.bf16.msra.mxu0 %v14332_v5 }
0x216d   :  { %14337 = vmatprep.subr.bf16.mxu0 %v14336_v11 }
0x2170   :  { %14339 = vmatpush3.bf16.msra.mxu0 %v14336_v11  ;;  %v14376_v11 = vpack.c.bf16 %v7574_v8, %v7573_v10 }
0x2171   :  { %14341 = vmatprep.subr.bf16.mxu0 %v14340_v12 }
0x2174   :  { %14343 = vmatpush3.bf16.msra.mxu0 %v14340_v12  ;;  %v14384_v12 = vpack.c.bf16 %v7578_v7, %v7577_v39 }
0x2175   :  { %14345 = vmatprep.subr.bf16.mxu0 %v14344_v20 }
0x2178   :  { %14347 = vmatpush3.bf16.msra.mxu0 %v14344_v20 }
0x2236   :  { %v11881_v26 = vpop.f32.mrb[54].mxu0 }
0x2237   :  { %v11882_v29 = vpop.f32.mrb[55].mxu0 }
0x2238   :  { %v11883_v51 = vadd.f32 %v11882_v29, %v11881_v26  ;;  %v7556_v26 = vld [vmem:[#allocation17 + $0xe0] sm:$0xff] }
0x223a   :  { %v7474_v55 = vadd.f32 %v11883_v51, %v11249_v28  ;;  %v11884_v31 = vpop.f32.mrb[56].mxu0  ;;  %v7539_v51 = vld [vmem:[#allocation14 + $0xf0] sm:$0xff] }
0x223b   :  { %v11885_v33 = vpop.f32.mrb[57].mxu0 }
0x223c   :  { %v11886_v32 = vadd.f32 %v11885_v33, %v11884_v31  ;;  %v7482_v34 = vadd.f32 %v7474_v55, %v7241_v15  ;;  %v7540_v55 = vld [vmem:[#allocation14 + $0xf8] sm:$0xff] }
0x223d   :  { %v14320_v31 = vpack.c.bf16 %v7540_v55, %v7539_v51  ;;  %v7558_v33 = vld [vmem:[#allocation17 + $0xf0] sm:$0xff]  ;;  %v11254_v51 = vld [vmem:[#allocation22 + $0x1] ss:$0 sm:$0xff] }
0x223e   :  { %v7479_v19 = vadd.f32 %v11886_v32, %v11249_v28  ;;  %7486 = vadd.xlane.f32.xlu1 %v7482_v34  ;;  %v7557_v28 = vld [vmem:[#allocation17 + $0xe8] sm:$0xff]  ;;  %v7559_v32 = vld [vmem:[#allocation17 + $0xf8] sm:$0xff] }
0x223f   :  { %v14348_v29 = vpack.c.bf16 %v7557_v28, %v7556_v26 }
0x2240   :  { %v7483_v22 = vadd.f32 %v7479_v19, %v7242_v3  ;;  %v14300_v3 = vpack.c.bf16 %v7530_v60, %v7529_v4  ;;  %v7563_v19 = vld [vmem:[#allocation20 + $0x80] sm:$0xff] }
0x2241   :  { %14349 = vmatprep.subr.bf16.mxu0 %v14348_v29 }
0x2242   :  { %7488 = vadd.xlane.f32.xlu0 %v7483_v22  ;;  %14301 = vmatprep.subr.bf16.mxu1 %v14300_v3 }
0x2243   :  { %14303 = vmatpush3.bf16.msra.mxu1 %v14300_v3  ;;  %14351 = vmatpush3.bf16.msra.mxu0 %v14348_v29  ;;  %v7567_v3 = vld [vmem:[#allocation20 + $0xa0] sm:$0xff] }
0x2244   :  { %14305 = vmatprep.subr.bf16.mxu1 %v14304_v53 }
0x2247   :  { %14307 = vmatpush3.bf16.msra.mxu1 %v14304_v53  ;;  %v14372_v53 = vpack.c.bf16 %v7572_v9, %v7571_v63 }
0x2248   :  { %14309 = vmatprep.subr.bf16.mxu1 %v14308_v30 }
0x224b   :  { %14311 = vmatpush3.bf16.msra.mxu1 %v14308_v30  ;;  %v14380_v30 = vpack.c.bf16 %v7576_v2, %v7575_v50 }
0x224c   :  { %14313 = vmatprep.subr.bf16.mxu1 %v14312_v17 }
0x224f   :  { %14315 = vmatpush3.bf16.msra.mxu1 %v14312_v17 }
0x2250   :  { %14317 = vmatprep.subr.bf16.mxu1 %v14316_v41 }
0x2253   :  { %14319 = vmatpush3.bf16.msra.mxu1 %v14316_v41 }
0x2254   :  { %14321 = vmatprep.subr.bf16.mxu1 %v14320_v31 }
0x2257   :  { %14323 = vmatpush3.bf16.msra.mxu1 %v14320_v31 }
0x22cb   :  { %v7487_v49 = vpop.xlane.xlu1 %7486 }
0x22cc   :  { %v7490_v48 = vmul.f32 0.0078125, %v7487_v49 }
0x22ce   :  { %v17337_v52 = vsub.f32 %v7482_v34, %v7490_v48  ;;  %v14352_v34 = vpack.c.bf16 %v7559_v32, %v7558_v33 }
0x22cf   :  { %v7489_v56 = vpop.xlane.xlu0 %7488 }
0x22d0   :  { %v7491_v59 = vmul.f32 0.0078125, %v7489_v56  ;;  %v7494_v61 = vmul.f32 %v17337_v52, %v17337_v52  ;;  %14353 = vmatprep.subr.bf16.mxu0 %v14352_v34 }
0x22d1   :  { %14355 = vmatpush3.bf16.msra.mxu0 %v14352_v34 }
0x22d2   :  { %v17341_v62 = vsub.f32 %v7483_v22, %v7491_v59  ;;  %7496 = vadd.xlane.f32.xlu1 %v7494_v61  ;;  %v7564_v22 = vld [vmem:[#allocation20 + $0x88] sm:$0xff]  ;;  %v7565_v59 = vld [vmem:[#allocation20 + $0x90] sm:$0xff]  ;;  %v7566_v61 = vld [vmem:[#allocation20 + $0x98] sm:$0xff] }
0x22d3   :  { %v14356_v25 = vpack.c.bf16 %v7564_v22, %v7563_v19  ;;  %v14360_v60 = vpack.c.bf16 %v7566_v61, %v7565_v59 }
0x22d4   :  { %v7495_v15 = vmul.f32 %v17341_v62, %v17341_v62 }
0x22d5   :  { %14357 = vmatprep.subr.bf16.mxu1 %v14356_v25 }
0x22d6   :  { %7498 = vadd.xlane.f32.xlu0 %v7495_v15 }
0x235f   :  { %v7497_v35 = vpop.xlane.xlu1 %7496 }
0x2360   :  { %v7500_v57 = vmul.f32 0.0078125, %v7497_v35 }
0x2362   :  { %v7502_v36 = vadd.f32 1e-05, %v7500_v57 }
0x2363   :  { %v7499_v37 = vpop.xlane.xlu0 %7498 }
0x2364   :  { %15200 = vrsqrt.f32 %v7502_v36  ;;  %v7501_v38 = vmul.f32 0.0078125, %v7499_v37 }
0x2366   :  { %v7503_v40 = vadd.f32 1e-05, %v7501_v38 }
0x2368   :  { %15202 = vrsqrt.f32 %v7503_v40 }
0x236e   :  { %v15201_v42 = vpop.eup %15200 }
0x236f   :  { %v7506_v45 = vmul.f32 %v15201_v42, %v17337_v52  ;;  %v14364_v52 = vpack.c.bf16 %v7568_v44, %v7567_v3 }
0x2371   :  { %v7514_v47 = vmul.f32 %v11250_v43, %v7506_v45 }
0x2372   :  { %v15203_v49 = vpop.eup %15202 }
0x2373   :  { %v7507_v48 = vmul.f32 %v15203_v49, %v17341_v62  ;;  %v17347_v56 = vadd.f32 %v11251_v46, %v7514_v47  ;;  %v7569_v62 = vld [vmem:[#allocation20 + $0xb0] sm:$0xff] }
0x2374   :  { %v14368_v5 = vpack.c.bf16 %v7570_v1, %v7569_v62  ;;  %v15282_v62 = vld [vmem:[%s17732_s2 + $0x8] sm:$0xff] }
0x2375   :  { %v7515_v15 = vmul.f32 %v11250_v43, %v7507_v48  ;;  %13015 = vmatprep.mubr.f32.mxu1 %v17347_v56  ;;  %13050 = vmatprep.mubr.f32.mxu0 %v17347_v56 }
0x2377   :  { %v17351_v4 = vadd.f32 %v11251_v46, %v7515_v15 }
0x2379   :  { %13016 = vmatmul.mubr.f32.vlgmr.msra.gmra.mrb[62].mxu1 %v17351_v4  ;;  %13051 = vmatmul.mubr.f32.vlgmr.msra.gmra.mrb[58].mxu0 %v17351_v4 }
0x237a   :  { %14359 = vmatpush3.bf16.msra.mxu1 %v14356_v25  ;;  %13085 = vmatprep.mubr.f32.mxu1 %v17347_v56 }
0x237b   :  { %14361 = vmatprep.subr.bf16.mxu1 %v14360_v60 }
0x237e   :  { %14363 = vmatpush3.bf16.msra.mxu1 %v14360_v60 }
0x237f   :  { %14365 = vmatprep.subr.bf16.mxu1 %v14364_v52 }
0x2382   :  { %14367 = vmatpush3.bf16.msra.mxu1 %v14364_v52 }
0x2383   :  { %14369 = vmatprep.subr.bf16.mxu1 %v14368_v5 }
0x2386   :  { %14371 = vmatpush3.bf16.msra.mxu1 %v14368_v5  ;;  %v15283_v5 = vld [vmem:[%s17732_s2] sm:$0xff] }
0x2387   :  { %14373 = vmatprep.subr.bf16.mxu1 %v14372_v53 }
0x238a   :  { %14375 = vmatpush3.bf16.msra.mxu1 %v14372_v53 }
0x238b   :  { %14377 = vmatprep.subr.bf16.mxu1 %v14376_v11 }
0x238e   :  { %14379 = vmatpush3.bf16.msra.mxu1 %v14376_v11 }
0x238f   :  { %14381 = vmatprep.subr.bf16.mxu1 %v14380_v30 }
0x2392   :  { %14383 = vmatpush3.bf16.msra.mxu1 %v14380_v30 }
0x2393   :  { %14385 = vmatprep.subr.bf16.mxu1 %v14384_v12 }
0x2396   :  { %14387 = vmatpush3.bf16.msra.mxu1 %v14384_v12 }
0x2399   :  { %13086 = vmatmul.mubr.f32.vlgmr.msra.gmra.mrb[64].mxu1 %v17351_v4 }
0x244c   :  { %v13017_v17 = vpop.f32.mrb[62].mxu1  ;;  %v13052_v27 = vpop.f32.mrb[58].mxu0 }
0x244d   :  { %v7759_v23 = vadd.f32 %v13052_v27, %v11253_v13  ;;  %v7672_v20 = vpop.f32.mrb[63].mxu1  ;;  %v7753_v21 = vpop.f32.mrb[59].mxu0  ;;  %v7678_v29 = vadd.f32 %v13017_v17, %v11252_v14 }
0x244e   :  { %v7673_v24 = vadd.f32 %v11252_v14, %v7672_v20  ;;  %v7754_v41 = vadd.f32 %v11253_v13, %v7753_v21 }
0x2450   :  { %13092 = vmatprep.mubr.msk.f32.mxu0 %vm1019_vm0, %v7673_v24  ;;  %v14993_v26 = vpack.i.bf16 %v7759_v23, %v7754_v41  ;;  %v14388_v28 = vpack.c.bf16 %v7759_v23, %v7754_v41 }
0x2452   :  { %14994 = vrot.lane.b32.xlu0 %v14993_v26, %s16162_s14  ;;  %14989 = vrot.lane.b32.xlu1 %v14993_v26, %s16161_s18 }
0x2453   :  { %14390 = vmatprep.subr.msk.bf16.mxu0 %vm16727_vm1, %v14388_v28 }
0x2454   :  { %14393 = vmatpush3.bf16.xpose.msk.msra.mxu0 %vm16727_vm1, %v14388_v28 }
0x2456   :  { %14999 = vrot.lane.b32.xlu0 %v14993_v26, %s16163_s22  ;;  %7845 = vrot.lane.b32.xlu1 %v7673_v24, %s16161_s18 }
0x245a   :  { %7851 = vrot.lane.b32.xlu0 %v7678_v29, %s16162_s14  ;;  %7847 = vrot.lane.b32.xlu1 %v7678_v29, %s16161_s18 }
0x245b   :  { %13093 = vmatmul.mubr.msk.f32.vlgmr.msra.gmra.mrb[60].mxu0 %vm1019_vm0, %v7678_v29 }
0x245e   :  { %7855 = vrot.lane.b32.xlu0 %v7678_v29, %s16163_s22  ;;  %7849 = vrot.lane.b32.xlu1 %v7673_v24, %s16162_s14 }
0x2462   :  { %7853 = vrot.lane.b32.xlu1 %v7673_v24, %s16163_s22 }
0x246c   :  { %v13087_v55 = vpop.f32.mrb[64].mxu1 }
0x246d   :  { %v7840_v31 = vadd.f32 %v13087_v55, %v11254_v51  ;;  %v7834_v33 = vpop.f32.mrb[65].mxu1 }
0x246e   :  { %v7835_v32 = vadd.f32 %v11254_v51, %v7834_v33 }
0x2470   :  { %v14412_v34 = vpack.c.bf16 %v7840_v31, %v7835_v32  ;;  %v17372_v19 = vpack.i.bf16 %v7840_v31, %v7835_v32 }
0x24c4   :  { %v14995_v22 = vpop.permute.xlu0 %14994  ;;  %v14990_v25 = vpop.permute.xlu1 %14989 }
0x24c5   :  { %v14997_v35 = vunpack.i.h.bf16 %v14995_v22  ;;  %v14996_v57 = vunpack.i.l.bf16 %v14995_v22  ;;  %v14992_v36 = vunpack.i.h.bf16 %v14990_v25  ;;  %v14991_v37 = vunpack.i.l.bf16 %v14990_v25 }
0x24c7   :  { %v14400_v38 = vpack.c.bf16 %v14997_v35, %v14996_v57  ;;  %v14394_v40 = vpack.c.bf16 %v14992_v36, %v14991_v37 }
0x24c8   :  { %v15000_v42 = vpop.permute.xlu0 %14999  ;;  %v7846_v43 = vpop.permute.xlu1 %7845 }
0x24c9   :  { %v15002_v45 = vunpack.i.h.bf16 %v15000_v42  ;;  %v15001_v46 = vunpack.i.l.bf16 %v15000_v42  ;;  %14396 = vmatprep.subr.msk.bf16.mxu1 %vm16727_vm1, %v14394_v40  ;;  %13099 = vmatprep.mubr.msk.f32.mxu1 %vm1019_vm0, %v7846_v43 }
0x24ca   :  { %14402 = vmatprep.subr.msk.bf16.mxu0 %vm16727_vm1, %v14400_v38  ;;  %14399 = vmatpush3.bf16.xpose.msk.msra.mxu1 %vm16727_vm1, %v14394_v40 }
0x24cb   :  { %v14406_v47 = vpack.c.bf16 %v15002_v45, %v15001_v46  ;;  %14405 = vmatpush3.bf16.xpose.msk.msra.mxu0 %vm16727_vm1, %v14400_v38 }
0x24cc   :  { %14413 = vmatprep.subr.bf16.mxu0 %v14412_v34  ;;  %v7848_v49 = vpop.permute.xlu1 %7847  ;;  %v7852_v59 = vpop.permute.xlu0 %7851 }
0x24cd   :  { %14408 = vmatprep.subr.msk.bf16.mxu1 %vm16727_vm1, %v14406_v47 }
0x24d0   :  { %v7850_v48 = vpop.permute.xlu1 %7849  ;;  %v7856_v15 = vpop.permute.xlu0 %7855 }
0x24d1   :  { %13100 = vmatmul.mubr.msk.f32.vlgmr.msra.gmra.mrb[66].mxu1 %vm1019_vm0, %v7848_v49  ;;  %13106 = vmatprep.mubr.msk.f32.mxu0 %vm1019_vm0, %v7850_v48 }
0x24d2   :  { %13107 = vmatmul.mubr.msk.f32.vlgmr.msra.gmra.mrb[62].mxu0 %vm1019_vm0, %v7852_v59  ;;  %14411 = vmatpush3.bf16.xpose.msk.msra.mxu1 %vm16727_vm1, %v14406_v47 }
0x24d3   :  { %14415 = vmatpush3.bf16.msra.mxu0 %v14412_v34 }
0x24d4   :  { %v7854_v61 = vpop.permute.xlu1 %7853 }
0x24d5   :  { %13113 = vmatprep.mubr.msk.f32.mxu1 %vm1019_vm0, %v7854_v61 }
0x24d9   :  { %13114 = vmatmul.mubr.msk.f32.vlgmr.msra.gmra.mrb[68].mxu1 %vm1019_vm0, %v7856_v15 }
0x252e   :  { %v13094_v60 = vpop.f32.mrb[60].mxu0 }
0x252f   :  { %v8224_v3 = vmul.f32 0.17677669, %v13094_v60  ;;  %v7965_v44 = vpop.f32.mrb[61].mxu0 }
0x2530   :  { %v8223_v52 = vmul.f32 0.17677669, %v7965_v44 }
0x2531   :  { %v8232_v1 = vadd.f32 %v15282_v62, %v8224_v3 }
0x2532   :  { %v8231_v63 = vadd.f32 %v15283_v5, %v8223_v52 }
0x2533   :  { %v8242_v9 = vsel %vm1368_vm2, %v8232_v1, -inf }
0x2534   :  { %8243 = vmax.xlane.f32.xlu0 %v8242_v9  ;;  %v8239_v53 = vsel %vm1368_vm2, %v8231_v63, -inf }
0x2535   :  { %8240 = vmax.xlane.f32.xlu1 %v8239_v53 }
0x25a4   :  { %v13101_v10 = vpop.f32.mrb[66].mxu1 }
0x25a5   :  { %v8226_v8 = vmul.f32 0.17677669, %v13101_v10  ;;  %v8048_v11 = vpop.f32.mrb[67].mxu1  ;;  %v13108_v50 = vpop.f32.mrb[62].mxu0 }
0x25a6   :  { %v8225_v2 = vmul.f32 0.17677669, %v8048_v11  ;;  %v8228_v30 = vmul.f32 0.17677669, %v13108_v50  ;;  %v8131_v39 = vpop.f32.mrb[63].mxu0 }
0x25a7   :  { %v8234_v7 = vadd.f32 %v15282_v62, %v8226_v8  ;;  %v8227_v12 = vmul.f32 0.17677669, %v8131_v39 }
0x25a8   :  { %v8233_v13 = vadd.f32 %v15283_v5, %v8225_v2  ;;  %v8236_v14 = vadd.f32 %v15282_v62, %v8228_v30 }
0x25a9   :  { %v8248_v17 = vsel %vm1368_vm2, %v8234_v7, -inf  ;;  %v8235_v27 = vadd.f32 %v15283_v5, %v8227_v12 }
0x25aa   :  { %8249 = vmax.xlane.f32.xlu1 %v8248_v17  ;;  %v8245_v23 = vsel %vm1368_vm2, %v8233_v13, -inf  ;;  %v8254_v41 = vsel %vm1368_vm2, %v8236_v14, -inf }
0x25ab   :  { %8246 = vmax.xlane.f32.xlu0 %v8245_v23  ;;  %v8251_v28 = vsel %vm1368_vm2, %v8235_v27, -inf }
0x25ac   :  { %v13115_v20 = vpop.f32.mrb[68].mxu1 }
0x25ad   :  { %v8230_v21 = vmul.f32 0.17677669, %v13115_v20  ;;  %v8214_v24 = vpop.f32.mrb[69].mxu1 }
0x25ae   :  { %v8229_v26 = vmul.f32 0.17677669, %v8214_v24  ;;  %8255 = vmax.xlane.f32.xlu1 %v8254_v41 }
0x25af   :  { %v8238_v29 = vadd.f32 %v15282_v62, %v8230_v21  ;;  %8252 = vmax.xlane.f32.xlu0 %v8251_v28 }
0x25b0   :  { %v8237_v51 = vadd.f32 %v15283_v5, %v8229_v26 }
0x25b1   :  { %v8260_v55 = vsel %vm1368_vm2, %v8238_v29, -inf }
0x25b2   :  { %8261 = vmax.xlane.f32.xlu1 %v8260_v55  ;;  %v8257_v31 = vsel %vm1368_vm2, %v8237_v51, -inf }
0x25b3   :  { %8258 = vmax.xlane.f32.xlu0 %v8257_v31 }
0x25c1   :  { %v8244_v33 = vpop.xlane.xlu0 %8243 }
0x25c2   :  { %v8264_v32 = vsub.f32 %v8232_v1, %v8244_v33  ;;  %v8241_v34 = vpop.xlane.xlu1 %8240 }
0x25c3   :  { %v8263_v22 = vsub.f32 %v8231_v63, %v8241_v34  ;;  %v7582_v34 = vld [vmem:[#allocation23 + $0x80] sm:$0xff] }
0x25c4   :  { %v8273_v25 = vmul.f32 1.442695, %v8264_v32 }
0x25c5   :  { %v8271_v35 = vmul.f32 1.442695, %v8263_v22  ;;  %v7583_v22 = vld [vmem:[#allocation23 + $0x88] sm:$0xff] }
0x25c6   :  { %15204 = vpow2.f32 %v8273_v25 }
0x25c7   :  { %15206 = vpow2.f32 %v8271_v35 }
0x25d0   :  { %v15205_v57 = vpop.eup %15204 }
0x25d1   :  { %v15207_v36 = vpop.eup %15206  ;;  %v8290_v37 = vsel %vm1368_vm2, %v15205_v57, 0.0 }
0x25d2   :  { %8291 = vadd.xlane.f32.xlu1 %v8290_v37  ;;  %v8287_v38 = vsel %vm1368_vm2, %v15207_v36, 0.0 }
0x25d3   :  { %8288 = vadd.xlane.f32.xlu0 %v8287_v38 }
0x2637   :  { %v8250_v40 = vpop.xlane.xlu1 %8249 }
0x2638   :  { %v8266_v42 = vsub.f32 %v8234_v7, %v8250_v40  ;;  %v8247_v43 = vpop.xlane.xlu0 %8246 }
0x2639   :  { %v8265_v45 = vsub.f32 %v8233_v13, %v8247_v43 }
0x263a   :  { %v8277_v46 = vmul.f32 1.442695, %v8266_v42  ;;  %v14428_v42 = vpack.c.bf16 %v7583_v22, %v7582_v34  ;;  %v9057_v34 = vld [vmem:[#allocation29 + $0xa0] sm:$0xff]  ;;  %v9058_v22 = vld [vmem:[#allocation29 + $0xa8] sm:$0xff] }
0x263b   :  { %v8275_v47 = vmul.f32 1.442695, %v8265_v45  ;;  %v8256_v49 = vpop.xlane.xlu1 %8255 }
0x263c   :  { %15208 = vpow2.f32 %v8277_v46  ;;  %v8268_v48 = vsub.f32 %v8236_v14, %v8256_v49  ;;  %v8253_v59 = vpop.xlane.xlu0 %8252  ;;  %v7584_v49 = vld [vmem:[#allocation23 + $0x90] sm:$0xff] }
0x263d   :  { %15210 = vpow2.f32 %v8275_v47  ;;  %v8267_v61 = vsub.f32 %v8235_v27, %v8253_v59 }
0x263e   :  { %v8281_v15 = vmul.f32 1.442695, %v8268_v48  ;;  %v7585_v48 = vld [vmem:[#allocation23 + $0x98] sm:$0xff] }
0x263f   :  { %v8279_v60 = vmul.f32 1.442695, %v8267_v61  ;;  %v8262_v3 = vpop.xlane.xlu1 %8261 }
0x2640   :  { %15212 = vpow2.f32 %v8281_v15  ;;  %v8270_v44 = vsub.f32 %v8238_v29, %v8262_v3  ;;  %v8259_v52 = vpop.xlane.xlu0 %8258  ;;  %v14432_v3 = vpack.c.bf16 %v7585_v48, %v7584_v49  ;;  %v9067_v48 = vld [vmem:[#allocation29 + $0xf0] sm:$0xff] }
0x2641   :  { %15214 = vpow2.f32 %v8279_v60  ;;  %v8269_v62 = vsub.f32 %v8237_v51, %v8259_v52  ;;  %v7587_v52 = vld [vmem:[#allocation23 + $0xa8] sm:$0xff] }
0x2642   :  { %v8285_v1 = vmul.f32 1.442695, %v8270_v44  ;;  %v7586_v44 = vld [vmem:[#allocation23 + $0xa0] sm:$0xff] }
0x2643   :  { %v8283_v5 = vmul.f32 1.442695, %v8269_v62 }
0x2644   :  { %15216 = vpow2.f32 %v8285_v1 }
0x2645   :  { %15218 = vpow2.f32 %v8283_v5  ;;  %v14436_v5 = vpack.c.bf16 %v7587_v52, %v7586_v44 }
0x2646   :  { %v17404_v63 = vpop.eup %15208 }
0x2647   :  { %v15211_v9 = vpop.eup %15210  ;;  %v8296_v53 = vsel %vm1368_vm2, %v17404_v63, 0.0 }
0x2648   :  { %8297 = vadd.xlane.f32.xlu1 %v8296_v53  ;;  %v8293_v10 = vsel %vm1368_vm2, %v15211_v9, 0.0  ;;  %v7589_v53 = vld [vmem:[#allocation23 + $0xb8] sm:$0xff] }
0x2649   :  { %8294 = vadd.xlane.f32.xlu0 %v8293_v10 }
0x264a   :  { %v17409_v8 = vpop.eup %15212 }
0x264b   :  { %v15215_v11 = vpop.eup %15214  ;;  %v8302_v50 = vsel %vm1368_vm2, %v17409_v8, 0.0 }
0x264c   :  { %8303 = vadd.xlane.f32.xlu1 %v8302_v50  ;;  %v8299_v2 = vsel %vm1368_vm2, %v15215_v11, 0.0  ;;  %v7590_v50 = vld [vmem:[#allocation23 + $0xc0] sm:$0xff] }
0x264d   :  { %8300 = vadd.xlane.f32.xlu0 %v8299_v2  ;;  %v7591_v2 = vld [vmem:[#allocation23 + $0xc8] sm:$0xff] }
0x264e   :  { %v17414_v30 = vpop.eup %15216 }
0x264f   :  { %v17416_v39 = vpop.eup %15218  ;;  %v8308_v7 = vsel %vm1368_vm2, %v17414_v30, 0.0 }
0x2650   :  { %8309 = vadd.xlane.f32.xlu1 %v8308_v7  ;;  %v8305_v12 = vsel %vm1368_vm2, %v17416_v39, 0.0  ;;  %v7593_v7 = vld [vmem:[#allocation23 + $0xd8] sm:$0xff] }
0x2651   :  { %8306 = vadd.xlane.f32.xlu0 %v8305_v12 }
0x265f   :  { %v8292_v13 = vpop.xlane.xlu1 %8291 }
0x2660   :  { %15220 = vrcp.f32 %v8292_v13  ;;  %v8289_v14 = vpop.xlane.xlu0 %8288 }
0x2661   :  { %15222 = vrcp.f32 %v8289_v14  ;;  %15009 = vrot.lane.b32.xlu1 %v17372_v19, %s16162_s14 }
0x2665   :  { %15014 = vrot.lane.b32.xlu1 %v17372_v19, %s16163_s22 }
0x2667   :  { %15004 = vrot.lane.b32.xlu0 %v17372_v19, %s16161_s18 }
0x266a   :  { %v15221_v17 = vpop.eup %15220 }
0x266b   :  { %v15223_v27 = vpop.eup %15222  ;;  %v8320_v20 = vmul.f32 %v15221_v17, %v15205_v57 }
0x266c   :  { %v8319_v23 = vmul.f32 %v15223_v27, %v15207_v36 }
0x266e   :  { %13120 = vmatprep.mubr.msk.f32.mxu0 %vm1368_vm2, %v8319_v23  ;;  %v7594_v23 = vld [vmem:[#allocation23 + $0xe0] sm:$0xff] }
0x266f   :  { %13121 = vmatmul.mubr.msk.f32.vlgmr.msra.gmra.mrb[64].mxu0 %vm1368_vm2, %v8320_v20  ;;  %v7595_v20 = vld [vmem:[#allocation23 + $0xe8] sm:$0xff] }
0x26d5   :  { %v8298_v21 = vpop.xlane.xlu1 %8297 }
0x26d6   :  { %v8295_v24 = vpop.xlane.xlu0 %8294 }
0x26d7   :  { %15224 = vrcp.f32 %v8295_v24 }
0x26d9   :  { %v8304_v41 = vpop.xlane.xlu1 %8303 }
0x26da   :  { %15226 = vrcp.f32 %v8304_v41  ;;  %v8301_v26 = vpop.xlane.xlu0 %8300  ;;  %v14452_v41 = vpack.c.bf16 %v7595_v20, %v7594_v23 }
0x26db   :  { %15228 = vrcp.f32 %v8301_v26  ;;  %v7596_v26 = vld [vmem:[#allocation23 + $0xf0] sm:$0xff] }
0x26dc   :  { %15230 = vrcp.f32 %v8298_v21 }
0x26dd   :  { %v8310_v28 = vpop.xlane.xlu1 %8309 }
0x26de   :  { %v8307_v29 = vpop.xlane.xlu0 %8306 }
0x26df   :  { %15232 = vrcp.f32 %v8307_v29 }
0x26e0   :  { %15234 = vrcp.f32 %v8310_v28  ;;  %v7597_v28 = vld [vmem:[#allocation23 + $0xf8] sm:$0xff] }
0x26e1   :  { %v15225_v19 = vpop.eup %15224  ;;  %v15010_v51 = vpop.permute.xlu1 %15009  ;;  %v14456_v29 = vpack.c.bf16 %v7597_v28, %v7596_v26  ;;  %v9040_v26 = vld [vmem:[#allocation26 + $0xb0] sm:$0xff]  ;;  %v9041_v28 = vld [vmem:[#allocation26 + $0xb8] sm:$0xff] }
0x26e2   :  { %v15012_v55 = vunpack.i.h.bf16 %v15010_v51  ;;  %v15011_v31 = vunpack.i.l.bf16 %v15010_v51  ;;  %v15005_v33 = vpop.permute.xlu0 %15004  ;;  %v8321_v32 = vmul.f32 %v15225_v19, %v15211_v9  ;;  %v9053_v19 = vld [vmem:[#allocation29 + $0x80] sm:$0xff]  ;;  %v9054_v51 = vld [vmem:[#allocation29 + $0x88] sm:$0xff] }
0x26e3   :  { %v15007_v25 = vunpack.i.h.bf16 %v15005_v33  ;;  %v15006_v35 = vunpack.i.l.bf16 %v15005_v33  ;;  %v9056_v33 = vld [vmem:[#allocation29 + $0x98] sm:$0xff] }
0x26e4   :  { %v15227_v57 = vpop.eup %15226  ;;  %v14420_v36 = vpack.c.bf16 %v15012_v55, %v15011_v31  ;;  %13127 = vmatprep.mubr.msk.f32.mxu1 %vm1368_vm2, %v8321_v32  ;;  %v14492_v55 = vpack.c.bf16 %v9054_v51, %v9053_v19  ;;  %v9055_v31 = vld [vmem:[#allocation29 + $0x90] sm:$0xff]  ;;  %v9042_v19 = vld [vmem:[#allocation26 + $0xc0] sm:$0xff]  ;;  %v9043_v51 = vld [vmem:[#allocation26 + $0xc8] sm:$0xff] }
0x26e5   :  { %v15229_v37 = vpop.eup %15228  ;;  %v14416_v38 = vpack.c.bf16 %v15007_v25, %v15006_v35  ;;  %v15015_v40 = vpop.permute.xlu1 %15014  ;;  %v8324_v59 = vmul.f32 %v15227_v57, %v17409_v8  ;;  %v14496_v32 = vpack.c.bf16 %v9056_v33, %v9055_v31  ;;  %v14500_v25 = vpack.c.bf16 %v9058_v22, %v9057_v34  ;;  %v9059_v35 = vld [vmem:[#allocation29 + $0xb0] sm:$0xff]  ;;  %v9060_v57 = vld [vmem:[#allocation29 + $0xb8] sm:$0xff]  ;;  %v9047_v22 = vld [vmem:[#allocation26 + $0xe8] sm:$0xff] }
0x26e6   :  { %v15231_v43 = vpop.eup %15230  ;;  %v15017_v45 = vunpack.i.h.bf16 %v15015_v40  ;;  %v15016_v46 = vunpack.i.l.bf16 %v15015_v40  ;;  %14421 = vmatprep.subr.bf16.mxu0 %v14420_v36  ;;  %v8323_v47 = vmul.f32 %v15229_v37, %v15215_v11  ;;  %v9061_v37 = vld [vmem:[#allocation29 + $0xc0] sm:$0xff]  ;;  %v9044_v31 = vld [vmem:[#allocation26 + $0xd0] sm:$0xff]  ;;  %v9045_v33 = vld [vmem:[#allocation26 + $0xd8] sm:$0xff] }
0x26e7   :  { %14417 = vmatprep.subr.bf16.mxu1 %v14416_v38  ;;  %14423 = vmatpush3.bf16.msra.mxu0 %v14420_v36  ;;  %v8322_v60 = vmul.f32 %v15231_v43, %v17404_v63  ;;  %v7588_v63 = vld [vmem:[#allocation23 + $0xb0] sm:$0xff]  ;;  %v14504_v36 = vpack.c.bf16 %v9060_v57, %v9059_v35  ;;  %v9064_v43 = vld [vmem:[#allocation29 + $0xd8] sm:$0xff] }
0x26e8   :  { %v14424_v61 = vpack.c.bf16 %v15017_v45, %v15016_v46  ;;  %14419 = vmatpush3.bf16.msra.mxu1 %v14416_v38  ;;  %13134 = vmatprep.mubr.msk.f32.mxu0 %vm1368_vm2, %v8323_v47  ;;  %v14440_v11 = vpack.c.bf16 %v7589_v53, %v7588_v63  ;;  %v9062_v38 = vld [vmem:[#allocation29 + $0xc8] sm:$0xff]  ;;  %v9065_v46 = vld [vmem:[#allocation29 + $0xe0] sm:$0xff]  ;;  %v9049_v57 = vld [vmem:[#allocation26 + $0xf8] sm:$0xff] }
0x26e9   :  { %v15233_v15 = vpop.eup %15232  ;;  %14429 = vmatprep.subr.bf16.mxu0 %v14428_v42  ;;  %v14508_v40 = vpack.c.bf16 %v9062_v38, %v9061_v37  ;;  %v9066_v47 = vld [vmem:[#allocation29 + $0xe8] sm:$0xff]  ;;  %v9046_v34 = vld [vmem:[#allocation26 + $0xe0] sm:$0xff] }
0x26ea   :  { %v15235_v62 = vpop.eup %15234  ;;  %13135 = vmatmul.mubr.msk.f32.vlgmr.msra.gmra.mrb[66].mxu0 %vm1368_vm2, %v8324_v59  ;;  %14425 = vmatprep.subr.bf16.mxu1 %v14424_v61  ;;  %v8325_v1 = vmul.f32 %v15233_v15, %v17416_v39  ;;  %v14444_v39 = vpack.c.bf16 %v7591_v2, %v7590_v50  ;;  %v14516_v49 = vpack.c.bf16 %v9066_v47, %v9065_v46  ;;  %v9068_v59 = vld [vmem:[#allocation29 + $0xf8] sm:$0xff]  ;;  %v9035_v50 = vld [vmem:[#allocation26 + $0x88] sm:$0xff] }
0x26eb   :  { %13128 = vmatmul.mubr.msk.f32.vlgmr.msra.gmra.mrb[70].mxu1 %vm1368_vm2, %v8322_v60  ;;  %14431 = vmatpush3.bf16.msra.mxu0 %v14428_v42  ;;  %v8326_v9 = vmul.f32 %v15235_v62, %v17414_v30  ;;  %v7592_v30 = vld [vmem:[#allocation23 + $0xd0] sm:$0xff]  ;;  %v11281_v15 = vld [vmem:[#allocation25 + $0x1] ss:$0 sm:$0xff]  ;;  %v14484_v35 = vpack.c.bf16 %v9047_v22, %v9046_v34  ;;  %v9072_v37 = vld [vmem:[#allocation32 + $0x80] sm:$0xff] }
0x26ec   :  { %14427 = vmatpush3.bf16.msra.mxu1 %v14424_v61  ;;  %13141 = vmatprep.mubr.msk.f32.mxu1 %vm1368_vm2, %v8325_v1  ;;  %v14448_v27 = vpack.c.bf16 %v7593_v7, %v7592_v30  ;;  %v9063_v42 = vld [vmem:[#allocation29 + $0xd0] sm:$0xff]  ;;  %v14520_v61 = vpack.c.bf16 %v9068_v59, %v9067_v48 }
0x26ed   :  { %14433 = vmatprep.subr.bf16.mxu0 %v14432_v3  ;;  %v14512_v45 = vpack.c.bf16 %v9064_v43, %v9063_v42  ;;  %v9073_v38 = vld [vmem:[#allocation32 + $0x88] sm:$0xff] }
0x26ef   :  { %13142 = vmatmul.mubr.msk.f32.vlgmr.msra.gmra.mrb[72].mxu1 %vm1368_vm2, %v8326_v9  ;;  %14435 = vmatpush3.bf16.msra.mxu0 %v14432_v3 }
0x26f0   :  { %14437 = vmatprep.subr.bf16.mxu0 %v14436_v5 }
0x2742   :  { %v13122_v10 = vpop.f32.mrb[64].mxu0 }
0x2743   :  { %v8399_v8 = vpop.f32.mrb[65].mxu0 }
0x2744   :  { %13152 = vmatprep.mubr.msk.f32.mxu0 %vm1019_vm0, %v8399_v8 }
0x2745   :  { %13153 = vmatmul.mubr.msk.f32.vlgmr.msra.gmra.mrb[68].mxu0 %vm1019_vm0, %v13122_v10 }
0x2746   :  { %14439 = vmatpush3.bf16.msra.mxu0 %v14436_v5  ;;  %v11291_v5 = vld [vmem:[#allocation31 + $0x1] ss:$0 sm:$0xff] }
0x2747   :  { %14441 = vmatprep.subr.bf16.mxu0 %v14440_v11 }
0x274a   :  { %14443 = vmatpush3.bf16.msra.mxu0 %v14440_v11 }
0x274b   :  { %14445 = vmatprep.subr.bf16.mxu0 %v14444_v39 }
0x27bd   :  { %v13136_v12 = vpop.f32.mrb[66].mxu0 }
0x27be   :  { %v13129_v13 = vpop.f32.mrb[70].mxu1  ;;  %v8561_v14 = vpop.f32.mrb[67].mxu0 }
0x27bf   :  { %v8480_v17 = vpop.f32.mrb[71].mxu1 }
0x27c0   :  { %13163 = vmatprep.mubr.msk.f32.mxu0 %vm1019_vm0, %v8480_v17 }
0x27c1   :  { %13164 = vmatmul.mubr.msk.f32.vlgmr.msra.gmra.mrb[68].mxu0 %vm1019_vm0, %v13129_v13 }
0x27c2   :  { %14447 = vmatpush3.bf16.msra.mxu0 %v14444_v39  ;;  %v13143_v21 = vpop.f32.mrb[72].mxu1  ;;  %13174 = vmatprep.mubr.msk.f32.mxu0 %vm1019_vm0, %v8561_v14  ;;  %v9037_v39 = vld [vmem:[#allocation26 + $0x98] sm:$0xff] }
0x27c3   :  { %v8642_v24 = vpop.f32.mrb[73].mxu1  ;;  %14449 = vmatprep.subr.bf16.mxu0 %v14448_v27 }
0x27c6   :  { %14451 = vmatpush3.bf16.msra.mxu0 %v14448_v27 }
0x27c7   :  { %14453 = vmatprep.subr.bf16.mxu0 %v14452_v41 }
0x27c9   :  { %13175 = vmatmul.mubr.msk.f32.vlgmr.msra.gmra.mrb[68].mxu0 %vm1019_vm0, %v13136_v12 }
0x27ca   :  { %14455 = vmatpush3.bf16.msra.mxu0 %v14452_v41  ;;  %13185 = vmatprep.mubr.msk.f32.mxu0 %vm1019_vm0, %v8642_v24  ;;  %v9039_v24 = vld [vmem:[#allocation26 + $0xa8] sm:$0xff] }
0x27cb   :  { %14457 = vmatprep.subr.bf16.mxu0 %v14456_v29 }
0x27ce   :  { %14459 = vmatpush3.bf16.msra.mxu0 %v14456_v29  ;;  %v14472_v29 = vpack.c.bf16 %v9041_v28, %v9040_v26 }
0x27cf   :  { %14493 = vmatprep.subr.bf16.mxu0 %v14492_v55 }
0x27d1   :  { %13186 = vmatmul.mubr.msk.f32.vlgmr.msra.gmra.mrb[68].mxu0 %vm1019_vm0, %v13143_v21  ;;  %v9038_v21 = vld [vmem:[#allocation26 + $0xa0] sm:$0xff] }
0x27d2   :  { %14495 = vmatpush3.bf16.msra.mxu0 %v14492_v55  ;;  %13255 = vmatprep.mubr.f32.mxu0 %v17204_v58  ;;  %v14468_v41 = vpack.c.bf16 %v9039_v24, %v9038_v21  ;;  %v14476_v55 = vpack.c.bf16 %v9043_v51, %v9042_v19  ;;  %v9086_v21 = vld [vmem:[#allocation32 + $0xf0] sm:$0xff]  ;;  %v9087_v24 = vld [vmem:[#allocation32 + $0xf8] sm:$0xff] }
0x27d3   :  { %14497 = vmatprep.subr.bf16.mxu0 %v14496_v32  ;;  %v14552_v26 = vpack.c.bf16 %v9087_v24, %v9086_v21 }
0x27d6   :  { %14499 = vmatpush3.bf16.msra.mxu0 %v14496_v32  ;;  %v14480_v32 = vpack.c.bf16 %v9045_v33, %v9044_v31 }
0x27d7   :  { %14501 = vmatprep.subr.bf16.mxu0 %v14500_v25 }
0x27da   :  { %14503 = vmatpush3.bf16.msra.mxu0 %v14500_v25  ;;  %v9048_v25 = vld [vmem:[#allocation26 + $0xf0] sm:$0xff] }
0x27db   :  { %14505 = vmatprep.subr.bf16.mxu0 %v14504_v36 }
0x27de   :  { %14507 = vmatpush3.bf16.msra.mxu0 %v14504_v36  ;;  %v14488_v36 = vpack.c.bf16 %v9049_v57, %v9048_v25 }
0x27df   :  { %14509 = vmatprep.subr.bf16.mxu0 %v14508_v40 }
0x27e2   :  { %14511 = vmatpush3.bf16.msra.mxu0 %v14508_v40  ;;  %v14524_v40 = vpack.c.bf16 %v9073_v38, %v9072_v37 }
0x27e3   :  { %14513 = vmatprep.subr.bf16.mxu0 %v14512_v45 }
0x27e6   :  { %14515 = vmatpush3.bf16.msra.mxu0 %v14512_v45 }
0x27e7   :  { %14517 = vmatprep.subr.bf16.mxu0 %v14516_v49 }
0x27ea   :  { %14519 = vmatpush3.bf16.msra.mxu0 %v14516_v49 }
0x27eb   :  { %14521 = vmatprep.subr.bf16.mxu0 %v14520_v61 }
0x27ee   :  { %14523 = vmatpush3.bf16.msra.mxu0 %v14520_v61 }
0x27f1   :  { %13256 = vmatmul.mubr.f32.vlgmr.msra.gmra.mrb[70].mxu0 %v17218_v54 }
0x28a4   :  { %v13187_v60 = vpop.f32.mrb[68].mxu0 }
0x28a5   :  { %v14732_v3 = vadd.f32 %v13187_v60, %v11281_v15  ;;  %v8978_v44 = vpop.f32.mrb[69].mxu0 }
0x28a6   :  { %v14733_v52 = vadd.f32 %v11281_v15, %v8978_v44 }
0x28a7   :  { %v8990_v62 = vadd.f32 %v14732_v3, %v17351_v4  ;;  %v9034_v4 = vld [vmem:[#allocation26 + $0x80] sm:$0xff]  ;;  %v11288_v3 = vld [vmem:[#allocation38 + $0x1] ss:$0 sm:$0xff] }
0x28a8   :  { %v8989_v1 = vadd.f32 %v14733_v52, %v17347_v56  ;;  %v9036_v56 = vld [vmem:[#allocation26 + $0x90] sm:$0xff]  ;;  %v14460_v2 = vpack.c.bf16 %v9035_v50, %v9034_v4  ;;  %v11289_v52 = vld [vmem:[#allocation40 + $0x1] ss:$0 sm:$0xff] }
0x28a9   :  { %8997 = vadd.xlane.f32.xlu1 %v8990_v62  ;;  %v14464_v30 = vpack.c.bf16 %v9037_v39, %v9036_v56  ;;  %v9076_v4 = vld [vmem:[#allocation32 + $0xa0] sm:$0xff]  ;;  %v9077_v50 = vld [vmem:[#allocation32 + $0xa8] sm:$0xff]  ;;  %v9079_v39 = vld [vmem:[#allocation32 + $0xb8] sm:$0xff] }
0x28aa   :  { %8995 = vadd.xlane.f32.xlu0 %v8989_v1  ;;  %14461 = vmatprep.subr.bf16.mxu1 %v14460_v2  ;;  %v14532_v56 = vpack.c.bf16 %v9077_v50, %v9076_v4 }
0x28ab   :  { %14463 = vmatpush3.bf16.msra.mxu1 %v14460_v2  ;;  %v9078_v2 = vld [vmem:[#allocation32 + $0xb0] sm:$0xff] }
0x28ac   :  { %14465 = vmatprep.subr.bf16.mxu1 %v14464_v30 }
0x28af   :  { %14467 = vmatpush3.bf16.msra.mxu1 %v14464_v30  ;;  %v14536_v30 = vpack.c.bf16 %v9079_v39, %v9078_v2 }
0x28b0   :  { %14469 = vmatprep.subr.bf16.mxu1 %v14468_v41 }
0x28b3   :  { %14471 = vmatpush3.bf16.msra.mxu1 %v14468_v41 }
0x28b4   :  { %14473 = vmatprep.subr.bf16.mxu1 %v14472_v29 }
0x28b7   :  { %14475 = vmatpush3.bf16.msra.mxu1 %v14472_v29 }
0x28b8   :  { %14477 = vmatprep.subr.bf16.mxu1 %v14476_v55 }
0x28bb   :  { %14479 = vmatpush3.bf16.msra.mxu1 %v14476_v55 }
0x28bc   :  { %14481 = vmatprep.subr.bf16.mxu1 %v14480_v32 }
0x28bf   :  { %14483 = vmatpush3.bf16.msra.mxu1 %v14480_v32  ;;  %v11290_v32 = vld [vmem:[#allocation28 + $0x1] ss:$0 sm:$0xff] }
0x28c0   :  { %14485 = vmatprep.subr.bf16.mxu1 %v14484_v35 }
0x28c3   :  { %14487 = vmatpush3.bf16.msra.mxu1 %v14484_v35 }
0x28c4   :  { %v13257_v9 = vpop.f32.mrb[70].mxu0  ;;  %14489 = vmatprep.subr.bf16.mxu1 %v14488_v36 }
0x28c5   :  { %v9268_v63 = vadd.f32 %v13257_v9, %v11291_v5  ;;  %v9262_v53 = vpop.f32.mrb[71].mxu0 }
0x28c6   :  { %v9263_v10 = vadd.f32 %v11291_v5, %v9262_v53  ;;  %v9075_v53 = vld [vmem:[#allocation32 + $0x98] sm:$0xff] }
0x28c7   :  { %14491 = vmatpush3.bf16.msra.mxu1 %v14488_v36 }
0x28c8   :  { %v15018_v8 = vpack.i.bf16 %v9268_v63, %v9263_v10  ;;  %v14556_v11 = vpack.c.bf16 %v9268_v63, %v9263_v10  ;;  %14525 = vmatprep.subr.bf16.mxu1 %v14524_v40  ;;  %v9074_v63 = vld [vmem:[#allocation32 + $0x90] sm:$0xff] }
0x28ca   :  { %15019 = vrot.lane.b32.xlu1 %v15018_v8, %s16161_s18  ;;  %14558 = vmatprep.subr.msk.bf16.mxu0 %vm16727_vm1, %v14556_v11 }
0x28cb   :  { %14561 = vmatpush3.bf16.xpose.msk.msra.mxu0 %vm16727_vm1, %v14556_v11  ;;  %v14528_v11 = vpack.c.bf16 %v9075_v53, %v9074_v63 }
0x2936   :  { %v8998_v7 = vpop.xlane.xlu1 %8997 }
0x2937   :  { %v8996_v12 = vpop.xlane.xlu0 %8995  ;;  %v9000_v13 = vmul.f32 0.0078125, %v8998_v7  ;;  %v9080_v7 = vld [vmem:[#allocation32 + $0xc0] sm:$0xff] }
0x2938   :  { %v8999_v14 = vmul.f32 0.0078125, %v8996_v12  ;;  %v9081_v12 = vld [vmem:[#allocation32 + $0xc8] sm:$0xff] }
0x2939   :  { %v9002_v27 = vsub.f32 %v8990_v62, %v9000_v13  ;;  %v14540_v13 = vpack.c.bf16 %v9081_v12, %v9080_v7 }
0x293a   :  { %v9001_v17 = vsub.f32 %v8989_v1, %v8999_v14  ;;  %v9082_v14 = vld [vmem:[#allocation32 + $0xd0] sm:$0xff] }
0x293b   :  { %v9004_v20 = vmul.f32 %v9002_v27, %v9002_v27 }
0x293c   :  { %v9003_v23 = vmul.f32 %v9001_v17, %v9001_v17  ;;  %v15020_v41 = vpop.permute.xlu1 %15019 }
0x293d   :  { %v15022_v28 = vunpack.i.h.bf16 %v15020_v41  ;;  %v15021_v29 = vunpack.i.l.bf16 %v15020_v41 }
0x293e   :  { %9005 = vadd.xlane.f32.xlu0 %v9003_v23  ;;  %v9084_v23 = vld [vmem:[#allocation32 + $0xe0] sm:$0xff] }
0x293f   :  { %v14562_v19 = vpack.c.bf16 %v15022_v28, %v15021_v29 }
0x2942   :  { %9007 = vadd.xlane.f32.xlu0 %v9004_v20  ;;  %v9085_v20 = vld [vmem:[#allocation32 + $0xe8] sm:$0xff] }
0x2958   :  { %15024 = vrot.lane.b32.xlu0 %v15018_v8, %s16162_s14 }
0x295c   :  { %15029 = vrot.lane.b32.xlu0 %v15018_v8, %s16163_s22 }
0x29cb   :  { %v9006_v42 = vpop.xlane.xlu0 %9005 }
0x29cc   :  { %v9009_v43 = vmul.f32 0.0078125, %v9006_v42 }
0x29ce   :  { %v9011_v45 = vadd.f32 1e-05, %v9009_v43 }
0x29cf   :  { %v9008_v46 = vpop.xlane.xlu0 %9007 }
0x29d0   :  { %15236 = vrsqrt.f32 %v9011_v45  ;;  %v9010_v47 = vmul.f32 0.0078125, %v9008_v46 }
0x29d2   :  { %v9012_v49 = vadd.f32 1e-05, %v9010_v47 }
0x29d3   :  { %v15025_v48 = vpop.permute.xlu0 %15024 }
0x29d4   :  { %15238 = vrsqrt.f32 %v9012_v49  ;;  %v15027_v59 = vunpack.i.h.bf16 %v15025_v48  ;;  %v15026_v61 = vunpack.i.l.bf16 %v15025_v48 }
0x29d6   :  { %v17459_v15 = vpack.c.bf16 %v15027_v59, %v15026_v61 }
0x29d7   :  { %v15030_v51 = vpop.permute.xlu0 %15029 }
0x29d8   :  { %14570 = vmatprep.subr.msk.bf16.mxu0 %vm16727_vm1, %v17459_v15  ;;  %v15032_v55 = vunpack.i.h.bf16 %v15030_v51  ;;  %v15031_v31 = vunpack.i.l.bf16 %v15030_v51 }
0x29da   :  { %v15237_v60 = vpop.eup %15236  ;;  %v14574_v33 = vpack.c.bf16 %v15032_v55, %v15031_v31 }
0x29db   :  { %v9015_v44 = vmul.f32 %v15237_v60, %v9001_v17  ;;  %v9083_v17 = vld [vmem:[#allocation32 + $0xd8] sm:$0xff] }
0x29dd   :  { %v9023_v62 = vmul.f32 %v11288_v3, %v9015_v44  ;;  %v15285_v44 = vld [vmem:[%s17733_s29] sm:$0xff] }
0x29de   :  { %v15239_v1 = vpop.eup %15238 }
0x29df   :  { %v9016_v5 = vmul.f32 %v15239_v1, %v9002_v27  ;;  %v17464_v9 = vadd.f32 %v11289_v52, %v9023_v62  ;;  %v14544_v27 = vpack.c.bf16 %v9083_v17, %v9082_v14 }
0x29e1   :  { %v9024_v10 = vmul.f32 %v11288_v3, %v9016_v5  ;;  %13220 = vmatprep.mubr.f32.mxu1 %v17464_v9 }
0x29e3   :  { %v17467_v8 = vadd.f32 %v11289_v52, %v9024_v10 }
0x29e5   :  { %13221 = vmatmul.mubr.f32.vlgmr.msra.gmra.mrb[74].mxu1 %v17467_v8 }
0x29e6   :  { %14527 = vmatpush3.bf16.msra.mxu1 %v14524_v40  ;;  %13290 = vmatprep.mubr.f32.mxu1 %v17204_v58  ;;  %v14548_v58 = vpack.c.bf16 %v9085_v20, %v9084_v23 }
0x29e7   :  { %14529 = vmatprep.subr.bf16.mxu1 %v14528_v11 }
0x29ea   :  { %14531 = vmatpush3.bf16.msra.mxu1 %v14528_v11 }
0x29eb   :  { %14533 = vmatprep.subr.bf16.mxu1 %v14532_v56 }
0x29ee   :  { %14535 = vmatpush3.bf16.msra.mxu1 %v14532_v56 }
0x29ef   :  { %14537 = vmatprep.subr.bf16.mxu1 %v14536_v30 }
0x29f2   :  { %14539 = vmatpush3.bf16.msra.mxu1 %v14536_v30 }
0x29f3   :  { %14541 = vmatprep.subr.bf16.mxu1 %v14540_v13 }
0x29f6   :  { %14543 = vmatpush3.bf16.msra.mxu1 %v14540_v13 }
0x29f7   :  { %14545 = vmatprep.subr.bf16.mxu1 %v14544_v27 }
0x29fa   :  { %14547 = vmatpush3.bf16.msra.mxu1 %v14544_v27 }
0x29fb   :  { %14549 = vmatprep.subr.bf16.mxu1 %v14548_v58 }
0x29fe   :  { %14551 = vmatpush3.bf16.msra.mxu1 %v14548_v58 }
0x29ff   :  { %14553 = vmatprep.subr.bf16.mxu1 %v14552_v26 }
0x2a02   :  { %14555 = vmatpush3.bf16.msra.mxu1 %v14552_v26 }
0x2a03   :  { %14564 = vmatprep.subr.msk.bf16.mxu1 %vm16727_vm1, %v14562_v19 }
0x2a05   :  { %13291 = vmatmul.mubr.f32.vlgmr.msra.gmra.mrb[76].mxu1 %v17218_v54  ;;  %v11292_v54 = vld [vmem:[#allocation34 + $0x1] ss:$0 sm:$0xff] }
0x2a0b   :  { %14567 = vmatpush3.bf16.xpose.msk.msra.mxu1 %vm16727_vm1, %v14562_v19 }
0x2a0c   :  { %14576 = vmatprep.subr.msk.bf16.mxu1 %vm16727_vm1, %v14574_v33 }
0x2ab8   :  { %v13222_v34 = vpop.f32.mrb[74].mxu1 }
0x2ab9   :  { %v9187_v22 = vadd.f32 %v13222_v34, %v11290_v32  ;;  %v9181_v25 = vpop.f32.mrb[75].mxu1 }
0x2aba   :  { %v9182_v35 = vadd.f32 %v11290_v32, %v9181_v25 }
0x2abb   :  { %9360 = vrot.lane.b32.xlu0 %v9187_v22, %s16162_s14 }
0x2abc   :  { %9354 = vrot.lane.b32.xlu1 %v9182_v35, %s16161_s18  ;;  %13297 = vmatprep.mubr.msk.f32.mxu0 %vm1019_vm0, %v9182_v35 }
0x2abd   :  { %13298 = vmatmul.mubr.msk.f32.vlgmr.msra.gmra.mrb[72].mxu0 %vm1019_vm0, %v9187_v22 }
0x2abe   :  { %14573 = vmatpush3.bf16.xpose.msk.msra.mxu0 %vm16727_vm1, %v17459_v15 }
0x2abf   :  { %9364 = vrot.lane.b32.xlu0 %v9187_v22, %s16163_s22 }
0x2ac0   :  { %9356 = vrot.lane.b32.xlu1 %v9187_v22, %s16161_s18 }
0x2ac4   :  { %9358 = vrot.lane.b32.xlu1 %v9182_v35, %s16162_s14 }
0x2ac8   :  { %9362 = vrot.lane.b32.xlu1 %v9182_v35, %s16163_s22 }
0x2ad8   :  { %v13292_v57 = vpop.f32.mrb[76].mxu1 }
0x2ad9   :  { %v9349_v36 = vadd.f32 %v13292_v57, %v11292_v54  ;;  %v9343_v37 = vpop.f32.mrb[77].mxu1 }
0x2ada   :  { %v9344_v38 = vadd.f32 %v11292_v54, %v9343_v37 }
0x2adc   :  { %v14580_v40 = vpack.c.bf16 %v9349_v36, %v9344_v38  ;;  %v17489_v42 = vpack.i.bf16 %v9349_v36, %v9344_v38 }
0x2ade   :  { %14581 = vmatprep.subr.bf16.mxu0 %v14580_v40 }
0x2b2d   :  { %v9361_v46 = vpop.permute.xlu0 %9360 }
0x2b2e   :  { %v9355_v43 = vpop.permute.xlu1 %9354 }
0x2b2f   :  { %13304 = vmatprep.mubr.msk.f32.mxu1 %vm1019_vm0, %v9355_v43 }
0x2b31   :  { %v9365_v48 = vpop.permute.xlu0 %9364 }
0x2b32   :  { %v9357_v45 = vpop.permute.xlu1 %9356 }
0x2b33   :  { %13305 = vmatmul.mubr.msk.f32.vlgmr.msra.gmra.mrb[78].mxu1 %vm1019_vm0, %v9357_v45 }
0x2b34   :  { %14579 = vmatpush3.bf16.xpose.msk.msra.mxu1 %vm16727_vm1, %v14574_v33 }
0x2b36   :  { %v9359_v47 = vpop.permute.xlu1 %9358 }
0x2b37   :  { %13311 = vmatprep.mubr.msk.f32.mxu0 %vm1019_vm0, %v9359_v47 }
0x2b38   :  { %13312 = vmatmul.mubr.msk.f32.vlgmr.msra.gmra.mrb[74].mxu0 %vm1019_vm0, %v9361_v46 }
0x2b39   :  { %14583 = vmatpush3.bf16.msra.mxu0 %v14580_v40 }
0x2b3a   :  { %v9363_v49 = vpop.permute.xlu1 %9362 }
0x2b3b   :  { %13318 = vmatprep.mubr.msk.f32.mxu1 %vm1019_vm0, %v9363_v49 }
0x2b3c   :  { %13319 = vmatmul.mubr.msk.f32.vlgmr.msra.gmra.mrb[80].mxu1 %vm1019_vm0, %v9365_v48 }
0x2b90   :  { %v13299_v59 = vpop.f32.mrb[72].mxu0 }
0x2b91   :  { %v9733_v61 = vmul.f32 0.17677669, %v13299_v59  ;;  %v9474_v15 = vpop.f32.mrb[73].mxu0 }
0x2b92   :  { %v9732_v60 = vmul.f32 0.17677669, %v9474_v15 }
0x2b93   :  { %v9741_v3 = vadd.f32 %v15284_v0, %v9733_v61 }
0x2b94   :  { %v9740_v52 = vadd.f32 %v15285_v44, %v9732_v60 }
0x2b95   :  { %v9751_v62 = vsel %vm1368_vm2, %v9741_v3, -inf }
0x2b96   :  { %9752 = vmax.xlane.f32.xlu0 %v9751_v62  ;;  %v9748_v1 = vsel %vm1368_vm2, %v9740_v52, -inf }
0x2b97   :  { %9749 = vmax.xlane.f32.xlu1 %v9748_v1 }
0x2c06   :  { %v13306_v5 = vpop.f32.mrb[78].mxu1 }
0x2c07   :  { %v9735_v63 = vmul.f32 0.17677669, %v13306_v5  ;;  %v9557_v53 = vpop.f32.mrb[79].mxu1 }
0x2c08   :  { %v9734_v10 = vmul.f32 0.17677669, %v9557_v53 }
0x2c09   :  { %v9743_v11 = vadd.f32 %v15284_v0, %v9735_v63 }
0x2c0a   :  { %v9742_v4 = vadd.f32 %v15285_v44, %v9734_v10 }
0x2c0b   :  { %v13313_v50 = vpop.f32.mrb[74].mxu0  ;;  %v9757_v56 = vsel %vm1368_vm2, %v9743_v11, -inf }
0x2c0c   :  { %v9737_v2 = vmul.f32 0.17677669, %v13313_v50  ;;  %9758 = vmax.xlane.f32.xlu1 %v9757_v56  ;;  %v9640_v39 = vpop.f32.mrb[75].mxu0  ;;  %v9754_v30 = vsel %vm1368_vm2, %v9742_v4, -inf }
0x2c0d   :  { %v9736_v7 = vmul.f32 0.17677669, %v9640_v39  ;;  %9755 = vmax.xlane.f32.xlu0 %v9754_v30 }
0x2c0e   :  { %v9745_v12 = vadd.f32 %v15284_v0, %v9737_v2 }
0x2c0f   :  { %v9744_v13 = vadd.f32 %v15285_v44, %v9736_v7  ;;  %v13320_v14 = vpop.f32.mrb[80].mxu1 }
0x2c10   :  { %v9739_v17 = vmul.f32 0.17677669, %v13320_v14  ;;  %v9723_v27 = vpop.f32.mrb[81].mxu1  ;;  %v9763_v23 = vsel %vm1368_vm2, %v9745_v12, -inf }
0x2c11   :  { %v9738_v20 = vmul.f32 0.17677669, %v9723_v27  ;;  %9764 = vmax.xlane.f32.xlu1 %v9763_v23  ;;  %v9760_v58 = vsel %vm1368_vm2, %v9744_v13, -inf }
0x2c12   :  { %v9747_v21 = vadd.f32 %v15284_v0, %v9739_v17  ;;  %9761 = vmax.xlane.f32.xlu0 %v9760_v58 }
0x2c13   :  { %v9746_v24 = vadd.f32 %v15285_v44, %v9738_v20 }
0x2c14   :  { %v9769_v41 = vsel %vm1368_vm2, %v9747_v21, -inf }
0x2c15   :  { %9770 = vmax.xlane.f32.xlu1 %v9769_v41  ;;  %v9766_v26 = vsel %vm1368_vm2, %v9746_v24, -inf }
0x2c16   :  { %9767 = vmax.xlane.f32.xlu0 %v9766_v26  ;;  %v9091_v26 = vld [vmem:[#allocation35 + $0x80] sm:$0xff] }
0x2c23   :  { %v9753_v28 = vpop.xlane.xlu0 %9752 }
0x2c24   :  { %v9773_v29 = vsub.f32 %v9741_v3, %v9753_v28  ;;  %v9750_v19 = vpop.xlane.xlu1 %9749  ;;  %v9092_v28 = vld [vmem:[#allocation35 + $0x88] sm:$0xff] }
0x2c25   :  { %v9772_v51 = vsub.f32 %v9740_v52, %v9750_v19 }
0x2c26   :  { %v9782_v55 = vmul.f32 1.442695, %v9773_v29 }
0x2c27   :  { %v9780_v31 = vmul.f32 1.442695, %v9772_v51 }
0x2c28   :  { %15240 = vpow2.f32 %v9782_v55 }
0x2c29   :  { %15242 = vpow2.f32 %v9780_v31 }
0x2c32   :  { %v15241_v33 = vpop.eup %15240 }
0x2c33   :  { %v15243_v32 = vpop.eup %15242  ;;  %v9799_v34 = vsel %vm1368_vm2, %v15241_v33, 0.0 }
0x2c34   :  { %9800 = vadd.xlane.f32.xlu1 %v9799_v34  ;;  %v9796_v22 = vsel %vm1368_vm2, %v15243_v32, 0.0  ;;  %v14596_v34 = vpack.c.bf16 %v9092_v28, %v9091_v26  ;;  %v10546_v26 = vld [vmem:[#allocation47 + $0x118] sm:$0xff]  ;;  %v10543_v28 = vld [vmem:[#allocation47 + $0x100] sm:$0xff] }
0x2c35   :  { %9797 = vadd.xlane.f32.xlu0 %v9796_v22 }
0x2c99   :  { %v9759_v25 = vpop.xlane.xlu1 %9758 }
0x2c9a   :  { %v9775_v35 = vsub.f32 %v9743_v11, %v9759_v25  ;;  %v9756_v54 = vpop.xlane.xlu0 %9755 }
0x2c9b   :  { %v9774_v57 = vsub.f32 %v9742_v4, %v9756_v54 }
0x2c9c   :  { %v9786_v36 = vmul.f32 1.442695, %v9775_v35 }
0x2c9d   :  { %v9784_v37 = vmul.f32 1.442695, %v9774_v57  ;;  %v9093_v57 = vld [vmem:[#allocation35 + $0x90] sm:$0xff] }
0x2c9e   :  { %15244 = vpow2.f32 %v9786_v36  ;;  %v9765_v38 = vpop.xlane.xlu1 %9764  ;;  %v9094_v36 = vld [vmem:[#allocation35 + $0x98] sm:$0xff] }
0x2c9f   :  { %15246 = vpow2.f32 %v9784_v37  ;;  %v9777_v40 = vsub.f32 %v9745_v12, %v9765_v38  ;;  %v9762_v43 = vpop.xlane.xlu0 %9761 }
0x2ca0   :  { %v9776_v45 = vsub.f32 %v9744_v13, %v9762_v43 }
0x2ca1   :  { %v9790_v46 = vmul.f32 1.442695, %v9777_v40 }
0x2ca2   :  { %v9788_v47 = vmul.f32 1.442695, %v9776_v45  ;;  %v9771_v49 = vpop.xlane.xlu1 %9770  ;;  %v14600_v45 = vpack.c.bf16 %v9094_v36, %v9093_v57 }
0x2ca3   :  { %15248 = vpow2.f32 %v9790_v46  ;;  %v9779_v48 = vsub.f32 %v9747_v21, %v9771_v49  ;;  %v9768_v59 = vpop.xlane.xlu0 %9767  ;;  %v9095_v46 = vld [vmem:[#allocation35 + $0xa0] sm:$0xff] }
0x2ca4   :  { %15250 = vpow2.f32 %v9788_v47  ;;  %v9778_v61 = vsub.f32 %v9746_v24, %v9768_v59  ;;  %v9096_v47 = vld [vmem:[#allocation35 + $0xa8] sm:$0xff] }
0x2ca5   :  { %v9794_v15 = vmul.f32 1.442695, %v9779_v48  ;;  %v14604_v59 = vpack.c.bf16 %v9096_v47, %v9095_v46 }
0x2ca6   :  { %v9792_v60 = vmul.f32 1.442695, %v9778_v61 }
0x2ca7   :  { %15252 = vpow2.f32 %v9794_v15  ;;  %v9097_v15 = vld [vmem:[#allocation35 + $0xb0] sm:$0xff] }
0x2ca8   :  { %v17511_v0 = vpop.eup %15244  ;;  %15254 = vpow2.f32 %v9792_v60  ;;  %v9098_v60 = vld [vmem:[#allocation35 + $0xb8] sm:$0xff] }
0x2ca9   :  { %v15247_v3 = vpop.eup %15246  ;;  %v9805_v44 = vsel %vm1368_vm2, %v17511_v0, 0.0 }
0x2caa   :  { %9806 = vadd.xlane.f32.xlu1 %v9805_v44  ;;  %v9802_v52 = vsel %vm1368_vm2, %v15247_v3, 0.0  ;;  %v14608_v44 = vpack.c.bf16 %v9098_v60, %v9097_v15  ;;  %v10558_v15 = vld [vmem:[#allocation47 + $0x178] sm:$0xff] }
0x2cab   :  { %9803 = vadd.xlane.f32.xlu0 %v9802_v52  ;;  %v9099_v52 = vld [vmem:[#allocation35 + $0xc0] sm:$0xff] }
0x2cad   :  { %v17516_v62 = vpop.eup %15248 }
0x2cae   :  { %v15251_v1 = vpop.eup %15250  ;;  %v9811_v5 = vsel %vm1368_vm2, %v17516_v62, 0.0 }
0x2caf   :  { %9812 = vadd.xlane.f32.xlu1 %v9811_v5  ;;  %v9808_v63 = vsel %vm1368_vm2, %v15251_v1, 0.0  ;;  %v9101_v5 = vld [vmem:[#allocation35 + $0xd0] sm:$0xff] }
0x2cb0   :  { %9809 = vadd.xlane.f32.xlu0 %v9808_v63  ;;  %v9102_v63 = vld [vmem:[#allocation35 + $0xd8] sm:$0xff] }
0x2cb1   :  { %v17521_v53 = vpop.eup %15252 }
0x2cb2   :  { %v17523_v10 = vpop.eup %15254  ;;  %v9817_v11 = vsel %vm1368_vm2, %v17521_v53, 0.0 }
0x2cb3   :  { %9818 = vadd.xlane.f32.xlu1 %v9817_v11  ;;  %v9814_v4 = vsel %vm1368_vm2, %v17523_v10, 0.0 }
0x2cb4   :  { %9815 = vadd.xlane.f32.xlu0 %v9814_v4 }
0x2cc1   :  { %v9801_v50 = vpop.xlane.xlu1 %9800 }
0x2cc2   :  { %15256 = vrcp.f32 %v9801_v50  ;;  %v9798_v56 = vpop.xlane.xlu0 %9797  ;;  %v14616_v50 = vpack.c.bf16 %v9102_v63, %v9101_v5  ;;  %v10559_v5 = vld [vmem:[#allocation47 + $0x180] sm:$0xff]  ;;  %v10561_v63 = vld [vmem:[#allocation47 + $0x190] sm:$0xff] }
0x2cc3   :  { %15258 = vrcp.f32 %v9798_v56  ;;  %v9103_v56 = vld [vmem:[#allocation35 + $0xe0] sm:$0xff] }
0x2cc4   :  { %15039 = vrot.lane.b32.xlu1 %v17489_v42, %s16162_s14 }
0x2cc8   :  { %15044 = vrot.lane.b32.xlu1 %v17489_v42, %s16163_s22 }
0x2cca   :  { %15034 = vrot.lane.b32.xlu0 %v17489_v42, %s16161_s18 }
0x2ccc   :  { %v15257_v2 = vpop.eup %15256 }
0x2ccd   :  { %v15259_v39 = vpop.eup %15258  ;;  %v17535_v7 = vmul.f32 %v15257_v2, %v15241_v33  ;;  %v9104_v2 = vld [vmem:[#allocation35 + $0xe8] sm:$0xff] }
0x2cce   :  { %v9828_v30 = vmul.f32 %v15259_v39, %v15243_v32 }
0x2cd0   :  { %13325 = vmatprep.mubr.msk.f32.mxu0 %vm1368_vm2, %v9828_v30  ;;  %10942 = vst.msk [vmem:[#allocation53] sm:$0xff] %vm10941_vm3, %v9828_v30 }
0x2cd1   :  { %13326 = vmatmul.mubr.msk.f32.vlgmr.msra.gmra.mrb[76].mxu0 %vm1368_vm2, %v17535_v7 }
0x2d37   :  { %v9807_v12 = vpop.xlane.xlu1 %9806 }
0x2d38   :  { %v9804_v13 = vpop.xlane.xlu0 %9803 }
0x2d39   :  { %15260 = vrcp.f32 %v9804_v13  ;;  %v9105_v13 = vld [vmem:[#allocation35 + $0xf0] sm:$0xff] }
0x2d3c   :  { %v9813_v14 = vpop.xlane.xlu1 %9812 }
0x2d3d   :  { %15262 = vrcp.f32 %v9813_v14  ;;  %v9810_v17 = vpop.xlane.xlu0 %9809  ;;  %v9106_v14 = vld [vmem:[#allocation35 + $0xf8] sm:$0xff] }
0x2d3e   :  { %15264 = vrcp.f32 %v9810_v17  ;;  %v14624_v17 = vpack.c.bf16 %v9106_v14, %v9105_v13  ;;  %v10569_v13 = vld [vmem:[#allocation47 + $0x1d0] sm:$0xff] }
0x2d3f   :  { %15266 = vrcp.f32 %v9807_v12  ;;  %v14620_v12 = vpack.c.bf16 %v9104_v2, %v9103_v56  ;;  %v10565_v56 = vld [vmem:[#allocation47 + $0x1b0] sm:$0xff]  ;;  %v10568_v2 = vld [vmem:[#allocation47 + $0x1c8] sm:$0xff] }
0x2d40   :  { %v9819_v42 = vpop.xlane.xlu1 %9818 }
0x2d41   :  { %v9816_v27 = vpop.xlane.xlu0 %9815 }
0x2d42   :  { %15268 = vrcp.f32 %v9816_v27 }
0x2d43   :  { %v15261_v23 = vpop.eup %15260  ;;  %15270 = vrcp.f32 %v9819_v42  ;;  %v11319_v42 = vld [vmem:[#allocation37 + $0x1] ss:$0 sm:$0xff] }
0x2d44   :  { %v15040_v20 = vpop.permute.xlu1 %15039  ;;  %v9830_v58 = vmul.f32 %v15261_v23, %v15247_v3 }
0x2d45   :  { %v15042_v21 = vunpack.i.h.bf16 %v15040_v20  ;;  %v15041_v24 = vunpack.i.l.bf16 %v15040_v20  ;;  %v15035_v41 = vpop.permute.xlu0 %15034 }
0x2d46   :  { %v15037_v29 = vunpack.i.h.bf16 %v15035_v41  ;;  %v15036_v19 = vunpack.i.l.bf16 %v15035_v41  ;;  %13332 = vmatprep.mubr.msk.f32.mxu1 %vm1368_vm2, %v9830_v58  ;;  %10943 = vst.msk [vmem:[#allocation53 + $0x8] sm:$0xff] %vm10941_vm3, %v9830_v58  ;;  %v10544_v41 = vld [vmem:[#allocation47 + $0x108] sm:$0xff] }
0x2d47   :  { %v15263_v51 = vpop.eup %15262  ;;  %v14588_v55 = vpack.c.bf16 %v15042_v21, %v15041_v24 }
0x2d48   :  { %v15265_v31 = vpop.eup %15264  ;;  %v14584_v33 = vpack.c.bf16 %v15037_v29, %v15036_v19  ;;  %v15045_v32 = vpop.permute.xlu1 %15044  ;;  %v17544_v37 = vmul.f32 %v15263_v51, %v17516_v62  ;;  %v9100_v62 = vld [vmem:[#allocation35 + $0xc8] sm:$0xff]  ;;  %v14628_v29 = vpack.c.bf16 %v10546_v26, %v10544_v41  ;;  %v10545_v19 = vld [vmem:[#allocation47 + $0x110] sm:$0xff]  ;;  %v10548_v51 = vld [vmem:[#allocation47 + $0x128] sm:$0xff] }
0x2d49   :  { %v15267_v22 = vpop.eup %15266  ;;  %v15047_v25 = vunpack.i.h.bf16 %v15045_v32  ;;  %v15046_v35 = vunpack.i.l.bf16 %v15045_v32  ;;  %14589 = vmatprep.subr.bf16.mxu0 %v14588_v55  ;;  %v9832_v54 = vmul.f32 %v15265_v31, %v15251_v1  ;;  %v14612_v1 = vpack.c.bf16 %v9100_v62, %v9099_v52  ;;  %v10547_v32 = vld [vmem:[#allocation47 + $0x120] sm:$0xff]  ;;  %v10560_v52 = vld [vmem:[#allocation47 + $0x188] sm:$0xff]  ;;  %v10562_v62 = vld [vmem:[#allocation47 + $0x198] sm:$0xff] }
0x2d4a   :  { %14585 = vmatprep.subr.bf16.mxu1 %v14584_v33  ;;  %14591 = vmatpush3.bf16.msra.mxu0 %v14588_v55  ;;  %v17549_v43 = vmul.f32 %v15267_v22, %v17511_v0  ;;  %v10550_v55 = vld [vmem:[#allocation47 + $0x138] sm:$0xff]  ;;  %v14630_v31 = vpack.c.bf16 %v10545_v19, %v10543_v28  ;;  %v10552_v22 = vld [vmem:[#allocation47 + $0x148] sm:$0xff]  ;;  %v10578_v26 = vld [vmem:[#allocation49 + $0x100] sm:$0xff] }
0x2d4b   :  { %v14592_v38 = vpack.c.bf16 %v15047_v25, %v15046_v35  ;;  %14587 = vmatpush3.bf16.msra.mxu1 %v14584_v33  ;;  %13339 = vmatprep.mubr.msk.f32.mxu0 %vm1368_vm2, %v9832_v54  ;;  %10944 = vst.msk [vmem:[#allocation53 + $0x10] sm:$0xff] %vm10941_vm3, %v9832_v54  ;;  %v14632_v33 = vpack.c.bf16 %v10550_v55, %v10548_v51  ;;  %v10554_v25 = vld [vmem:[#allocation47 + $0x158] sm:$0xff]  ;;  %v10551_v35 = vld [vmem:[#allocation47 + $0x140] sm:$0xff]  ;;  %v10553_v54 = vld [vmem:[#allocation47 + $0x150] sm:$0xff] }
0x2d4c   :  { %v15269_v40 = vpop.eup %15268  ;;  %14597 = vmatprep.subr.bf16.mxu0 %v14596_v34  ;;  %v14638_v57 = vpack.c.bf16 %v10553_v54, %v10551_v35  ;;  %v10595_v41 = vld [vmem:[#allocation49 + $0x188] sm:$0xff]  ;;  %v10596_v19 = vld [vmem:[#allocation49 + $0x190] sm:$0xff]  ;;  %v10597_v51 = vld [vmem:[#allocation49 + $0x198] sm:$0xff] }
0x2d4d   :  { %v15271_v49 = vpop.eup %15270  ;;  %13340 = vmatmul.mubr.msk.f32.vlgmr.msra.gmra.mrb[78].mxu0 %vm1368_vm2, %v17544_v37  ;;  %14593 = vmatprep.subr.bf16.mxu1 %v14592_v38  ;;  %v9834_v48 = vmul.f32 %v15269_v40, %v17523_v10  ;;  %v10583_v35 = vld [vmem:[#allocation49 + $0x128] sm:$0xff]  ;;  %v10600_v54 = vld [vmem:[#allocation49 + $0x1b0] sm:$0xff] }
0x2d4e   :  { %13333 = vmatmul.mubr.msk.f32.vlgmr.msra.gmra.mrb[82].mxu1 %vm1368_vm2, %v17549_v43  ;;  %14599 = vmatpush3.bf16.msra.mxu0 %v14596_v34  ;;  %v17559_v61 = vmul.f32 %v15271_v49, %v17521_v53  ;;  %v10549_v34 = vld [vmem:[#allocation47 + $0x130] sm:$0xff] }
0x2d4f   :  { %14595 = vmatpush3.bf16.msra.mxu1 %v14592_v38  ;;  %13346 = vmatprep.mubr.msk.f32.mxu1 %vm1368_vm2, %v9834_v48  ;;  %10945 = vst.msk [vmem:[#allocation53 + $0x18] sm:$0xff] %vm10941_vm3, %v9834_v48 }
0x2d50   :  { %14601 = vmatprep.subr.bf16.mxu0 %v14600_v45  ;;  %14629 = vmatprep.subr.bf16.mxu1 %v14628_v29  ;;  %v10579_v29 = vld [vmem:[#allocation49 + $0x108] sm:$0xff] }
0x2d51   :  { %v14662_v55 = vpack.c.bf16 %v10579_v29, %v10578_v26  ;;  %v10609_v29 = vld [vmem:[#allocation49 + $0x1f8] sm:$0xff] }
0x2d52   :  { %13347 = vmatmul.mubr.msk.f32.vlgmr.msra.gmra.mrb[84].mxu1 %vm1368_vm2, %v17559_v61  ;;  %14603 = vmatpush3.bf16.msra.mxu0 %v14600_v45 }
0x2d53   :  { %14605 = vmatprep.subr.bf16.mxu0 %v14604_v59  ;;  %10687 = vmatprep.mubr.f32.mxu1 %v16164_v6 }
0x2d54   :  { %14631 = vmatpush1.bf16.msra.mxu1 %v14630_v31  ;;  %v14664_v31 = vpack.c.bf16 %v10597_v51, %v10596_v19  ;;  %v10592_v19 = vld [vmem:[#allocation49 + $0x170] sm:$0xff]  ;;  %v10593_v51 = vld [vmem:[#allocation49 + $0x178] sm:$0xff] }
0x2d55   :  { %14633 = vmatprep.subr.bf16.mxu1 %v14632_v33  ;;  %v10580_v33 = vld [vmem:[#allocation49 + $0x110] sm:$0xff] }
0x2da4   :  { %v13327_v0 = vpop.f32.mrb[76].mxu0 }
0x2da5   :  { %v9908_v3 = vpop.f32.mrb[77].mxu0 }
0x2da6   :  { %13357 = vmatprep.mubr.msk.f32.mxu0 %vm1019_vm0, %v9908_v3  ;;  %v10557_v3 = vld [vmem:[#allocation47 + $0x170] sm:$0xff] }
0x2da7   :  { %13358 = vmatmul.mubr.msk.f32.vlgmr.msra.gmra.mrb[80].mxu0 %vm1019_vm0, %v13327_v0  ;;  %v10555_v0 = vld [vmem:[#allocation47 + $0x160] sm:$0xff] }
0x2da8   :  { %14607 = vmatpush3.bf16.msra.mxu0 %v14604_v59  ;;  %v10556_v59 = vld [vmem:[#allocation47 + $0x168] sm:$0xff] }
0x2da9   :  { %14609 = vmatprep.subr.bf16.mxu0 %v14608_v44  ;;  %v14640_v60 = vpack.c.bf16 %v10558_v15, %v10556_v59 }
0x2dac   :  { %14611 = vmatpush3.bf16.msra.mxu0 %v14608_v44  ;;  %v14642_v44 = vpack.c.bf16 %v10557_v3, %v10555_v0  ;;  %v10587_v0 = vld [vmem:[#allocation49 + $0x148] sm:$0xff]  ;;  %v10604_v3 = vld [vmem:[#allocation49 + $0x1d0] sm:$0xff] }
0x2dad   :  { %14613 = vmatprep.subr.bf16.mxu0 %v14612_v1 }
0x2e20   :  { %v13341_v53 = vpop.f32.mrb[78].mxu0 }
0x2e21   :  { %v13334_v10 = vpop.f32.mrb[82].mxu1  ;;  %v10070_v11 = vpop.f32.mrb[79].mxu0 }
0x2e22   :  { %v9989_v4 = vpop.f32.mrb[83].mxu1 }
0x2e23   :  { %13368 = vmatprep.mubr.msk.f32.mxu0 %vm1019_vm0, %v9989_v4 }
0x2e24   :  { %13369 = vmatmul.mubr.msk.f32.vlgmr.msra.gmra.mrb[80].mxu0 %vm1019_vm0, %v13334_v10  ;;  %v10564_v10 = vld [vmem:[#allocation47 + $0x1a8] sm:$0xff] }
0x2e25   :  { %v13348_v39 = vpop.f32.mrb[84].mxu1  ;;  %14615 = vmatpush3.bf16.msra.mxu0 %v14612_v1  ;;  %13379 = vmatprep.mubr.msk.f32.mxu0 %vm1019_vm0, %v10070_v11  ;;  %v14644_v1 = vpack.c.bf16 %v10562_v62, %v10560_v52  ;;  %v10566_v11 = vld [vmem:[#allocation47 + $0x1b8] sm:$0xff] }
0x2e26   :  { %v10151_v30 = vpop.f32.mrb[85].mxu1  ;;  %14617 = vmatprep.subr.bf16.mxu0 %v14616_v50  ;;  %v14648_v4 = vpack.c.bf16 %v10566_v11, %v10564_v10 }
0x2e29   :  { %14619 = vmatpush3.bf16.msra.mxu0 %v14616_v50  ;;  %v10563_v50 = vld [vmem:[#allocation47 + $0x1a0] sm:$0xff] }
0x2e2a   :  { %14621 = vmatprep.subr.bf16.mxu0 %v14620_v12 }
0x2e2c   :  { %13380 = vmatmul.mubr.msk.f32.vlgmr.msra.gmra.mrb[80].mxu0 %vm1019_vm0, %v13341_v53  ;;  %v14646_v53 = vpack.c.bf16 %v10561_v63, %v10559_v5  ;;  %v10589_v5 = vld [vmem:[#allocation49 + $0x158] sm:$0xff]  ;;  %v10606_v63 = vld [vmem:[#allocation49 + $0x1e0] sm:$0xff] }
0x2e2d   :  { %14623 = vmatpush3.bf16.msra.mxu0 %v14620_v12  ;;  %13390 = vmatprep.mubr.msk.f32.mxu0 %vm1019_vm0, %v10151_v30  ;;  %v10570_v30 = vld [vmem:[#allocation47 + $0x1d8] sm:$0xff]  ;;  %v10567_v12 = vld [vmem:[#allocation47 + $0x1c0] sm:$0xff] }
0x2e2e   :  { %14625 = vmatprep.subr.bf16.mxu0 %v14624_v17  ;;  %v14652_v14 = vpack.c.bf16 %v10570_v30, %v10568_v2 }
0x2e31   :  { %14627 = vmatpush3.bf16.msra.mxu0 %v14624_v17  ;;  %v10572_v17 = vld [vmem:[#allocation47 + $0x1e8] sm:$0xff] }
0x2e34   :  { %13391 = vmatmul.mubr.msk.f32.vlgmr.msra.gmra.mrb[80].mxu0 %vm1019_vm0, %v13348_v39  ;;  %v14650_v39 = vpack.c.bf16 %v10565_v56, %v10563_v50 }
0x2f07   :  { %v13392_v27 = vpop.f32.mrb[80].mxu0 }
0x2f08   :  { %v14734_v23 = vadd.f32 %v13392_v27, %v11319_v42  ;;  %v10487_v20 = vpop.f32.mrb[81].mxu0  ;;  %v14654_v27 = vpack.c.bf16 %v10569_v13, %v10567_v12  ;;  %v11326_v13 = vld [vmem:[#allocation41 + $0x1] ss:$0 sm:$0xff] }
0x2f09   :  { %v14735_v58 = vadd.f32 %v11319_v42, %v10487_v20  ;;  %v10574_v42 = vld [vmem:[#allocation47 + $0x1f8] sm:$0xff]  ;;  %v10571_v20 = vld [vmem:[#allocation47 + $0x1e0] sm:$0xff] }
0x2f0a   :  { %v10499_v21 = vadd.f32 %v14734_v23, %v17467_v8  ;;  %v14634_v8 = vpack.c.bf16 %v10549_v34, %v10547_v32  ;;  %v14656_v23 = vpack.c.bf16 %v10574_v42, %v10572_v17  ;;  %v10581_v32 = vld [vmem:[#allocation49 + $0x118] sm:$0xff]  ;;  %v10598_v34 = vld [vmem:[#allocation49 + $0x1a0] sm:$0xff] }
0x2f0b   :  { %v10498_v24 = vadd.f32 %v14735_v58, %v17464_v9  ;;  %v14636_v9 = vpack.c.bf16 %v10554_v25, %v10552_v22  ;;  %v10573_v58 = vld [vmem:[#allocation47 + $0x1f0] sm:$0xff]  ;;  %v10599_v22 = vld [vmem:[#allocation49 + $0x1a8] sm:$0xff]  ;;  %v14666_v25 = vpack.c.bf16 %v10581_v32, %v10580_v33  ;;  %v11327_v17 = vld [vmem:[#allocation43 + $0x1] ss:$0 sm:$0xff] }
0x2f0c   :  { %10506 = vadd.xlane.f32.xlu1 %v10499_v21  ;;  %14635 = vmatpush1.bf16.msra.mxu1 %v14634_v8  ;;  %v14668_v8 = vpack.c.bf16 %v10599_v22, %v10598_v34 }
0x2f0d   :  { %10504 = vadd.xlane.f32.xlu0 %v10498_v24  ;;  %14637 = vmatprep.subr.bf16.mxu1 %v14636_v9  ;;  %v10582_v9 = vld [vmem:[#allocation49 + $0x120] sm:$0xff] }
0x2f10   :  { %14639 = vmatpush1.bf16.msra.mxu1 %v14638_v57  ;;  %v10601_v57 = vld [vmem:[#allocation49 + $0x1b8] sm:$0xff] }
0x2f11   :  { %14641 = vmatprep.subr.bf16.mxu1 %v14640_v60  ;;  %v10586_v60 = vld [vmem:[#allocation49 + $0x140] sm:$0xff] }
0x2f12   :  { %v14678_v52 = vpack.c.bf16 %v10587_v0, %v10586_v60 }
0x2f14   :  { %14643 = vmatpush1.bf16.msra.mxu1 %v14642_v44  ;;  %v10605_v44 = vld [vmem:[#allocation49 + $0x1d8] sm:$0xff] }
0x2f15   :  { %14645 = vmatprep.subr.bf16.mxu1 %v14644_v1  ;;  %v14680_v62 = vpack.c.bf16 %v10605_v44, %v10604_v3  ;;  %v10588_v1 = vld [vmem:[#allocation49 + $0x150] sm:$0xff]  ;;  %v10829_v44 = vld [vmem:[%s16421_s24] sm:$0xff] }
0x2f16   :  { %v14682_v10 = vpack.c.bf16 %v10589_v5, %v10588_v1  ;;  %v10832_v5 = vld [vmem:[%s16421_s24 + $0x18] sm:$0xff] }
0x2f18   :  { %14647 = vmatpush1.bf16.msra.mxu1 %v14646_v53  ;;  %v10607_v53 = vld [vmem:[#allocation49 + $0x1e8] sm:$0xff] }
0x2f19   :  { %14649 = vmatprep.subr.bf16.mxu1 %v14648_v4  ;;  %v14684_v11 = vpack.c.bf16 %v10607_v53, %v10606_v63 }
0x2f1c   :  { %14651 = vmatpush1.bf16.msra.mxu1 %v14650_v39 }
0x2f1d   :  { %14653 = vmatprep.subr.bf16.mxu1 %v14652_v14 }
0x2f20   :  { %14655 = vmatpush1.bf16.msra.mxu1 %v14654_v27 }
0x2f21   :  { %14657 = vmatprep.subr.bf16.mxu1 %v14656_v23 }
0x2f99   :  { %v10507_v36 = vpop.xlane.xlu1 %10506 }
0x2f9a   :  { %v10505_v38 = vpop.xlane.xlu0 %10504  ;;  %v10509_v40 = vmul.f32 0.0078125, %v10507_v36  ;;  %v14670_v36 = vpack.c.bf16 %v10583_v35, %v10582_v9 }
0x2f9b   :  { %v10508_v45 = vmul.f32 0.0078125, %v10505_v38  ;;  %v14672_v38 = vpack.c.bf16 %v10601_v57, %v10600_v54 }
0x2f9c   :  { %v17576_v47 = vsub.f32 %v10499_v21, %v10509_v40  ;;  %v14658_v21 = vpack.c.bf16 %v10573_v58, %v10571_v20  ;;  %v10584_v40 = vld [vmem:[#allocation49 + $0x130] sm:$0xff] }
0x2f9d   :  { %v17574_v46 = vsub.f32 %v10498_v24, %v10508_v45  ;;  %v10594_v24 = vld [vmem:[#allocation49 + $0x180] sm:$0xff]  ;;  %v10585_v45 = vld [vmem:[#allocation49 + $0x138] sm:$0xff] }
0x2f9e   :  { %v10513_v48 = vmul.f32 %v17576_v47, %v17576_v47  ;;  %14659 = vmatpush1.bf16.msra.mxu1 %v14658_v21  ;;  %v14660_v28 = vpack.c.bf16 %v10595_v41, %v10594_v24  ;;  %v14674_v59 = vpack.c.bf16 %v10585_v45, %v10584_v40  ;;  %v10590_v24 = vld [vmem:[#allocation49 + $0x160] sm:$0xff]  ;;  %v10591_v41 = vld [vmem:[#allocation49 + $0x168] sm:$0xff] }
0x2f9f   :  { %v10512_v49 = vmul.f32 %v17574_v46, %v17574_v46  ;;  %v14686_v26 = vpack.c.bf16 %v10591_v41, %v10590_v24  ;;  %v10841_v24 = vld [vmem:[%s16421_s24 + $0x60] sm:$0xff]  ;;  %v10842_v41 = vld [vmem:[%s16421_s24 + $0x68] sm:$0xff] }
0x2fa0   :  { %14661 = vmatprep.subr.bf16.mxu0 %v14660_v28  ;;  %v10608_v28 = vld [vmem:[#allocation49 + $0x1f0] sm:$0xff] }
0x2fa1   :  { %10514 = vadd.xlane.f32.xlu0 %v10512_v49  ;;  %14663 = vmatpush3.bf16.msra.mxu0 %v14662_v55  ;;  %v10602_v49 = vld [vmem:[#allocation49 + $0x1c0] sm:$0xff]  ;;  %v14690_v55 = vpack.c.bf16 %v10593_v51, %v10592_v19 }
0x2fa2   :  { %14665 = vmatprep.subr.bf16.mxu0 %v14664_v31 }
0x2fa5   :  { %10516 = vadd.xlane.f32.xlu0 %v10513_v48  ;;  %14667 = vmatpush3.bf16.msra.mxu0 %v14666_v25  ;;  %v10603_v48 = vld [vmem:[#allocation49 + $0x1c8] sm:$0xff] }
0x2fa6   :  { %14669 = vmatprep.subr.bf16.mxu0 %v14668_v8  ;;  %v14676_v15 = vpack.c.bf16 %v10603_v48, %v10602_v49 }
0x2fa9   :  { %14671 = vmatpush3.bf16.msra.mxu0 %v14670_v36 }
0x2faa   :  { %14673 = vmatprep.subr.bf16.mxu0 %v14672_v38 }
0x2fad   :  { %14675 = vmatpush3.bf16.msra.mxu0 %v14674_v59 }
0x2fae   :  { %14677 = vmatprep.subr.bf16.mxu0 %v14676_v15 }
0x2fb1   :  { %14679 = vmatpush3.bf16.msra.mxu0 %v14678_v52  ;;  %v10830_v52 = vld [vmem:[%s16421_s24 + $0x8] sm:$0xff] }
0x2fb2   :  { %14681 = vmatprep.subr.bf16.mxu0 %v14680_v62  ;;  %v10831_v62 = vld [vmem:[%s16421_s24 + $0x10] sm:$0xff]  ;;  %v14692_v1 = vpack.c.bf16 %v10830_v52, %v10829_v44 }
0x2fb3   :  { %v14696_v63 = vpack.c.bf16 %v10832_v5, %v10831_v62 }
0x2fb4   :  { %14693 = vmatprep.subr.bf16.mxu1 %v14692_v1 }
0x2fb5   :  { %14683 = vmatpush3.bf16.msra.mxu0 %v14682_v10 }
0x2fb6   :  { %14685 = vmatprep.subr.bf16.mxu0 %v14684_v11 }
0x2fb9   :  { %14687 = vmatpush3.bf16.msra.mxu0 %v14686_v26  ;;  %v14716_v26 = vpack.c.bf16 %v10842_v41, %v10841_v24 }
0x302e   :  { %v10515_v4 = vpop.xlane.xlu0 %10514 }
0x302f   :  { %v10518_v50 = vmul.f32 0.0078125, %v10515_v4 }
0x3031   :  { %v10520_v56 = vadd.f32 1e-05, %v10518_v50 }
0x3032   :  { %v10517_v2 = vpop.xlane.xlu0 %10516 }
0x3033   :  { %15272 = vrsqrt.f32 %v10520_v56  ;;  %v10519_v39 = vmul.f32 0.0078125, %v10517_v2 }
0x3035   :  { %v10521_v30 = vadd.f32 1e-05, %v10519_v39 }
0x3037   :  { %15274 = vrsqrt.f32 %v10521_v30  ;;  %v10833_v30 = vld [vmem:[%s16421_s24 + $0x20] sm:$0xff] }
0x303d   :  { %v15273_v12 = vpop.eup %15272 }
0x303e   :  { %v10524_v14 = vmul.f32 %v15273_v12, %v17574_v46  ;;  %v14688_v46 = vpack.c.bf16 %v10609_v29, %v10608_v28  ;;  %v10834_v12 = vld [vmem:[%s16421_s24 + $0x28] sm:$0xff]  ;;  %v10843_v28 = vld [vmem:[%s16421_s24 + $0x70] sm:$0xff]  ;;  %v10844_v29 = vld [vmem:[%s16421_s24 + $0x78] sm:$0xff] }
0x3040   :  { %v10532_v42 = vmul.f32 %v11326_v13, %v10524_v14  ;;  %14689 = vmatprep.subr.bf16.mxu0 %v14688_v46  ;;  %v10835_v14 = vld [vmem:[%s16421_s24 + $0x30] sm:$0xff] }
0x3041   :  { %v15275_v27 = vpop.eup %15274  ;;  %14691 = vmatpush3.bf16.msra.mxu0 %v14690_v55 }
0x3042   :  { %v10540_v23 = vadd.f32 %v11327_v17, %v10532_v42  ;;  %v10525_v20 = vmul.f32 %v15275_v27, %v17576_v47  ;;  %v11328_v47 = vld [vmem:[%s17734_s7 + $0x2] sm:$0x3] }
0x3043   :  { %v10616_v31 = vrot.slane %v11328_v47, %v16873_v16  ;;  %v10620_v33 = vrot.slane %v11328_v47, %v16876_v18  ;;  %v11329_v18 = vld [vmem:[#allocation50 + $0x1] ss:$0 sm:$0xff] }
0x3044   :  { %10688 = vmatmul.mubr.f32.vlgmr.msra.gmra.mrb[86].mxu1 %v10540_v23  ;;  %v10533_v58 = vmul.f32 %v11326_v13, %v10525_v20  ;;  %v14700_v13 = vpack.c.bf16 %v10834_v12, %v10833_v30  ;;  %v10837_v27 = vld [vmem:[%s16421_s24 + $0x40] sm:$0xff] }
0x3045   :  { %10693 = vmatprep.mubr.f32.mxu1 %v16164_v6  ;;  %14695 = vmatpush3.bf16.msra.mxu1 %v14692_v1 }
0x3046   :  { %v10541_v21 = vadd.f32 %v11327_v17, %v10533_v58  ;;  %14697 = vmatprep.subr.bf16.mxu1 %v14696_v63  ;;  %v10836_v17 = vld [vmem:[%s16421_s24 + $0x38] sm:$0xff] }
0x3047   :  { %v14704_v42 = vpack.c.bf16 %v10836_v17, %v10835_v14  ;;  %v10840_v58 = vld [vmem:[%s16421_s24 + $0x58] sm:$0xff] }
0x3048   :  { %10694 = vmatmul.mubr.f32.gmra.mrb[88].mxu1 %v10541_v21 }
0x3049   :  { %14699 = vmatpush3.bf16.msra.mxu1 %v14696_v63 }
0x304a   :  { %14701 = vmatprep.subr.bf16.mxu1 %v14700_v13 }
0x304d   :  { %14703 = vmatpush3.bf16.msra.mxu1 %v14700_v13 }
0x304e   :  { %14705 = vmatprep.subr.bf16.mxu1 %v14704_v42 }
0x3051   :  { %14707 = vmatpush3.bf16.msra.mxu1 %v14704_v42 }
0x3117   :  { %v10689_v6 = vpop.f32.mrb[86].mxu1 }
0x3118   :  { %v10690_v32 = vadd.f32 %v10689_v6, %v10616_v31  ;;  %v10691_v34 = vpop.f32.mrb[87].mxu1 }
0x3119   :  { %v10692_v22 = vadd.f32 %v10691_v34, %v10620_v33  ;;  %v11330_v34 = vld [vmem:[#allocation44 + $0x1] ss:$0 sm:$0xff] }
0x311a   :  { %v10700_v9 = vmax.f32 %v10690_v32, 0.0 }
0x311b   :  { %v10701_v25 = vmax.f32 %v10692_v22, 0.0  ;;  %v10695_v8 = vpop.f32.mrb[88].mxu1 }
0x311c   :  { %v10696_v35 = vadd.f32 %v10695_v8, %v10616_v31  ;;  %v10697_v54 = vpop.f32.mrb[89].mxu1 }
0x311d   :  { %v10698_v57 = vadd.f32 %v10697_v54, %v10620_v33  ;;  %10774 = vmatprep.mubr.f32.mxu0 %v10701_v25  ;;  %v11331_v25 = vld [vmem:[#allocation46 + $0x1] ss:$0 sm:$0xff] }
0x311e   :  { %10775 = vmatmul.mubr.f32.vlgmr.msra.gmra.mrb[82].mxu0 %v10700_v9  ;;  %v10702_v38 = vmax.f32 %v10696_v35, 0.0 }
0x311f   :  { %v10703_v36 = vmax.f32 %v10698_v57, 0.0 }
0x3121   :  { %10779 = vmatprep.mubr.f32.mxu0 %v10703_v36 }
0x3122   :  { %10780 = vmatmul.mubr.f32.gmra.mrb[84].mxu0 %v10702_v38 }
0x31f1   :  { %v12139_v16 = vpop.f32.mrb[82].mxu0 }
0x31f2   :  { %v12140_v40 = vpop.f32.mrb[83].mxu0 }
0x31f3   :  { %v12141_v45 = vadd.f32 %v12140_v40, %v12139_v16 }
0x31f5   :  { %v10777_v49 = vadd.f32 %v12141_v45, %v11329_v18  ;;  %v12142_v48 = vpop.f32.mrb[84].mxu0 }
0x31f6   :  { %v12143_v59 = vpop.f32.mrb[85].mxu0 }
0x31f7   :  { %v12144_v15 = vadd.f32 %v12143_v59, %v12142_v48  ;;  %v10785_v60 = vadd.f32 %v10777_v49, %v10540_v23  ;;  %v10838_v23 = vld [vmem:[%s16421_s24 + $0x48] sm:$0xff] }
0x31f8   :  { %v14708_v20 = vpack.c.bf16 %v10838_v23, %v10837_v27 }
0x31f9   :  { %v10782_v0 = vadd.f32 %v12144_v15, %v11329_v18  ;;  %10791 = vadd.xlane.f32.xlu1 %v10785_v60 }
0x31fa   :  { %14709 = vmatprep.subr.bf16.mxu1 %v14708_v20 }
0x31fb   :  { %v10786_v3 = vadd.f32 %v10782_v0, %v10541_v21  ;;  %14711 = vmatpush3.bf16.msra.mxu1 %v14708_v20 }
0x31fd   :  { %10793 = vadd.xlane.f32.xlu0 %v10786_v3 }
0x3286   :  { %v10792_v53 = vpop.xlane.xlu1 %10791 }
0x3287   :  { %v10795_v10 = vmul.f32 0.0078125, %v10792_v53 }
0x3289   :  { %v10797_v11 = vsub.f32 %v10785_v60, %v10795_v10 }
0x328a   :  { %v10794_v4 = vpop.xlane.xlu0 %10793 }
0x328b   :  { %v10796_v50 = vmul.f32 0.0078125, %v10794_v4  ;;  %v10799_v56 = vmul.f32 %v10797_v11, %v10797_v11 }
0x328d   :  { %v10798_v2 = vsub.f32 %v10786_v3, %v10796_v50  ;;  %10801 = vadd.xlane.f32.xlu1 %v10799_v56 }
0x328f   :  { %v10800_v39 = vmul.f32 %v10798_v2, %v10798_v2 }
0x3291   :  { %10803 = vadd.xlane.f32.xlu0 %v10800_v39 }
0x329e   :  { %10929 = vrot.lane.b32.xlu1 %v17535_v7, %s16165_s12  ;;  %v10839_v7 = vld [vmem:[%s16421_s24 + $0x50] sm:$0xff]  ;;  %s16166_s24 = smov [#allocation53]  }
0x329f   :  { %v14712_v21 = vpack.c.bf16 %v10840_v58, %v10839_v7  ;;  %s10967_s27 = sshll.u32 %s16166_s24, 4  ;;  %s10968_s27 = int_to_ptr.vmem [resolvable:$true] %s10967_s27 }
0x32a0   :  { %s15990_s21 = scalar_lea.vmem %s10968_s27, 1024  ;;  %p15995_p5 = scmp.lt.s32.totalorder %s10968_s27, %s10968_s27 }
0x32a1   :  { %14713 = vmatprep.subr.bf16.mxu1 %v14712_v21  ;;  %p15991_p4 = scmp.ne.s32.totalorder %s10968_s27, %s15990_s21  ;;  %p15996_p6 = scmp.lt.s32.totalorder %s15990_s21, %s15990_s21 }
0x32a2   :  { %10933 = vrot.lane.b32.xlu1 %v17544_v37, %s16165_s12  ;;  %14715 = vmatpush3.bf16.msra.mxu1 %v14712_v21  ;;  %v14720_v37 = vpack.c.bf16 %v10844_v29, %v10843_v28 }
0x32a3   :  { %14717 = vmatprep.subr.bf16.mxu1 %v14716_v26  ;;  %p15997_p7 = por %p15996_p6, %p15995_p5 }
0x32a5   :  { %p15998_p8 = pnand %p15997_p7, %p15991_p4 }
0x32a6   :  { %10935 = vrot.lane.b32.xlu1 %v17559_v61, %s16165_s12  ;;  %14719 = vmatpush3.bf16.msra.mxu1 %v14716_v26 }
0x32a7   :  { %10931 = vrot.lane.b32.xlu0 %v17549_v43, %s16165_s12  ;;  %14721 = vmatprep.subr.bf16.mxu1 %v14720_v37 }
0x32aa   :  { %14723 = vmatpush3.bf16.msra.mxu1 %v14720_v37 }
0x331a   :  { %v10802_v46 = vpop.xlane.xlu1 %10801 }
0x331b   :  { %v10805_v61 = vmul.f32 0.0078125, %v10802_v46 }
0x331d   :  { %v10807_v19 = vadd.f32 1e-05, %v10805_v61 }
0x331e   :  { %v10930_v51 = vpop.permute.xlu1 %10929  ;;  %v10804_v55 = vpop.xlane.xlu0 %10803 }
0x331f   :  { %15276 = vrsqrt.f32 %v10807_v19  ;;  %10946 = vst.msk [vmem:[#allocation53 + $0x20] sm:$0xff] %vm10941_vm3, %v10930_v51  ;;  %v10806_v43 = vmul.f32 0.0078125, %v10804_v55 }
0x3321   :  { %v10808_v47 = vadd.f32 1e-05, %v10806_v43 }
0x3322   :  { %v10934_v31 = vpop.permute.xlu1 %10933  ;;  %v10932_v33 = vpop.permute.xlu0 %10931 }
0x3323   :  { %15278 = vrsqrt.f32 %v10808_v47  ;;  %10948 = vst.msk [vmem:[#allocation53 + $0x30] sm:$0xff] %vm10941_vm3, %v10934_v31  ;;  %10947 = vst.msk [vmem:[#allocation53 + $0x28] sm:$0xff] %vm10941_vm3, %v10932_v33 }
0x3326   :  { %v10936_v6 = vpop.permute.xlu1 %10935 }
0x3327   :  { %10949 = vst.msk [vmem:[#allocation53 + $0x38] sm:$0xff] %vm10941_vm3, %v10936_v6 }
0x3329   :  { %v15277_v32 = vpop.eup %15276 }
0x332a   :  { %v10811_v22 = vmul.f32 %v15277_v32, %v10797_v11 }
0x332c   :  { %v10819_v8 = vmul.f32 %v11330_v34, %v10811_v22 }
0x332d   :  { %v15279_v9 = vpop.eup %15278 }
0x332e   :  { %v10812_v35 = vmul.f32 %v15279_v9, %v10798_v2  ;;  %v10827_v54 = vadd.f32 %v11331_v25, %v10819_v8 }
0x3330   :  { %v10820_v57 = vmul.f32 %v11330_v34, %v10812_v35  ;;  %13425 = vmatprep.mubr.f32.mxu1 %v10827_v54 }
0x3332   :  { %v10828_v36 = vadd.f32 %v11331_v25, %v10820_v57 }
0x3334   :  { %13426 = vmatmul.mubr.f32.vlgmr.msra.gmra.mrb[90].mxu1 %v10828_v36 }
0x3335   :  { %16001 = shalt.err (!%p15998_p8)
}
0x3336   :  { %s16002_s10 = scalar_lea.hbm %s16436_s13, 1024 }
0x3337   :  { %p16003_p9 = scmp.ne.s32.totalorder %s16436_s13, %s16002_s10  ;;  %p16006_p10 = scmp.lt.u32.totalorder %s16002_s10, %s16436_s13 }
0x3339   :  { %p16008_p11 = pnand %p16006_p10, %p16003_p9 }
0x333b   :  { %16011 = shalt.err (!%p16008_p11)
}
0x333c   :  { %10973 = dma.vmem_to_hbm [thread:$0]  %s10968_s27, 1024, %s16436_s13, [#allocation54], %s16126_s11, %s16126_s11, %s16127_s15  }
0x333d   :  { %v11332_v38 = vld [vmem:[%s16426_s19] ss:$0 sm:$0xff]  ;;  %s16167_s17 = smov [#allocation52]  }
0x333e   :  { %s10955_s6 = sshll.u32 %s16167_s17, 4  ;;  %s10956_s6 = int_to_ptr.vmem [resolvable:$true] %s10955_s6 }
0x333f   :  { %s16012_s1 = scalar_lea.vmem %s10956_s6, 256  ;;  %p16017_p13 = scmp.lt.s32.totalorder %s10956_s6, %s10956_s6 }
0x3340   :  { %p16013_p12 = scmp.ne.s32.totalorder %s10956_s6, %s16012_s1  ;;  %p16018_p0 = scmp.lt.s32.totalorder %s16012_s1, %s16012_s1 }
0x3342   :  { %p16019_p1 = por %p16018_p0, %p16017_p13 }
0x3344   :  { %p16020_p2 = pnand %p16019_p1, %p16013_p12 }
0x3407   :  { %v13427_v16 = vpop.f32.mrb[90].mxu1 }
0x3408   :  { %v10924_v18 = vadd.f32 %v13427_v16, %v11332_v38  ;;  %v10918_v40 = vpop.f32.mrb[91].mxu1 }
0x3409   :  { %v10919_v45 = vadd.f32 %v11332_v38, %v10918_v40 }
0x340a   :  { %10928 = vst [vmem:[#allocation52 + $0x8] sm:$0xff] %v10924_v18 }
0x340b   :  { %10927 = vst [vmem:[#allocation52] sm:$0xff] %v10919_v45 }
0x340c   :  { %16023 = shalt.err (!%p16020_p2)
}
0x340d   :  { %s16024_s13 = scalar_lea.hbm %s16431_s3, 256 }
0x340e   :  { %p16025_p3 = scmp.ne.s32.totalorder %s16431_s3, %s16024_s13  ;;  %p16028_p4 = scmp.lt.u32.totalorder %s16024_s13, %s16431_s3 }
0x3410   :  { %p16030_p5 = pnand %p16028_p4, %p16025_p3 }
0x3412   :  { %16033 = shalt.err (!%p16030_p5)
}
0x3413   :  { %10961 = dma.vmem_to_hbm [thread:$0]  %s10956_s6, 256, %s16431_s3, [#allocation4], %s16126_s11, %s16126_s11, %s16127_s15  }
0x3414   :  { %16068 = dma.done.wait [#allocation4], 256  }
0x3415   :  { %16069 = vsyncadd [#allocation4], 4294967040 }
0x3416   :  { %16070 = dma.done.wait [#allocation54], 1024  }
0x3417   :  { %16071 = vsyncadd [#allocation54], 4294966272 }
0x3418   :  { %10980 = vsyncpa [#allocation3], 1 }
0x3419   :  { %10981 = vsyncpa [#allocation6], 1 }
0x341a   :  { %10982 = vsyncpa [#allocation9], 1 }
0x341b   :  { %10983 = vsyncpa [#allocation12], 1 }
0x341c   :  { %10984 = vsyncpa [#allocation15], 1 }
0x341d   :  { %10985 = vsyncpa [#allocation18], 1 }
0x341e   :  { %10986 = vsyncpa [#allocation21], 1 }
0x341f   :  { %10987 = vsyncpa [#allocation24], 1 }
0x3420   :  { %10988 = vsyncpa [#allocation27], 1 }
0x3421   :  { %10989 = vsyncpa [#allocation30], 1 }
0x3422   :  { %10990 = vsyncpa [#allocation33], 1 }
0x3423   :  { %10991 = vsyncpa [#allocation36], 1 }
0x3424   :  { %10992 = vsyncpa [#allocation39], 1 }
0x3425   :  { %10993 = vsyncpa [#allocation42], 1 }
0x3426   :  { %10994 = vsyncpa [#allocation45], 1 }
0x3427   :  { %10995 = vsyncpa [#allocation48], 1 }
0x3428   :  { %10996 = vsyncpa [#allocation51], 1 }
0x3429   :  { %10997 = vsyncpa [#allocation4], 1 }
0x342a   :  { %10998 = vsyncpa [#allocation54], 1 }

</bundles_post_ra>
